<compile_context>
chip_gen: v7x
topology: tpu7x:2x2x1
jax: 0.10.0
libtpu: 0.0.40
codegen_flags: <defaults>
</compile_context>

<pallas_src>
import functools

import jax
import jax.numpy as jnp
from jax.experimental import pallas as pl
from jax.experimental.pallas import tpu as pltpu

LANES = 128
KSIZE = 4
STRIDE = 2
PAD = 1
C1_IN_PAD = 8  # layer-1 input channels padded 3 -> 8 so K1 = 16 * 8 = 128


# ----------------------------- Pallas kernel --------------------------------
def _build_patches(src_ref, dst_ref, ho, wo, wp):
    """Build im2col patches (ho*wo, 16*cin) from a flattened, spatially padded
    channels-last activation ref of shape (hp*wp, cin). Feature order (kh, kw, c)."""
    cin = src_ref.shape[-1]
    for oh in range(ho):
        for kh in range(KSIZE):
            for kw in range(KSIZE):
                tap = kh * KSIZE + kw
                row0 = (STRIDE * oh + kh) * wp + kw
                src = src_ref[pl.ds(row0, wo, stride=STRIDE), :]        # (wo, cin)
                dst_ref[oh * wo:(oh + 1) * wo,
                        tap * cin:(tap + 1) * cin] = src.astype(dst_ref.dtype)


def _encoder_kernel(x_ref, w1_ref, b1_ref, w2_ref, b2_ref, w3_ref, b3_ref,
                    out_ref, p1, act1, p2, act2, p3, *, dims):
    (ho1, wo1, wp1, ho2, wo2, wp2, ho3, wo3, wp3) = dims

    # ---------------- layer 1: conv(3->64) + ReLU ----------------
    _build_patches(x_ref, p1, ho1, wo1, wp1)
    h1 = jnp.dot(p1[...], w1_ref[...], preferred_element_type=jnp.float32)
    h1 = jnp.maximum(h1 + b1_ref[...], 0.0)                             # (ho1*wo1, 64)

    # scatter into zero-bordered (spatially padded) layer-2 input buffer
    act1[...] = jnp.zeros_like(act1)
    for oh in range(ho1):
        r0 = (oh + 1) * wp2 + 1
        act1[r0:r0 + wo1, :] = h1[oh * wo1:(oh + 1) * wo1, :]

    # ---------------- layer 2: conv(64->128) + ReLU ----------------
    _build_patches(act1, p2, ho2, wo2, wp2)
    h2 = jnp.dot(p2[...], w2_ref[...], preferred_element_type=jnp.float32)
    h2 = jnp.maximum(h2 + b2_ref[...], 0.0)                             # (ho2*wo2, 128)

    act2[...] = jnp.zeros_like(act2)
    for oh in range(ho2):
        r0 = (oh + 1) * wp3 + 1
        act2[r0:r0 + wo2, :] = h2[oh * wo2:(oh + 1) * wo2, :]

    # ---------------- layer 3: conv(128->latent_pad), no ReLU ----------------
    _build_patches(act2, p3, ho3, wo3, wp3)
    h3 = jnp.dot(p3[...], w3_ref[...], preferred_element_type=jnp.float32)
    out_ref[...] = (h3 + b3_ref[...]).astype(out_ref.dtype)             # (ho3*wo3, 128)


# ----------------------------- Host-side prep --------------------------------
def _prep_weight(w, cin_pad=None, cout_pad=None):
    """PyTorch OIHW -> (kh*kw*cin_pad, cout_pad) bf16, row order (kh, kw, c)."""
    cout, cin, kh, kw = w.shape
    wt = jnp.transpose(w, (2, 3, 1, 0))                                  # (kh,kw,ci,co)
    if cin_pad is not None and cin_pad > cin:
        wt = jnp.pad(wt, ((0, 0), (0, 0), (0, cin_pad - cin), (0, 0)))
    if cout_pad is not None and cout_pad > cout:
        wt = jnp.pad(wt, ((0, 0), (0, 0), (0, 0), (0, cout_pad - cout)))
    a, b, ci, co = wt.shape
    return wt.reshape(a * b * ci, co).astype(jnp.bfloat16)


@jax.jit
def encoder_forward(params, x):
    (w1, b1), (w2, b2), (w3, b3) = params
    n, cin, h, w = x.shape
    latent_dim = w3.shape[0]
    assert cin == 3 and h % 8 == 0 and w % 8 == 0 and latent_dim <= LANES

    ho1, wo1 = h // 2, w // 2
    ho2, wo2 = ho1 // 2, wo1 // 2
    ho3, wo3 = ho2 // 2, wo2 // 2
    hp1, wp1 = h + 2 * PAD, w + 2 * PAD
    hp2, wp2 = ho1 + 2 * PAD, wo1 + 2 * PAD
    hp3, wp3 = ho2 + 2 * PAD, wo2 + 2 * PAD
    c1, c2 = w1.shape[0], w2.shape[0]                                    # 64, 128

    # Boundary-only layout work: NCHW -> NHWC, spatial pad, channel pad 3->8.
    xin = jnp.transpose(x, (0, 2, 3, 1))
    xin = jnp.pad(xin, ((0, 0), (PAD, PAD), (PAD, PAD), (0, C1_IN_PAD - cin)))
    xin = xin.reshape(n, hp1 * wp1, C1_IN_PAD)

    w1m = _prep_weight(w1, cin_pad=C1_IN_PAD)                            # (128, 64)
    w2m = _prep_weight(w2)                                               # (1024, 128)
    w3m = _prep_weight(w3, cout_pad=LANES)                               # (2048, 128)
    b1m = b1.reshape(1, -1).astype(jnp.float32)
    b2m = b2.reshape(1, -1).astype(jnp.float32)
    b3m = jnp.pad(b3, (0, LANES - latent_dim)).reshape(1, -1).astype(jnp.float32)

    dims = (ho1, wo1, wp1, ho2, wo2, wp2, ho3, wo3, wp3)
    kernel = functools.partial(_encoder_kernel, dims=dims)

    out = pl.pallas_call(
        kernel,
        out_shape=jax.ShapeDtypeStruct((n, ho3 * wo3, LANES), jnp.float32),
        grid_spec=pltpu.PrefetchScalarGridSpec(
            num_scalar_prefetch=0,
            grid=(n,),
            in_specs=[
                pl.BlockSpec((None, hp1 * wp1, C1_IN_PAD), lambda i: (i, 0, 0)),
                pl.BlockSpec((16 * C1_IN_PAD, c1), lambda i: (0, 0)),    # resident
                pl.BlockSpec((1, c1), lambda i: (0, 0)),
                pl.BlockSpec((16 * c1, c2), lambda i: (0, 0)),
                pl.BlockSpec((1, c2), lambda i: (0, 0)),
                pl.BlockSpec((16 * c2, LANES), lambda i: (0, 0)),
                pl.BlockSpec((1, LANES), lambda i: (0, 0)),
            ],
            out_specs=pl.BlockSpec((None, ho3 * wo3, LANES), lambda i: (i, 0, 0)),
            scratch_shapes=[
                pltpu.VMEM((ho1 * wo1, 16 * C1_IN_PAD), jnp.bfloat16),   # p1
                pltpu.VMEM((hp2 * wp2, c1), jnp.float32),                # act1 (padded)
                pltpu.VMEM((ho2 * wo2, 16 * c1), jnp.bfloat16),          # p2
                pltpu.VMEM((hp3 * wp3, c2), jnp.float32),                # act2 (padded)
                pltpu.VMEM((ho3 * wo3, 16 * c2), jnp.bfloat16),          # p3
            ],
        ),
        compiler_params=pltpu.CompilerParams(
            dimension_semantics=("parallel",),
            vmem_limit_bytes=32 << 20,
        ),
    )(xin, w1m, b1m, w2m, b2m, w3m, b3m)

    out = out.reshape(n, ho3, wo3, LANES)[..., :latent_dim]
    return jnp.transpose(out, (0, 3, 1, 2))                              # NCHW


# ----------------------------- Params / reference ----------------------------
def init_encoder_params(key, latent_dim):
    """Deterministic PyTorch-style (Kaiming-uniform-ish) init."""
    shapes = [(64, 3, 4, 4), (128, 64, 4, 4), (latent_dim, 128, 4, 4)]
    params = []
    for s in shapes:
        key, kw_, kb_ = jax.random.split(key, 3)
        fan_in = s[1] * s[2] * s[3]
        bound = 1.0 / jnp.sqrt(fan_in)
        w = jax.random.uniform(kw_, s, jnp.float32, -bound, bound)
        b = jax.random.uniform(kb_, (s[0],), jnp.float32, -bound, bound)
        params.append((w, b))
    return params


def encoder_reference(params, x):
    """Reference with the same bf16-operand / f32-accumulate numerics as the kernel."""
    def conv(x, w, b, relu):
        y = jax.lax.conv_general_dilated(
            x.astype(jnp.bfloat16), w.astype(jnp.bfloat16),
            window_strides=(2, 2), padding=((1, 1), (1, 1)),
            dimension_numbers=("NCHW", "OIHW", "NCHW"),
            preferred_element_type=jnp.float32,
        ) + b.reshape(1, -1, 1, 1)
        return jnp.maximum(y, 0.0) if relu else y

    (w1, b1), (w2, b2), (w3, b3) = params
    h = conv(x, w1, b1, True)
    h = conv(h, w2, b2, True)
    return conv(h, w3, b3, False)


if __name__ == "__main__":
    latent_dim = 32
    key = jax.random.PRNGKey(0)
    key, kx = jax.random.split(key)
    x = jax.random.normal(kx, (2, 3, 16, 16), jnp.float32)   # NCHW, matches PyTorch

    params = init_encoder_params(key, latent_dim)

    out = jax.block_until_ready(encoder_forward(params, x))
    ref = jax.block_until_ready(encoder_reference(params, x))

    assert out.shape == (2, latent_dim, 2, 2), out.shape
    max_err = float(jnp.max(jnp.abs(out - ref)))
    assert jnp.allclose(out, ref, atol=1e-2, rtol=1e-2), max_err
    print("KERNEL_OK")
</pallas_src>

<mosaic_0001>
module attributes {stable_mosaic.version = 11 : i64} {
  func.func @_encoder_kernel(%arg0: i32, %arg1: memref<1x324x8xf32, #tpu.memory_space<vmem>>, %arg2: memref<128x64xbf16, #tpu.memory_space<vmem>>, %arg3: memref<1x64xf32, #tpu.memory_space<vmem>>, %arg4: memref<1024x128xbf16, #tpu.memory_space<vmem>>, %arg5: memref<1x128xf32, #tpu.memory_space<vmem>>, %arg6: memref<2048x128xbf16, #tpu.memory_space<vmem>>, %arg7: memref<1x128xf32, #tpu.memory_space<vmem>>, %arg8: memref<1x4x128xf32, #tpu.memory_space<vmem>>, %arg9: memref<64x128xbf16, #tpu.memory_space<vmem>>, %arg10: memref<100x64xf32, #tpu.memory_space<vmem>>, %arg11: memref<16x1024xbf16, #tpu.memory_space<vmem>>, %arg12: memref<36x128xf32, #tpu.memory_space<vmem>>, %arg13: memref<4x2048xbf16, #tpu.memory_space<vmem>>) attributes {dimension_semantics = [#tpu.dimension_semantics<parallel>], iteration_bounds = array<i64: 2>, scalar_prefetch = 0 : i64, scratch_operands = 5 : i64, tpu.core_type = #tpu.core_type<tc>, window_params = [{transform_indices = @transform_0, window_bounds = array<i64: 1, 324, 8>}, {pipeline_mode = #tpu.pipeline_mode<synchronous>, transform_indices = @transform_1, window_bounds = array<i64: 128, 64>}, {pipeline_mode = #tpu.pipeline_mode<synchronous>, transform_indices = @transform_2, window_bounds = array<i64: 1, 64>}, {pipeline_mode = #tpu.pipeline_mode<synchronous>, transform_indices = @transform_3, window_bounds = array<i64: 1024, 128>}, {pipeline_mode = #tpu.pipeline_mode<synchronous>, transform_indices = @transform_4, window_bounds = array<i64: 1, 128>}, {pipeline_mode = #tpu.pipeline_mode<synchronous>, transform_indices = @transform_5, window_bounds = array<i64: 2048, 128>}, {pipeline_mode = #tpu.pipeline_mode<synchronous>, transform_indices = @transform_6, window_bounds = array<i64: 1, 128>}, {transform_indices = @transform_7, window_bounds = array<i64: 1, 4, 128>}]} {
    %c0 = arith.constant 0 : index
    %c0_0 = arith.constant 0 : index
    %c0_1 = arith.constant 0 : index
    %0 = tpu.strided_load %arg1[%c0, %c0_0, %c0_1] {strides = array<i32: 1, 2, 1>} : memref<1x324x8xf32, #tpu.memory_space<vmem>>, vector<1x8x8xf32>
    %1 = vector.shape_cast %0 : vector<1x8x8xf32> to vector<8x8xf32>
    %2 = arith.truncf %1 : vector<8x8xf32> to vector<8x8xbf16>
    %c0_2 = arith.constant 0 : index
    %c0_3 = arith.constant 0 : index
    %3 = vector.load %arg9[%c0_2, %c0_3] : memref<64x128xbf16, #tpu.memory_space<vmem>>, vector<8x8xbf16>
    tpu.vector_store %arg9[%c0_2, %c0_3], %2 {strides = array<i32>} : memref<64x128xbf16, #tpu.memory_space<vmem>>, vector<8x8xbf16>,
    %c0_4 = arith.constant 0 : index
    %c1 = arith.constant 1 : index
    %c0_5 = arith.constant 0 : index
    %4 = tpu.strided_load %arg1[%c0_4, %c1, %c0_5] {strides = array<i32: 1, 2, 1>} : memref<1x324x8xf32, #tpu.memory_space<vmem>>, vector<1x8x8xf32>
    %5 = vector.shape_cast %4 : vector<1x8x8xf32> to vector<8x8xf32>
    %6 = arith.truncf %5 : vector<8x8xf32> to vector<8x8xbf16>
    %c0_6 = arith.constant 0 : index
    %c8 = arith.constant 8 : index
    %7 = vector.load %arg9[%c0_6, %c8] : memref<64x128xbf16, #tpu.memory_space<vmem>>, vector<8x8xbf16>
    tpu.vector_store %arg9[%c0_6, %c8], %6 {strides = array<i32>} : memref<64x128xbf16, #tpu.memory_space<vmem>>, vector<8x8xbf16>,
    %c0_7 = arith.constant 0 : index
    %c2 = arith.constant 2 : index
    %c0_8 = arith.constant 0 : index
    %8 = tpu.strided_load %arg1[%c0_7, %c2, %c0_8] {strides = array<i32: 1, 2, 1>} : memref<1x324x8xf32, #tpu.memory_space<vmem>>, vector<1x8x8xf32>
    %9 = vector.shape_cast %8 : vector<1x8x8xf32> to vector<8x8xf32>
    %10 = arith.truncf %9 : vector<8x8xf32> to vector<8x8xbf16>
    %c0_9 = arith.constant 0 : index
    %c16 = arith.constant 16 : index
    %11 = vector.load %arg9[%c0_9, %c16] : memref<64x128xbf16, #tpu.memory_space<vmem>>, vector<8x8xbf16>
    tpu.vector_store %arg9[%c0_9, %c16], %10 {strides = array<i32>} : memref<64x128xbf16, #tpu.memory_space<vmem>>, vector<8x8xbf16>,
    %c0_10 = arith.constant 0 : index
    %c3 = arith.constant 3 : index
    %c0_11 = arith.constant 0 : index
    %12 = tpu.strided_load %arg1[%c0_10, %c3, %c0_11] {strides = array<i32: 1, 2, 1>} : memref<1x324x8xf32, #tpu.memory_space<vmem>>, vector<1x8x8xf32>
    %13 = vector.shape_cast %12 : vector<1x8x8xf32> to vector<8x8xf32>
    %14 = arith.truncf %13 : vector<8x8xf32> to vector<8x8xbf16>
    %c0_12 = arith.constant 0 : index
    %c24 = arith.constant 24 : index
    %15 = vector.load %arg9[%c0_12, %c24] : memref<64x128xbf16, #tpu.memory_space<vmem>>, vector<8x8xbf16>
    tpu.vector_store %arg9[%c0_12, %c24], %14 {strides = array<i32>} : memref<64x128xbf16, #tpu.memory_space<vmem>>, vector<8x8xbf16>,
    %c0_13 = arith.constant 0 : index
    %c18 = arith.constant 18 : index
    %c0_14 = arith.constant 0 : index
    %16 = tpu.strided_load %arg1[%c0_13, %c18, %c0_14] {strides = array<i32: 1, 2, 1>} : memref<1x324x8xf32, #tpu.memory_space<vmem>>, vector<1x8x8xf32>
    %17 = vector.shape_cast %16 : vector<1x8x8xf32> to vector<8x8xf32>
    %18 = arith.truncf %17 : vector<8x8xf32> to vector<8x8xbf16>
    %c0_15 = arith.constant 0 : index
    %c32 = arith.constant 32 : index
    %19 = vector.load %arg9[%c0_15, %c32] : memref<64x128xbf16, #tpu.memory_space<vmem>>, vector<8x8xbf16>
    tpu.vector_store %arg9[%c0_15, %c32], %18 {strides = array<i32>} : memref<64x128xbf16, #tpu.memory_space<vmem>>, vector<8x8xbf16>,
    %c0_16 = arith.constant 0 : index
    %c19 = arith.constant 19 : index
    %c0_17 = arith.constant 0 : index
    %20 = tpu.strided_load %arg1[%c0_16, %c19, %c0_17] {strides = array<i32: 1, 2, 1>} : memref<1x324x8xf32, #tpu.memory_space<vmem>>, vector<1x8x8xf32>
    %21 = vector.shape_cast %20 : vector<1x8x8xf32> to vector<8x8xf32>
    %22 = arith.truncf %21 : vector<8x8xf32> to vector<8x8xbf16>
    %c0_18 = arith.constant 0 : index
    %c40 = arith.constant 40 : index
    %23 = vector.load %arg9[%c0_18, %c40] : memref<64x128xbf16, #tpu.memory_space<vmem>>, vector<8x8xbf16>
    tpu.vector_store %arg9[%c0_18, %c40], %22 {strides = array<i32>} : memref<64x128xbf16, #tpu.memory_space<vmem>>, vector<8x8xbf16>,
    %c0_19 = arith.constant 0 : index
    %c20 = arith.constant 20 : index
    %c0_20 = arith.constant 0 : index
    %24 = tpu.strided_load %arg1[%c0_19, %c20, %c0_20] {strides = array<i32: 1, 2, 1>} : memref<1x324x8xf32, #tpu.memory_space<vmem>>, vector<1x8x8xf32>
    %25 = vector.shape_cast %24 : vector<1x8x8xf32> to vector<8x8xf32>
    %26 = arith.truncf %25 : vector<8x8xf32> to vector<8x8xbf16>
    %c0_21 = arith.constant 0 : index
    %c48 = arith.constant 48 : index
    %27 = vector.load %arg9[%c0_21, %c48] : memref<64x128xbf16, #tpu.memory_space<vmem>>, vector<8x8xbf16>
    tpu.vector_store %arg9[%c0_21, %c48], %26 {strides = array<i32>} : memref<64x128xbf16, #tpu.memory_space<vmem>>, vector<8x8xbf16>,
    %c0_22 = arith.constant 0 : index
    %c21 = arith.constant 21 : index
    %c0_23 = arith.constant 0 : index
    %28 = tpu.strided_load %arg1[%c0_22, %c21, %c0_23] {strides = array<i32: 1, 2, 1>} : memref<1x324x8xf32, #tpu.memory_space<vmem>>, vector<1x8x8xf32>
    %29 = vector.shape_cast %28 : vector<1x8x8xf32> to vector<8x8xf32>
    %30 = arith.truncf %29 : vector<8x8xf32> to vector<8x8xbf16>
    %c0_24 = arith.constant 0 : index
    %c56 = arith.constant 56 : index
    %31 = vector.load %arg9[%c0_24, %c56] : memref<64x128xbf16, #tpu.memory_space<vmem>>, vector<8x8xbf16>
    tpu.vector_store %arg9[%c0_24, %c56], %30 {strides = array<i32>} : memref<64x128xbf16, #tpu.memory_space<vmem>>, vector<8x8xbf16>,
    %c0_25 = arith.constant 0 : index
    %c36 = arith.constant 36 : index
    %c0_26 = arith.constant 0 : index
    %32 = tpu.strided_load %arg1[%c0_25, %c36, %c0_26] {strides = array<i32: 1, 2, 1>} : memref<1x324x8xf32, #tpu.memory_space<vmem>>, vector<1x8x8xf32>
    %33 = vector.shape_cast %32 : vector<1x8x8xf32> to vector<8x8xf32>
    %34 = arith.truncf %33 : vector<8x8xf32> to vector<8x8xbf16>
    %c0_27 = arith.constant 0 : index
    %c64 = arith.constant 64 : index
    %35 = vector.load %arg9[%c0_27, %c64] : memref<64x128xbf16, #tpu.memory_space<vmem>>, vector<8x8xbf16>
    tpu.vector_store %arg9[%c0_27, %c64], %34 {strides = array<i32>} : memref<64x128xbf16, #tpu.memory_space<vmem>>, vector<8x8xbf16>,
    %c0_28 = arith.constant 0 : index
    %c37 = arith.constant 37 : index
    %c0_29 = arith.constant 0 : index
    %36 = tpu.strided_load %arg1[%c0_28, %c37, %c0_29] {strides = array<i32: 1, 2, 1>} : memref<1x324x8xf32, #tpu.memory_space<vmem>>, vector<1x8x8xf32>
    %37 = vector.shape_cast %36 : vector<1x8x8xf32> to vector<8x8xf32>
    %38 = arith.truncf %37 : vector<8x8xf32> to vector<8x8xbf16>
    %c0_30 = arith.constant 0 : index
    %c72 = arith.constant 72 : index
    %39 = vector.load %arg9[%c0_30, %c72] : memref<64x128xbf16, #tpu.memory_space<vmem>>, vector<8x8xbf16>
    tpu.vector_store %arg9[%c0_30, %c72], %38 {strides = array<i32>} : memref<64x128xbf16, #tpu.memory_space<vmem>>, vector<8x8xbf16>,
    %c0_31 = arith.constant 0 : index
    %c38 = arith.constant 38 : index
    %c0_32 = arith.constant 0 : index
    %40 = tpu.strided_load %arg1[%c0_31, %c38, %c0_32] {strides = array<i32: 1, 2, 1>} : memref<1x324x8xf32, #tpu.memory_space<vmem>>, vector<1x8x8xf32>
    %41 = vector.shape_cast %40 : vector<1x8x8xf32> to vector<8x8xf32>
    %42 = arith.truncf %41 : vector<8x8xf32> to vector<8x8xbf16>
    %c0_33 = arith.constant 0 : index
    %c80 = arith.constant 80 : index
    %43 = vector.load %arg9[%c0_33, %c80] : memref<64x128xbf16, #tpu.memory_space<vmem>>, vector<8x8xbf16>
    tpu.vector_store %arg9[%c0_33, %c80], %42 {strides = array<i32>} : memref<64x128xbf16, #tpu.memory_space<vmem>>, vector<8x8xbf16>,
    %c0_34 = arith.constant 0 : index
    %c39 = arith.constant 39 : index
    %c0_35 = arith.constant 0 : index
    %44 = tpu.strided_load %arg1[%c0_34, %c39, %c0_35] {strides = array<i32: 1, 2, 1>} : memref<1x324x8xf32, #tpu.memory_space<vmem>>, vector<1x8x8xf32>
    %45 = vector.shape_cast %44 : vector<1x8x8xf32> to vector<8x8xf32>
    %46 = arith.truncf %45 : vector<8x8xf32> to vector<8x8xbf16>
    %c0_36 = arith.constant 0 : index
    %c88 = arith.constant 88 : index
    %47 = vector.load %arg9[%c0_36, %c88] : memref<64x128xbf16, #tpu.memory_space<vmem>>, vector<8x8xbf16>
    tpu.vector_store %arg9[%c0_36, %c88], %46 {strides = array<i32>} : memref<64x128xbf16, #tpu.memory_space<vmem>>, vector<8x8xbf16>,
    %c0_37 = arith.constant 0 : index
    %c54 = arith.constant 54 : index
    %c0_38 = arith.constant 0 : index
    %48 = tpu.strided_load %arg1[%c0_37, %c54, %c0_38] {strides = array<i32: 1, 2, 1>} : memref<1x324x8xf32, #tpu.memory_space<vmem>>, vector<1x8x8xf32>
    %49 = vector.shape_cast %48 : vector<1x8x8xf32> to vector<8x8xf32>
    %50 = arith.truncf %49 : vector<8x8xf32> to vector<8x8xbf16>
    %c0_39 = arith.constant 0 : index
    %c96 = arith.constant 96 : index
    %51 = vector.load %arg9[%c0_39, %c96] : memref<64x128xbf16, #tpu.memory_space<vmem>>, vector<8x8xbf16>
    tpu.vector_store %arg9[%c0_39, %c96], %50 {strides = array<i32>} : memref<64x128xbf16, #tpu.memory_space<vmem>>, vector<8x8xbf16>,
    %c0_40 = arith.constant 0 : index
    %c55 = arith.constant 55 : index
    %c0_41 = arith.constant 0 : index
    %52 = tpu.strided_load %arg1[%c0_40, %c55, %c0_41] {strides = array<i32: 1, 2, 1>} : memref<1x324x8xf32, #tpu.memory_space<vmem>>, vector<1x8x8xf32>
    %53 = vector.shape_cast %52 : vector<1x8x8xf32> to vector<8x8xf32>
    %54 = arith.truncf %53 : vector<8x8xf32> to vector<8x8xbf16>
    %c0_42 = arith.constant 0 : index
    %c104 = arith.constant 104 : index
    %55 = vector.load %arg9[%c0_42, %c104] : memref<64x128xbf16, #tpu.memory_space<vmem>>, vector<8x8xbf16>
    tpu.vector_store %arg9[%c0_42, %c104], %54 {strides = array<i32>} : memref<64x128xbf16, #tpu.memory_space<vmem>>, vector<8x8xbf16>,
    %c0_43 = arith.constant 0 : index
    %c56_44 = arith.constant 56 : index
    %c0_45 = arith.constant 0 : index
    %56 = tpu.strided_load %arg1[%c0_43, %c56_44, %c0_45] {strides = array<i32: 1, 2, 1>} : memref<1x324x8xf32, #tpu.memory_space<vmem>>, vector<1x8x8xf32>
    %57 = vector.shape_cast %56 : vector<1x8x8xf32> to vector<8x8xf32>
    %58 = arith.truncf %57 : vector<8x8xf32> to vector<8x8xbf16>
    %c0_46 = arith.constant 0 : index
    %c112 = arith.constant 112 : index
    %59 = vector.load %arg9[%c0_46, %c112] : memref<64x128xbf16, #tpu.memory_space<vmem>>, vector<8x8xbf16>
    tpu.vector_store %arg9[%c0_46, %c112], %58 {strides = array<i32>} : memref<64x128xbf16, #tpu.memory_space<vmem>>, vector<8x8xbf16>,
    %c0_47 = arith.constant 0 : index
    %c57 = arith.constant 57 : index
    %c0_48 = arith.constant 0 : index
    %60 = tpu.strided_load %arg1[%c0_47, %c57, %c0_48] {strides = array<i32: 1, 2, 1>} : memref<1x324x8xf32, #tpu.memory_space<vmem>>, vector<1x8x8xf32>
    %61 = vector.shape_cast %60 : vector<1x8x8xf32> to vector<8x8xf32>
    %62 = arith.truncf %61 : vector<8x8xf32> to vector<8x8xbf16>
    %c0_49 = arith.constant 0 : index
    %c120 = arith.constant 120 : index
    %63 = vector.load %arg9[%c0_49, %c120] : memref<64x128xbf16, #tpu.memory_space<vmem>>, vector<8x8xbf16>
    tpu.vector_store %arg9[%c0_49, %c120], %62 {strides = array<i32>} : memref<64x128xbf16, #tpu.memory_space<vmem>>, vector<8x8xbf16>,
    %c0_50 = arith.constant 0 : index
    %c36_51 = arith.constant 36 : index
    %c0_52 = arith.constant 0 : index
    %64 = tpu.strided_load %arg1[%c0_50, %c36_51, %c0_52] {strides = array<i32: 1, 2, 1>} : memref<1x324x8xf32, #tpu.memory_space<vmem>>, vector<1x8x8xf32>
    %65 = vector.shape_cast %64 : vector<1x8x8xf32> to vector<8x8xf32>
    %66 = arith.truncf %65 : vector<8x8xf32> to vector<8x8xbf16>
    %c8_53 = arith.constant 8 : index
    %c0_54 = arith.constant 0 : index
    %67 = vector.load %arg9[%c8_53, %c0_54] : memref<64x128xbf16, #tpu.memory_space<vmem>>, vector<8x8xbf16>
    tpu.vector_store %arg9[%c8_53, %c0_54], %66 {strides = array<i32>} : memref<64x128xbf16, #tpu.memory_space<vmem>>, vector<8x8xbf16>,
    %c0_55 = arith.constant 0 : index
    %c37_56 = arith.constant 37 : index
    %c0_57 = arith.constant 0 : index
    %68 = tpu.strided_load %arg1[%c0_55, %c37_56, %c0_57] {strides = array<i32: 1, 2, 1>} : memref<1x324x8xf32, #tpu.memory_space<vmem>>, vector<1x8x8xf32>
    %69 = vector.shape_cast %68 : vector<1x8x8xf32> to vector<8x8xf32>
    %70 = arith.truncf %69 : vector<8x8xf32> to vector<8x8xbf16>
    %c8_58 = arith.constant 8 : index
    %c8_59 = arith.constant 8 : index
    %71 = vector.load %arg9[%c8_58, %c8_59] : memref<64x128xbf16, #tpu.memory_space<vmem>>, vector<8x8xbf16>
    tpu.vector_store %arg9[%c8_58, %c8_59], %70 {strides = array<i32>} : memref<64x128xbf16, #tpu.memory_space<vmem>>, vector<8x8xbf16>,
    %c0_60 = arith.constant 0 : index
    %c38_61 = arith.constant 38 : index
    %c0_62 = arith.constant 0 : index
    %72 = tpu.strided_load %arg1[%c0_60, %c38_61, %c0_62] {strides = array<i32: 1, 2, 1>} : memref<1x324x8xf32, #tpu.memory_space<vmem>>, vector<1x8x8xf32>
    %73 = vector.shape_cast %72 : vector<1x8x8xf32> to vector<8x8xf32>
    %74 = arith.truncf %73 : vector<8x8xf32> to vector<8x8xbf16>
    %c8_63 = arith.constant 8 : index
    %c16_64 = arith.constant 16 : index
    %75 = vector.load %arg9[%c8_63, %c16_64] : memref<64x128xbf16, #tpu.memory_space<vmem>>, vector<8x8xbf16>
    tpu.vector_store %arg9[%c8_63, %c16_64], %74 {strides = array<i32>} : memref<64x128xbf16, #tpu.memory_space<vmem>>, vector<8x8xbf16>,
    %c0_65 = arith.constant 0 : index
    %c39_66 = arith.constant 39 : index
    %c0_67 = arith.constant 0 : index
    %76 = tpu.strided_load %arg1[%c0_65, %c39_66, %c0_67] {strides = array<i32: 1, 2, 1>} : memref<1x324x8xf32, #tpu.memory_space<vmem>>, vector<1x8x8xf32>
    %77 = vector.shape_cast %76 : vector<1x8x8xf32> to vector<8x8xf32>
    %78 = arith.truncf %77 : vector<8x8xf32> to vector<8x8xbf16>
    %c8_68 = arith.constant 8 : index
    %c24_69 = arith.constant 24 : index
    %79 = vector.load %arg9[%c8_68, %c24_69] : memref<64x128xbf16, #tpu.memory_space<vmem>>, vector<8x8xbf16>
    tpu.vector_store %arg9[%c8_68, %c24_69], %78 {strides = array<i32>} : memref<64x128xbf16, #tpu.memory_space<vmem>>, vector<8x8xbf16>,
    %c0_70 = arith.constant 0 : index
    %c54_71 = arith.constant 54 : index
    %c0_72 = arith.constant 0 : index
    %80 = tpu.strided_load %arg1[%c0_70, %c54_71, %c0_72] {strides = array<i32: 1, 2, 1>} : memref<1x324x8xf32, #tpu.memory_space<vmem>>, vector<1x8x8xf32>
    %81 = vector.shape_cast %80 : vector<1x8x8xf32> to vector<8x8xf32>
    %82 = arith.truncf %81 : vector<8x8xf32> to vector<8x8xbf16>
    %c8_73 = arith.constant 8 : index
    %c32_74 = arith.constant 32 : index
    %83 = vector.load %arg9[%c8_73, %c32_74] : memref<64x128xbf16, #tpu.memory_space<vmem>>, vector<8x8xbf16>
    tpu.vector_store %arg9[%c8_73, %c32_74], %82 {strides = array<i32>} : memref<64x128xbf16, #tpu.memory_space<vmem>>, vector<8x8xbf16>,
    %c0_75 = arith.constant 0 : index
    %c55_76 = arith.constant 55 : index
    %c0_77 = arith.constant 0 : index
    %84 = tpu.strided_load %arg1[%c0_75, %c55_76, %c0_77] {strides = array<i32: 1, 2, 1>} : memref<1x324x8xf32, #tpu.memory_space<vmem>>, vector<1x8x8xf32>
    %85 = vector.shape_cast %84 : vector<1x8x8xf32> to vector<8x8xf32>
    %86 = arith.truncf %85 : vector<8x8xf32> to vector<8x8xbf16>
    %c8_78 = arith.constant 8 : index
    %c40_79 = arith.constant 40 : index
    %87 = vector.load %arg9[%c8_78, %c40_79] : memref<64x128xbf16, #tpu.memory_space<vmem>>, vector<8x8xbf16>
    tpu.vector_store %arg9[%c8_78, %c40_79], %86 {strides = array<i32>} : memref<64x128xbf16, #tpu.memory_space<vmem>>, vector<8x8xbf16>,
    %c0_80 = arith.constant 0 : index
    %c56_81 = arith.constant 56 : index
    %c0_82 = arith.constant 0 : index
    %88 = tpu.strided_load %arg1[%c0_80, %c56_81, %c0_82] {strides = array<i32: 1, 2, 1>} : memref<1x324x8xf32, #tpu.memory_space<vmem>>, vector<1x8x8xf32>
    %89 = vector.shape_cast %88 : vector<1x8x8xf32> to vector<8x8xf32>
    %90 = arith.truncf %89 : vector<8x8xf32> to vector<8x8xbf16>
    %c8_83 = arith.constant 8 : index
    %c48_84 = arith.constant 48 : index
    %91 = vector.load %arg9[%c8_83, %c48_84] : memref<64x128xbf16, #tpu.memory_space<vmem>>, vector<8x8xbf16>
    tpu.vector_store %arg9[%c8_83, %c48_84], %90 {strides = array<i32>} : memref<64x128xbf16, #tpu.memory_space<vmem>>, vector<8x8xbf16>,
    %c0_85 = arith.constant 0 : index
    %c57_86 = arith.constant 57 : index
    %c0_87 = arith.constant 0 : index
    %92 = tpu.strided_load %arg1[%c0_85, %c57_86, %c0_87] {strides = array<i32: 1, 2, 1>} : memref<1x324x8xf32, #tpu.memory_space<vmem>>, vector<1x8x8xf32>
    %93 = vector.shape_cast %92 : vector<1x8x8xf32> to vector<8x8xf32>
    %94 = arith.truncf %93 : vector<8x8xf32> to vector<8x8xbf16>
    %c8_88 = arith.constant 8 : index
    %c56_89 = arith.constant 56 : index
    %95 = vector.load %arg9[%c8_88, %c56_89] : memref<64x128xbf16, #tpu.memory_space<vmem>>, vector<8x8xbf16>
    tpu.vector_store %arg9[%c8_88, %c56_89], %94 {strides = array<i32>} : memref<64x128xbf16, #tpu.memory_space<vmem>>, vector<8x8xbf16>,
    %c0_90 = arith.constant 0 : index
    %c72_91 = arith.constant 72 : index
    %c0_92 = arith.constant 0 : index
    %96 = tpu.strided_load %arg1[%c0_90, %c72_91, %c0_92] {strides = array<i32: 1, 2, 1>} : memref<1x324x8xf32, #tpu.memory_space<vmem>>, vector<1x8x8xf32>
    %97 = vector.shape_cast %96 : vector<1x8x8xf32> to vector<8x8xf32>
    %98 = arith.truncf %97 : vector<8x8xf32> to vector<8x8xbf16>
    %c8_93 = arith.constant 8 : index
    %c64_94 = arith.constant 64 : index
    %99 = vector.load %arg9[%c8_93, %c64_94] : memref<64x128xbf16, #tpu.memory_space<vmem>>, vector<8x8xbf16>
    tpu.vector_store %arg9[%c8_93, %c64_94], %98 {strides = array<i32>} : memref<64x128xbf16, #tpu.memory_space<vmem>>, vector<8x8xbf16>,
    %c0_95 = arith.constant 0 : index
    %c73 = arith.constant 73 : index
    %c0_96 = arith.constant 0 : index
    %100 = tpu.strided_load %arg1[%c0_95, %c73, %c0_96] {strides = array<i32: 1, 2, 1>} : memref<1x324x8xf32, #tpu.memory_space<vmem>>, vector<1x8x8xf32>
    %101 = vector.shape_cast %100 : vector<1x8x8xf32> to vector<8x8xf32>
    %102 = arith.truncf %101 : vector<8x8xf32> to vector<8x8xbf16>
    %c8_97 = arith.constant 8 : index
    %c72_98 = arith.constant 72 : index
    %103 = vector.load %arg9[%c8_97, %c72_98] : memref<64x128xbf16, #tpu.memory_space<vmem>>, vector<8x8xbf16>
    tpu.vector_store %arg9[%c8_97, %c72_98], %102 {strides = array<i32>} : memref<64x128xbf16, #tpu.memory_space<vmem>>, vector<8x8xbf16>,
    %c0_99 = arith.constant 0 : index
    %c74 = arith.constant 74 : index
    %c0_100 = arith.constant 0 : index
    %104 = tpu.strided_load %arg1[%c0_99, %c74, %c0_100] {strides = array<i32: 1, 2, 1>} : memref<1x324x8xf32, #tpu.memory_space<vmem>>, vector<1x8x8xf32>
    %105 = vector.shape_cast %104 : vector<1x8x8xf32> to vector<8x8xf32>
    %106 = arith.truncf %105 : vector<8x8xf32> to vector<8x8xbf16>
    %c8_101 = arith.constant 8 : index
    %c80_102 = arith.constant 80 : index
    %107 = vector.load %arg9[%c8_101, %c80_102] : memref<64x128xbf16, #tpu.memory_space<vmem>>, vector<8x8xbf16>
    tpu.vector_store %arg9[%c8_101, %c80_102], %106 {strides = array<i32>} : memref<64x128xbf16, #tpu.memory_space<vmem>>, vector<8x8xbf16>,
    %c0_103 = arith.constant 0 : index
    %c75 = arith.constant 75 : index
    %c0_104 = arith.constant 0 : index
    %108 = tpu.strided_load %arg1[%c0_103, %c75, %c0_104] {strides = array<i32: 1, 2, 1>} : memref<1x324x8xf32, #tpu.memory_space<vmem>>, vector<1x8x8xf32>
    %109 = vector.shape_cast %108 : vector<1x8x8xf32> to vector<8x8xf32>
    %110 = arith.truncf %109 : vector<8x8xf32> to vector<8x8xbf16>
    %c8_105 = arith.constant 8 : index
    %c88_106 = arith.constant 88 : index
    %111 = vector.load %arg9[%c8_105, %c88_106] : memref<64x128xbf16, #tpu.memory_space<vmem>>, vector<8x8xbf16>
    tpu.vector_store %arg9[%c8_105, %c88_106], %110 {strides = array<i32>} : memref<64x128xbf16, #tpu.memory_space<vmem>>, vector<8x8xbf16>,
    %c0_107 = arith.constant 0 : index
    %c90 = arith.constant 90 : index
    %c0_108 = arith.constant 0 : index
    %112 = tpu.strided_load %arg1[%c0_107, %c90, %c0_108] {strides = array<i32: 1, 2, 1>} : memref<1x324x8xf32, #tpu.memory_space<vmem>>, vector<1x8x8xf32>
    %113 = vector.shape_cast %112 : vector<1x8x8xf32> to vector<8x8xf32>
    %114 = arith.truncf %113 : vector<8x8xf32> to vector<8x8xbf16>
    %c8_109 = arith.constant 8 : index
    %c96_110 = arith.constant 96 : index
    %115 = vector.load %arg9[%c8_109, %c96_110] : memref<64x128xbf16, #tpu.memory_space<vmem>>, vector<8x8xbf16>
    tpu.vector_store %arg9[%c8_109, %c96_110], %114 {strides = array<i32>} : memref<64x128xbf16, #tpu.memory_space<vmem>>, vector<8x8xbf16>,
    %c0_111 = arith.constant 0 : index
    %c91 = arith.constant 91 : index
    %c0_112 = arith.constant 0 : index
    %116 = tpu.strided_load %arg1[%c0_111, %c91, %c0_112] {strides = array<i32: 1, 2, 1>} : memref<1x324x8xf32, #tpu.memory_space<vmem>>, vector<1x8x8xf32>
    %117 = vector.shape_cast %116 : vector<1x8x8xf32> to vector<8x8xf32>
    %118 = arith.truncf %117 : vector<8x8xf32> to vector<8x8xbf16>
    %c8_113 = arith.constant 8 : index
    %c104_114 = arith.constant 104 : index
    %119 = vector.load %arg9[%c8_113, %c104_114] : memref<64x128xbf16, #tpu.memory_space<vmem>>, vector<8x8xbf16>
    tpu.vector_store %arg9[%c8_113, %c104_114], %118 {strides = array<i32>} : memref<64x128xbf16, #tpu.memory_space<vmem>>, vector<8x8xbf16>,
    %c0_115 = arith.constant 0 : index
    %c92 = arith.constant 92 : index
    %c0_116 = arith.constant 0 : index
    %120 = tpu.strided_load %arg1[%c0_115, %c92, %c0_116] {strides = array<i32: 1, 2, 1>} : memref<1x324x8xf32, #tpu.memory_space<vmem>>, vector<1x8x8xf32>
    %121 = vector.shape_cast %120 : vector<1x8x8xf32> to vector<8x8xf32>
    %122 = arith.truncf %121 : vector<8x8xf32> to vector<8x8xbf16>
    %c8_117 = arith.constant 8 : index
    %c112_118 = arith.constant 112 : index
    %123 = vector.load %arg9[%c8_117, %c112_118] : memref<64x128xbf16, #tpu.memory_space<vmem>>, vector<8x8xbf16>
    tpu.vector_store %arg9[%c8_117, %c112_118], %122 {strides = array<i32>} : memref<64x128xbf16, #tpu.memory_space<vmem>>, vector<8x8xbf16>,
    %c0_119 = arith.constant 0 : index
    %c93 = arith.constant 93 : index
    %c0_120 = arith.constant 0 : index
    %124 = tpu.strided_load %arg1[%c0_119, %c93, %c0_120] {strides = array<i32: 1, 2, 1>} : memref<1x324x8xf32, #tpu.memory_space<vmem>>, vector<1x8x8xf32>
    %125 = vector.shape_cast %124 : vector<1x8x8xf32> to vector<8x8xf32>
    %126 = arith.truncf %125 : vector<8x8xf32> to vector<8x8xbf16>
    %c8_121 = arith.constant 8 : index
    %c120_122 = arith.constant 120 : index
    %127 = vector.load %arg9[%c8_121, %c120_122] : memref<64x128xbf16, #tpu.memory_space<vmem>>, vector<8x8xbf16>
    tpu.vector_store %arg9[%c8_121, %c120_122], %126 {strides = array<i32>} : memref<64x128xbf16, #tpu.memory_space<vmem>>, vector<8x8xbf16>,
    %c0_123 = arith.constant 0 : index
    %c72_124 = arith.constant 72 : index
    %c0_125 = arith.constant 0 : index
    %128 = tpu.strided_load %arg1[%c0_123, %c72_124, %c0_125] {strides = array<i32: 1, 2, 1>} : memref<1x324x8xf32, #tpu.memory_space<vmem>>, vector<1x8x8xf32>
    %129 = vector.shape_cast %128 : vector<1x8x8xf32> to vector<8x8xf32>
    %130 = arith.truncf %129 : vector<8x8xf32> to vector<8x8xbf16>
    %c16_126 = arith.constant 16 : index
    %c0_127 = arith.constant 0 : index
    %131 = vector.load %arg9[%c16_126, %c0_127] : memref<64x128xbf16, #tpu.memory_space<vmem>>, vector<8x8xbf16>
    tpu.vector_store %arg9[%c16_126, %c0_127], %130 {strides = array<i32>} : memref<64x128xbf16, #tpu.memory_space<vmem>>, vector<8x8xbf16>,
    %c0_128 = arith.constant 0 : index
    %c73_129 = arith.constant 73 : index
    %c0_130 = arith.constant 0 : index
    %132 = tpu.strided_load %arg1[%c0_128, %c73_129, %c0_130] {strides = array<i32: 1, 2, 1>} : memref<1x324x8xf32, #tpu.memory_space<vmem>>, vector<1x8x8xf32>
    %133 = vector.shape_cast %132 : vector<1x8x8xf32> to vector<8x8xf32>
    %134 = arith.truncf %133 : vector<8x8xf32> to vector<8x8xbf16>
    %c16_131 = arith.constant 16 : index
    %c8_132 = arith.constant 8 : index
    %135 = vector.load %arg9[%c16_131, %c8_132] : memref<64x128xbf16, #tpu.memory_space<vmem>>, vector<8x8xbf16>
    tpu.vector_store %arg9[%c16_131, %c8_132], %134 {strides = array<i32>} : memref<64x128xbf16, #tpu.memory_space<vmem>>, vector<8x8xbf16>,
    %c0_133 = arith.constant 0 : index
    %c74_134 = arith.constant 74 : index
    %c0_135 = arith.constant 0 : index
    %136 = tpu.strided_load %arg1[%c0_133, %c74_134, %c0_135] {strides = array<i32: 1, 2, 1>} : memref<1x324x8xf32, #tpu.memory_space<vmem>>, vector<1x8x8xf32>
    %137 = vector.shape_cast %136 : vector<1x8x8xf32> to vector<8x8xf32>
    %138 = arith.truncf %137 : vector<8x8xf32> to vector<8x8xbf16>
    %c16_136 = arith.constant 16 : index
    %c16_137 = arith.constant 16 : index
    %139 = vector.load %arg9[%c16_136, %c16_137] : memref<64x128xbf16, #tpu.memory_space<vmem>>, vector<8x8xbf16>
    tpu.vector_store %arg9[%c16_136, %c16_137], %138 {strides = array<i32>} : memref<64x128xbf16, #tpu.memory_space<vmem>>, vector<8x8xbf16>,
    %c0_138 = arith.constant 0 : index
    %c75_139 = arith.constant 75 : index
    %c0_140 = arith.constant 0 : index
    %140 = tpu.strided_load %arg1[%c0_138, %c75_139, %c0_140] {strides = array<i32: 1, 2, 1>} : memref<1x324x8xf32, #tpu.memory_space<vmem>>, vector<1x8x8xf32>
    %141 = vector.shape_cast %140 : vector<1x8x8xf32> to vector<8x8xf32>
    %142 = arith.truncf %141 : vector<8x8xf32> to vector<8x8xbf16>
    %c16_141 = arith.constant 16 : index
    %c24_142 = arith.constant 24 : index
    %143 = vector.load %arg9[%c16_141, %c24_142] : memref<64x128xbf16, #tpu.memory_space<vmem>>, vector<8x8xbf16>
    tpu.vector_store %arg9[%c16_141, %c24_142], %142 {strides = array<i32>} : memref<64x128xbf16, #tpu.memory_space<vmem>>, vector<8x8xbf16>,
    %c0_143 = arith.constant 0 : index
    %c90_144 = arith.constant 90 : index
    %c0_145 = arith.constant 0 : index
    %144 = tpu.strided_load %arg1[%c0_143, %c90_144, %c0_145] {strides = array<i32: 1, 2, 1>} : memref<1x324x8xf32, #tpu.memory_space<vmem>>, vector<1x8x8xf32>
    %145 = vector.shape_cast %144 : vector<1x8x8xf32> to vector<8x8xf32>
    %146 = arith.truncf %145 : vector<8x8xf32> to vector<8x8xbf16>
    %c16_146 = arith.constant 16 : index
    %c32_147 = arith.constant 32 : index
    %147 = vector.load %arg9[%c16_146, %c32_147] : memref<64x128xbf16, #tpu.memory_space<vmem>>, vector<8x8xbf16>
    tpu.vector_store %arg9[%c16_146, %c32_147], %146 {strides = array<i32>} : memref<64x128xbf16, #tpu.memory_space<vmem>>, vector<8x8xbf16>,
    %c0_148 = arith.constant 0 : index
    %c91_149 = arith.constant 91 : index
    %c0_150 = arith.constant 0 : index
    %148 = tpu.strided_load %arg1[%c0_148, %c91_149, %c0_150] {strides = array<i32: 1, 2, 1>} : memref<1x324x8xf32, #tpu.memory_space<vmem>>, vector<1x8x8xf32>
    %149 = vector.shape_cast %148 : vector<1x8x8xf32> to vector<8x8xf32>
    %150 = arith.truncf %149 : vector<8x8xf32> to vector<8x8xbf16>
    %c16_151 = arith.constant 16 : index
    %c40_152 = arith.constant 40 : index
    %151 = vector.load %arg9[%c16_151, %c40_152] : memref<64x128xbf16, #tpu.memory_space<vmem>>, vector<8x8xbf16>
    tpu.vector_store %arg9[%c16_151, %c40_152], %150 {strides = array<i32>} : memref<64x128xbf16, #tpu.memory_space<vmem>>, vector<8x8xbf16>,
    %c0_153 = arith.constant 0 : index
    %c92_154 = arith.constant 92 : index
    %c0_155 = arith.constant 0 : index
    %152 = tpu.strided_load %arg1[%c0_153, %c92_154, %c0_155] {strides = array<i32: 1, 2, 1>} : memref<1x324x8xf32, #tpu.memory_space<vmem>>, vector<1x8x8xf32>
    %153 = vector.shape_cast %152 : vector<1x8x8xf32> to vector<8x8xf32>
    %154 = arith.truncf %153 : vector<8x8xf32> to vector<8x8xbf16>
    %c16_156 = arith.constant 16 : index
    %c48_157 = arith.constant 48 : index
    %155 = vector.load %arg9[%c16_156, %c48_157] : memref<64x128xbf16, #tpu.memory_space<vmem>>, vector<8x8xbf16>
    tpu.vector_store %arg9[%c16_156, %c48_157], %154 {strides = array<i32>} : memref<64x128xbf16, #tpu.memory_space<vmem>>, vector<8x8xbf16>,
    %c0_158 = arith.constant 0 : index
    %c93_159 = arith.constant 93 : index
    %c0_160 = arith.constant 0 : index
    %156 = tpu.strided_load %arg1[%c0_158, %c93_159, %c0_160] {strides = array<i32: 1, 2, 1>} : memref<1x324x8xf32, #tpu.memory_space<vmem>>, vector<1x8x8xf32>
    %157 = vector.shape_cast %156 : vector<1x8x8xf32> to vector<8x8xf32>
    %158 = arith.truncf %157 : vector<8x8xf32> to vector<8x8xbf16>
    %c16_161 = arith.constant 16 : index
    %c56_162 = arith.constant 56 : index
    %159 = vector.load %arg9[%c16_161, %c56_162] : memref<64x128xbf16, #tpu.memory_space<vmem>>, vector<8x8xbf16>
    tpu.vector_store %arg9[%c16_161, %c56_162], %158 {strides = array<i32>} : memref<64x128xbf16, #tpu.memory_space<vmem>>, vector<8x8xbf16>,
    %c0_163 = arith.constant 0 : index
    %c108 = arith.constant 108 : index
    %c0_164 = arith.constant 0 : index
    %160 = tpu.strided_load %arg1[%c0_163, %c108, %c0_164] {strides = array<i32: 1, 2, 1>} : memref<1x324x8xf32, #tpu.memory_space<vmem>>, vector<1x8x8xf32>
    %161 = vector.shape_cast %160 : vector<1x8x8xf32> to vector<8x8xf32>
    %162 = arith.truncf %161 : vector<8x8xf32> to vector<8x8xbf16>
    %c16_165 = arith.constant 16 : index
    %c64_166 = arith.constant 64 : index
    %163 = vector.load %arg9[%c16_165, %c64_166] : memref<64x128xbf16, #tpu.memory_space<vmem>>, vector<8x8xbf16>
    tpu.vector_store %arg9[%c16_165, %c64_166], %162 {strides = array<i32>} : memref<64x128xbf16, #tpu.memory_space<vmem>>, vector<8x8xbf16>,
    %c0_167 = arith.constant 0 : index
    %c109 = arith.constant 109 : index
    %c0_168 = arith.constant 0 : index
    %164 = tpu.strided_load %arg1[%c0_167, %c109, %c0_168] {strides = array<i32: 1, 2, 1>} : memref<1x324x8xf32, #tpu.memory_space<vmem>>, vector<1x8x8xf32>
    %165 = vector.shape_cast %164 : vector<1x8x8xf32> to vector<8x8xf32>
    %166 = arith.truncf %165 : vector<8x8xf32> to vector<8x8xbf16>
    %c16_169 = arith.constant 16 : index
    %c72_170 = arith.constant 72 : index
    %167 = vector.load %arg9[%c16_169, %c72_170] : memref<64x128xbf16, #tpu.memory_space<vmem>>, vector<8x8xbf16>
    tpu.vector_store %arg9[%c16_169, %c72_170], %166 {strides = array<i32>} : memref<64x128xbf16, #tpu.memory_space<vmem>>, vector<8x8xbf16>,
    %c0_171 = arith.constant 0 : index
    %c110 = arith.constant 110 : index
    %c0_172 = arith.constant 0 : index
    %168 = tpu.strided_load %arg1[%c0_171, %c110, %c0_172] {strides = array<i32: 1, 2, 1>} : memref<1x324x8xf32, #tpu.memory_space<vmem>>, vector<1x8x8xf32>
    %169 = vector.shape_cast %168 : vector<1x8x8xf32> to vector<8x8xf32>
    %170 = arith.truncf %169 : vector<8x8xf32> to vector<8x8xbf16>
    %c16_173 = arith.constant 16 : index
    %c80_174 = arith.constant 80 : index
    %171 = vector.load %arg9[%c16_173, %c80_174] : memref<64x128xbf16, #tpu.memory_space<vmem>>, vector<8x8xbf16>
    tpu.vector_store %arg9[%c16_173, %c80_174], %170 {strides = array<i32>} : memref<64x128xbf16, #tpu.memory_space<vmem>>, vector<8x8xbf16>,
    %c0_175 = arith.constant 0 : index
    %c111 = arith.constant 111 : index
    %c0_176 = arith.constant 0 : index
    %172 = tpu.strided_load %arg1[%c0_175, %c111, %c0_176] {strides = array<i32: 1, 2, 1>} : memref<1x324x8xf32, #tpu.memory_space<vmem>>, vector<1x8x8xf32>
    %173 = vector.shape_cast %172 : vector<1x8x8xf32> to vector<8x8xf32>
    %174 = arith.truncf %173 : vector<8x8xf32> to vector<8x8xbf16>
    %c16_177 = arith.constant 16 : index
    %c88_178 = arith.constant 88 : index
    %175 = vector.load %arg9[%c16_177, %c88_178] : memref<64x128xbf16, #tpu.memory_space<vmem>>, vector<8x8xbf16>
    tpu.vector_store %arg9[%c16_177, %c88_178], %174 {strides = array<i32>} : memref<64x128xbf16, #tpu.memory_space<vmem>>, vector<8x8xbf16>,
    %c0_179 = arith.constant 0 : index
    %c126 = arith.constant 126 : index
    %c0_180 = arith.constant 0 : index
    %176 = tpu.strided_load %arg1[%c0_179, %c126, %c0_180] {strides = array<i32: 1, 2, 1>} : memref<1x324x8xf32, #tpu.memory_space<vmem>>, vector<1x8x8xf32>
    %177 = vector.shape_cast %176 : vector<1x8x8xf32> to vector<8x8xf32>
    %178 = arith.truncf %177 : vector<8x8xf32> to vector<8x8xbf16>
    %c16_181 = arith.constant 16 : index
    %c96_182 = arith.constant 96 : index
    %179 = vector.load %arg9[%c16_181, %c96_182] : memref<64x128xbf16, #tpu.memory_space<vmem>>, vector<8x8xbf16>
    tpu.vector_store %arg9[%c16_181, %c96_182], %178 {strides = array<i32>} : memref<64x128xbf16, #tpu.memory_space<vmem>>, vector<8x8xbf16>,
    %c0_183 = arith.constant 0 : index
    %c127 = arith.constant 127 : index
    %c0_184 = arith.constant 0 : index
    %180 = tpu.strided_load %arg1[%c0_183, %c127, %c0_184] {strides = array<i32: 1, 2, 1>} : memref<1x324x8xf32, #tpu.memory_space<vmem>>, vector<1x8x8xf32>
    %181 = vector.shape_cast %180 : vector<1x8x8xf32> to vector<8x8xf32>
    %182 = arith.truncf %181 : vector<8x8xf32> to vector<8x8xbf16>
    %c16_185 = arith.constant 16 : index
    %c104_186 = arith.constant 104 : index
    %183 = vector.load %arg9[%c16_185, %c104_186] : memref<64x128xbf16, #tpu.memory_space<vmem>>, vector<8x8xbf16>
    tpu.vector_store %arg9[%c16_185, %c104_186], %182 {strides = array<i32>} : memref<64x128xbf16, #tpu.memory_space<vmem>>, vector<8x8xbf16>,
    %c0_187 = arith.constant 0 : index
    %c128 = arith.constant 128 : index
    %c0_188 = arith.constant 0 : index
    %184 = tpu.strided_load %arg1[%c0_187, %c128, %c0_188] {strides = array<i32: 1, 2, 1>} : memref<1x324x8xf32, #tpu.memory_space<vmem>>, vector<1x8x8xf32>
    %185 = vector.shape_cast %184 : vector<1x8x8xf32> to vector<8x8xf32>
    %186 = arith.truncf %185 : vector<8x8xf32> to vector<8x8xbf16>
    %c16_189 = arith.constant 16 : index
    %c112_190 = arith.constant 112 : index
    %187 = vector.load %arg9[%c16_189, %c112_190] : memref<64x128xbf16, #tpu.memory_space<vmem>>, vector<8x8xbf16>
    tpu.vector_store %arg9[%c16_189, %c112_190], %186 {strides = array<i32>} : memref<64x128xbf16, #tpu.memory_space<vmem>>, vector<8x8xbf16>,
    %c0_191 = arith.constant 0 : index
    %c129 = arith.constant 129 : index
    %c0_192 = arith.constant 0 : index
    %188 = tpu.strided_load %arg1[%c0_191, %c129, %c0_192] {strides = array<i32: 1, 2, 1>} : memref<1x324x8xf32, #tpu.memory_space<vmem>>, vector<1x8x8xf32>
    %189 = vector.shape_cast %188 : vector<1x8x8xf32> to vector<8x8xf32>
    %190 = arith.truncf %189 : vector<8x8xf32> to vector<8x8xbf16>
    %c16_193 = arith.constant 16 : index
    %c120_194 = arith.constant 120 : index
    %191 = vector.load %arg9[%c16_193, %c120_194] : memref<64x128xbf16, #tpu.memory_space<vmem>>, vector<8x8xbf16>
    tpu.vector_store %arg9[%c16_193, %c120_194], %190 {strides = array<i32>} : memref<64x128xbf16, #tpu.memory_space<vmem>>, vector<8x8xbf16>,
    %c0_195 = arith.constant 0 : index
    %c108_196 = arith.constant 108 : index
    %c0_197 = arith.constant 0 : index
    %192 = tpu.strided_load %arg1[%c0_195, %c108_196, %c0_197] {strides = array<i32: 1, 2, 1>} : memref<1x324x8xf32, #tpu.memory_space<vmem>>, vector<1x8x8xf32>
    %193 = vector.shape_cast %192 : vector<1x8x8xf32> to vector<8x8xf32>
    %194 = arith.truncf %193 : vector<8x8xf32> to vector<8x8xbf16>
    %c24_198 = arith.constant 24 : index
    %c0_199 = arith.constant 0 : index
    %195 = vector.load %arg9[%c24_198, %c0_199] : memref<64x128xbf16, #tpu.memory_space<vmem>>, vector<8x8xbf16>
    tpu.vector_store %arg9[%c24_198, %c0_199], %194 {strides = array<i32>} : memref<64x128xbf16, #tpu.memory_space<vmem>>, vector<8x8xbf16>,
    %c0_200 = arith.constant 0 : index
    %c109_201 = arith.constant 109 : index
    %c0_202 = arith.constant 0 : index
    %196 = tpu.strided_load %arg1[%c0_200, %c109_201, %c0_202] {strides = array<i32: 1, 2, 1>} : memref<1x324x8xf32, #tpu.memory_space<vmem>>, vector<1x8x8xf32>
    %197 = vector.shape_cast %196 : vector<1x8x8xf32> to vector<8x8xf32>
    %198 = arith.truncf %197 : vector<8x8xf32> to vector<8x8xbf16>
    %c24_203 = arith.constant 24 : index
    %c8_204 = arith.constant 8 : index
    %199 = vector.load %arg9[%c24_203, %c8_204] : memref<64x128xbf16, #tpu.memory_space<vmem>>, vector<8x8xbf16>
    tpu.vector_store %arg9[%c24_203, %c8_204], %198 {strides = array<i32>} : memref<64x128xbf16, #tpu.memory_space<vmem>>, vector<8x8xbf16>,
    %c0_205 = arith.constant 0 : index
    %c110_206 = arith.constant 110 : index
    %c0_207 = arith.constant 0 : index
    %200 = tpu.strided_load %arg1[%c0_205, %c110_206, %c0_207] {strides = array<i32: 1, 2, 1>} : memref<1x324x8xf32, #tpu.memory_space<vmem>>, vector<1x8x8xf32>
    %201 = vector.shape_cast %200 : vector<1x8x8xf32> to vector<8x8xf32>
    %202 = arith.truncf %201 : vector<8x8xf32> to vector<8x8xbf16>
    %c24_208 = arith.constant 24 : index
    %c16_209 = arith.constant 16 : index
    %203 = vector.load %arg9[%c24_208, %c16_209] : memref<64x128xbf16, #tpu.memory_space<vmem>>, vector<8x8xbf16>
    tpu.vector_store %arg9[%c24_208, %c16_209], %202 {strides = array<i32>} : memref<64x128xbf16, #tpu.memory_space<vmem>>, vector<8x8xbf16>,
    %c0_210 = arith.constant 0 : index
    %c111_211 = arith.constant 111 : index
    %c0_212 = arith.constant 0 : index
    %204 = tpu.strided_load %arg1[%c0_210, %c111_211, %c0_212] {strides = array<i32: 1, 2, 1>} : memref<1x324x8xf32, #tpu.memory_space<vmem>>, vector<1x8x8xf32>
    %205 = vector.shape_cast %204 : vector<1x8x8xf32> to vector<8x8xf32>
    %206 = arith.truncf %205 : vector<8x8xf32> to vector<8x8xbf16>
    %c24_213 = arith.constant 24 : index
    %c24_214 = arith.constant 24 : index
    %207 = vector.load %arg9[%c24_213, %c24_214] : memref<64x128xbf16, #tpu.memory_space<vmem>>, vector<8x8xbf16>
    tpu.vector_store %arg9[%c24_213, %c24_214], %206 {strides = array<i32>} : memref<64x128xbf16, #tpu.memory_space<vmem>>, vector<8x8xbf16>,
    %c0_215 = arith.constant 0 : index
    %c126_216 = arith.constant 126 : index
    %c0_217 = arith.constant 0 : index
    %208 = tpu.strided_load %arg1[%c0_215, %c126_216, %c0_217] {strides = array<i32: 1, 2, 1>} : memref<1x324x8xf32, #tpu.memory_space<vmem>>, vector<1x8x8xf32>
    %209 = vector.shape_cast %208 : vector<1x8x8xf32> to vector<8x8xf32>
    %210 = arith.truncf %209 : vector<8x8xf32> to vector<8x8xbf16>
    %c24_218 = arith.constant 24 : index
    %c32_219 = arith.constant 32 : index
    %211 = vector.load %arg9[%c24_218, %c32_219] : memref<64x128xbf16, #tpu.memory_space<vmem>>, vector<8x8xbf16>
    tpu.vector_store %arg9[%c24_218, %c32_219], %210 {strides = array<i32>} : memref<64x128xbf16, #tpu.memory_space<vmem>>, vector<8x8xbf16>,
    %c0_220 = arith.constant 0 : index
    %c127_221 = arith.constant 127 : index
    %c0_222 = arith.constant 0 : index
    %212 = tpu.strided_load %arg1[%c0_220, %c127_221, %c0_222] {strides = array<i32: 1, 2, 1>} : memref<1x324x8xf32, #tpu.memory_space<vmem>>, vector<1x8x8xf32>
    %213 = vector.shape_cast %212 : vector<1x8x8xf32> to vector<8x8xf32>
    %214 = arith.truncf %213 : vector<8x8xf32> to vector<8x8xbf16>
    %c24_223 = arith.constant 24 : index
    %c40_224 = arith.constant 40 : index
    %215 = vector.load %arg9[%c24_223, %c40_224] : memref<64x128xbf16, #tpu.memory_space<vmem>>, vector<8x8xbf16>
    tpu.vector_store %arg9[%c24_223, %c40_224], %214 {strides = array<i32>} : memref<64x128xbf16, #tpu.memory_space<vmem>>, vector<8x8xbf16>,
    %c0_225 = arith.constant 0 : index
    %c128_226 = arith.constant 128 : index
    %c0_227 = arith.constant 0 : index
    %216 = tpu.strided_load %arg1[%c0_225, %c128_226, %c0_227] {strides = array<i32: 1, 2, 1>} : memref<1x324x8xf32, #tpu.memory_space<vmem>>, vector<1x8x8xf32>
    %217 = vector.shape_cast %216 : vector<1x8x8xf32> to vector<8x8xf32>
    %218 = arith.truncf %217 : vector<8x8xf32> to vector<8x8xbf16>
    %c24_228 = arith.constant 24 : index
    %c48_229 = arith.constant 48 : index
    %219 = vector.load %arg9[%c24_228, %c48_229] : memref<64x128xbf16, #tpu.memory_space<vmem>>, vector<8x8xbf16>
    tpu.vector_store %arg9[%c24_228, %c48_229], %218 {strides = array<i32>} : memref<64x128xbf16, #tpu.memory_space<vmem>>, vector<8x8xbf16>,
    %c0_230 = arith.constant 0 : index
    %c129_231 = arith.constant 129 : index
    %c0_232 = arith.constant 0 : index
    %220 = tpu.strided_load %arg1[%c0_230, %c129_231, %c0_232] {strides = array<i32: 1, 2, 1>} : memref<1x324x8xf32, #tpu.memory_space<vmem>>, vector<1x8x8xf32>
    %221 = vector.shape_cast %220 : vector<1x8x8xf32> to vector<8x8xf32>
    %222 = arith.truncf %221 : vector<8x8xf32> to vector<8x8xbf16>
    %c24_233 = arith.constant 24 : index
    %c56_234 = arith.constant 56 : index
    %223 = vector.load %arg9[%c24_233, %c56_234] : memref<64x128xbf16, #tpu.memory_space<vmem>>, vector<8x8xbf16>
    tpu.vector_store %arg9[%c24_233, %c56_234], %222 {strides = array<i32>} : memref<64x128xbf16, #tpu.memory_space<vmem>>, vector<8x8xbf16>,
    %c0_235 = arith.constant 0 : index
    %c144 = arith.constant 144 : index
    %c0_236 = arith.constant 0 : index
    %224 = tpu.strided_load %arg1[%c0_235, %c144, %c0_236] {strides = array<i32: 1, 2, 1>} : memref<1x324x8xf32, #tpu.memory_space<vmem>>, vector<1x8x8xf32>
    %225 = vector.shape_cast %224 : vector<1x8x8xf32> to vector<8x8xf32>
    %226 = arith.truncf %225 : vector<8x8xf32> to vector<8x8xbf16>
    %c24_237 = arith.constant 24 : index
    %c64_238 = arith.constant 64 : index
    %227 = vector.load %arg9[%c24_237, %c64_238] : memref<64x128xbf16, #tpu.memory_space<vmem>>, vector<8x8xbf16>
    tpu.vector_store %arg9[%c24_237, %c64_238], %226 {strides = array<i32>} : memref<64x128xbf16, #tpu.memory_space<vmem>>, vector<8x8xbf16>,
    %c0_239 = arith.constant 0 : index
    %c145 = arith.constant 145 : index
    %c0_240 = arith.constant 0 : index
    %228 = tpu.strided_load %arg1[%c0_239, %c145, %c0_240] {strides = array<i32: 1, 2, 1>} : memref<1x324x8xf32, #tpu.memory_space<vmem>>, vector<1x8x8xf32>
    %229 = vector.shape_cast %228 : vector<1x8x8xf32> to vector<8x8xf32>
    %230 = arith.truncf %229 : vector<8x8xf32> to vector<8x8xbf16>
    %c24_241 = arith.constant 24 : index
    %c72_242 = arith.constant 72 : index
    %231 = vector.load %arg9[%c24_241, %c72_242] : memref<64x128xbf16, #tpu.memory_space<vmem>>, vector<8x8xbf16>
    tpu.vector_store %arg9[%c24_241, %c72_242], %230 {strides = array<i32>} : memref<64x128xbf16, #tpu.memory_space<vmem>>, vector<8x8xbf16>,
    %c0_243 = arith.constant 0 : index
    %c146 = arith.constant 146 : index
    %c0_244 = arith.constant 0 : index
    %232 = tpu.strided_load %arg1[%c0_243, %c146, %c0_244] {strides = array<i32: 1, 2, 1>} : memref<1x324x8xf32, #tpu.memory_space<vmem>>, vector<1x8x8xf32>
    %233 = vector.shape_cast %232 : vector<1x8x8xf32> to vector<8x8xf32>
    %234 = arith.truncf %233 : vector<8x8xf32> to vector<8x8xbf16>
    %c24_245 = arith.constant 24 : index
    %c80_246 = arith.constant 80 : index
    %235 = vector.load %arg9[%c24_245, %c80_246] : memref<64x128xbf16, #tpu.memory_space<vmem>>, vector<8x8xbf16>
    tpu.vector_store %arg9[%c24_245, %c80_246], %234 {strides = array<i32>} : memref<64x128xbf16, #tpu.memory_space<vmem>>, vector<8x8xbf16>,
    %c0_247 = arith.constant 0 : index
    %c147 = arith.constant 147 : index
    %c0_248 = arith.constant 0 : index
    %236 = tpu.strided_load %arg1[%c0_247, %c147, %c0_248] {strides = array<i32: 1, 2, 1>} : memref<1x324x8xf32, #tpu.memory_space<vmem>>, vector<1x8x8xf32>
    %237 = vector.shape_cast %236 : vector<1x8x8xf32> to vector<8x8xf32>
    %238 = arith.truncf %237 : vector<8x8xf32> to vector<8x8xbf16>
    %c24_249 = arith.constant 24 : index
    %c88_250 = arith.constant 88 : index
    %239 = vector.load %arg9[%c24_249, %c88_250] : memref<64x128xbf16, #tpu.memory_space<vmem>>, vector<8x8xbf16>
    tpu.vector_store %arg9[%c24_249, %c88_250], %238 {strides = array<i32>} : memref<64x128xbf16, #tpu.memory_space<vmem>>, vector<8x8xbf16>,
    %c0_251 = arith.constant 0 : index
    %c162 = arith.constant 162 : index
    %c0_252 = arith.constant 0 : index
    %240 = tpu.strided_load %arg1[%c0_251, %c162, %c0_252] {strides = array<i32: 1, 2, 1>} : memref<1x324x8xf32, #tpu.memory_space<vmem>>, vector<1x8x8xf32>
    %241 = vector.shape_cast %240 : vector<1x8x8xf32> to vector<8x8xf32>
    %242 = arith.truncf %241 : vector<8x8xf32> to vector<8x8xbf16>
    %c24_253 = arith.constant 24 : index
    %c96_254 = arith.constant 96 : index
    %243 = vector.load %arg9[%c24_253, %c96_254] : memref<64x128xbf16, #tpu.memory_space<vmem>>, vector<8x8xbf16>
    tpu.vector_store %arg9[%c24_253, %c96_254], %242 {strides = array<i32>} : memref<64x128xbf16, #tpu.memory_space<vmem>>, vector<8x8xbf16>,
    %c0_255 = arith.constant 0 : index
    %c163 = arith.constant 163 : index
    %c0_256 = arith.constant 0 : index
    %244 = tpu.strided_load %arg1[%c0_255, %c163, %c0_256] {strides = array<i32: 1, 2, 1>} : memref<1x324x8xf32, #tpu.memory_space<vmem>>, vector<1x8x8xf32>
    %245 = vector.shape_cast %244 : vector<1x8x8xf32> to vector<8x8xf32>
    %246 = arith.truncf %245 : vector<8x8xf32> to vector<8x8xbf16>
    %c24_257 = arith.constant 24 : index
    %c104_258 = arith.constant 104 : index
    %247 = vector.load %arg9[%c24_257, %c104_258] : memref<64x128xbf16, #tpu.memory_space<vmem>>, vector<8x8xbf16>
    tpu.vector_store %arg9[%c24_257, %c104_258], %246 {strides = array<i32>} : memref<64x128xbf16, #tpu.memory_space<vmem>>, vector<8x8xbf16>,
    %c0_259 = arith.constant 0 : index
    %c164 = arith.constant 164 : index
    %c0_260 = arith.constant 0 : index
    %248 = tpu.strided_load %arg1[%c0_259, %c164, %c0_260] {strides = array<i32: 1, 2, 1>} : memref<1x324x8xf32, #tpu.memory_space<vmem>>, vector<1x8x8xf32>
    %249 = vector.shape_cast %248 : vector<1x8x8xf32> to vector<8x8xf32>
    %250 = arith.truncf %249 : vector<8x8xf32> to vector<8x8xbf16>
    %c24_261 = arith.constant 24 : index
    %c112_262 = arith.constant 112 : index
    %251 = vector.load %arg9[%c24_261, %c112_262] : memref<64x128xbf16, #tpu.memory_space<vmem>>, vector<8x8xbf16>
    tpu.vector_store %arg9[%c24_261, %c112_262], %250 {strides = array<i32>} : memref<64x128xbf16, #tpu.memory_space<vmem>>, vector<8x8xbf16>,
    %c0_263 = arith.constant 0 : index
    %c165 = arith.constant 165 : index
    %c0_264 = arith.constant 0 : index
    %252 = tpu.strided_load %arg1[%c0_263, %c165, %c0_264] {strides = array<i32: 1, 2, 1>} : memref<1x324x8xf32, #tpu.memory_space<vmem>>, vector<1x8x8xf32>
    %253 = vector.shape_cast %252 : vector<1x8x8xf32> to vector<8x8xf32>
    %254 = arith.truncf %253 : vector<8x8xf32> to vector<8x8xbf16>
    %c24_265 = arith.constant 24 : index
    %c120_266 = arith.constant 120 : index
    %255 = vector.load %arg9[%c24_265, %c120_266] : memref<64x128xbf16, #tpu.memory_space<vmem>>, vector<8x8xbf16>
    tpu.vector_store %arg9[%c24_265, %c120_266], %254 {strides = array<i32>} : memref<64x128xbf16, #tpu.memory_space<vmem>>, vector<8x8xbf16>,
    %c0_267 = arith.constant 0 : index
    %c144_268 = arith.constant 144 : index
    %c0_269 = arith.constant 0 : index
    %256 = tpu.strided_load %arg1[%c0_267, %c144_268, %c0_269] {strides = array<i32: 1, 2, 1>} : memref<1x324x8xf32, #tpu.memory_space<vmem>>, vector<1x8x8xf32>
    %257 = vector.shape_cast %256 : vector<1x8x8xf32> to vector<8x8xf32>
    %258 = arith.truncf %257 : vector<8x8xf32> to vector<8x8xbf16>
    %c32_270 = arith.constant 32 : index
    %c0_271 = arith.constant 0 : index
    %259 = vector.load %arg9[%c32_270, %c0_271] : memref<64x128xbf16, #tpu.memory_space<vmem>>, vector<8x8xbf16>
    tpu.vector_store %arg9[%c32_270, %c0_271], %258 {strides = array<i32>} : memref<64x128xbf16, #tpu.memory_space<vmem>>, vector<8x8xbf16>,
    %c0_272 = arith.constant 0 : index
    %c145_273 = arith.constant 145 : index
    %c0_274 = arith.constant 0 : index
    %260 = tpu.strided_load %arg1[%c0_272, %c145_273, %c0_274] {strides = array<i32: 1, 2, 1>} : memref<1x324x8xf32, #tpu.memory_space<vmem>>, vector<1x8x8xf32>
    %261 = vector.shape_cast %260 : vector<1x8x8xf32> to vector<8x8xf32>
    %262 = arith.truncf %261 : vector<8x8xf32> to vector<8x8xbf16>
    %c32_275 = arith.constant 32 : index
    %c8_276 = arith.constant 8 : index
    %263 = vector.load %arg9[%c32_275, %c8_276] : memref<64x128xbf16, #tpu.memory_space<vmem>>, vector<8x8xbf16>
    tpu.vector_store %arg9[%c32_275, %c8_276], %262 {strides = array<i32>} : memref<64x128xbf16, #tpu.memory_space<vmem>>, vector<8x8xbf16>,
    %c0_277 = arith.constant 0 : index
    %c146_278 = arith.constant 146 : index
    %c0_279 = arith.constant 0 : index
    %264 = tpu.strided_load %arg1[%c0_277, %c146_278, %c0_279] {strides = array<i32: 1, 2, 1>} : memref<1x324x8xf32, #tpu.memory_space<vmem>>, vector<1x8x8xf32>
    %265 = vector.shape_cast %264 : vector<1x8x8xf32> to vector<8x8xf32>
    %266 = arith.truncf %265 : vector<8x8xf32> to vector<8x8xbf16>
    %c32_280 = arith.constant 32 : index
    %c16_281 = arith.constant 16 : index
    %267 = vector.load %arg9[%c32_280, %c16_281] : memref<64x128xbf16, #tpu.memory_space<vmem>>, vector<8x8xbf16>
    tpu.vector_store %arg9[%c32_280, %c16_281], %266 {strides = array<i32>} : memref<64x128xbf16, #tpu.memory_space<vmem>>, vector<8x8xbf16>,
    %c0_282 = arith.constant 0 : index
    %c147_283 = arith.constant 147 : index
    %c0_284 = arith.constant 0 : index
    %268 = tpu.strided_load %arg1[%c0_282, %c147_283, %c0_284] {strides = array<i32: 1, 2, 1>} : memref<1x324x8xf32, #tpu.memory_space<vmem>>, vector<1x8x8xf32>
    %269 = vector.shape_cast %268 : vector<1x8x8xf32> to vector<8x8xf32>
    %270 = arith.truncf %269 : vector<8x8xf32> to vector<8x8xbf16>
    %c32_285 = arith.constant 32 : index
    %c24_286 = arith.constant 24 : index
    %271 = vector.load %arg9[%c32_285, %c24_286] : memref<64x128xbf16, #tpu.memory_space<vmem>>, vector<8x8xbf16>
    tpu.vector_store %arg9[%c32_285, %c24_286], %270 {strides = array<i32>} : memref<64x128xbf16, #tpu.memory_space<vmem>>, vector<8x8xbf16>,
    %c0_287 = arith.constant 0 : index
    %c162_288 = arith.constant 162 : index
    %c0_289 = arith.constant 0 : index
    %272 = tpu.strided_load %arg1[%c0_287, %c162_288, %c0_289] {strides = array<i32: 1, 2, 1>} : memref<1x324x8xf32, #tpu.memory_space<vmem>>, vector<1x8x8xf32>
    %273 = vector.shape_cast %272 : vector<1x8x8xf32> to vector<8x8xf32>
    %274 = arith.truncf %273 : vector<8x8xf32> to vector<8x8xbf16>
    %c32_290 = arith.constant 32 : index
    %c32_291 = arith.constant 32 : index
    %275 = vector.load %arg9[%c32_290, %c32_291] : memref<64x128xbf16, #tpu.memory_space<vmem>>, vector<8x8xbf16>
    tpu.vector_store %arg9[%c32_290, %c32_291], %274 {strides = array<i32>} : memref<64x128xbf16, #tpu.memory_space<vmem>>, vector<8x8xbf16>,
    %c0_292 = arith.constant 0 : index
    %c163_293 = arith.constant 163 : index
    %c0_294 = arith.constant 0 : index
    %276 = tpu.strided_load %arg1[%c0_292, %c163_293, %c0_294] {strides = array<i32: 1, 2, 1>} : memref<1x324x8xf32, #tpu.memory_space<vmem>>, vector<1x8x8xf32>
    %277 = vector.shape_cast %276 : vector<1x8x8xf32> to vector<8x8xf32>
    %278 = arith.truncf %277 : vector<8x8xf32> to vector<8x8xbf16>
    %c32_295 = arith.constant 32 : index
    %c40_296 = arith.constant 40 : index
    %279 = vector.load %arg9[%c32_295, %c40_296] : memref<64x128xbf16, #tpu.memory_space<vmem>>, vector<8x8xbf16>
    tpu.vector_store %arg9[%c32_295, %c40_296], %278 {strides = array<i32>} : memref<64x128xbf16, #tpu.memory_space<vmem>>, vector<8x8xbf16>,
    %c0_297 = arith.constant 0 : index
    %c164_298 = arith.constant 164 : index
    %c0_299 = arith.constant 0 : index
    %280 = tpu.strided_load %arg1[%c0_297, %c164_298, %c0_299] {strides = array<i32: 1, 2, 1>} : memref<1x324x8xf32, #tpu.memory_space<vmem>>, vector<1x8x8xf32>
    %281 = vector.shape_cast %280 : vector<1x8x8xf32> to vector<8x8xf32>
    %282 = arith.truncf %281 : vector<8x8xf32> to vector<8x8xbf16>
    %c32_300 = arith.constant 32 : index
    %c48_301 = arith.constant 48 : index
    %283 = vector.load %arg9[%c32_300, %c48_301] : memref<64x128xbf16, #tpu.memory_space<vmem>>, vector<8x8xbf16>
    tpu.vector_store %arg9[%c32_300, %c48_301], %282 {strides = array<i32>} : memref<64x128xbf16, #tpu.memory_space<vmem>>, vector<8x8xbf16>,
    %c0_302 = arith.constant 0 : index
    %c165_303 = arith.constant 165 : index
    %c0_304 = arith.constant 0 : index
    %284 = tpu.strided_load %arg1[%c0_302, %c165_303, %c0_304] {strides = array<i32: 1, 2, 1>} : memref<1x324x8xf32, #tpu.memory_space<vmem>>, vector<1x8x8xf32>
    %285 = vector.shape_cast %284 : vector<1x8x8xf32> to vector<8x8xf32>
    %286 = arith.truncf %285 : vector<8x8xf32> to vector<8x8xbf16>
    %c32_305 = arith.constant 32 : index
    %c56_306 = arith.constant 56 : index
    %287 = vector.load %arg9[%c32_305, %c56_306] : memref<64x128xbf16, #tpu.memory_space<vmem>>, vector<8x8xbf16>
    tpu.vector_store %arg9[%c32_305, %c56_306], %286 {strides = array<i32>} : memref<64x128xbf16, #tpu.memory_space<vmem>>, vector<8x8xbf16>,
    %c0_307 = arith.constant 0 : index
    %c180 = arith.constant 180 : index
    %c0_308 = arith.constant 0 : index
    %288 = tpu.strided_load %arg1[%c0_307, %c180, %c0_308] {strides = array<i32: 1, 2, 1>} : memref<1x324x8xf32, #tpu.memory_space<vmem>>, vector<1x8x8xf32>
    %289 = vector.shape_cast %288 : vector<1x8x8xf32> to vector<8x8xf32>
    %290 = arith.truncf %289 : vector<8x8xf32> to vector<8x8xbf16>
    %c32_309 = arith.constant 32 : index
    %c64_310 = arith.constant 64 : index
    %291 = vector.load %arg9[%c32_309, %c64_310] : memref<64x128xbf16, #tpu.memory_space<vmem>>, vector<8x8xbf16>
    tpu.vector_store %arg9[%c32_309, %c64_310], %290 {strides = array<i32>} : memref<64x128xbf16, #tpu.memory_space<vmem>>, vector<8x8xbf16>,
    %c0_311 = arith.constant 0 : index
    %c181 = arith.constant 181 : index
    %c0_312 = arith.constant 0 : index
    %292 = tpu.strided_load %arg1[%c0_311, %c181, %c0_312] {strides = array<i32: 1, 2, 1>} : memref<1x324x8xf32, #tpu.memory_space<vmem>>, vector<1x8x8xf32>
    %293 = vector.shape_cast %292 : vector<1x8x8xf32> to vector<8x8xf32>
    %294 = arith.truncf %293 : vector<8x8xf32> to vector<8x8xbf16>
    %c32_313 = arith.constant 32 : index
    %c72_314 = arith.constant 72 : index
    %295 = vector.load %arg9[%c32_313, %c72_314] : memref<64x128xbf16, #tpu.memory_space<vmem>>, vector<8x8xbf16>
    tpu.vector_store %arg9[%c32_313, %c72_314], %294 {strides = array<i32>} : memref<64x128xbf16, #tpu.memory_space<vmem>>, vector<8x8xbf16>,
    %c0_315 = arith.constant 0 : index
    %c182 = arith.constant 182 : index
    %c0_316 = arith.constant 0 : index
    %296 = tpu.strided_load %arg1[%c0_315, %c182, %c0_316] {strides = array<i32: 1, 2, 1>} : memref<1x324x8xf32, #tpu.memory_space<vmem>>, vector<1x8x8xf32>
    %297 = vector.shape_cast %296 : vector<1x8x8xf32> to vector<8x8xf32>
    %298 = arith.truncf %297 : vector<8x8xf32> to vector<8x8xbf16>
    %c32_317 = arith.constant 32 : index
    %c80_318 = arith.constant 80 : index
    %299 = vector.load %arg9[%c32_317, %c80_318] : memref<64x128xbf16, #tpu.memory_space<vmem>>, vector<8x8xbf16>
    tpu.vector_store %arg9[%c32_317, %c80_318], %298 {strides = array<i32>} : memref<64x128xbf16, #tpu.memory_space<vmem>>, vector<8x8xbf16>,
    %c0_319 = arith.constant 0 : index
    %c183 = arith.constant 183 : index
    %c0_320 = arith.constant 0 : index
    %300 = tpu.strided_load %arg1[%c0_319, %c183, %c0_320] {strides = array<i32: 1, 2, 1>} : memref<1x324x8xf32, #tpu.memory_space<vmem>>, vector<1x8x8xf32>
    %301 = vector.shape_cast %300 : vector<1x8x8xf32> to vector<8x8xf32>
    %302 = arith.truncf %301 : vector<8x8xf32> to vector<8x8xbf16>
    %c32_321 = arith.constant 32 : index
    %c88_322 = arith.constant 88 : index
    %303 = vector.load %arg9[%c32_321, %c88_322] : memref<64x128xbf16, #tpu.memory_space<vmem>>, vector<8x8xbf16>
    tpu.vector_store %arg9[%c32_321, %c88_322], %302 {strides = array<i32>} : memref<64x128xbf16, #tpu.memory_space<vmem>>, vector<8x8xbf16>,
    %c0_323 = arith.constant 0 : index
    %c198 = arith.constant 198 : index
    %c0_324 = arith.constant 0 : index
    %304 = tpu.strided_load %arg1[%c0_323, %c198, %c0_324] {strides = array<i32: 1, 2, 1>} : memref<1x324x8xf32, #tpu.memory_space<vmem>>, vector<1x8x8xf32>
    %305 = vector.shape_cast %304 : vector<1x8x8xf32> to vector<8x8xf32>
    %306 = arith.truncf %305 : vector<8x8xf32> to vector<8x8xbf16>
    %c32_325 = arith.constant 32 : index
    %c96_326 = arith.constant 96 : index
    %307 = vector.load %arg9[%c32_325, %c96_326] : memref<64x128xbf16, #tpu.memory_space<vmem>>, vector<8x8xbf16>
    tpu.vector_store %arg9[%c32_325, %c96_326], %306 {strides = array<i32>} : memref<64x128xbf16, #tpu.memory_space<vmem>>, vector<8x8xbf16>,
    %c0_327 = arith.constant 0 : index
    %c199 = arith.constant 199 : index
    %c0_328 = arith.constant 0 : index
    %308 = tpu.strided_load %arg1[%c0_327, %c199, %c0_328] {strides = array<i32: 1, 2, 1>} : memref<1x324x8xf32, #tpu.memory_space<vmem>>, vector<1x8x8xf32>
    %309 = vector.shape_cast %308 : vector<1x8x8xf32> to vector<8x8xf32>
    %310 = arith.truncf %309 : vector<8x8xf32> to vector<8x8xbf16>
    %c32_329 = arith.constant 32 : index
    %c104_330 = arith.constant 104 : index
    %311 = vector.load %arg9[%c32_329, %c104_330] : memref<64x128xbf16, #tpu.memory_space<vmem>>, vector<8x8xbf16>
    tpu.vector_store %arg9[%c32_329, %c104_330], %310 {strides = array<i32>} : memref<64x128xbf16, #tpu.memory_space<vmem>>, vector<8x8xbf16>,
    %c0_331 = arith.constant 0 : index
    %c200 = arith.constant 200 : index
    %c0_332 = arith.constant 0 : index
    %312 = tpu.strided_load %arg1[%c0_331, %c200, %c0_332] {strides = array<i32: 1, 2, 1>} : memref<1x324x8xf32, #tpu.memory_space<vmem>>, vector<1x8x8xf32>
    %313 = vector.shape_cast %312 : vector<1x8x8xf32> to vector<8x8xf32>
    %314 = arith.truncf %313 : vector<8x8xf32> to vector<8x8xbf16>
    %c32_333 = arith.constant 32 : index
    %c112_334 = arith.constant 112 : index
    %315 = vector.load %arg9[%c32_333, %c112_334] : memref<64x128xbf16, #tpu.memory_space<vmem>>, vector<8x8xbf16>
    tpu.vector_store %arg9[%c32_333, %c112_334], %314 {strides = array<i32>} : memref<64x128xbf16, #tpu.memory_space<vmem>>, vector<8x8xbf16>,
    %c0_335 = arith.constant 0 : index
    %c201 = arith.constant 201 : index
    %c0_336 = arith.constant 0 : index
    %316 = tpu.strided_load %arg1[%c0_335, %c201, %c0_336] {strides = array<i32: 1, 2, 1>} : memref<1x324x8xf32, #tpu.memory_space<vmem>>, vector<1x8x8xf32>
    %317 = vector.shape_cast %316 : vector<1x8x8xf32> to vector<8x8xf32>
    %318 = arith.truncf %317 : vector<8x8xf32> to vector<8x8xbf16>
    %c32_337 = arith.constant 32 : index
    %c120_338 = arith.constant 120 : index
    %319 = vector.load %arg9[%c32_337, %c120_338] : memref<64x128xbf16, #tpu.memory_space<vmem>>, vector<8x8xbf16>
    tpu.vector_store %arg9[%c32_337, %c120_338], %318 {strides = array<i32>} : memref<64x128xbf16, #tpu.memory_space<vmem>>, vector<8x8xbf16>,
    %c0_339 = arith.constant 0 : index
    %c180_340 = arith.constant 180 : index
    %c0_341 = arith.constant 0 : index
    %320 = tpu.strided_load %arg1[%c0_339, %c180_340, %c0_341] {strides = array<i32: 1, 2, 1>} : memref<1x324x8xf32, #tpu.memory_space<vmem>>, vector<1x8x8xf32>
    %321 = vector.shape_cast %320 : vector<1x8x8xf32> to vector<8x8xf32>
    %322 = arith.truncf %321 : vector<8x8xf32> to vector<8x8xbf16>
    %c40_342 = arith.constant 40 : index
    %c0_343 = arith.constant 0 : index
    %323 = vector.load %arg9[%c40_342, %c0_343] : memref<64x128xbf16, #tpu.memory_space<vmem>>, vector<8x8xbf16>
    tpu.vector_store %arg9[%c40_342, %c0_343], %322 {strides = array<i32>} : memref<64x128xbf16, #tpu.memory_space<vmem>>, vector<8x8xbf16>,
    %c0_344 = arith.constant 0 : index
    %c181_345 = arith.constant 181 : index
    %c0_346 = arith.constant 0 : index
    %324 = tpu.strided_load %arg1[%c0_344, %c181_345, %c0_346] {strides = array<i32: 1, 2, 1>} : memref<1x324x8xf32, #tpu.memory_space<vmem>>, vector<1x8x8xf32>
    %325 = vector.shape_cast %324 : vector<1x8x8xf32> to vector<8x8xf32>
    %326 = arith.truncf %325 : vector<8x8xf32> to vector<8x8xbf16>
    %c40_347 = arith.constant 40 : index
    %c8_348 = arith.constant 8 : index
    %327 = vector.load %arg9[%c40_347, %c8_348] : memref<64x128xbf16, #tpu.memory_space<vmem>>, vector<8x8xbf16>
    tpu.vector_store %arg9[%c40_347, %c8_348], %326 {strides = array<i32>} : memref<64x128xbf16, #tpu.memory_space<vmem>>, vector<8x8xbf16>,
    %c0_349 = arith.constant 0 : index
    %c182_350 = arith.constant 182 : index
    %c0_351 = arith.constant 0 : index
    %328 = tpu.strided_load %arg1[%c0_349, %c182_350, %c0_351] {strides = array<i32: 1, 2, 1>} : memref<1x324x8xf32, #tpu.memory_space<vmem>>, vector<1x8x8xf32>
    %329 = vector.shape_cast %328 : vector<1x8x8xf32> to vector<8x8xf32>
    %330 = arith.truncf %329 : vector<8x8xf32> to vector<8x8xbf16>
    %c40_352 = arith.constant 40 : index
    %c16_353 = arith.constant 16 : index
    %331 = vector.load %arg9[%c40_352, %c16_353] : memref<64x128xbf16, #tpu.memory_space<vmem>>, vector<8x8xbf16>
    tpu.vector_store %arg9[%c40_352, %c16_353], %330 {strides = array<i32>} : memref<64x128xbf16, #tpu.memory_space<vmem>>, vector<8x8xbf16>,
    %c0_354 = arith.constant 0 : index
    %c183_355 = arith.constant 183 : index
    %c0_356 = arith.constant 0 : index
    %332 = tpu.strided_load %arg1[%c0_354, %c183_355, %c0_356] {strides = array<i32: 1, 2, 1>} : memref<1x324x8xf32, #tpu.memory_space<vmem>>, vector<1x8x8xf32>
    %333 = vector.shape_cast %332 : vector<1x8x8xf32> to vector<8x8xf32>
    %334 = arith.truncf %333 : vector<8x8xf32> to vector<8x8xbf16>
    %c40_357 = arith.constant 40 : index
    %c24_358 = arith.constant 24 : index
    %335 = vector.load %arg9[%c40_357, %c24_358] : memref<64x128xbf16, #tpu.memory_space<vmem>>, vector<8x8xbf16>
    tpu.vector_store %arg9[%c40_357, %c24_358], %334 {strides = array<i32>} : memref<64x128xbf16, #tpu.memory_space<vmem>>, vector<8x8xbf16>,
    %c0_359 = arith.constant 0 : index
    %c198_360 = arith.constant 198 : index
    %c0_361 = arith.constant 0 : index
    %336 = tpu.strided_load %arg1[%c0_359, %c198_360, %c0_361] {strides = array<i32: 1, 2, 1>} : memref<1x324x8xf32, #tpu.memory_space<vmem>>, vector<1x8x8xf32>
    %337 = vector.shape_cast %336 : vector<1x8x8xf32> to vector<8x8xf32>
    %338 = arith.truncf %337 : vector<8x8xf32> to vector<8x8xbf16>
    %c40_362 = arith.constant 40 : index
    %c32_363 = arith.constant 32 : index
    %339 = vector.load %arg9[%c40_362, %c32_363] : memref<64x128xbf16, #tpu.memory_space<vmem>>, vector<8x8xbf16>
    tpu.vector_store %arg9[%c40_362, %c32_363], %338 {strides = array<i32>} : memref<64x128xbf16, #tpu.memory_space<vmem>>, vector<8x8xbf16>,
    %c0_364 = arith.constant 0 : index
    %c199_365 = arith.constant 199 : index
    %c0_366 = arith.constant 0 : index
    %340 = tpu.strided_load %arg1[%c0_364, %c199_365, %c0_366] {strides = array<i32: 1, 2, 1>} : memref<1x324x8xf32, #tpu.memory_space<vmem>>, vector<1x8x8xf32>
    %341 = vector.shape_cast %340 : vector<1x8x8xf32> to vector<8x8xf32>
    %342 = arith.truncf %341 : vector<8x8xf32> to vector<8x8xbf16>
    %c40_367 = arith.constant 40 : index
    %c40_368 = arith.constant 40 : index
    %343 = vector.load %arg9[%c40_367, %c40_368] : memref<64x128xbf16, #tpu.memory_space<vmem>>, vector<8x8xbf16>
    tpu.vector_store %arg9[%c40_367, %c40_368], %342 {strides = array<i32>} : memref<64x128xbf16, #tpu.memory_space<vmem>>, vector<8x8xbf16>,
    %c0_369 = arith.constant 0 : index
    %c200_370 = arith.constant 200 : index
    %c0_371 = arith.constant 0 : index
    %344 = tpu.strided_load %arg1[%c0_369, %c200_370, %c0_371] {strides = array<i32: 1, 2, 1>} : memref<1x324x8xf32, #tpu.memory_space<vmem>>, vector<1x8x8xf32>
    %345 = vector.shape_cast %344 : vector<1x8x8xf32> to vector<8x8xf32>
    %346 = arith.truncf %345 : vector<8x8xf32> to vector<8x8xbf16>
    %c40_372 = arith.constant 40 : index
    %c48_373 = arith.constant 48 : index
    %347 = vector.load %arg9[%c40_372, %c48_373] : memref<64x128xbf16, #tpu.memory_space<vmem>>, vector<8x8xbf16>
    tpu.vector_store %arg9[%c40_372, %c48_373], %346 {strides = array<i32>} : memref<64x128xbf16, #tpu.memory_space<vmem>>, vector<8x8xbf16>,
    %c0_374 = arith.constant 0 : index
    %c201_375 = arith.constant 201 : index
    %c0_376 = arith.constant 0 : index
    %348 = tpu.strided_load %arg1[%c0_374, %c201_375, %c0_376] {strides = array<i32: 1, 2, 1>} : memref<1x324x8xf32, #tpu.memory_space<vmem>>, vector<1x8x8xf32>
    %349 = vector.shape_cast %348 : vector<1x8x8xf32> to vector<8x8xf32>
    %350 = arith.truncf %349 : vector<8x8xf32> to vector<8x8xbf16>
    %c40_377 = arith.constant 40 : index
    %c56_378 = arith.constant 56 : index
    %351 = vector.load %arg9[%c40_377, %c56_378] : memref<64x128xbf16, #tpu.memory_space<vmem>>, vector<8x8xbf16>
    tpu.vector_store %arg9[%c40_377, %c56_378], %350 {strides = array<i32>} : memref<64x128xbf16, #tpu.memory_space<vmem>>, vector<8x8xbf16>,
    %c0_379 = arith.constant 0 : index
    %c216 = arith.constant 216 : index
    %c0_380 = arith.constant 0 : index
    %352 = tpu.strided_load %arg1[%c0_379, %c216, %c0_380] {strides = array<i32: 1, 2, 1>} : memref<1x324x8xf32, #tpu.memory_space<vmem>>, vector<1x8x8xf32>
    %353 = vector.shape_cast %352 : vector<1x8x8xf32> to vector<8x8xf32>
    %354 = arith.truncf %353 : vector<8x8xf32> to vector<8x8xbf16>
    %c40_381 = arith.constant 40 : index
    %c64_382 = arith.constant 64 : index
    %355 = vector.load %arg9[%c40_381, %c64_382] : memref<64x128xbf16, #tpu.memory_space<vmem>>, vector<8x8xbf16>
    tpu.vector_store %arg9[%c40_381, %c64_382], %354 {strides = array<i32>} : memref<64x128xbf16, #tpu.memory_space<vmem>>, vector<8x8xbf16>,
    %c0_383 = arith.constant 0 : index
    %c217 = arith.constant 217 : index
    %c0_384 = arith.constant 0 : index
    %356 = tpu.strided_load %arg1[%c0_383, %c217, %c0_384] {strides = array<i32: 1, 2, 1>} : memref<1x324x8xf32, #tpu.memory_space<vmem>>, vector<1x8x8xf32>
    %357 = vector.shape_cast %356 : vector<1x8x8xf32> to vector<8x8xf32>
    %358 = arith.truncf %357 : vector<8x8xf32> to vector<8x8xbf16>
    %c40_385 = arith.constant 40 : index
    %c72_386 = arith.constant 72 : index
    %359 = vector.load %arg9[%c40_385, %c72_386] : memref<64x128xbf16, #tpu.memory_space<vmem>>, vector<8x8xbf16>
    tpu.vector_store %arg9[%c40_385, %c72_386], %358 {strides = array<i32>} : memref<64x128xbf16, #tpu.memory_space<vmem>>, vector<8x8xbf16>,
    %c0_387 = arith.constant 0 : index
    %c218 = arith.constant 218 : index
    %c0_388 = arith.constant 0 : index
    %360 = tpu.strided_load %arg1[%c0_387, %c218, %c0_388] {strides = array<i32: 1, 2, 1>} : memref<1x324x8xf32, #tpu.memory_space<vmem>>, vector<1x8x8xf32>
    %361 = vector.shape_cast %360 : vector<1x8x8xf32> to vector<8x8xf32>
    %362 = arith.truncf %361 : vector<8x8xf32> to vector<8x8xbf16>
    %c40_389 = arith.constant 40 : index
    %c80_390 = arith.constant 80 : index
    %363 = vector.load %arg9[%c40_389, %c80_390] : memref<64x128xbf16, #tpu.memory_space<vmem>>, vector<8x8xbf16>
    tpu.vector_store %arg9[%c40_389, %c80_390], %362 {strides = array<i32>} : memref<64x128xbf16, #tpu.memory_space<vmem>>, vector<8x8xbf16>,
    %c0_391 = arith.constant 0 : index
    %c219 = arith.constant 219 : index
    %c0_392 = arith.constant 0 : index
    %364 = tpu.strided_load %arg1[%c0_391, %c219, %c0_392] {strides = array<i32: 1, 2, 1>} : memref<1x324x8xf32, #tpu.memory_space<vmem>>, vector<1x8x8xf32>
    %365 = vector.shape_cast %364 : vector<1x8x8xf32> to vector<8x8xf32>
    %366 = arith.truncf %365 : vector<8x8xf32> to vector<8x8xbf16>
    %c40_393 = arith.constant 40 : index
    %c88_394 = arith.constant 88 : index
    %367 = vector.load %arg9[%c40_393, %c88_394] : memref<64x128xbf16, #tpu.memory_space<vmem>>, vector<8x8xbf16>
    tpu.vector_store %arg9[%c40_393, %c88_394], %366 {strides = array<i32>} : memref<64x128xbf16, #tpu.memory_space<vmem>>, vector<8x8xbf16>,
    %c0_395 = arith.constant 0 : index
    %c234 = arith.constant 234 : index
    %c0_396 = arith.constant 0 : index
    %368 = tpu.strided_load %arg1[%c0_395, %c234, %c0_396] {strides = array<i32: 1, 2, 1>} : memref<1x324x8xf32, #tpu.memory_space<vmem>>, vector<1x8x8xf32>
    %369 = vector.shape_cast %368 : vector<1x8x8xf32> to vector<8x8xf32>
    %370 = arith.truncf %369 : vector<8x8xf32> to vector<8x8xbf16>
    %c40_397 = arith.constant 40 : index
    %c96_398 = arith.constant 96 : index
    %371 = vector.load %arg9[%c40_397, %c96_398] : memref<64x128xbf16, #tpu.memory_space<vmem>>, vector<8x8xbf16>
    tpu.vector_store %arg9[%c40_397, %c96_398], %370 {strides = array<i32>} : memref<64x128xbf16, #tpu.memory_space<vmem>>, vector<8x8xbf16>,
    %c0_399 = arith.constant 0 : index
    %c235 = arith.constant 235 : index
    %c0_400 = arith.constant 0 : index
    %372 = tpu.strided_load %arg1[%c0_399, %c235, %c0_400] {strides = array<i32: 1, 2, 1>} : memref<1x324x8xf32, #tpu.memory_space<vmem>>, vector<1x8x8xf32>
    %373 = vector.shape_cast %372 : vector<1x8x8xf32> to vector<8x8xf32>
    %374 = arith.truncf %373 : vector<8x8xf32> to vector<8x8xbf16>
    %c40_401 = arith.constant 40 : index
    %c104_402 = arith.constant 104 : index
    %375 = vector.load %arg9[%c40_401, %c104_402] : memref<64x128xbf16, #tpu.memory_space<vmem>>, vector<8x8xbf16>
    tpu.vector_store %arg9[%c40_401, %c104_402], %374 {strides = array<i32>} : memref<64x128xbf16, #tpu.memory_space<vmem>>, vector<8x8xbf16>,
    %c0_403 = arith.constant 0 : index
    %c236 = arith.constant 236 : index
    %c0_404 = arith.constant 0 : index
    %376 = tpu.strided_load %arg1[%c0_403, %c236, %c0_404] {strides = array<i32: 1, 2, 1>} : memref<1x324x8xf32, #tpu.memory_space<vmem>>, vector<1x8x8xf32>
    %377 = vector.shape_cast %376 : vector<1x8x8xf32> to vector<8x8xf32>
    %378 = arith.truncf %377 : vector<8x8xf32> to vector<8x8xbf16>
    %c40_405 = arith.constant 40 : index
    %c112_406 = arith.constant 112 : index
    %379 = vector.load %arg9[%c40_405, %c112_406] : memref<64x128xbf16, #tpu.memory_space<vmem>>, vector<8x8xbf16>
    tpu.vector_store %arg9[%c40_405, %c112_406], %378 {strides = array<i32>} : memref<64x128xbf16, #tpu.memory_space<vmem>>, vector<8x8xbf16>,
    %c0_407 = arith.constant 0 : index
    %c237 = arith.constant 237 : index
    %c0_408 = arith.constant 0 : index
    %380 = tpu.strided_load %arg1[%c0_407, %c237, %c0_408] {strides = array<i32: 1, 2, 1>} : memref<1x324x8xf32, #tpu.memory_space<vmem>>, vector<1x8x8xf32>
    %381 = vector.shape_cast %380 : vector<1x8x8xf32> to vector<8x8xf32>
    %382 = arith.truncf %381 : vector<8x8xf32> to vector<8x8xbf16>
    %c40_409 = arith.constant 40 : index
    %c120_410 = arith.constant 120 : index
    %383 = vector.load %arg9[%c40_409, %c120_410] : memref<64x128xbf16, #tpu.memory_space<vmem>>, vector<8x8xbf16>
    tpu.vector_store %arg9[%c40_409, %c120_410], %382 {strides = array<i32>} : memref<64x128xbf16, #tpu.memory_space<vmem>>, vector<8x8xbf16>,
    %c0_411 = arith.constant 0 : index
    %c216_412 = arith.constant 216 : index
    %c0_413 = arith.constant 0 : index
    %384 = tpu.strided_load %arg1[%c0_411, %c216_412, %c0_413] {strides = array<i32: 1, 2, 1>} : memref<1x324x8xf32, #tpu.memory_space<vmem>>, vector<1x8x8xf32>
    %385 = vector.shape_cast %384 : vector<1x8x8xf32> to vector<8x8xf32>
    %386 = arith.truncf %385 : vector<8x8xf32> to vector<8x8xbf16>
    %c48_414 = arith.constant 48 : index
    %c0_415 = arith.constant 0 : index
    %387 = vector.load %arg9[%c48_414, %c0_415] : memref<64x128xbf16, #tpu.memory_space<vmem>>, vector<8x8xbf16>
    tpu.vector_store %arg9[%c48_414, %c0_415], %386 {strides = array<i32>} : memref<64x128xbf16, #tpu.memory_space<vmem>>, vector<8x8xbf16>,
    %c0_416 = arith.constant 0 : index
    %c217_417 = arith.constant 217 : index
    %c0_418 = arith.constant 0 : index
    %388 = tpu.strided_load %arg1[%c0_416, %c217_417, %c0_418] {strides = array<i32: 1, 2, 1>} : memref<1x324x8xf32, #tpu.memory_space<vmem>>, vector<1x8x8xf32>
    %389 = vector.shape_cast %388 : vector<1x8x8xf32> to vector<8x8xf32>
    %390 = arith.truncf %389 : vector<8x8xf32> to vector<8x8xbf16>
    %c48_419 = arith.constant 48 : index
    %c8_420 = arith.constant 8 : index
    %391 = vector.load %arg9[%c48_419, %c8_420] : memref<64x128xbf16, #tpu.memory_space<vmem>>, vector<8x8xbf16>
    tpu.vector_store %arg9[%c48_419, %c8_420], %390 {strides = array<i32>} : memref<64x128xbf16, #tpu.memory_space<vmem>>, vector<8x8xbf16>,
    %c0_421 = arith.constant 0 : index
    %c218_422 = arith.constant 218 : index
    %c0_423 = arith.constant 0 : index
    %392 = tpu.strided_load %arg1[%c0_421, %c218_422, %c0_423] {strides = array<i32: 1, 2, 1>} : memref<1x324x8xf32, #tpu.memory_space<vmem>>, vector<1x8x8xf32>
    %393 = vector.shape_cast %392 : vector<1x8x8xf32> to vector<8x8xf32>
    %394 = arith.truncf %393 : vector<8x8xf32> to vector<8x8xbf16>
    %c48_424 = arith.constant 48 : index
    %c16_425 = arith.constant 16 : index
    %395 = vector.load %arg9[%c48_424, %c16_425] : memref<64x128xbf16, #tpu.memory_space<vmem>>, vector<8x8xbf16>
    tpu.vector_store %arg9[%c48_424, %c16_425], %394 {strides = array<i32>} : memref<64x128xbf16, #tpu.memory_space<vmem>>, vector<8x8xbf16>,
    %c0_426 = arith.constant 0 : index
    %c219_427 = arith.constant 219 : index
    %c0_428 = arith.constant 0 : index
    %396 = tpu.strided_load %arg1[%c0_426, %c219_427, %c0_428] {strides = array<i32: 1, 2, 1>} : memref<1x324x8xf32, #tpu.memory_space<vmem>>, vector<1x8x8xf32>
    %397 = vector.shape_cast %396 : vector<1x8x8xf32> to vector<8x8xf32>
    %398 = arith.truncf %397 : vector<8x8xf32> to vector<8x8xbf16>
    %c48_429 = arith.constant 48 : index
    %c24_430 = arith.constant 24 : index
    %399 = vector.load %arg9[%c48_429, %c24_430] : memref<64x128xbf16, #tpu.memory_space<vmem>>, vector<8x8xbf16>
    tpu.vector_store %arg9[%c48_429, %c24_430], %398 {strides = array<i32>} : memref<64x128xbf16, #tpu.memory_space<vmem>>, vector<8x8xbf16>,
    %c0_431 = arith.constant 0 : index
    %c234_432 = arith.constant 234 : index
    %c0_433 = arith.constant 0 : index
    %400 = tpu.strided_load %arg1[%c0_431, %c234_432, %c0_433] {strides = array<i32: 1, 2, 1>} : memref<1x324x8xf32, #tpu.memory_space<vmem>>, vector<1x8x8xf32>
    %401 = vector.shape_cast %400 : vector<1x8x8xf32> to vector<8x8xf32>
    %402 = arith.truncf %401 : vector<8x8xf32> to vector<8x8xbf16>
    %c48_434 = arith.constant 48 : index
    %c32_435 = arith.constant 32 : index
    %403 = vector.load %arg9[%c48_434, %c32_435] : memref<64x128xbf16, #tpu.memory_space<vmem>>, vector<8x8xbf16>
    tpu.vector_store %arg9[%c48_434, %c32_435], %402 {strides = array<i32>} : memref<64x128xbf16, #tpu.memory_space<vmem>>, vector<8x8xbf16>,
    %c0_436 = arith.constant 0 : index
    %c235_437 = arith.constant 235 : index
    %c0_438 = arith.constant 0 : index
    %404 = tpu.strided_load %arg1[%c0_436, %c235_437, %c0_438] {strides = array<i32: 1, 2, 1>} : memref<1x324x8xf32, #tpu.memory_space<vmem>>, vector<1x8x8xf32>
    %405 = vector.shape_cast %404 : vector<1x8x8xf32> to vector<8x8xf32>
    %406 = arith.truncf %405 : vector<8x8xf32> to vector<8x8xbf16>
    %c48_439 = arith.constant 48 : index
    %c40_440 = arith.constant 40 : index
    %407 = vector.load %arg9[%c48_439, %c40_440] : memref<64x128xbf16, #tpu.memory_space<vmem>>, vector<8x8xbf16>
    tpu.vector_store %arg9[%c48_439, %c40_440], %406 {strides = array<i32>} : memref<64x128xbf16, #tpu.memory_space<vmem>>, vector<8x8xbf16>,
    %c0_441 = arith.constant 0 : index
    %c236_442 = arith.constant 236 : index
    %c0_443 = arith.constant 0 : index
    %408 = tpu.strided_load %arg1[%c0_441, %c236_442, %c0_443] {strides = array<i32: 1, 2, 1>} : memref<1x324x8xf32, #tpu.memory_space<vmem>>, vector<1x8x8xf32>
    %409 = vector.shape_cast %408 : vector<1x8x8xf32> to vector<8x8xf32>
    %410 = arith.truncf %409 : vector<8x8xf32> to vector<8x8xbf16>
    %c48_444 = arith.constant 48 : index
    %c48_445 = arith.constant 48 : index
    %411 = vector.load %arg9[%c48_444, %c48_445] : memref<64x128xbf16, #tpu.memory_space<vmem>>, vector<8x8xbf16>
    tpu.vector_store %arg9[%c48_444, %c48_445], %410 {strides = array<i32>} : memref<64x128xbf16, #tpu.memory_space<vmem>>, vector<8x8xbf16>,
    %c0_446 = arith.constant 0 : index
    %c237_447 = arith.constant 237 : index
    %c0_448 = arith.constant 0 : index
    %412 = tpu.strided_load %arg1[%c0_446, %c237_447, %c0_448] {strides = array<i32: 1, 2, 1>} : memref<1x324x8xf32, #tpu.memory_space<vmem>>, vector<1x8x8xf32>
    %413 = vector.shape_cast %412 : vector<1x8x8xf32> to vector<8x8xf32>
    %414 = arith.truncf %413 : vector<8x8xf32> to vector<8x8xbf16>
    %c48_449 = arith.constant 48 : index
    %c56_450 = arith.constant 56 : index
    %415 = vector.load %arg9[%c48_449, %c56_450] : memref<64x128xbf16, #tpu.memory_space<vmem>>, vector<8x8xbf16>
    tpu.vector_store %arg9[%c48_449, %c56_450], %414 {strides = array<i32>} : memref<64x128xbf16, #tpu.memory_space<vmem>>, vector<8x8xbf16>,
    %c0_451 = arith.constant 0 : index
    %c252 = arith.constant 252 : index
    %c0_452 = arith.constant 0 : index
    %416 = tpu.strided_load %arg1[%c0_451, %c252, %c0_452] {strides = array<i32: 1, 2, 1>} : memref<1x324x8xf32, #tpu.memory_space<vmem>>, vector<1x8x8xf32>
    %417 = vector.shape_cast %416 : vector<1x8x8xf32> to vector<8x8xf32>
    %418 = arith.truncf %417 : vector<8x8xf32> to vector<8x8xbf16>
    %c48_453 = arith.constant 48 : index
    %c64_454 = arith.constant 64 : index
    %419 = vector.load %arg9[%c48_453, %c64_454] : memref<64x128xbf16, #tpu.memory_space<vmem>>, vector<8x8xbf16>
    tpu.vector_store %arg9[%c48_453, %c64_454], %418 {strides = array<i32>} : memref<64x128xbf16, #tpu.memory_space<vmem>>, vector<8x8xbf16>,
    %c0_455 = arith.constant 0 : index
    %c253 = arith.constant 253 : index
    %c0_456 = arith.constant 0 : index
    %420 = tpu.strided_load %arg1[%c0_455, %c253, %c0_456] {strides = array<i32: 1, 2, 1>} : memref<1x324x8xf32, #tpu.memory_space<vmem>>, vector<1x8x8xf32>
    %421 = vector.shape_cast %420 : vector<1x8x8xf32> to vector<8x8xf32>
    %422 = arith.truncf %421 : vector<8x8xf32> to vector<8x8xbf16>
    %c48_457 = arith.constant 48 : index
    %c72_458 = arith.constant 72 : index
    %423 = vector.load %arg9[%c48_457, %c72_458] : memref<64x128xbf16, #tpu.memory_space<vmem>>, vector<8x8xbf16>
    tpu.vector_store %arg9[%c48_457, %c72_458], %422 {strides = array<i32>} : memref<64x128xbf16, #tpu.memory_space<vmem>>, vector<8x8xbf16>,
    %c0_459 = arith.constant 0 : index
    %c254 = arith.constant 254 : index
    %c0_460 = arith.constant 0 : index
    %424 = tpu.strided_load %arg1[%c0_459, %c254, %c0_460] {strides = array<i32: 1, 2, 1>} : memref<1x324x8xf32, #tpu.memory_space<vmem>>, vector<1x8x8xf32>
    %425 = vector.shape_cast %424 : vector<1x8x8xf32> to vector<8x8xf32>
    %426 = arith.truncf %425 : vector<8x8xf32> to vector<8x8xbf16>
    %c48_461 = arith.constant 48 : index
    %c80_462 = arith.constant 80 : index
    %427 = vector.load %arg9[%c48_461, %c80_462] : memref<64x128xbf16, #tpu.memory_space<vmem>>, vector<8x8xbf16>
    tpu.vector_store %arg9[%c48_461, %c80_462], %426 {strides = array<i32>} : memref<64x128xbf16, #tpu.memory_space<vmem>>, vector<8x8xbf16>,
    %c0_463 = arith.constant 0 : index
    %c255 = arith.constant 255 : index
    %c0_464 = arith.constant 0 : index
    %428 = tpu.strided_load %arg1[%c0_463, %c255, %c0_464] {strides = array<i32: 1, 2, 1>} : memref<1x324x8xf32, #tpu.memory_space<vmem>>, vector<1x8x8xf32>
    %429 = vector.shape_cast %428 : vector<1x8x8xf32> to vector<8x8xf32>
    %430 = arith.truncf %429 : vector<8x8xf32> to vector<8x8xbf16>
    %c48_465 = arith.constant 48 : index
    %c88_466 = arith.constant 88 : index
    %431 = vector.load %arg9[%c48_465, %c88_466] : memref<64x128xbf16, #tpu.memory_space<vmem>>, vector<8x8xbf16>
    tpu.vector_store %arg9[%c48_465, %c88_466], %430 {strides = array<i32>} : memref<64x128xbf16, #tpu.memory_space<vmem>>, vector<8x8xbf16>,
    %c0_467 = arith.constant 0 : index
    %c270 = arith.constant 270 : index
    %c0_468 = arith.constant 0 : index
    %432 = tpu.strided_load %arg1[%c0_467, %c270, %c0_468] {strides = array<i32: 1, 2, 1>} : memref<1x324x8xf32, #tpu.memory_space<vmem>>, vector<1x8x8xf32>
    %433 = vector.shape_cast %432 : vector<1x8x8xf32> to vector<8x8xf32>
    %434 = arith.truncf %433 : vector<8x8xf32> to vector<8x8xbf16>
    %c48_469 = arith.constant 48 : index
    %c96_470 = arith.constant 96 : index
    %435 = vector.load %arg9[%c48_469, %c96_470] : memref<64x128xbf16, #tpu.memory_space<vmem>>, vector<8x8xbf16>
    tpu.vector_store %arg9[%c48_469, %c96_470], %434 {strides = array<i32>} : memref<64x128xbf16, #tpu.memory_space<vmem>>, vector<8x8xbf16>,
    %c0_471 = arith.constant 0 : index
    %c271 = arith.constant 271 : index
    %c0_472 = arith.constant 0 : index
    %436 = tpu.strided_load %arg1[%c0_471, %c271, %c0_472] {strides = array<i32: 1, 2, 1>} : memref<1x324x8xf32, #tpu.memory_space<vmem>>, vector<1x8x8xf32>
    %437 = vector.shape_cast %436 : vector<1x8x8xf32> to vector<8x8xf32>
    %438 = arith.truncf %437 : vector<8x8xf32> to vector<8x8xbf16>
    %c48_473 = arith.constant 48 : index
    %c104_474 = arith.constant 104 : index
    %439 = vector.load %arg9[%c48_473, %c104_474] : memref<64x128xbf16, #tpu.memory_space<vmem>>, vector<8x8xbf16>
    tpu.vector_store %arg9[%c48_473, %c104_474], %438 {strides = array<i32>} : memref<64x128xbf16, #tpu.memory_space<vmem>>, vector<8x8xbf16>,
    %c0_475 = arith.constant 0 : index
    %c272 = arith.constant 272 : index
    %c0_476 = arith.constant 0 : index
    %440 = tpu.strided_load %arg1[%c0_475, %c272, %c0_476] {strides = array<i32: 1, 2, 1>} : memref<1x324x8xf32, #tpu.memory_space<vmem>>, vector<1x8x8xf32>
    %441 = vector.shape_cast %440 : vector<1x8x8xf32> to vector<8x8xf32>
    %442 = arith.truncf %441 : vector<8x8xf32> to vector<8x8xbf16>
    %c48_477 = arith.constant 48 : index
    %c112_478 = arith.constant 112 : index
    %443 = vector.load %arg9[%c48_477, %c112_478] : memref<64x128xbf16, #tpu.memory_space<vmem>>, vector<8x8xbf16>
    tpu.vector_store %arg9[%c48_477, %c112_478], %442 {strides = array<i32>} : memref<64x128xbf16, #tpu.memory_space<vmem>>, vector<8x8xbf16>,
    %c0_479 = arith.constant 0 : index
    %c273 = arith.constant 273 : index
    %c0_480 = arith.constant 0 : index
    %444 = tpu.strided_load %arg1[%c0_479, %c273, %c0_480] {strides = array<i32: 1, 2, 1>} : memref<1x324x8xf32, #tpu.memory_space<vmem>>, vector<1x8x8xf32>
    %445 = vector.shape_cast %444 : vector<1x8x8xf32> to vector<8x8xf32>
    %446 = arith.truncf %445 : vector<8x8xf32> to vector<8x8xbf16>
    %c48_481 = arith.constant 48 : index
    %c120_482 = arith.constant 120 : index
    %447 = vector.load %arg9[%c48_481, %c120_482] : memref<64x128xbf16, #tpu.memory_space<vmem>>, vector<8x8xbf16>
    tpu.vector_store %arg9[%c48_481, %c120_482], %446 {strides = array<i32>} : memref<64x128xbf16, #tpu.memory_space<vmem>>, vector<8x8xbf16>,
    %c0_483 = arith.constant 0 : index
    %c252_484 = arith.constant 252 : index
    %c0_485 = arith.constant 0 : index
    %448 = tpu.strided_load %arg1[%c0_483, %c252_484, %c0_485] {strides = array<i32: 1, 2, 1>} : memref<1x324x8xf32, #tpu.memory_space<vmem>>, vector<1x8x8xf32>
    %449 = vector.shape_cast %448 : vector<1x8x8xf32> to vector<8x8xf32>
    %450 = arith.truncf %449 : vector<8x8xf32> to vector<8x8xbf16>
    %c56_486 = arith.constant 56 : index
    %c0_487 = arith.constant 0 : index
    %451 = vector.load %arg9[%c56_486, %c0_487] : memref<64x128xbf16, #tpu.memory_space<vmem>>, vector<8x8xbf16>
    tpu.vector_store %arg9[%c56_486, %c0_487], %450 {strides = array<i32>} : memref<64x128xbf16, #tpu.memory_space<vmem>>, vector<8x8xbf16>,
    %c0_488 = arith.constant 0 : index
    %c253_489 = arith.constant 253 : index
    %c0_490 = arith.constant 0 : index
    %452 = tpu.strided_load %arg1[%c0_488, %c253_489, %c0_490] {strides = array<i32: 1, 2, 1>} : memref<1x324x8xf32, #tpu.memory_space<vmem>>, vector<1x8x8xf32>
    %453 = vector.shape_cast %452 : vector<1x8x8xf32> to vector<8x8xf32>
    %454 = arith.truncf %453 : vector<8x8xf32> to vector<8x8xbf16>
    %c56_491 = arith.constant 56 : index
    %c8_492 = arith.constant 8 : index
    %455 = vector.load %arg9[%c56_491, %c8_492] : memref<64x128xbf16, #tpu.memory_space<vmem>>, vector<8x8xbf16>
    tpu.vector_store %arg9[%c56_491, %c8_492], %454 {strides = array<i32>} : memref<64x128xbf16, #tpu.memory_space<vmem>>, vector<8x8xbf16>,
    %c0_493 = arith.constant 0 : index
    %c254_494 = arith.constant 254 : index
    %c0_495 = arith.constant 0 : index
    %456 = tpu.strided_load %arg1[%c0_493, %c254_494, %c0_495] {strides = array<i32: 1, 2, 1>} : memref<1x324x8xf32, #tpu.memory_space<vmem>>, vector<1x8x8xf32>
    %457 = vector.shape_cast %456 : vector<1x8x8xf32> to vector<8x8xf32>
    %458 = arith.truncf %457 : vector<8x8xf32> to vector<8x8xbf16>
    %c56_496 = arith.constant 56 : index
    %c16_497 = arith.constant 16 : index
    %459 = vector.load %arg9[%c56_496, %c16_497] : memref<64x128xbf16, #tpu.memory_space<vmem>>, vector<8x8xbf16>
    tpu.vector_store %arg9[%c56_496, %c16_497], %458 {strides = array<i32>} : memref<64x128xbf16, #tpu.memory_space<vmem>>, vector<8x8xbf16>,
    %c0_498 = arith.constant 0 : index
    %c255_499 = arith.constant 255 : index
    %c0_500 = arith.constant 0 : index
    %460 = tpu.strided_load %arg1[%c0_498, %c255_499, %c0_500] {strides = array<i32: 1, 2, 1>} : memref<1x324x8xf32, #tpu.memory_space<vmem>>, vector<1x8x8xf32>
    %461 = vector.shape_cast %460 : vector<1x8x8xf32> to vector<8x8xf32>
    %462 = arith.truncf %461 : vector<8x8xf32> to vector<8x8xbf16>
    %c56_501 = arith.constant 56 : index
    %c24_502 = arith.constant 24 : index
    %463 = vector.load %arg9[%c56_501, %c24_502] : memref<64x128xbf16, #tpu.memory_space<vmem>>, vector<8x8xbf16>
    tpu.vector_store %arg9[%c56_501, %c24_502], %462 {strides = array<i32>} : memref<64x128xbf16, #tpu.memory_space<vmem>>, vector<8x8xbf16>,
    %c0_503 = arith.constant 0 : index
    %c270_504 = arith.constant 270 : index
    %c0_505 = arith.constant 0 : index
    %464 = tpu.strided_load %arg1[%c0_503, %c270_504, %c0_505] {strides = array<i32: 1, 2, 1>} : memref<1x324x8xf32, #tpu.memory_space<vmem>>, vector<1x8x8xf32>
    %465 = vector.shape_cast %464 : vector<1x8x8xf32> to vector<8x8xf32>
    %466 = arith.truncf %465 : vector<8x8xf32> to vector<8x8xbf16>
    %c56_506 = arith.constant 56 : index
    %c32_507 = arith.constant 32 : index
    %467 = vector.load %arg9[%c56_506, %c32_507] : memref<64x128xbf16, #tpu.memory_space<vmem>>, vector<8x8xbf16>
    tpu.vector_store %arg9[%c56_506, %c32_507], %466 {strides = array<i32>} : memref<64x128xbf16, #tpu.memory_space<vmem>>, vector<8x8xbf16>,
    %c0_508 = arith.constant 0 : index
    %c271_509 = arith.constant 271 : index
    %c0_510 = arith.constant 0 : index
    %468 = tpu.strided_load %arg1[%c0_508, %c271_509, %c0_510] {strides = array<i32: 1, 2, 1>} : memref<1x324x8xf32, #tpu.memory_space<vmem>>, vector<1x8x8xf32>
    %469 = vector.shape_cast %468 : vector<1x8x8xf32> to vector<8x8xf32>
    %470 = arith.truncf %469 : vector<8x8xf32> to vector<8x8xbf16>
    %c56_511 = arith.constant 56 : index
    %c40_512 = arith.constant 40 : index
    %471 = vector.load %arg9[%c56_511, %c40_512] : memref<64x128xbf16, #tpu.memory_space<vmem>>, vector<8x8xbf16>
    tpu.vector_store %arg9[%c56_511, %c40_512], %470 {strides = array<i32>} : memref<64x128xbf16, #tpu.memory_space<vmem>>, vector<8x8xbf16>,
    %c0_513 = arith.constant 0 : index
    %c272_514 = arith.constant 272 : index
    %c0_515 = arith.constant 0 : index
    %472 = tpu.strided_load %arg1[%c0_513, %c272_514, %c0_515] {strides = array<i32: 1, 2, 1>} : memref<1x324x8xf32, #tpu.memory_space<vmem>>, vector<1x8x8xf32>
    %473 = vector.shape_cast %472 : vector<1x8x8xf32> to vector<8x8xf32>
    %474 = arith.truncf %473 : vector<8x8xf32> to vector<8x8xbf16>
    %c56_516 = arith.constant 56 : index
    %c48_517 = arith.constant 48 : index
    %475 = vector.load %arg9[%c56_516, %c48_517] : memref<64x128xbf16, #tpu.memory_space<vmem>>, vector<8x8xbf16>
    tpu.vector_store %arg9[%c56_516, %c48_517], %474 {strides = array<i32>} : memref<64x128xbf16, #tpu.memory_space<vmem>>, vector<8x8xbf16>,
    %c0_518 = arith.constant 0 : index
    %c273_519 = arith.constant 273 : index
    %c0_520 = arith.constant 0 : index
    %476 = tpu.strided_load %arg1[%c0_518, %c273_519, %c0_520] {strides = array<i32: 1, 2, 1>} : memref<1x324x8xf32, #tpu.memory_space<vmem>>, vector<1x8x8xf32>
    %477 = vector.shape_cast %476 : vector<1x8x8xf32> to vector<8x8xf32>
    %478 = arith.truncf %477 : vector<8x8xf32> to vector<8x8xbf16>
    %c56_521 = arith.constant 56 : index
    %c56_522 = arith.constant 56 : index
    %479 = vector.load %arg9[%c56_521, %c56_522] : memref<64x128xbf16, #tpu.memory_space<vmem>>, vector<8x8xbf16>
    tpu.vector_store %arg9[%c56_521, %c56_522], %478 {strides = array<i32>} : memref<64x128xbf16, #tpu.memory_space<vmem>>, vector<8x8xbf16>,
    %c0_523 = arith.constant 0 : index
    %c288 = arith.constant 288 : index
    %c0_524 = arith.constant 0 : index
    %480 = tpu.strided_load %arg1[%c0_523, %c288, %c0_524] {strides = array<i32: 1, 2, 1>} : memref<1x324x8xf32, #tpu.memory_space<vmem>>, vector<1x8x8xf32>
    %481 = vector.shape_cast %480 : vector<1x8x8xf32> to vector<8x8xf32>
    %482 = arith.truncf %481 : vector<8x8xf32> to vector<8x8xbf16>
    %c56_525 = arith.constant 56 : index
    %c64_526 = arith.constant 64 : index
    %483 = vector.load %arg9[%c56_525, %c64_526] : memref<64x128xbf16, #tpu.memory_space<vmem>>, vector<8x8xbf16>
    tpu.vector_store %arg9[%c56_525, %c64_526], %482 {strides = array<i32>} : memref<64x128xbf16, #tpu.memory_space<vmem>>, vector<8x8xbf16>,
    %c0_527 = arith.constant 0 : index
    %c289 = arith.constant 289 : index
    %c0_528 = arith.constant 0 : index
    %484 = tpu.strided_load %arg1[%c0_527, %c289, %c0_528] {strides = array<i32: 1, 2, 1>} : memref<1x324x8xf32, #tpu.memory_space<vmem>>, vector<1x8x8xf32>
    %485 = vector.shape_cast %484 : vector<1x8x8xf32> to vector<8x8xf32>
    %486 = arith.truncf %485 : vector<8x8xf32> to vector<8x8xbf16>
    %c56_529 = arith.constant 56 : index
    %c72_530 = arith.constant 72 : index
    %487 = vector.load %arg9[%c56_529, %c72_530] : memref<64x128xbf16, #tpu.memory_space<vmem>>, vector<8x8xbf16>
    tpu.vector_store %arg9[%c56_529, %c72_530], %486 {strides = array<i32>} : memref<64x128xbf16, #tpu.memory_space<vmem>>, vector<8x8xbf16>,
    %c0_531 = arith.constant 0 : index
    %c290 = arith.constant 290 : index
    %c0_532 = arith.constant 0 : index
    %488 = tpu.strided_load %arg1[%c0_531, %c290, %c0_532] {strides = array<i32: 1, 2, 1>} : memref<1x324x8xf32, #tpu.memory_space<vmem>>, vector<1x8x8xf32>
    %489 = vector.shape_cast %488 : vector<1x8x8xf32> to vector<8x8xf32>
    %490 = arith.truncf %489 : vector<8x8xf32> to vector<8x8xbf16>
    %c56_533 = arith.constant 56 : index
    %c80_534 = arith.constant 80 : index
    %491 = vector.load %arg9[%c56_533, %c80_534] : memref<64x128xbf16, #tpu.memory_space<vmem>>, vector<8x8xbf16>
    tpu.vector_store %arg9[%c56_533, %c80_534], %490 {strides = array<i32>} : memref<64x128xbf16, #tpu.memory_space<vmem>>, vector<8x8xbf16>,
    %c0_535 = arith.constant 0 : index
    %c291 = arith.constant 291 : index
    %c0_536 = arith.constant 0 : index
    %492 = tpu.strided_load %arg1[%c0_535, %c291, %c0_536] {strides = array<i32: 1, 2, 1>} : memref<1x324x8xf32, #tpu.memory_space<vmem>>, vector<1x8x8xf32>
    %493 = vector.shape_cast %492 : vector<1x8x8xf32> to vector<8x8xf32>
    %494 = arith.truncf %493 : vector<8x8xf32> to vector<8x8xbf16>
    %c56_537 = arith.constant 56 : index
    %c88_538 = arith.constant 88 : index
    %495 = vector.load %arg9[%c56_537, %c88_538] : memref<64x128xbf16, #tpu.memory_space<vmem>>, vector<8x8xbf16>
    tpu.vector_store %arg9[%c56_537, %c88_538], %494 {strides = array<i32>} : memref<64x128xbf16, #tpu.memory_space<vmem>>, vector<8x8xbf16>,
    %c0_539 = arith.constant 0 : index
    %c306 = arith.constant 306 : index
    %c0_540 = arith.constant 0 : index
    %496 = tpu.strided_load %arg1[%c0_539, %c306, %c0_540] {strides = array<i32: 1, 2, 1>} : memref<1x324x8xf32, #tpu.memory_space<vmem>>, vector<1x8x8xf32>
    %497 = vector.shape_cast %496 : vector<1x8x8xf32> to vector<8x8xf32>
    %498 = arith.truncf %497 : vector<8x8xf32> to vector<8x8xbf16>
    %c56_541 = arith.constant 56 : index
    %c96_542 = arith.constant 96 : index
    %499 = vector.load %arg9[%c56_541, %c96_542] : memref<64x128xbf16, #tpu.memory_space<vmem>>, vector<8x8xbf16>
    tpu.vector_store %arg9[%c56_541, %c96_542], %498 {strides = array<i32>} : memref<64x128xbf16, #tpu.memory_space<vmem>>, vector<8x8xbf16>,
    %c0_543 = arith.constant 0 : index
    %c307 = arith.constant 307 : index
    %c0_544 = arith.constant 0 : index
    %500 = tpu.strided_load %arg1[%c0_543, %c307, %c0_544] {strides = array<i32: 1, 2, 1>} : memref<1x324x8xf32, #tpu.memory_space<vmem>>, vector<1x8x8xf32>
    %501 = vector.shape_cast %500 : vector<1x8x8xf32> to vector<8x8xf32>
    %502 = arith.truncf %501 : vector<8x8xf32> to vector<8x8xbf16>
    %c56_545 = arith.constant 56 : index
    %c104_546 = arith.constant 104 : index
    %503 = vector.load %arg9[%c56_545, %c104_546] : memref<64x128xbf16, #tpu.memory_space<vmem>>, vector<8x8xbf16>
    tpu.vector_store %arg9[%c56_545, %c104_546], %502 {strides = array<i32>} : memref<64x128xbf16, #tpu.memory_space<vmem>>, vector<8x8xbf16>,
    %c0_547 = arith.constant 0 : index
    %c308 = arith.constant 308 : index
    %c0_548 = arith.constant 0 : index
    %504 = tpu.strided_load %arg1[%c0_547, %c308, %c0_548] {strides = array<i32: 1, 2, 1>} : memref<1x324x8xf32, #tpu.memory_space<vmem>>, vector<1x8x8xf32>
    %505 = vector.shape_cast %504 : vector<1x8x8xf32> to vector<8x8xf32>
    %506 = arith.truncf %505 : vector<8x8xf32> to vector<8x8xbf16>
    %c56_549 = arith.constant 56 : index
    %c112_550 = arith.constant 112 : index
    %507 = vector.load %arg9[%c56_549, %c112_550] : memref<64x128xbf16, #tpu.memory_space<vmem>>, vector<8x8xbf16>
    tpu.vector_store %arg9[%c56_549, %c112_550], %506 {strides = array<i32>} : memref<64x128xbf16, #tpu.memory_space<vmem>>, vector<8x8xbf16>,
    %c0_551 = arith.constant 0 : index
    %c309 = arith.constant 309 : index
    %c0_552 = arith.constant 0 : index
    %508 = tpu.strided_load %arg1[%c0_551, %c309, %c0_552] {strides = array<i32: 1, 2, 1>} : memref<1x324x8xf32, #tpu.memory_space<vmem>>, vector<1x8x8xf32>
    %509 = vector.shape_cast %508 : vector<1x8x8xf32> to vector<8x8xf32>
    %510 = arith.truncf %509 : vector<8x8xf32> to vector<8x8xbf16>
    %c56_553 = arith.constant 56 : index
    %c120_554 = arith.constant 120 : index
    %511 = vector.load %arg9[%c56_553, %c120_554] : memref<64x128xbf16, #tpu.memory_space<vmem>>, vector<8x8xbf16>
    tpu.vector_store %arg9[%c56_553, %c120_554], %510 {strides = array<i32>} : memref<64x128xbf16, #tpu.memory_space<vmem>>, vector<8x8xbf16>,
    %c0_555 = arith.constant 0 : index
    %c0_556 = arith.constant 0 : index
    %512 = vector.load %arg9[%c0_555, %c0_556] : memref<64x128xbf16, #tpu.memory_space<vmem>>, vector<64x128xbf16>
    %c0_557 = arith.constant 0 : index
    %c0_558 = arith.constant 0 : index
    %513 = vector.load %arg2[%c0_557, %c0_558] : memref<128x64xbf16, #tpu.memory_space<vmem>>, vector<128x64xbf16>
    %cst = arith.constant dense<0.000000e+00> : vector<64x64xf32>
    %514 = tpu.matmul %512, %513, %cst {dimension_numbers = #tpu.dot_dimension_numbers<[1], [0], [0], [1], [0, 0, 1, 1], [], []>} : vector<64x128xbf16>, vector<128x64xbf16>, vector<64x64xf32> -> vector<64x64xf32>
    %c0_559 = arith.constant 0 : index
    %c0_560 = arith.constant 0 : index
    %515 = vector.load %arg3[%c0_559, %c0_560] : memref<1x64xf32, #tpu.memory_space<vmem>>, vector<1x64xf32>
    %516 = vector.broadcast %515 : vector<1x64xf32> to vector<64x64xf32>
    %517 = arith.addf %514, %516 : vector<64x64xf32>
    %cst_561 = arith.constant 0.000000e+00 : f32
    %518 = vector.broadcast %cst_561 : f32 to vector<64x64xf32>
    %519 = arith.maximumf %517, %518 : vector<64x64xf32>
    %cst_562 = arith.constant 0.000000e+00 : f32
    %520 = vector.broadcast %cst_562 : f32 to vector<100x64xf32>
    %c0_563 = arith.constant 0 : index
    %c0_564 = arith.constant 0 : index
    %521 = vector.load %arg10[%c0_563, %c0_564] : memref<100x64xf32, #tpu.memory_space<vmem>>, vector<100x64xf32>
    tpu.vector_store %arg10[%c0_563, %c0_564], %520 {strides = array<i32>} : memref<100x64xf32, #tpu.memory_space<vmem>>, vector<100x64xf32>,
    %522 = vector.extract_strided_slice %519 {offsets = [0, 0], sizes = [8, 64], strides = [1, 1]} : vector<64x64xf32> to vector<8x64xf32>
    %c11 = arith.constant 11 : index
    %c0_565 = arith.constant 0 : index
    %523 = vector.load %arg10[%c11, %c0_565] : memref<100x64xf32, #tpu.memory_space<vmem>>, vector<8x64xf32>
    tpu.vector_store %arg10[%c11, %c0_565], %522 {strides = array<i32>} : memref<100x64xf32, #tpu.memory_space<vmem>>, vector<8x64xf32>,
    %524 = vector.extract_strided_slice %519 {offsets = [8, 0], sizes = [8, 64], strides = [1, 1]} : vector<64x64xf32> to vector<8x64xf32>
    %c21_566 = arith.constant 21 : index
    %c0_567 = arith.constant 0 : index
    %525 = vector.load %arg10[%c21_566, %c0_567] : memref<100x64xf32, #tpu.memory_space<vmem>>, vector<8x64xf32>
    tpu.vector_store %arg10[%c21_566, %c0_567], %524 {strides = array<i32>} : memref<100x64xf32, #tpu.memory_space<vmem>>, vector<8x64xf32>,
    %526 = vector.extract_strided_slice %519 {offsets = [16, 0], sizes = [8, 64], strides = [1, 1]} : vector<64x64xf32> to vector<8x64xf32>
    %c31 = arith.constant 31 : index
    %c0_568 = arith.constant 0 : index
    %527 = vector.load %arg10[%c31, %c0_568] : memref<100x64xf32, #tpu.memory_space<vmem>>, vector<8x64xf32>
    tpu.vector_store %arg10[%c31, %c0_568], %526 {strides = array<i32>} : memref<100x64xf32, #tpu.memory_space<vmem>>, vector<8x64xf32>,
    %528 = vector.extract_strided_slice %519 {offsets = [24, 0], sizes = [8, 64], strides = [1, 1]} : vector<64x64xf32> to vector<8x64xf32>
    %c41 = arith.constant 41 : index
    %c0_569 = arith.constant 0 : index
    %529 = vector.load %arg10[%c41, %c0_569] : memref<100x64xf32, #tpu.memory_space<vmem>>, vector<8x64xf32>
    tpu.vector_store %arg10[%c41, %c0_569], %528 {strides = array<i32>} : memref<100x64xf32, #tpu.memory_space<vmem>>, vector<8x64xf32>,
    %530 = vector.extract_strided_slice %519 {offsets = [32, 0], sizes = [8, 64], strides = [1, 1]} : vector<64x64xf32> to vector<8x64xf32>
    %c51 = arith.constant 51 : index
    %c0_570 = arith.constant 0 : index
    %531 = vector.load %arg10[%c51, %c0_570] : memref<100x64xf32, #tpu.memory_space<vmem>>, vector<8x64xf32>
    tpu.vector_store %arg10[%c51, %c0_570], %530 {strides = array<i32>} : memref<100x64xf32, #tpu.memory_space<vmem>>, vector<8x64xf32>,
    %532 = vector.extract_strided_slice %519 {offsets = [40, 0], sizes = [8, 64], strides = [1, 1]} : vector<64x64xf32> to vector<8x64xf32>
    %c61 = arith.constant 61 : index
    %c0_571 = arith.constant 0 : index
    %533 = vector.load %arg10[%c61, %c0_571] : memref<100x64xf32, #tpu.memory_space<vmem>>, vector<8x64xf32>
    tpu.vector_store %arg10[%c61, %c0_571], %532 {strides = array<i32>} : memref<100x64xf32, #tpu.memory_space<vmem>>, vector<8x64xf32>,
    %534 = vector.extract_strided_slice %519 {offsets = [48, 0], sizes = [8, 64], strides = [1, 1]} : vector<64x64xf32> to vector<8x64xf32>
    %c71 = arith.constant 71 : index
    %c0_572 = arith.constant 0 : index
    %535 = vector.load %arg10[%c71, %c0_572] : memref<100x64xf32, #tpu.memory_space<vmem>>, vector<8x64xf32>
    tpu.vector_store %arg10[%c71, %c0_572], %534 {strides = array<i32>} : memref<100x64xf32, #tpu.memory_space<vmem>>, vector<8x64xf32>,
    %536 = vector.extract_strided_slice %519 {offsets = [56, 0], sizes = [8, 64], strides = [1, 1]} : vector<64x64xf32> to vector<8x64xf32>
    %c81 = arith.constant 81 : index
    %c0_573 = arith.constant 0 : index
    %537 = vector.load %arg10[%c81, %c0_573] : memref<100x64xf32, #tpu.memory_space<vmem>>, vector<8x64xf32>
    tpu.vector_store %arg10[%c81, %c0_573], %536 {strides = array<i32>} : memref<100x64xf32, #tpu.memory_space<vmem>>, vector<8x64xf32>,
    %c0_574 = arith.constant 0 : index
    %c0_575 = arith.constant 0 : index
    %538 = tpu.strided_load %arg10[%c0_574, %c0_575] {strides = array<i32: 2, 1>} : memref<100x64xf32, #tpu.memory_space<vmem>>, vector<4x64xf32>
    %539 = arith.truncf %538 : vector<4x64xf32> to vector<4x64xbf16>
    %c0_576 = arith.constant 0 : index
    %c0_577 = arith.constant 0 : index
    %540 = vector.load %arg11[%c0_576, %c0_577] : memref<16x1024xbf16, #tpu.memory_space<vmem>>, vector<4x64xbf16>
    tpu.vector_store %arg11[%c0_576, %c0_577], %539 {strides = array<i32>} : memref<16x1024xbf16, #tpu.memory_space<vmem>>, vector<4x64xbf16>,
    %c1_578 = arith.constant 1 : index
    %c0_579 = arith.constant 0 : index
    %541 = tpu.strided_load %arg10[%c1_578, %c0_579] {strides = array<i32: 2, 1>} : memref<100x64xf32, #tpu.memory_space<vmem>>, vector<4x64xf32>
    %542 = arith.truncf %541 : vector<4x64xf32> to vector<4x64xbf16>
    %c0_580 = arith.constant 0 : index
    %c64_581 = arith.constant 64 : index
    %543 = vector.load %arg11[%c0_580, %c64_581] : memref<16x1024xbf16, #tpu.memory_space<vmem>>, vector<4x64xbf16>
    tpu.vector_store %arg11[%c0_580, %c64_581], %542 {strides = array<i32>} : memref<16x1024xbf16, #tpu.memory_space<vmem>>, vector<4x64xbf16>,
    %c2_582 = arith.constant 2 : index
    %c0_583 = arith.constant 0 : index
    %544 = tpu.strided_load %arg10[%c2_582, %c0_583] {strides = array<i32: 2, 1>} : memref<100x64xf32, #tpu.memory_space<vmem>>, vector<4x64xf32>
    %545 = arith.truncf %544 : vector<4x64xf32> to vector<4x64xbf16>
    %c0_584 = arith.constant 0 : index
    %c128_585 = arith.constant 128 : index
    %546 = vector.load %arg11[%c0_584, %c128_585] : memref<16x1024xbf16, #tpu.memory_space<vmem>>, vector<4x64xbf16>
    tpu.vector_store %arg11[%c0_584, %c128_585], %545 {strides = array<i32>} : memref<16x1024xbf16, #tpu.memory_space<vmem>>, vector<4x64xbf16>,
    %c3_586 = arith.constant 3 : index
    %c0_587 = arith.constant 0 : index
    %547 = tpu.strided_load %arg10[%c3_586, %c0_587] {strides = array<i32: 2, 1>} : memref<100x64xf32, #tpu.memory_space<vmem>>, vector<4x64xf32>
    %548 = arith.truncf %547 : vector<4x64xf32> to vector<4x64xbf16>
    %c0_588 = arith.constant 0 : index
    %c192 = arith.constant 192 : index
    %549 = vector.load %arg11[%c0_588, %c192] : memref<16x1024xbf16, #tpu.memory_space<vmem>>, vector<4x64xbf16>
    tpu.vector_store %arg11[%c0_588, %c192], %548 {strides = array<i32>} : memref<16x1024xbf16, #tpu.memory_space<vmem>>, vector<4x64xbf16>,
    %c10 = arith.constant 10 : index
    %c0_589 = arith.constant 0 : index
    %550 = tpu.strided_load %arg10[%c10, %c0_589] {strides = array<i32: 2, 1>} : memref<100x64xf32, #tpu.memory_space<vmem>>, vector<4x64xf32>
    %551 = arith.truncf %550 : vector<4x64xf32> to vector<4x64xbf16>
    %c0_590 = arith.constant 0 : index
    %c256 = arith.constant 256 : index
    %552 = vector.load %arg11[%c0_590, %c256] : memref<16x1024xbf16, #tpu.memory_space<vmem>>, vector<4x64xbf16>
    tpu.vector_store %arg11[%c0_590, %c256], %551 {strides = array<i32>} : memref<16x1024xbf16, #tpu.memory_space<vmem>>, vector<4x64xbf16>,
    %c11_591 = arith.constant 11 : index
    %c0_592 = arith.constant 0 : index
    %553 = tpu.strided_load %arg10[%c11_591, %c0_592] {strides = array<i32: 2, 1>} : memref<100x64xf32, #tpu.memory_space<vmem>>, vector<4x64xf32>
    %554 = arith.truncf %553 : vector<4x64xf32> to vector<4x64xbf16>
    %c0_593 = arith.constant 0 : index
    %c320 = arith.constant 320 : index
    %555 = vector.load %arg11[%c0_593, %c320] : memref<16x1024xbf16, #tpu.memory_space<vmem>>, vector<4x64xbf16>
    tpu.vector_store %arg11[%c0_593, %c320], %554 {strides = array<i32>} : memref<16x1024xbf16, #tpu.memory_space<vmem>>, vector<4x64xbf16>,
    %c12 = arith.constant 12 : index
    %c0_594 = arith.constant 0 : index
    %556 = tpu.strided_load %arg10[%c12, %c0_594] {strides = array<i32: 2, 1>} : memref<100x64xf32, #tpu.memory_space<vmem>>, vector<4x64xf32>
    %557 = arith.truncf %556 : vector<4x64xf32> to vector<4x64xbf16>
    %c0_595 = arith.constant 0 : index
    %c384 = arith.constant 384 : index
    %558 = vector.load %arg11[%c0_595, %c384] : memref<16x1024xbf16, #tpu.memory_space<vmem>>, vector<4x64xbf16>
    tpu.vector_store %arg11[%c0_595, %c384], %557 {strides = array<i32>} : memref<16x1024xbf16, #tpu.memory_space<vmem>>, vector<4x64xbf16>,
    %c13 = arith.constant 13 : index
    %c0_596 = arith.constant 0 : index
    %559 = tpu.strided_load %arg10[%c13, %c0_596] {strides = array<i32: 2, 1>} : memref<100x64xf32, #tpu.memory_space<vmem>>, vector<4x64xf32>
    %560 = arith.truncf %559 : vector<4x64xf32> to vector<4x64xbf16>
    %c0_597 = arith.constant 0 : index
    %c448 = arith.constant 448 : index
    %561 = vector.load %arg11[%c0_597, %c448] : memref<16x1024xbf16, #tpu.memory_space<vmem>>, vector<4x64xbf16>
    tpu.vector_store %arg11[%c0_597, %c448], %560 {strides = array<i32>} : memref<16x1024xbf16, #tpu.memory_space<vmem>>, vector<4x64xbf16>,
    %c20_598 = arith.constant 20 : index
    %c0_599 = arith.constant 0 : index
    %562 = tpu.strided_load %arg10[%c20_598, %c0_599] {strides = array<i32: 2, 1>} : memref<100x64xf32, #tpu.memory_space<vmem>>, vector<4x64xf32>
    %563 = arith.truncf %562 : vector<4x64xf32> to vector<4x64xbf16>
    %c0_600 = arith.constant 0 : index
    %c512 = arith.constant 512 : index
    %564 = vector.load %arg11[%c0_600, %c512] : memref<16x1024xbf16, #tpu.memory_space<vmem>>, vector<4x64xbf16>
    tpu.vector_store %arg11[%c0_600, %c512], %563 {strides = array<i32>} : memref<16x1024xbf16, #tpu.memory_space<vmem>>, vector<4x64xbf16>,
    %c21_601 = arith.constant 21 : index
    %c0_602 = arith.constant 0 : index
    %565 = tpu.strided_load %arg10[%c21_601, %c0_602] {strides = array<i32: 2, 1>} : memref<100x64xf32, #tpu.memory_space<vmem>>, vector<4x64xf32>
    %566 = arith.truncf %565 : vector<4x64xf32> to vector<4x64xbf16>
    %c0_603 = arith.constant 0 : index
    %c576 = arith.constant 576 : index
    %567 = vector.load %arg11[%c0_603, %c576] : memref<16x1024xbf16, #tpu.memory_space<vmem>>, vector<4x64xbf16>
    tpu.vector_store %arg11[%c0_603, %c576], %566 {strides = array<i32>} : memref<16x1024xbf16, #tpu.memory_space<vmem>>, vector<4x64xbf16>,
    %c22 = arith.constant 22 : index
    %c0_604 = arith.constant 0 : index
    %568 = tpu.strided_load %arg10[%c22, %c0_604] {strides = array<i32: 2, 1>} : memref<100x64xf32, #tpu.memory_space<vmem>>, vector<4x64xf32>
    %569 = arith.truncf %568 : vector<4x64xf32> to vector<4x64xbf16>
    %c0_605 = arith.constant 0 : index
    %c640 = arith.constant 640 : index
    %570 = vector.load %arg11[%c0_605, %c640] : memref<16x1024xbf16, #tpu.memory_space<vmem>>, vector<4x64xbf16>
    tpu.vector_store %arg11[%c0_605, %c640], %569 {strides = array<i32>} : memref<16x1024xbf16, #tpu.memory_space<vmem>>, vector<4x64xbf16>,
    %c23 = arith.constant 23 : index
    %c0_606 = arith.constant 0 : index
    %571 = tpu.strided_load %arg10[%c23, %c0_606] {strides = array<i32: 2, 1>} : memref<100x64xf32, #tpu.memory_space<vmem>>, vector<4x64xf32>
    %572 = arith.truncf %571 : vector<4x64xf32> to vector<4x64xbf16>
    %c0_607 = arith.constant 0 : index
    %c704 = arith.constant 704 : index
    %573 = vector.load %arg11[%c0_607, %c704] : memref<16x1024xbf16, #tpu.memory_space<vmem>>, vector<4x64xbf16>
    tpu.vector_store %arg11[%c0_607, %c704], %572 {strides = array<i32>} : memref<16x1024xbf16, #tpu.memory_space<vmem>>, vector<4x64xbf16>,
    %c30 = arith.constant 30 : index
    %c0_608 = arith.constant 0 : index
    %574 = tpu.strided_load %arg10[%c30, %c0_608] {strides = array<i32: 2, 1>} : memref<100x64xf32, #tpu.memory_space<vmem>>, vector<4x64xf32>
    %575 = arith.truncf %574 : vector<4x64xf32> to vector<4x64xbf16>
    %c0_609 = arith.constant 0 : index
    %c768 = arith.constant 768 : index
    %576 = vector.load %arg11[%c0_609, %c768] : memref<16x1024xbf16, #tpu.memory_space<vmem>>, vector<4x64xbf16>
    tpu.vector_store %arg11[%c0_609, %c768], %575 {strides = array<i32>} : memref<16x1024xbf16, #tpu.memory_space<vmem>>, vector<4x64xbf16>,
    %c31_610 = arith.constant 31 : index
    %c0_611 = arith.constant 0 : index
    %577 = tpu.strided_load %arg10[%c31_610, %c0_611] {strides = array<i32: 2, 1>} : memref<100x64xf32, #tpu.memory_space<vmem>>, vector<4x64xf32>
    %578 = arith.truncf %577 : vector<4x64xf32> to vector<4x64xbf16>
    %c0_612 = arith.constant 0 : index
    %c832 = arith.constant 832 : index
    %579 = vector.load %arg11[%c0_612, %c832] : memref<16x1024xbf16, #tpu.memory_space<vmem>>, vector<4x64xbf16>
    tpu.vector_store %arg11[%c0_612, %c832], %578 {strides = array<i32>} : memref<16x1024xbf16, #tpu.memory_space<vmem>>, vector<4x64xbf16>,
    %c32_613 = arith.constant 32 : index
    %c0_614 = arith.constant 0 : index
    %580 = tpu.strided_load %arg10[%c32_613, %c0_614] {strides = array<i32: 2, 1>} : memref<100x64xf32, #tpu.memory_space<vmem>>, vector<4x64xf32>
    %581 = arith.truncf %580 : vector<4x64xf32> to vector<4x64xbf16>
    %c0_615 = arith.constant 0 : index
    %c896 = arith.constant 896 : index
    %582 = vector.load %arg11[%c0_615, %c896] : memref<16x1024xbf16, #tpu.memory_space<vmem>>, vector<4x64xbf16>
    tpu.vector_store %arg11[%c0_615, %c896], %581 {strides = array<i32>} : memref<16x1024xbf16, #tpu.memory_space<vmem>>, vector<4x64xbf16>,
    %c33 = arith.constant 33 : index
    %c0_616 = arith.constant 0 : index
    %583 = tpu.strided_load %arg10[%c33, %c0_616] {strides = array<i32: 2, 1>} : memref<100x64xf32, #tpu.memory_space<vmem>>, vector<4x64xf32>
    %584 = arith.truncf %583 : vector<4x64xf32> to vector<4x64xbf16>
    %c0_617 = arith.constant 0 : index
    %c960 = arith.constant 960 : index
    %585 = vector.load %arg11[%c0_617, %c960] : memref<16x1024xbf16, #tpu.memory_space<vmem>>, vector<4x64xbf16>
    tpu.vector_store %arg11[%c0_617, %c960], %584 {strides = array<i32>} : memref<16x1024xbf16, #tpu.memory_space<vmem>>, vector<4x64xbf16>,
    %c20_618 = arith.constant 20 : index
    %c0_619 = arith.constant 0 : index
    %586 = tpu.strided_load %arg10[%c20_618, %c0_619] {strides = array<i32: 2, 1>} : memref<100x64xf32, #tpu.memory_space<vmem>>, vector<4x64xf32>
    %587 = arith.truncf %586 : vector<4x64xf32> to vector<4x64xbf16>
    %c4 = arith.constant 4 : index
    %c0_620 = arith.constant 0 : index
    %588 = vector.load %arg11[%c4, %c0_620] : memref<16x1024xbf16, #tpu.memory_space<vmem>>, vector<4x64xbf16>
    tpu.vector_store %arg11[%c4, %c0_620], %587 {strides = array<i32>} : memref<16x1024xbf16, #tpu.memory_space<vmem>>, vector<4x64xbf16>,
    %c21_621 = arith.constant 21 : index
    %c0_622 = arith.constant 0 : index
    %589 = tpu.strided_load %arg10[%c21_621, %c0_622] {strides = array<i32: 2, 1>} : memref<100x64xf32, #tpu.memory_space<vmem>>, vector<4x64xf32>
    %590 = arith.truncf %589 : vector<4x64xf32> to vector<4x64xbf16>
    %c4_623 = arith.constant 4 : index
    %c64_624 = arith.constant 64 : index
    %591 = vector.load %arg11[%c4_623, %c64_624] : memref<16x1024xbf16, #tpu.memory_space<vmem>>, vector<4x64xbf16>
    tpu.vector_store %arg11[%c4_623, %c64_624], %590 {strides = array<i32>} : memref<16x1024xbf16, #tpu.memory_space<vmem>>, vector<4x64xbf16>,
    %c22_625 = arith.constant 22 : index
    %c0_626 = arith.constant 0 : index
    %592 = tpu.strided_load %arg10[%c22_625, %c0_626] {strides = array<i32: 2, 1>} : memref<100x64xf32, #tpu.memory_space<vmem>>, vector<4x64xf32>
    %593 = arith.truncf %592 : vector<4x64xf32> to vector<4x64xbf16>
    %c4_627 = arith.constant 4 : index
    %c128_628 = arith.constant 128 : index
    %594 = vector.load %arg11[%c4_627, %c128_628] : memref<16x1024xbf16, #tpu.memory_space<vmem>>, vector<4x64xbf16>
    tpu.vector_store %arg11[%c4_627, %c128_628], %593 {strides = array<i32>} : memref<16x1024xbf16, #tpu.memory_space<vmem>>, vector<4x64xbf16>,
    %c23_629 = arith.constant 23 : index
    %c0_630 = arith.constant 0 : index
    %595 = tpu.strided_load %arg10[%c23_629, %c0_630] {strides = array<i32: 2, 1>} : memref<100x64xf32, #tpu.memory_space<vmem>>, vector<4x64xf32>
    %596 = arith.truncf %595 : vector<4x64xf32> to vector<4x64xbf16>
    %c4_631 = arith.constant 4 : index
    %c192_632 = arith.constant 192 : index
    %597 = vector.load %arg11[%c4_631, %c192_632] : memref<16x1024xbf16, #tpu.memory_space<vmem>>, vector<4x64xbf16>
    tpu.vector_store %arg11[%c4_631, %c192_632], %596 {strides = array<i32>} : memref<16x1024xbf16, #tpu.memory_space<vmem>>, vector<4x64xbf16>,
    %c30_633 = arith.constant 30 : index
    %c0_634 = arith.constant 0 : index
    %598 = tpu.strided_load %arg10[%c30_633, %c0_634] {strides = array<i32: 2, 1>} : memref<100x64xf32, #tpu.memory_space<vmem>>, vector<4x64xf32>
    %599 = arith.truncf %598 : vector<4x64xf32> to vector<4x64xbf16>
    %c4_635 = arith.constant 4 : index
    %c256_636 = arith.constant 256 : index
    %600 = vector.load %arg11[%c4_635, %c256_636] : memref<16x1024xbf16, #tpu.memory_space<vmem>>, vector<4x64xbf16>
    tpu.vector_store %arg11[%c4_635, %c256_636], %599 {strides = array<i32>} : memref<16x1024xbf16, #tpu.memory_space<vmem>>, vector<4x64xbf16>,
    %c31_637 = arith.constant 31 : index
    %c0_638 = arith.constant 0 : index
    %601 = tpu.strided_load %arg10[%c31_637, %c0_638] {strides = array<i32: 2, 1>} : memref<100x64xf32, #tpu.memory_space<vmem>>, vector<4x64xf32>
    %602 = arith.truncf %601 : vector<4x64xf32> to vector<4x64xbf16>
    %c4_639 = arith.constant 4 : index
    %c320_640 = arith.constant 320 : index
    %603 = vector.load %arg11[%c4_639, %c320_640] : memref<16x1024xbf16, #tpu.memory_space<vmem>>, vector<4x64xbf16>
    tpu.vector_store %arg11[%c4_639, %c320_640], %602 {strides = array<i32>} : memref<16x1024xbf16, #tpu.memory_space<vmem>>, vector<4x64xbf16>,
    %c32_641 = arith.constant 32 : index
    %c0_642 = arith.constant 0 : index
    %604 = tpu.strided_load %arg10[%c32_641, %c0_642] {strides = array<i32: 2, 1>} : memref<100x64xf32, #tpu.memory_space<vmem>>, vector<4x64xf32>
    %605 = arith.truncf %604 : vector<4x64xf32> to vector<4x64xbf16>
    %c4_643 = arith.constant 4 : index
    %c384_644 = arith.constant 384 : index
    %606 = vector.load %arg11[%c4_643, %c384_644] : memref<16x1024xbf16, #tpu.memory_space<vmem>>, vector<4x64xbf16>
    tpu.vector_store %arg11[%c4_643, %c384_644], %605 {strides = array<i32>} : memref<16x1024xbf16, #tpu.memory_space<vmem>>, vector<4x64xbf16>,
    %c33_645 = arith.constant 33 : index
    %c0_646 = arith.constant 0 : index
    %607 = tpu.strided_load %arg10[%c33_645, %c0_646] {strides = array<i32: 2, 1>} : memref<100x64xf32, #tpu.memory_space<vmem>>, vector<4x64xf32>
    %608 = arith.truncf %607 : vector<4x64xf32> to vector<4x64xbf16>
    %c4_647 = arith.constant 4 : index
    %c448_648 = arith.constant 448 : index
    %609 = vector.load %arg11[%c4_647, %c448_648] : memref<16x1024xbf16, #tpu.memory_space<vmem>>, vector<4x64xbf16>
    tpu.vector_store %arg11[%c4_647, %c448_648], %608 {strides = array<i32>} : memref<16x1024xbf16, #tpu.memory_space<vmem>>, vector<4x64xbf16>,
    %c40_649 = arith.constant 40 : index
    %c0_650 = arith.constant 0 : index
    %610 = tpu.strided_load %arg10[%c40_649, %c0_650] {strides = array<i32: 2, 1>} : memref<100x64xf32, #tpu.memory_space<vmem>>, vector<4x64xf32>
    %611 = arith.truncf %610 : vector<4x64xf32> to vector<4x64xbf16>
    %c4_651 = arith.constant 4 : index
    %c512_652 = arith.constant 512 : index
    %612 = vector.load %arg11[%c4_651, %c512_652] : memref<16x1024xbf16, #tpu.memory_space<vmem>>, vector<4x64xbf16>
    tpu.vector_store %arg11[%c4_651, %c512_652], %611 {strides = array<i32>} : memref<16x1024xbf16, #tpu.memory_space<vmem>>, vector<4x64xbf16>,
    %c41_653 = arith.constant 41 : index
    %c0_654 = arith.constant 0 : index
    %613 = tpu.strided_load %arg10[%c41_653, %c0_654] {strides = array<i32: 2, 1>} : memref<100x64xf32, #tpu.memory_space<vmem>>, vector<4x64xf32>
    %614 = arith.truncf %613 : vector<4x64xf32> to vector<4x64xbf16>
    %c4_655 = arith.constant 4 : index
    %c576_656 = arith.constant 576 : index
    %615 = vector.load %arg11[%c4_655, %c576_656] : memref<16x1024xbf16, #tpu.memory_space<vmem>>, vector<4x64xbf16>
    tpu.vector_store %arg11[%c4_655, %c576_656], %614 {strides = array<i32>} : memref<16x1024xbf16, #tpu.memory_space<vmem>>, vector<4x64xbf16>,
    %c42 = arith.constant 42 : index
    %c0_657 = arith.constant 0 : index
    %616 = tpu.strided_load %arg10[%c42, %c0_657] {strides = array<i32: 2, 1>} : memref<100x64xf32, #tpu.memory_space<vmem>>, vector<4x64xf32>
    %617 = arith.truncf %616 : vector<4x64xf32> to vector<4x64xbf16>
    %c4_658 = arith.constant 4 : index
    %c640_659 = arith.constant 640 : index
    %618 = vector.load %arg11[%c4_658, %c640_659] : memref<16x1024xbf16, #tpu.memory_space<vmem>>, vector<4x64xbf16>
    tpu.vector_store %arg11[%c4_658, %c640_659], %617 {strides = array<i32>} : memref<16x1024xbf16, #tpu.memory_space<vmem>>, vector<4x64xbf16>,
    %c43 = arith.constant 43 : index
    %c0_660 = arith.constant 0 : index
    %619 = tpu.strided_load %arg10[%c43, %c0_660] {strides = array<i32: 2, 1>} : memref<100x64xf32, #tpu.memory_space<vmem>>, vector<4x64xf32>
    %620 = arith.truncf %619 : vector<4x64xf32> to vector<4x64xbf16>
    %c4_661 = arith.constant 4 : index
    %c704_662 = arith.constant 704 : index
    %621 = vector.load %arg11[%c4_661, %c704_662] : memref<16x1024xbf16, #tpu.memory_space<vmem>>, vector<4x64xbf16>
    tpu.vector_store %arg11[%c4_661, %c704_662], %620 {strides = array<i32>} : memref<16x1024xbf16, #tpu.memory_space<vmem>>, vector<4x64xbf16>,
    %c50 = arith.constant 50 : index
    %c0_663 = arith.constant 0 : index
    %622 = tpu.strided_load %arg10[%c50, %c0_663] {strides = array<i32: 2, 1>} : memref<100x64xf32, #tpu.memory_space<vmem>>, vector<4x64xf32>
    %623 = arith.truncf %622 : vector<4x64xf32> to vector<4x64xbf16>
    %c4_664 = arith.constant 4 : index
    %c768_665 = arith.constant 768 : index
    %624 = vector.load %arg11[%c4_664, %c768_665] : memref<16x1024xbf16, #tpu.memory_space<vmem>>, vector<4x64xbf16>
    tpu.vector_store %arg11[%c4_664, %c768_665], %623 {strides = array<i32>} : memref<16x1024xbf16, #tpu.memory_space<vmem>>, vector<4x64xbf16>,
    %c51_666 = arith.constant 51 : index
    %c0_667 = arith.constant 0 : index
    %625 = tpu.strided_load %arg10[%c51_666, %c0_667] {strides = array<i32: 2, 1>} : memref<100x64xf32, #tpu.memory_space<vmem>>, vector<4x64xf32>
    %626 = arith.truncf %625 : vector<4x64xf32> to vector<4x64xbf16>
    %c4_668 = arith.constant 4 : index
    %c832_669 = arith.constant 832 : index
    %627 = vector.load %arg11[%c4_668, %c832_669] : memref<16x1024xbf16, #tpu.memory_space<vmem>>, vector<4x64xbf16>
    tpu.vector_store %arg11[%c4_668, %c832_669], %626 {strides = array<i32>} : memref<16x1024xbf16, #tpu.memory_space<vmem>>, vector<4x64xbf16>,
    %c52 = arith.constant 52 : index
    %c0_670 = arith.constant 0 : index
    %628 = tpu.strided_load %arg10[%c52, %c0_670] {strides = array<i32: 2, 1>} : memref<100x64xf32, #tpu.memory_space<vmem>>, vector<4x64xf32>
    %629 = arith.truncf %628 : vector<4x64xf32> to vector<4x64xbf16>
    %c4_671 = arith.constant 4 : index
    %c896_672 = arith.constant 896 : index
    %630 = vector.load %arg11[%c4_671, %c896_672] : memref<16x1024xbf16, #tpu.memory_space<vmem>>, vector<4x64xbf16>
    tpu.vector_store %arg11[%c4_671, %c896_672], %629 {strides = array<i32>} : memref<16x1024xbf16, #tpu.memory_space<vmem>>, vector<4x64xbf16>,
    %c53 = arith.constant 53 : index
    %c0_673 = arith.constant 0 : index
    %631 = tpu.strided_load %arg10[%c53, %c0_673] {strides = array<i32: 2, 1>} : memref<100x64xf32, #tpu.memory_space<vmem>>, vector<4x64xf32>
    %632 = arith.truncf %631 : vector<4x64xf32> to vector<4x64xbf16>
    %c4_674 = arith.constant 4 : index
    %c960_675 = arith.constant 960 : index
    %633 = vector.load %arg11[%c4_674, %c960_675] : memref<16x1024xbf16, #tpu.memory_space<vmem>>, vector<4x64xbf16>
    tpu.vector_store %arg11[%c4_674, %c960_675], %632 {strides = array<i32>} : memref<16x1024xbf16, #tpu.memory_space<vmem>>, vector<4x64xbf16>,
    %c40_676 = arith.constant 40 : index
    %c0_677 = arith.constant 0 : index
    %634 = tpu.strided_load %arg10[%c40_676, %c0_677] {strides = array<i32: 2, 1>} : memref<100x64xf32, #tpu.memory_space<vmem>>, vector<4x64xf32>
    %635 = arith.truncf %634 : vector<4x64xf32> to vector<4x64xbf16>
    %c8_678 = arith.constant 8 : index
    %c0_679 = arith.constant 0 : index
    %636 = vector.load %arg11[%c8_678, %c0_679] : memref<16x1024xbf16, #tpu.memory_space<vmem>>, vector<4x64xbf16>
    tpu.vector_store %arg11[%c8_678, %c0_679], %635 {strides = array<i32>} : memref<16x1024xbf16, #tpu.memory_space<vmem>>, vector<4x64xbf16>,
    %c41_680 = arith.constant 41 : index
    %c0_681 = arith.constant 0 : index
    %637 = tpu.strided_load %arg10[%c41_680, %c0_681] {strides = array<i32: 2, 1>} : memref<100x64xf32, #tpu.memory_space<vmem>>, vector<4x64xf32>
    %638 = arith.truncf %637 : vector<4x64xf32> to vector<4x64xbf16>
    %c8_682 = arith.constant 8 : index
    %c64_683 = arith.constant 64 : index
    %639 = vector.load %arg11[%c8_682, %c64_683] : memref<16x1024xbf16, #tpu.memory_space<vmem>>, vector<4x64xbf16>
    tpu.vector_store %arg11[%c8_682, %c64_683], %638 {strides = array<i32>} : memref<16x1024xbf16, #tpu.memory_space<vmem>>, vector<4x64xbf16>,
    %c42_684 = arith.constant 42 : index
    %c0_685 = arith.constant 0 : index
    %640 = tpu.strided_load %arg10[%c42_684, %c0_685] {strides = array<i32: 2, 1>} : memref<100x64xf32, #tpu.memory_space<vmem>>, vector<4x64xf32>
    %641 = arith.truncf %640 : vector<4x64xf32> to vector<4x64xbf16>
    %c8_686 = arith.constant 8 : index
    %c128_687 = arith.constant 128 : index
    %642 = vector.load %arg11[%c8_686, %c128_687] : memref<16x1024xbf16, #tpu.memory_space<vmem>>, vector<4x64xbf16>
    tpu.vector_store %arg11[%c8_686, %c128_687], %641 {strides = array<i32>} : memref<16x1024xbf16, #tpu.memory_space<vmem>>, vector<4x64xbf16>,
    %c43_688 = arith.constant 43 : index
    %c0_689 = arith.constant 0 : index
    %643 = tpu.strided_load %arg10[%c43_688, %c0_689] {strides = array<i32: 2, 1>} : memref<100x64xf32, #tpu.memory_space<vmem>>, vector<4x64xf32>
    %644 = arith.truncf %643 : vector<4x64xf32> to vector<4x64xbf16>
    %c8_690 = arith.constant 8 : index
    %c192_691 = arith.constant 192 : index
    %645 = vector.load %arg11[%c8_690, %c192_691] : memref<16x1024xbf16, #tpu.memory_space<vmem>>, vector<4x64xbf16>
    tpu.vector_store %arg11[%c8_690, %c192_691], %644 {strides = array<i32>} : memref<16x1024xbf16, #tpu.memory_space<vmem>>, vector<4x64xbf16>,
    %c50_692 = arith.constant 50 : index
    %c0_693 = arith.constant 0 : index
    %646 = tpu.strided_load %arg10[%c50_692, %c0_693] {strides = array<i32: 2, 1>} : memref<100x64xf32, #tpu.memory_space<vmem>>, vector<4x64xf32>
    %647 = arith.truncf %646 : vector<4x64xf32> to vector<4x64xbf16>
    %c8_694 = arith.constant 8 : index
    %c256_695 = arith.constant 256 : index
    %648 = vector.load %arg11[%c8_694, %c256_695] : memref<16x1024xbf16, #tpu.memory_space<vmem>>, vector<4x64xbf16>
    tpu.vector_store %arg11[%c8_694, %c256_695], %647 {strides = array<i32>} : memref<16x1024xbf16, #tpu.memory_space<vmem>>, vector<4x64xbf16>,
    %c51_696 = arith.constant 51 : index
    %c0_697 = arith.constant 0 : index
    %649 = tpu.strided_load %arg10[%c51_696, %c0_697] {strides = array<i32: 2, 1>} : memref<100x64xf32, #tpu.memory_space<vmem>>, vector<4x64xf32>
    %650 = arith.truncf %649 : vector<4x64xf32> to vector<4x64xbf16>
    %c8_698 = arith.constant 8 : index
    %c320_699 = arith.constant 320 : index
    %651 = vector.load %arg11[%c8_698, %c320_699] : memref<16x1024xbf16, #tpu.memory_space<vmem>>, vector<4x64xbf16>
    tpu.vector_store %arg11[%c8_698, %c320_699], %650 {strides = array<i32>} : memref<16x1024xbf16, #tpu.memory_space<vmem>>, vector<4x64xbf16>,
    %c52_700 = arith.constant 52 : index
    %c0_701 = arith.constant 0 : index
    %652 = tpu.strided_load %arg10[%c52_700, %c0_701] {strides = array<i32: 2, 1>} : memref<100x64xf32, #tpu.memory_space<vmem>>, vector<4x64xf32>
    %653 = arith.truncf %652 : vector<4x64xf32> to vector<4x64xbf16>
    %c8_702 = arith.constant 8 : index
    %c384_703 = arith.constant 384 : index
    %654 = vector.load %arg11[%c8_702, %c384_703] : memref<16x1024xbf16, #tpu.memory_space<vmem>>, vector<4x64xbf16>
    tpu.vector_store %arg11[%c8_702, %c384_703], %653 {strides = array<i32>} : memref<16x1024xbf16, #tpu.memory_space<vmem>>, vector<4x64xbf16>,
    %c53_704 = arith.constant 53 : index
    %c0_705 = arith.constant 0 : index
    %655 = tpu.strided_load %arg10[%c53_704, %c0_705] {strides = array<i32: 2, 1>} : memref<100x64xf32, #tpu.memory_space<vmem>>, vector<4x64xf32>
    %656 = arith.truncf %655 : vector<4x64xf32> to vector<4x64xbf16>
    %c8_706 = arith.constant 8 : index
    %c448_707 = arith.constant 448 : index
    %657 = vector.load %arg11[%c8_706, %c448_707] : memref<16x1024xbf16, #tpu.memory_space<vmem>>, vector<4x64xbf16>
    tpu.vector_store %arg11[%c8_706, %c448_707], %656 {strides = array<i32>} : memref<16x1024xbf16, #tpu.memory_space<vmem>>, vector<4x64xbf16>,
    %c60 = arith.constant 60 : index
    %c0_708 = arith.constant 0 : index
    %658 = tpu.strided_load %arg10[%c60, %c0_708] {strides = array<i32: 2, 1>} : memref<100x64xf32, #tpu.memory_space<vmem>>, vector<4x64xf32>
    %659 = arith.truncf %658 : vector<4x64xf32> to vector<4x64xbf16>
    %c8_709 = arith.constant 8 : index
    %c512_710 = arith.constant 512 : index
    %660 = vector.load %arg11[%c8_709, %c512_710] : memref<16x1024xbf16, #tpu.memory_space<vmem>>, vector<4x64xbf16>
    tpu.vector_store %arg11[%c8_709, %c512_710], %659 {strides = array<i32>} : memref<16x1024xbf16, #tpu.memory_space<vmem>>, vector<4x64xbf16>,
    %c61_711 = arith.constant 61 : index
    %c0_712 = arith.constant 0 : index
    %661 = tpu.strided_load %arg10[%c61_711, %c0_712] {strides = array<i32: 2, 1>} : memref<100x64xf32, #tpu.memory_space<vmem>>, vector<4x64xf32>
    %662 = arith.truncf %661 : vector<4x64xf32> to vector<4x64xbf16>
    %c8_713 = arith.constant 8 : index
    %c576_714 = arith.constant 576 : index
    %663 = vector.load %arg11[%c8_713, %c576_714] : memref<16x1024xbf16, #tpu.memory_space<vmem>>, vector<4x64xbf16>
    tpu.vector_store %arg11[%c8_713, %c576_714], %662 {strides = array<i32>} : memref<16x1024xbf16, #tpu.memory_space<vmem>>, vector<4x64xbf16>,
    %c62 = arith.constant 62 : index
    %c0_715 = arith.constant 0 : index
    %664 = tpu.strided_load %arg10[%c62, %c0_715] {strides = array<i32: 2, 1>} : memref<100x64xf32, #tpu.memory_space<vmem>>, vector<4x64xf32>
    %665 = arith.truncf %664 : vector<4x64xf32> to vector<4x64xbf16>
    %c8_716 = arith.constant 8 : index
    %c640_717 = arith.constant 640 : index
    %666 = vector.load %arg11[%c8_716, %c640_717] : memref<16x1024xbf16, #tpu.memory_space<vmem>>, vector<4x64xbf16>
    tpu.vector_store %arg11[%c8_716, %c640_717], %665 {strides = array<i32>} : memref<16x1024xbf16, #tpu.memory_space<vmem>>, vector<4x64xbf16>,
    %c63 = arith.constant 63 : index
    %c0_718 = arith.constant 0 : index
    %667 = tpu.strided_load %arg10[%c63, %c0_718] {strides = array<i32: 2, 1>} : memref<100x64xf32, #tpu.memory_space<vmem>>, vector<4x64xf32>
    %668 = arith.truncf %667 : vector<4x64xf32> to vector<4x64xbf16>
    %c8_719 = arith.constant 8 : index
    %c704_720 = arith.constant 704 : index
    %669 = vector.load %arg11[%c8_719, %c704_720] : memref<16x1024xbf16, #tpu.memory_space<vmem>>, vector<4x64xbf16>
    tpu.vector_store %arg11[%c8_719, %c704_720], %668 {strides = array<i32>} : memref<16x1024xbf16, #tpu.memory_space<vmem>>, vector<4x64xbf16>,
    %c70 = arith.constant 70 : index
    %c0_721 = arith.constant 0 : index
    %670 = tpu.strided_load %arg10[%c70, %c0_721] {strides = array<i32: 2, 1>} : memref<100x64xf32, #tpu.memory_space<vmem>>, vector<4x64xf32>
    %671 = arith.truncf %670 : vector<4x64xf32> to vector<4x64xbf16>
    %c8_722 = arith.constant 8 : index
    %c768_723 = arith.constant 768 : index
    %672 = vector.load %arg11[%c8_722, %c768_723] : memref<16x1024xbf16, #tpu.memory_space<vmem>>, vector<4x64xbf16>
    tpu.vector_store %arg11[%c8_722, %c768_723], %671 {strides = array<i32>} : memref<16x1024xbf16, #tpu.memory_space<vmem>>, vector<4x64xbf16>,
    %c71_724 = arith.constant 71 : index
    %c0_725 = arith.constant 0 : index
    %673 = tpu.strided_load %arg10[%c71_724, %c0_725] {strides = array<i32: 2, 1>} : memref<100x64xf32, #tpu.memory_space<vmem>>, vector<4x64xf32>
    %674 = arith.truncf %673 : vector<4x64xf32> to vector<4x64xbf16>
    %c8_726 = arith.constant 8 : index
    %c832_727 = arith.constant 832 : index
    %675 = vector.load %arg11[%c8_726, %c832_727] : memref<16x1024xbf16, #tpu.memory_space<vmem>>, vector<4x64xbf16>
    tpu.vector_store %arg11[%c8_726, %c832_727], %674 {strides = array<i32>} : memref<16x1024xbf16, #tpu.memory_space<vmem>>, vector<4x64xbf16>,
    %c72_728 = arith.constant 72 : index
    %c0_729 = arith.constant 0 : index
    %676 = tpu.strided_load %arg10[%c72_728, %c0_729] {strides = array<i32: 2, 1>} : memref<100x64xf32, #tpu.memory_space<vmem>>, vector<4x64xf32>
    %677 = arith.truncf %676 : vector<4x64xf32> to vector<4x64xbf16>
    %c8_730 = arith.constant 8 : index
    %c896_731 = arith.constant 896 : index
    %678 = vector.load %arg11[%c8_730, %c896_731] : memref<16x1024xbf16, #tpu.memory_space<vmem>>, vector<4x64xbf16>
    tpu.vector_store %arg11[%c8_730, %c896_731], %677 {strides = array<i32>} : memref<16x1024xbf16, #tpu.memory_space<vmem>>, vector<4x64xbf16>,
    %c73_732 = arith.constant 73 : index
    %c0_733 = arith.constant 0 : index
    %679 = tpu.strided_load %arg10[%c73_732, %c0_733] {strides = array<i32: 2, 1>} : memref<100x64xf32, #tpu.memory_space<vmem>>, vector<4x64xf32>
    %680 = arith.truncf %679 : vector<4x64xf32> to vector<4x64xbf16>
    %c8_734 = arith.constant 8 : index
    %c960_735 = arith.constant 960 : index
    %681 = vector.load %arg11[%c8_734, %c960_735] : memref<16x1024xbf16, #tpu.memory_space<vmem>>, vector<4x64xbf16>
    tpu.vector_store %arg11[%c8_734, %c960_735], %680 {strides = array<i32>} : memref<16x1024xbf16, #tpu.memory_space<vmem>>, vector<4x64xbf16>,
    %c60_736 = arith.constant 60 : index
    %c0_737 = arith.constant 0 : index
    %682 = tpu.strided_load %arg10[%c60_736, %c0_737] {strides = array<i32: 2, 1>} : memref<100x64xf32, #tpu.memory_space<vmem>>, vector<4x64xf32>
    %683 = arith.truncf %682 : vector<4x64xf32> to vector<4x64xbf16>
    %c12_738 = arith.constant 12 : index
    %c0_739 = arith.constant 0 : index
    %684 = vector.load %arg11[%c12_738, %c0_739] : memref<16x1024xbf16, #tpu.memory_space<vmem>>, vector<4x64xbf16>
    tpu.vector_store %arg11[%c12_738, %c0_739], %683 {strides = array<i32>} : memref<16x1024xbf16, #tpu.memory_space<vmem>>, vector<4x64xbf16>,
    %c61_740 = arith.constant 61 : index
    %c0_741 = arith.constant 0 : index
    %685 = tpu.strided_load %arg10[%c61_740, %c0_741] {strides = array<i32: 2, 1>} : memref<100x64xf32, #tpu.memory_space<vmem>>, vector<4x64xf32>
    %686 = arith.truncf %685 : vector<4x64xf32> to vector<4x64xbf16>
    %c12_742 = arith.constant 12 : index
    %c64_743 = arith.constant 64 : index
    %687 = vector.load %arg11[%c12_742, %c64_743] : memref<16x1024xbf16, #tpu.memory_space<vmem>>, vector<4x64xbf16>
    tpu.vector_store %arg11[%c12_742, %c64_743], %686 {strides = array<i32>} : memref<16x1024xbf16, #tpu.memory_space<vmem>>, vector<4x64xbf16>,
    %c62_744 = arith.constant 62 : index
    %c0_745 = arith.constant 0 : index
    %688 = tpu.strided_load %arg10[%c62_744, %c0_745] {strides = array<i32: 2, 1>} : memref<100x64xf32, #tpu.memory_space<vmem>>, vector<4x64xf32>
    %689 = arith.truncf %688 : vector<4x64xf32> to vector<4x64xbf16>
    %c12_746 = arith.constant 12 : index
    %c128_747 = arith.constant 128 : index
    %690 = vector.load %arg11[%c12_746, %c128_747] : memref<16x1024xbf16, #tpu.memory_space<vmem>>, vector<4x64xbf16>
    tpu.vector_store %arg11[%c12_746, %c128_747], %689 {strides = array<i32>} : memref<16x1024xbf16, #tpu.memory_space<vmem>>, vector<4x64xbf16>,
    %c63_748 = arith.constant 63 : index
    %c0_749 = arith.constant 0 : index
    %691 = tpu.strided_load %arg10[%c63_748, %c0_749] {strides = array<i32: 2, 1>} : memref<100x64xf32, #tpu.memory_space<vmem>>, vector<4x64xf32>
    %692 = arith.truncf %691 : vector<4x64xf32> to vector<4x64xbf16>
    %c12_750 = arith.constant 12 : index
    %c192_751 = arith.constant 192 : index
    %693 = vector.load %arg11[%c12_750, %c192_751] : memref<16x1024xbf16, #tpu.memory_space<vmem>>, vector<4x64xbf16>
    tpu.vector_store %arg11[%c12_750, %c192_751], %692 {strides = array<i32>} : memref<16x1024xbf16, #tpu.memory_space<vmem>>, vector<4x64xbf16>,
    %c70_752 = arith.constant 70 : index
    %c0_753 = arith.constant 0 : index
    %694 = tpu.strided_load %arg10[%c70_752, %c0_753] {strides = array<i32: 2, 1>} : memref<100x64xf32, #tpu.memory_space<vmem>>, vector<4x64xf32>
    %695 = arith.truncf %694 : vector<4x64xf32> to vector<4x64xbf16>
    %c12_754 = arith.constant 12 : index
    %c256_755 = arith.constant 256 : index
    %696 = vector.load %arg11[%c12_754, %c256_755] : memref<16x1024xbf16, #tpu.memory_space<vmem>>, vector<4x64xbf16>
    tpu.vector_store %arg11[%c12_754, %c256_755], %695 {strides = array<i32>} : memref<16x1024xbf16, #tpu.memory_space<vmem>>, vector<4x64xbf16>,
    %c71_756 = arith.constant 71 : index
    %c0_757 = arith.constant 0 : index
    %697 = tpu.strided_load %arg10[%c71_756, %c0_757] {strides = array<i32: 2, 1>} : memref<100x64xf32, #tpu.memory_space<vmem>>, vector<4x64xf32>
    %698 = arith.truncf %697 : vector<4x64xf32> to vector<4x64xbf16>
    %c12_758 = arith.constant 12 : index
    %c320_759 = arith.constant 320 : index
    %699 = vector.load %arg11[%c12_758, %c320_759] : memref<16x1024xbf16, #tpu.memory_space<vmem>>, vector<4x64xbf16>
    tpu.vector_store %arg11[%c12_758, %c320_759], %698 {strides = array<i32>} : memref<16x1024xbf16, #tpu.memory_space<vmem>>, vector<4x64xbf16>,
    %c72_760 = arith.constant 72 : index
    %c0_761 = arith.constant 0 : index
    %700 = tpu.strided_load %arg10[%c72_760, %c0_761] {strides = array<i32: 2, 1>} : memref<100x64xf32, #tpu.memory_space<vmem>>, vector<4x64xf32>
    %701 = arith.truncf %700 : vector<4x64xf32> to vector<4x64xbf16>
    %c12_762 = arith.constant 12 : index
    %c384_763 = arith.constant 384 : index
    %702 = vector.load %arg11[%c12_762, %c384_763] : memref<16x1024xbf16, #tpu.memory_space<vmem>>, vector<4x64xbf16>
    tpu.vector_store %arg11[%c12_762, %c384_763], %701 {strides = array<i32>} : memref<16x1024xbf16, #tpu.memory_space<vmem>>, vector<4x64xbf16>,
    %c73_764 = arith.constant 73 : index
    %c0_765 = arith.constant 0 : index
    %703 = tpu.strided_load %arg10[%c73_764, %c0_765] {strides = array<i32: 2, 1>} : memref<100x64xf32, #tpu.memory_space<vmem>>, vector<4x64xf32>
    %704 = arith.truncf %703 : vector<4x64xf32> to vector<4x64xbf16>
    %c12_766 = arith.constant 12 : index
    %c448_767 = arith.constant 448 : index
    %705 = vector.load %arg11[%c12_766, %c448_767] : memref<16x1024xbf16, #tpu.memory_space<vmem>>, vector<4x64xbf16>
    tpu.vector_store %arg11[%c12_766, %c448_767], %704 {strides = array<i32>} : memref<16x1024xbf16, #tpu.memory_space<vmem>>, vector<4x64xbf16>,
    %c80_768 = arith.constant 80 : index
    %c0_769 = arith.constant 0 : index
    %706 = tpu.strided_load %arg10[%c80_768, %c0_769] {strides = array<i32: 2, 1>} : memref<100x64xf32, #tpu.memory_space<vmem>>, vector<4x64xf32>
    %707 = arith.truncf %706 : vector<4x64xf32> to vector<4x64xbf16>
    %c12_770 = arith.constant 12 : index
    %c512_771 = arith.constant 512 : index
    %708 = vector.load %arg11[%c12_770, %c512_771] : memref<16x1024xbf16, #tpu.memory_space<vmem>>, vector<4x64xbf16>
    tpu.vector_store %arg11[%c12_770, %c512_771], %707 {strides = array<i32>} : memref<16x1024xbf16, #tpu.memory_space<vmem>>, vector<4x64xbf16>,
    %c81_772 = arith.constant 81 : index
    %c0_773 = arith.constant 0 : index
    %709 = tpu.strided_load %arg10[%c81_772, %c0_773] {strides = array<i32: 2, 1>} : memref<100x64xf32, #tpu.memory_space<vmem>>, vector<4x64xf32>
    %710 = arith.truncf %709 : vector<4x64xf32> to vector<4x64xbf16>
    %c12_774 = arith.constant 12 : index
    %c576_775 = arith.constant 576 : index
    %711 = vector.load %arg11[%c12_774, %c576_775] : memref<16x1024xbf16, #tpu.memory_space<vmem>>, vector<4x64xbf16>
    tpu.vector_store %arg11[%c12_774, %c576_775], %710 {strides = array<i32>} : memref<16x1024xbf16, #tpu.memory_space<vmem>>, vector<4x64xbf16>,
    %c82 = arith.constant 82 : index
    %c0_776 = arith.constant 0 : index
    %712 = tpu.strided_load %arg10[%c82, %c0_776] {strides = array<i32: 2, 1>} : memref<100x64xf32, #tpu.memory_space<vmem>>, vector<4x64xf32>
    %713 = arith.truncf %712 : vector<4x64xf32> to vector<4x64xbf16>
    %c12_777 = arith.constant 12 : index
    %c640_778 = arith.constant 640 : index
    %714 = vector.load %arg11[%c12_777, %c640_778] : memref<16x1024xbf16, #tpu.memory_space<vmem>>, vector<4x64xbf16>
    tpu.vector_store %arg11[%c12_777, %c640_778], %713 {strides = array<i32>} : memref<16x1024xbf16, #tpu.memory_space<vmem>>, vector<4x64xbf16>,
    %c83 = arith.constant 83 : index
    %c0_779 = arith.constant 0 : index
    %715 = tpu.strided_load %arg10[%c83, %c0_779] {strides = array<i32: 2, 1>} : memref<100x64xf32, #tpu.memory_space<vmem>>, vector<4x64xf32>
    %716 = arith.truncf %715 : vector<4x64xf32> to vector<4x64xbf16>
    %c12_780 = arith.constant 12 : index
    %c704_781 = arith.constant 704 : index
    %717 = vector.load %arg11[%c12_780, %c704_781] : memref<16x1024xbf16, #tpu.memory_space<vmem>>, vector<4x64xbf16>
    tpu.vector_store %arg11[%c12_780, %c704_781], %716 {strides = array<i32>} : memref<16x1024xbf16, #tpu.memory_space<vmem>>, vector<4x64xbf16>,
    %c90_782 = arith.constant 90 : index
    %c0_783 = arith.constant 0 : index
    %718 = tpu.strided_load %arg10[%c90_782, %c0_783] {strides = array<i32: 2, 1>} : memref<100x64xf32, #tpu.memory_space<vmem>>, vector<4x64xf32>
    %719 = arith.truncf %718 : vector<4x64xf32> to vector<4x64xbf16>
    %c12_784 = arith.constant 12 : index
    %c768_785 = arith.constant 768 : index
    %720 = vector.load %arg11[%c12_784, %c768_785] : memref<16x1024xbf16, #tpu.memory_space<vmem>>, vector<4x64xbf16>
    tpu.vector_store %arg11[%c12_784, %c768_785], %719 {strides = array<i32>} : memref<16x1024xbf16, #tpu.memory_space<vmem>>, vector<4x64xbf16>,
    %c91_786 = arith.constant 91 : index
    %c0_787 = arith.constant 0 : index
    %721 = tpu.strided_load %arg10[%c91_786, %c0_787] {strides = array<i32: 2, 1>} : memref<100x64xf32, #tpu.memory_space<vmem>>, vector<4x64xf32>
    %722 = arith.truncf %721 : vector<4x64xf32> to vector<4x64xbf16>
    %c12_788 = arith.constant 12 : index
    %c832_789 = arith.constant 832 : index
    %723 = vector.load %arg11[%c12_788, %c832_789] : memref<16x1024xbf16, #tpu.memory_space<vmem>>, vector<4x64xbf16>
    tpu.vector_store %arg11[%c12_788, %c832_789], %722 {strides = array<i32>} : memref<16x1024xbf16, #tpu.memory_space<vmem>>, vector<4x64xbf16>,
    %c92_790 = arith.constant 92 : index
    %c0_791 = arith.constant 0 : index
    %724 = tpu.strided_load %arg10[%c92_790, %c0_791] {strides = array<i32: 2, 1>} : memref<100x64xf32, #tpu.memory_space<vmem>>, vector<4x64xf32>
    %725 = arith.truncf %724 : vector<4x64xf32> to vector<4x64xbf16>
    %c12_792 = arith.constant 12 : index
    %c896_793 = arith.constant 896 : index
    %726 = vector.load %arg11[%c12_792, %c896_793] : memref<16x1024xbf16, #tpu.memory_space<vmem>>, vector<4x64xbf16>
    tpu.vector_store %arg11[%c12_792, %c896_793], %725 {strides = array<i32>} : memref<16x1024xbf16, #tpu.memory_space<vmem>>, vector<4x64xbf16>,
    %c93_794 = arith.constant 93 : index
    %c0_795 = arith.constant 0 : index
    %727 = tpu.strided_load %arg10[%c93_794, %c0_795] {strides = array<i32: 2, 1>} : memref<100x64xf32, #tpu.memory_space<vmem>>, vector<4x64xf32>
    %728 = arith.truncf %727 : vector<4x64xf32> to vector<4x64xbf16>
    %c12_796 = arith.constant 12 : index
    %c960_797 = arith.constant 960 : index
    %729 = vector.load %arg11[%c12_796, %c960_797] : memref<16x1024xbf16, #tpu.memory_space<vmem>>, vector<4x64xbf16>
    tpu.vector_store %arg11[%c12_796, %c960_797], %728 {strides = array<i32>} : memref<16x1024xbf16, #tpu.memory_space<vmem>>, vector<4x64xbf16>,
    %c0_798 = arith.constant 0 : index
    %c0_799 = arith.constant 0 : index
    %730 = vector.load %arg11[%c0_798, %c0_799] : memref<16x1024xbf16, #tpu.memory_space<vmem>>, vector<16x1024xbf16>
    %c0_800 = arith.constant 0 : index
    %c0_801 = arith.constant 0 : index
    %731 = vector.load %arg4[%c0_800, %c0_801] : memref<1024x128xbf16, #tpu.memory_space<vmem>>, vector<1024x128xbf16>
    %cst_802 = arith.constant dense<0.000000e+00> : vector<16x128xf32>
    %732 = tpu.matmul %730, %731, %cst_802 {dimension_numbers = #tpu.dot_dimension_numbers<[1], [0], [0], [1], [0, 0, 1, 1], [], []>} : vector<16x1024xbf16>, vector<1024x128xbf16>, vector<16x128xf32> -> vector<16x128xf32>
    %c0_803 = arith.constant 0 : index
    %c0_804 = arith.constant 0 : index
    %733 = vector.load %arg5[%c0_803, %c0_804] : memref<1x128xf32, #tpu.memory_space<vmem>>, vector<1x128xf32>
    %734 = vector.broadcast %733 : vector<1x128xf32> to vector<16x128xf32>
    %735 = arith.addf %732, %734 : vector<16x128xf32>
    %cst_805 = arith.constant 0.000000e+00 : f32
    %736 = vector.broadcast %cst_805 : f32 to vector<16x128xf32>
    %737 = arith.maximumf %735, %736 : vector<16x128xf32>
    %cst_806 = arith.constant 0.000000e+00 : f32
    %738 = vector.broadcast %cst_806 : f32 to vector<36x128xf32>
    %c0_807 = arith.constant 0 : index
    %c0_808 = arith.constant 0 : index
    %739 = vector.load %arg12[%c0_807, %c0_808] : memref<36x128xf32, #tpu.memory_space<vmem>>, vector<36x128xf32>
    tpu.vector_store %arg12[%c0_807, %c0_808], %738 {strides = array<i32>} : memref<36x128xf32, #tpu.memory_space<vmem>>, vector<36x128xf32>,
    %740 = vector.extract_strided_slice %737 {offsets = [0, 0], sizes = [4, 128], strides = [1, 1]} : vector<16x128xf32> to vector<4x128xf32>
    %c7 = arith.constant 7 : index
    %c0_809 = arith.constant 0 : index
    %741 = vector.load %arg12[%c7, %c0_809] : memref<36x128xf32, #tpu.memory_space<vmem>>, vector<4x128xf32>
    tpu.vector_store %arg12[%c7, %c0_809], %740 {strides = array<i32>} : memref<36x128xf32, #tpu.memory_space<vmem>>, vector<4x128xf32>,
    %742 = vector.extract_strided_slice %737 {offsets = [4, 0], sizes = [4, 128], strides = [1, 1]} : vector<16x128xf32> to vector<4x128xf32>
    %c13_810 = arith.constant 13 : index
    %c0_811 = arith.constant 0 : index
    %743 = vector.load %arg12[%c13_810, %c0_811] : memref<36x128xf32, #tpu.memory_space<vmem>>, vector<4x128xf32>
    tpu.vector_store %arg12[%c13_810, %c0_811], %742 {strides = array<i32>} : memref<36x128xf32, #tpu.memory_space<vmem>>, vector<4x128xf32>,
    %744 = vector.extract_strided_slice %737 {offsets = [8, 0], sizes = [4, 128], strides = [1, 1]} : vector<16x128xf32> to vector<4x128xf32>
    %c19_812 = arith.constant 19 : index
    %c0_813 = arith.constant 0 : index
    %745 = vector.load %arg12[%c19_812, %c0_813] : memref<36x128xf32, #tpu.memory_space<vmem>>, vector<4x128xf32>
    tpu.vector_store %arg12[%c19_812, %c0_813], %744 {strides = array<i32>} : memref<36x128xf32, #tpu.memory_space<vmem>>, vector<4x128xf32>,
    %746 = vector.extract_strided_slice %737 {offsets = [12, 0], sizes = [4, 128], strides = [1, 1]} : vector<16x128xf32> to vector<4x128xf32>
    %c25 = arith.constant 25 : index
    %c0_814 = arith.constant 0 : index
    %747 = vector.load %arg12[%c25, %c0_814] : memref<36x128xf32, #tpu.memory_space<vmem>>, vector<4x128xf32>
    tpu.vector_store %arg12[%c25, %c0_814], %746 {strides = array<i32>} : memref<36x128xf32, #tpu.memory_space<vmem>>, vector<4x128xf32>,
    %c0_815 = arith.constant 0 : index
    %c0_816 = arith.constant 0 : index
    %748 = tpu.strided_load %arg12[%c0_815, %c0_816] {strides = array<i32: 2, 1>} : memref<36x128xf32, #tpu.memory_space<vmem>>, vector<2x128xf32>
    %749 = arith.truncf %748 : vector<2x128xf32> to vector<2x128xbf16>
    %c0_817 = arith.constant 0 : index
    %c0_818 = arith.constant 0 : index
    %750 = vector.load %arg13[%c0_817, %c0_818] : memref<4x2048xbf16, #tpu.memory_space<vmem>>, vector<2x128xbf16>
    tpu.vector_store %arg13[%c0_817, %c0_818], %749 {strides = array<i32>} : memref<4x2048xbf16, #tpu.memory_space<vmem>>, vector<2x128xbf16>,
    %c1_819 = arith.constant 1 : index
    %c0_820 = arith.constant 0 : index
    %751 = tpu.strided_load %arg12[%c1_819, %c0_820] {strides = array<i32: 2, 1>} : memref<36x128xf32, #tpu.memory_space<vmem>>, vector<2x128xf32>
    %752 = arith.truncf %751 : vector<2x128xf32> to vector<2x128xbf16>
    %c0_821 = arith.constant 0 : index
    %c128_822 = arith.constant 128 : index
    %753 = vector.load %arg13[%c0_821, %c128_822] : memref<4x2048xbf16, #tpu.memory_space<vmem>>, vector<2x128xbf16>
    tpu.vector_store %arg13[%c0_821, %c128_822], %752 {strides = array<i32>} : memref<4x2048xbf16, #tpu.memory_space<vmem>>, vector<2x128xbf16>,
    %c2_823 = arith.constant 2 : index
    %c0_824 = arith.constant 0 : index
    %754 = tpu.strided_load %arg12[%c2_823, %c0_824] {strides = array<i32: 2, 1>} : memref<36x128xf32, #tpu.memory_space<vmem>>, vector<2x128xf32>
    %755 = arith.truncf %754 : vector<2x128xf32> to vector<2x128xbf16>
    %c0_825 = arith.constant 0 : index
    %c256_826 = arith.constant 256 : index
    %756 = vector.load %arg13[%c0_825, %c256_826] : memref<4x2048xbf16, #tpu.memory_space<vmem>>, vector<2x128xbf16>
    tpu.vector_store %arg13[%c0_825, %c256_826], %755 {strides = array<i32>} : memref<4x2048xbf16, #tpu.memory_space<vmem>>, vector<2x128xbf16>,
    %c3_827 = arith.constant 3 : index
    %c0_828 = arith.constant 0 : index
    %757 = tpu.strided_load %arg12[%c3_827, %c0_828] {strides = array<i32: 2, 1>} : memref<36x128xf32, #tpu.memory_space<vmem>>, vector<2x128xf32>
    %758 = arith.truncf %757 : vector<2x128xf32> to vector<2x128xbf16>
    %c0_829 = arith.constant 0 : index
    %c384_830 = arith.constant 384 : index
    %759 = vector.load %arg13[%c0_829, %c384_830] : memref<4x2048xbf16, #tpu.memory_space<vmem>>, vector<2x128xbf16>
    tpu.vector_store %arg13[%c0_829, %c384_830], %758 {strides = array<i32>} : memref<4x2048xbf16, #tpu.memory_space<vmem>>, vector<2x128xbf16>,
    %c6 = arith.constant 6 : index
    %c0_831 = arith.constant 0 : index
    %760 = tpu.strided_load %arg12[%c6, %c0_831] {strides = array<i32: 2, 1>} : memref<36x128xf32, #tpu.memory_space<vmem>>, vector<2x128xf32>
    %761 = arith.truncf %760 : vector<2x128xf32> to vector<2x128xbf16>
    %c0_832 = arith.constant 0 : index
    %c512_833 = arith.constant 512 : index
    %762 = vector.load %arg13[%c0_832, %c512_833] : memref<4x2048xbf16, #tpu.memory_space<vmem>>, vector<2x128xbf16>
    tpu.vector_store %arg13[%c0_832, %c512_833], %761 {strides = array<i32>} : memref<4x2048xbf16, #tpu.memory_space<vmem>>, vector<2x128xbf16>,
    %c7_834 = arith.constant 7 : index
    %c0_835 = arith.constant 0 : index
    %763 = tpu.strided_load %arg12[%c7_834, %c0_835] {strides = array<i32: 2, 1>} : memref<36x128xf32, #tpu.memory_space<vmem>>, vector<2x128xf32>
    %764 = arith.truncf %763 : vector<2x128xf32> to vector<2x128xbf16>
    %c0_836 = arith.constant 0 : index
    %c640_837 = arith.constant 640 : index
    %765 = vector.load %arg13[%c0_836, %c640_837] : memref<4x2048xbf16, #tpu.memory_space<vmem>>, vector<2x128xbf16>
    tpu.vector_store %arg13[%c0_836, %c640_837], %764 {strides = array<i32>} : memref<4x2048xbf16, #tpu.memory_space<vmem>>, vector<2x128xbf16>,
    %c8_838 = arith.constant 8 : index
    %c0_839 = arith.constant 0 : index
    %766 = tpu.strided_load %arg12[%c8_838, %c0_839] {strides = array<i32: 2, 1>} : memref<36x128xf32, #tpu.memory_space<vmem>>, vector<2x128xf32>
    %767 = arith.truncf %766 : vector<2x128xf32> to vector<2x128xbf16>
    %c0_840 = arith.constant 0 : index
    %c768_841 = arith.constant 768 : index
    %768 = vector.load %arg13[%c0_840, %c768_841] : memref<4x2048xbf16, #tpu.memory_space<vmem>>, vector<2x128xbf16>
    tpu.vector_store %arg13[%c0_840, %c768_841], %767 {strides = array<i32>} : memref<4x2048xbf16, #tpu.memory_space<vmem>>, vector<2x128xbf16>,
    %c9 = arith.constant 9 : index
    %c0_842 = arith.constant 0 : index
    %769 = tpu.strided_load %arg12[%c9, %c0_842] {strides = array<i32: 2, 1>} : memref<36x128xf32, #tpu.memory_space<vmem>>, vector<2x128xf32>
    %770 = arith.truncf %769 : vector<2x128xf32> to vector<2x128xbf16>
    %c0_843 = arith.constant 0 : index
    %c896_844 = arith.constant 896 : index
    %771 = vector.load %arg13[%c0_843, %c896_844] : memref<4x2048xbf16, #tpu.memory_space<vmem>>, vector<2x128xbf16>
    tpu.vector_store %arg13[%c0_843, %c896_844], %770 {strides = array<i32>} : memref<4x2048xbf16, #tpu.memory_space<vmem>>, vector<2x128xbf16>,
    %c12_845 = arith.constant 12 : index
    %c0_846 = arith.constant 0 : index
    %772 = tpu.strided_load %arg12[%c12_845, %c0_846] {strides = array<i32: 2, 1>} : memref<36x128xf32, #tpu.memory_space<vmem>>, vector<2x128xf32>
    %773 = arith.truncf %772 : vector<2x128xf32> to vector<2x128xbf16>
    %c0_847 = arith.constant 0 : index
    %c1024 = arith.constant 1024 : index
    %774 = vector.load %arg13[%c0_847, %c1024] : memref<4x2048xbf16, #tpu.memory_space<vmem>>, vector<2x128xbf16>
    tpu.vector_store %arg13[%c0_847, %c1024], %773 {strides = array<i32>} : memref<4x2048xbf16, #tpu.memory_space<vmem>>, vector<2x128xbf16>,
    %c13_848 = arith.constant 13 : index
    %c0_849 = arith.constant 0 : index
    %775 = tpu.strided_load %arg12[%c13_848, %c0_849] {strides = array<i32: 2, 1>} : memref<36x128xf32, #tpu.memory_space<vmem>>, vector<2x128xf32>
    %776 = arith.truncf %775 : vector<2x128xf32> to vector<2x128xbf16>
    %c0_850 = arith.constant 0 : index
    %c1152 = arith.constant 1152 : index
    %777 = vector.load %arg13[%c0_850, %c1152] : memref<4x2048xbf16, #tpu.memory_space<vmem>>, vector<2x128xbf16>
    tpu.vector_store %arg13[%c0_850, %c1152], %776 {strides = array<i32>} : memref<4x2048xbf16, #tpu.memory_space<vmem>>, vector<2x128xbf16>,
    %c14 = arith.constant 14 : index
    %c0_851 = arith.constant 0 : index
    %778 = tpu.strided_load %arg12[%c14, %c0_851] {strides = array<i32: 2, 1>} : memref<36x128xf32, #tpu.memory_space<vmem>>, vector<2x128xf32>
    %779 = arith.truncf %778 : vector<2x128xf32> to vector<2x128xbf16>
    %c0_852 = arith.constant 0 : index
    %c1280 = arith.constant 1280 : index
    %780 = vector.load %arg13[%c0_852, %c1280] : memref<4x2048xbf16, #tpu.memory_space<vmem>>, vector<2x128xbf16>
    tpu.vector_store %arg13[%c0_852, %c1280], %779 {strides = array<i32>} : memref<4x2048xbf16, #tpu.memory_space<vmem>>, vector<2x128xbf16>,
    %c15 = arith.constant 15 : index
    %c0_853 = arith.constant 0 : index
    %781 = tpu.strided_load %arg12[%c15, %c0_853] {strides = array<i32: 2, 1>} : memref<36x128xf32, #tpu.memory_space<vmem>>, vector<2x128xf32>
    %782 = arith.truncf %781 : vector<2x128xf32> to vector<2x128xbf16>
    %c0_854 = arith.constant 0 : index
    %c1408 = arith.constant 1408 : index
    %783 = vector.load %arg13[%c0_854, %c1408] : memref<4x2048xbf16, #tpu.memory_space<vmem>>, vector<2x128xbf16>
    tpu.vector_store %arg13[%c0_854, %c1408], %782 {strides = array<i32>} : memref<4x2048xbf16, #tpu.memory_space<vmem>>, vector<2x128xbf16>,
    %c18_855 = arith.constant 18 : index
    %c0_856 = arith.constant 0 : index
    %784 = tpu.strided_load %arg12[%c18_855, %c0_856] {strides = array<i32: 2, 1>} : memref<36x128xf32, #tpu.memory_space<vmem>>, vector<2x128xf32>
    %785 = arith.truncf %784 : vector<2x128xf32> to vector<2x128xbf16>
    %c0_857 = arith.constant 0 : index
    %c1536 = arith.constant 1536 : index
    %786 = vector.load %arg13[%c0_857, %c1536] : memref<4x2048xbf16, #tpu.memory_space<vmem>>, vector<2x128xbf16>
    tpu.vector_store %arg13[%c0_857, %c1536], %785 {strides = array<i32>} : memref<4x2048xbf16, #tpu.memory_space<vmem>>, vector<2x128xbf16>,
    %c19_858 = arith.constant 19 : index
    %c0_859 = arith.constant 0 : index
    %787 = tpu.strided_load %arg12[%c19_858, %c0_859] {strides = array<i32: 2, 1>} : memref<36x128xf32, #tpu.memory_space<vmem>>, vector<2x128xf32>
    %788 = arith.truncf %787 : vector<2x128xf32> to vector<2x128xbf16>
    %c0_860 = arith.constant 0 : index
    %c1664 = arith.constant 1664 : index
    %789 = vector.load %arg13[%c0_860, %c1664] : memref<4x2048xbf16, #tpu.memory_space<vmem>>, vector<2x128xbf16>
    tpu.vector_store %arg13[%c0_860, %c1664], %788 {strides = array<i32>} : memref<4x2048xbf16, #tpu.memory_space<vmem>>, vector<2x128xbf16>,
    %c20_861 = arith.constant 20 : index
    %c0_862 = arith.constant 0 : index
    %790 = tpu.strided_load %arg12[%c20_861, %c0_862] {strides = array<i32: 2, 1>} : memref<36x128xf32, #tpu.memory_space<vmem>>, vector<2x128xf32>
    %791 = arith.truncf %790 : vector<2x128xf32> to vector<2x128xbf16>
    %c0_863 = arith.constant 0 : index
    %c1792 = arith.constant 1792 : index
    %792 = vector.load %arg13[%c0_863, %c1792] : memref<4x2048xbf16, #tpu.memory_space<vmem>>, vector<2x128xbf16>
    tpu.vector_store %arg13[%c0_863, %c1792], %791 {strides = array<i32>} : memref<4x2048xbf16, #tpu.memory_space<vmem>>, vector<2x128xbf16>,
    %c21_864 = arith.constant 21 : index
    %c0_865 = arith.constant 0 : index
    %793 = tpu.strided_load %arg12[%c21_864, %c0_865] {strides = array<i32: 2, 1>} : memref<36x128xf32, #tpu.memory_space<vmem>>, vector<2x128xf32>
    %794 = arith.truncf %793 : vector<2x128xf32> to vector<2x128xbf16>
    %c0_866 = arith.constant 0 : index
    %c1920 = arith.constant 1920 : index
    %795 = vector.load %arg13[%c0_866, %c1920] : memref<4x2048xbf16, #tpu.memory_space<vmem>>, vector<2x128xbf16>
    tpu.vector_store %arg13[%c0_866, %c1920], %794 {strides = array<i32>} : memref<4x2048xbf16, #tpu.memory_space<vmem>>, vector<2x128xbf16>,
    %c12_867 = arith.constant 12 : index
    %c0_868 = arith.constant 0 : index
    %796 = tpu.strided_load %arg12[%c12_867, %c0_868] {strides = array<i32: 2, 1>} : memref<36x128xf32, #tpu.memory_space<vmem>>, vector<2x128xf32>
    %797 = arith.truncf %796 : vector<2x128xf32> to vector<2x128xbf16>
    %c2_869 = arith.constant 2 : index
    %c0_870 = arith.constant 0 : index
    %798 = vector.load %arg13[%c2_869, %c0_870] : memref<4x2048xbf16, #tpu.memory_space<vmem>>, vector<2x128xbf16>
    tpu.vector_store %arg13[%c2_869, %c0_870], %797 {strides = array<i32>} : memref<4x2048xbf16, #tpu.memory_space<vmem>>, vector<2x128xbf16>,
    %c13_871 = arith.constant 13 : index
    %c0_872 = arith.constant 0 : index
    %799 = tpu.strided_load %arg12[%c13_871, %c0_872] {strides = array<i32: 2, 1>} : memref<36x128xf32, #tpu.memory_space<vmem>>, vector<2x128xf32>
    %800 = arith.truncf %799 : vector<2x128xf32> to vector<2x128xbf16>
    %c2_873 = arith.constant 2 : index
    %c128_874 = arith.constant 128 : index
    %801 = vector.load %arg13[%c2_873, %c128_874] : memref<4x2048xbf16, #tpu.memory_space<vmem>>, vector<2x128xbf16>
    tpu.vector_store %arg13[%c2_873, %c128_874], %800 {strides = array<i32>} : memref<4x2048xbf16, #tpu.memory_space<vmem>>, vector<2x128xbf16>,
    %c14_875 = arith.constant 14 : index
    %c0_876 = arith.constant 0 : index
    %802 = tpu.strided_load %arg12[%c14_875, %c0_876] {strides = array<i32: 2, 1>} : memref<36x128xf32, #tpu.memory_space<vmem>>, vector<2x128xf32>
    %803 = arith.truncf %802 : vector<2x128xf32> to vector<2x128xbf16>
    %c2_877 = arith.constant 2 : index
    %c256_878 = arith.constant 256 : index
    %804 = vector.load %arg13[%c2_877, %c256_878] : memref<4x2048xbf16, #tpu.memory_space<vmem>>, vector<2x128xbf16>
    tpu.vector_store %arg13[%c2_877, %c256_878], %803 {strides = array<i32>} : memref<4x2048xbf16, #tpu.memory_space<vmem>>, vector<2x128xbf16>,
    %c15_879 = arith.constant 15 : index
    %c0_880 = arith.constant 0 : index
    %805 = tpu.strided_load %arg12[%c15_879, %c0_880] {strides = array<i32: 2, 1>} : memref<36x128xf32, #tpu.memory_space<vmem>>, vector<2x128xf32>
    %806 = arith.truncf %805 : vector<2x128xf32> to vector<2x128xbf16>
    %c2_881 = arith.constant 2 : index
    %c384_882 = arith.constant 384 : index
    %807 = vector.load %arg13[%c2_881, %c384_882] : memref<4x2048xbf16, #tpu.memory_space<vmem>>, vector<2x128xbf16>
    tpu.vector_store %arg13[%c2_881, %c384_882], %806 {strides = array<i32>} : memref<4x2048xbf16, #tpu.memory_space<vmem>>, vector<2x128xbf16>,
    %c18_883 = arith.constant 18 : index
    %c0_884 = arith.constant 0 : index
    %808 = tpu.strided_load %arg12[%c18_883, %c0_884] {strides = array<i32: 2, 1>} : memref<36x128xf32, #tpu.memory_space<vmem>>, vector<2x128xf32>
    %809 = arith.truncf %808 : vector<2x128xf32> to vector<2x128xbf16>
    %c2_885 = arith.constant 2 : index
    %c512_886 = arith.constant 512 : index
    %810 = vector.load %arg13[%c2_885, %c512_886] : memref<4x2048xbf16, #tpu.memory_space<vmem>>, vector<2x128xbf16>
    tpu.vector_store %arg13[%c2_885, %c512_886], %809 {strides = array<i32>} : memref<4x2048xbf16, #tpu.memory_space<vmem>>, vector<2x128xbf16>,
    %c19_887 = arith.constant 19 : index
    %c0_888 = arith.constant 0 : index
    %811 = tpu.strided_load %arg12[%c19_887, %c0_888] {strides = array<i32: 2, 1>} : memref<36x128xf32, #tpu.memory_space<vmem>>, vector<2x128xf32>
    %812 = arith.truncf %811 : vector<2x128xf32> to vector<2x128xbf16>
    %c2_889 = arith.constant 2 : index
    %c640_890 = arith.constant 640 : index
    %813 = vector.load %arg13[%c2_889, %c640_890] : memref<4x2048xbf16, #tpu.memory_space<vmem>>, vector<2x128xbf16>
    tpu.vector_store %arg13[%c2_889, %c640_890], %812 {strides = array<i32>} : memref<4x2048xbf16, #tpu.memory_space<vmem>>, vector<2x128xbf16>,
    %c20_891 = arith.constant 20 : index
    %c0_892 = arith.constant 0 : index
    %814 = tpu.strided_load %arg12[%c20_891, %c0_892] {strides = array<i32: 2, 1>} : memref<36x128xf32, #tpu.memory_space<vmem>>, vector<2x128xf32>
    %815 = arith.truncf %814 : vector<2x128xf32> to vector<2x128xbf16>
    %c2_893 = arith.constant 2 : index
    %c768_894 = arith.constant 768 : index
    %816 = vector.load %arg13[%c2_893, %c768_894] : memref<4x2048xbf16, #tpu.memory_space<vmem>>, vector<2x128xbf16>
    tpu.vector_store %arg13[%c2_893, %c768_894], %815 {strides = array<i32>} : memref<4x2048xbf16, #tpu.memory_space<vmem>>, vector<2x128xbf16>,
    %c21_895 = arith.constant 21 : index
    %c0_896 = arith.constant 0 : index
    %817 = tpu.strided_load %arg12[%c21_895, %c0_896] {strides = array<i32: 2, 1>} : memref<36x128xf32, #tpu.memory_space<vmem>>, vector<2x128xf32>
    %818 = arith.truncf %817 : vector<2x128xf32> to vector<2x128xbf16>
    %c2_897 = arith.constant 2 : index
    %c896_898 = arith.constant 896 : index
    %819 = vector.load %arg13[%c2_897, %c896_898] : memref<4x2048xbf16, #tpu.memory_space<vmem>>, vector<2x128xbf16>
    tpu.vector_store %arg13[%c2_897, %c896_898], %818 {strides = array<i32>} : memref<4x2048xbf16, #tpu.memory_space<vmem>>, vector<2x128xbf16>,
    %c24_899 = arith.constant 24 : index
    %c0_900 = arith.constant 0 : index
    %820 = tpu.strided_load %arg12[%c24_899, %c0_900] {strides = array<i32: 2, 1>} : memref<36x128xf32, #tpu.memory_space<vmem>>, vector<2x128xf32>
    %821 = arith.truncf %820 : vector<2x128xf32> to vector<2x128xbf16>
    %c2_901 = arith.constant 2 : index
    %c1024_902 = arith.constant 1024 : index
    %822 = vector.load %arg13[%c2_901, %c1024_902] : memref<4x2048xbf16, #tpu.memory_space<vmem>>, vector<2x128xbf16>
    tpu.vector_store %arg13[%c2_901, %c1024_902], %821 {strides = array<i32>} : memref<4x2048xbf16, #tpu.memory_space<vmem>>, vector<2x128xbf16>,
    %c25_903 = arith.constant 25 : index
    %c0_904 = arith.constant 0 : index
    %823 = tpu.strided_load %arg12[%c25_903, %c0_904] {strides = array<i32: 2, 1>} : memref<36x128xf32, #tpu.memory_space<vmem>>, vector<2x128xf32>
    %824 = arith.truncf %823 : vector<2x128xf32> to vector<2x128xbf16>
    %c2_905 = arith.constant 2 : index
    %c1152_906 = arith.constant 1152 : index
    %825 = vector.load %arg13[%c2_905, %c1152_906] : memref<4x2048xbf16, #tpu.memory_space<vmem>>, vector<2x128xbf16>
    tpu.vector_store %arg13[%c2_905, %c1152_906], %824 {strides = array<i32>} : memref<4x2048xbf16, #tpu.memory_space<vmem>>, vector<2x128xbf16>,
    %c26 = arith.constant 26 : index
    %c0_907 = arith.constant 0 : index
    %826 = tpu.strided_load %arg12[%c26, %c0_907] {strides = array<i32: 2, 1>} : memref<36x128xf32, #tpu.memory_space<vmem>>, vector<2x128xf32>
    %827 = arith.truncf %826 : vector<2x128xf32> to vector<2x128xbf16>
    %c2_908 = arith.constant 2 : index
    %c1280_909 = arith.constant 1280 : index
    %828 = vector.load %arg13[%c2_908, %c1280_909] : memref<4x2048xbf16, #tpu.memory_space<vmem>>, vector<2x128xbf16>
    tpu.vector_store %arg13[%c2_908, %c1280_909], %827 {strides = array<i32>} : memref<4x2048xbf16, #tpu.memory_space<vmem>>, vector<2x128xbf16>,
    %c27 = arith.constant 27 : index
    %c0_910 = arith.constant 0 : index
    %829 = tpu.strided_load %arg12[%c27, %c0_910] {strides = array<i32: 2, 1>} : memref<36x128xf32, #tpu.memory_space<vmem>>, vector<2x128xf32>
    %830 = arith.truncf %829 : vector<2x128xf32> to vector<2x128xbf16>
    %c2_911 = arith.constant 2 : index
    %c1408_912 = arith.constant 1408 : index
    %831 = vector.load %arg13[%c2_911, %c1408_912] : memref<4x2048xbf16, #tpu.memory_space<vmem>>, vector<2x128xbf16>
    tpu.vector_store %arg13[%c2_911, %c1408_912], %830 {strides = array<i32>} : memref<4x2048xbf16, #tpu.memory_space<vmem>>, vector<2x128xbf16>,
    %c30_913 = arith.constant 30 : index
    %c0_914 = arith.constant 0 : index
    %832 = tpu.strided_load %arg12[%c30_913, %c0_914] {strides = array<i32: 2, 1>} : memref<36x128xf32, #tpu.memory_space<vmem>>, vector<2x128xf32>
    %833 = arith.truncf %832 : vector<2x128xf32> to vector<2x128xbf16>
    %c2_915 = arith.constant 2 : index
    %c1536_916 = arith.constant 1536 : index
    %834 = vector.load %arg13[%c2_915, %c1536_916] : memref<4x2048xbf16, #tpu.memory_space<vmem>>, vector<2x128xbf16>
    tpu.vector_store %arg13[%c2_915, %c1536_916], %833 {strides = array<i32>} : memref<4x2048xbf16, #tpu.memory_space<vmem>>, vector<2x128xbf16>,
    %c31_917 = arith.constant 31 : index
    %c0_918 = arith.constant 0 : index
    %835 = tpu.strided_load %arg12[%c31_917, %c0_918] {strides = array<i32: 2, 1>} : memref<36x128xf32, #tpu.memory_space<vmem>>, vector<2x128xf32>
    %836 = arith.truncf %835 : vector<2x128xf32> to vector<2x128xbf16>
    %c2_919 = arith.constant 2 : index
    %c1664_920 = arith.constant 1664 : index
    %837 = vector.load %arg13[%c2_919, %c1664_920] : memref<4x2048xbf16, #tpu.memory_space<vmem>>, vector<2x128xbf16>
    tpu.vector_store %arg13[%c2_919, %c1664_920], %836 {strides = array<i32>} : memref<4x2048xbf16, #tpu.memory_space<vmem>>, vector<2x128xbf16>,
    %c32_921 = arith.constant 32 : index
    %c0_922 = arith.constant 0 : index
    %838 = tpu.strided_load %arg12[%c32_921, %c0_922] {strides = array<i32: 2, 1>} : memref<36x128xf32, #tpu.memory_space<vmem>>, vector<2x128xf32>
    %839 = arith.truncf %838 : vector<2x128xf32> to vector<2x128xbf16>
    %c2_923 = arith.constant 2 : index
    %c1792_924 = arith.constant 1792 : index
    %840 = vector.load %arg13[%c2_923, %c1792_924] : memref<4x2048xbf16, #tpu.memory_space<vmem>>, vector<2x128xbf16>
    tpu.vector_store %arg13[%c2_923, %c1792_924], %839 {strides = array<i32>} : memref<4x2048xbf16, #tpu.memory_space<vmem>>, vector<2x128xbf16>,
    %c33_925 = arith.constant 33 : index
    %c0_926 = arith.constant 0 : index
    %841 = tpu.strided_load %arg12[%c33_925, %c0_926] {strides = array<i32: 2, 1>} : memref<36x128xf32, #tpu.memory_space<vmem>>, vector<2x128xf32>
    %842 = arith.truncf %841 : vector<2x128xf32> to vector<2x128xbf16>
    %c2_927 = arith.constant 2 : index
    %c1920_928 = arith.constant 1920 : index
    %843 = vector.load %arg13[%c2_927, %c1920_928] : memref<4x2048xbf16, #tpu.memory_space<vmem>>, vector<2x128xbf16>
    tpu.vector_store %arg13[%c2_927, %c1920_928], %842 {strides = array<i32>} : memref<4x2048xbf16, #tpu.memory_space<vmem>>, vector<2x128xbf16>,
    %c0_929 = arith.constant 0 : index
    %c0_930 = arith.constant 0 : index
    %844 = vector.load %arg13[%c0_929, %c0_930] : memref<4x2048xbf16, #tpu.memory_space<vmem>>, vector<4x2048xbf16>
    %c0_931 = arith.constant 0 : index
    %c0_932 = arith.constant 0 : index
    %845 = vector.load %arg6[%c0_931, %c0_932] : memref<2048x128xbf16, #tpu.memory_space<vmem>>, vector<2048x128xbf16>
    %cst_933 = arith.constant dense<0.000000e+00> : vector<4x128xf32>
    %846 = tpu.matmul %844, %845, %cst_933 {dimension_numbers = #tpu.dot_dimension_numbers<[1], [0], [0], [1], [0, 0, 1, 1], [], []>} : vector<4x2048xbf16>, vector<2048x128xbf16>, vector<4x128xf32> -> vector<4x128xf32>
    %c0_934 = arith.constant 0 : index
    %c0_935 = arith.constant 0 : index
    %847 = vector.load %arg7[%c0_934, %c0_935] : memref<1x128xf32, #tpu.memory_space<vmem>>, vector<1x128xf32>
    %848 = vector.broadcast %847 : vector<1x128xf32> to vector<4x128xf32>
    %849 = arith.addf %846, %848 : vector<4x128xf32>
    %c0_936 = arith.constant 0 : index
    %c0_937 = arith.constant 0 : index
    %c0_938 = arith.constant 0 : index
    %850 = vector.load %arg8[%c0_936, %c0_937, %c0_938] : memref<1x4x128xf32, #tpu.memory_space<vmem>>, vector<1x4x128xf32>
    %851 = vector.shape_cast %850 : vector<1x4x128xf32> to vector<4x128xf32>
    %852 = vector.shape_cast %849 : vector<4x128xf32> to vector<1x4x128xf32>
    tpu.vector_store %arg8[%c0_936, %c0_937, %c0_938], %852 {strides = array<i32>} : memref<1x4x128xf32, #tpu.memory_space<vmem>>, vector<1x4x128xf32>,
    return
  }
  func.func @transform_0(%arg0: i32) -> (i32, i32, i32) {
    %c0_i32 = arith.constant 0 : i32
    %c0_i32_0 = arith.constant 0 : i32
    %c0_i32_1 = arith.constant 0 : i32
    return %arg0, %c0_i32, %c0_i32_0 : i32, i32, i32
  }
  func.func @transform_1(%arg0: i32) -> (i32, i32) {
    %c0_i32 = arith.constant 0 : i32
    %c0_i32_0 = arith.constant 0 : i32
    %c0_i32_1 = arith.constant 0 : i32
    return %c0_i32, %c0_i32_0 : i32, i32
  }
  func.func @transform_2(%arg0: i32) -> (i32, i32) {
    %c0_i32 = arith.constant 0 : i32
    %c0_i32_0 = arith.constant 0 : i32
    %c0_i32_1 = arith.constant 0 : i32
    return %c0_i32, %c0_i32_0 : i32, i32
  }
  func.func @transform_3(%arg0: i32) -> (i32, i32) {
    %c0_i32 = arith.constant 0 : i32
    %c0_i32_0 = arith.constant 0 : i32
    %c0_i32_1 = arith.constant 0 : i32
    return %c0_i32, %c0_i32_0 : i32, i32
  }
  func.func @transform_4(%arg0: i32) -> (i32, i32) {
    %c0_i32 = arith.constant 0 : i32
    %c0_i32_0 = arith.constant 0 : i32
    %c0_i32_1 = arith.constant 0 : i32
    return %c0_i32, %c0_i32_0 : i32, i32
  }
  func.func @transform_5(%arg0: i32) -> (i32, i32) {
    %c0_i32 = arith.constant 0 : i32
    %c0_i32_0 = arith.constant 0 : i32
    %c0_i32_1 = arith.constant 0 : i32
    return %c0_i32, %c0_i32_0 : i32, i32
  }
  func.func @transform_6(%arg0: i32) -> (i32, i32) {
    %c0_i32 = arith.constant 0 : i32
    %c0_i32_0 = arith.constant 0 : i32
    %c0_i32_1 = arith.constant 0 : i32
    return %c0_i32, %c0_i32_0 : i32, i32
  }
  func.func @transform_7(%arg0: i32) -> (i32, i32, i32) {
    %c0_i32 = arith.constant 0 : i32
    %c0_i32_0 = arith.constant 0 : i32
    %c0_i32_1 = arith.constant 0 : i32
    return %arg0, %c0_i32, %c0_i32_0 : i32, i32, i32
  }
}

</mosaic_0001>

<bundles_post_ra>
// kernel: encoder_forward.1
= control target key start
LH: loop header
LB: loop body
LE: loop exit
PB: predicated region body
PF: predicated region fallthrough
CT: control target
= control target key end

     0   :  { %s5363_s24 = smov 0   ;;  %s6553_s0 = inlined_call_operand.vmem [shape: f32[2,324,8], index: 0, kind: input, shape index: {}]   ;;  %s6554_s1 = inlined_call_operand.vmem [shape: bf16[128,64], index: 1, kind: input, shape index: {}]   ;;  %s6555_s2 = inlined_call_operand.vmem [shape: f32[1,64], index: 2, kind: input, shape index: {}]   ;;  %s6556_s3 = inlined_call_operand.vmem [shape: bf16[1024,128], index: 3, kind: input, shape index: {}]   ;;  %s6557_s4 = inlined_call_operand.vmem [shape: f32[1,128], index: 4, kind: input, shape index: {}]   ;;  %s6558_s5 = inlined_call_operand.vmem [shape: bf16[2048,128], index: 5, kind: input, shape index: {}]   ;;  %s6559_s6 = inlined_call_operand.vmem [shape: f32[1,128], index: 6, kind: input, shape index: {}]   ;;  %s6560_s7 = inlined_call_operand.vmem [shape: f32[2,4,128], index: 7, kind: output, shape index: {}]  }
   0x1 LB: > { %s4429_s25 = sadd.s32 4294967295, %s5304_s24   ;;  %p4433_p0 = scmp.ge.s32.totalorder %s5304_s24, 1  ;;  %s5304_s24 = sphi %s5363_s24, %s17_s24  }
   0x2   : > { %p237_p1 = scmp.lt.s32.totalorder %s5304_s24, 3 }
   0x4   : > { %p238_p2 = pnand %p4433_p0, %p237_p1 }
   0x5   : > { %p268_p3 = scmp.lt.s32.totalorder (!%p238_p2), %s4429_s25, 1  ;;  %s5306_s30 = smov (!%p238_p2), 16   ;;  %vm280_vm0 = vcmask (!%p238_p2), 60416   ;;  %vm422_vm1 = vcmask (!%p238_p2), 64516   ;;  %vm289_vm2 = vcmask (!%p238_p2), 126016   ;;  %vm298_vm3 = vcmask (!%p238_p2), 191616  }
   0x6   : > { %241 = sbr.rel (%p238_p2) target bundleno = 1350 (0x546), region = 48  ;;  %s5307_s8 = smov (!%p238_p2), 8   ;;  %vm431_vm4 = vcmask (!%p238_p2), 130116   ;;  %vm307_vm5 = vcmask (!%p238_p2), 257216   ;;  %vm440_vm6 = vcmask (!%p238_p2), 195716   ;;  %vm449_vm7 = vcmask (!%p238_p2), 261316  }
   0x7   : > { %s5308_s9 = smov (!%p238_p2), 24   ;;  %s5309_s10 = smov (!%p238_p2), 32   ;;  %vm458_vm8 = vcmask (!%p238_p2), 326916   ;;  %vm316_vm9 = vcmask (!%p238_p2), 322816   ;;  %vm467_vm10 = vcmask (!%p238_p2), 392516   ;;  %vm325_vm11 = vcmask (!%p238_p2), 388416  }
   0x8   : > { %s5310_s11 = smov (!%p238_p2), 40   ;;  %s5311_s12 = smov (!%p238_p2), 48   ;;  %vm6562_vm12 = vcmask (!%p238_p2), 458116   ;;  %vm6561_vm13 = vcmask (!%p238_p2), 454016   ;;  %vm485_vm14 = vcmask (!%p238_p2), 523716   ;;  %vm6563_vm15 = vcmask (!%p238_p2), 519616  }
   0x9   : > { %s5312_s13 = smov (!%p238_p2), 56   ;;  %s5313_s14 = smov (!%p238_p2), 64  }
   0xa   : > { %s5314_s15 = smov (!%p238_p2), 72   ;;  %s5315_s16 = smov (!%p238_p2), 80  }
   0xb   : > { %s5316_s17 = smov (!%p238_p2), 88   ;;  %s5317_s18 = smov (!%p238_p2), 96  }
   0xc   : > { %s5318_s19 = smov (!%p238_p2), 104  }
   0xd   : > { %s6588_s25 = smov (!%p268_p3, %s4429_s25), 1 }
   0xe   : > { %s5068_s26 = smul.u32 328, %s6588_s25  ;;  %s4435_s21 = sshll.u32 %s6588_s25, 2 }
   0xf   : > { %s276_s23 = scalar_lea.vmem %s6560_s7, %s4435_s21 }
  0x10   : > { %s5377_s29 = scalar_lea.vmem %s6553_s0, %s5068_s26  ;;  %s5319_s26 = smov 112  }
  0x11   : > { %v4437_v0 = vld [vmem:[%s5377_s29 + $0x2] ss:$2 sm:$0xff]  ;;  %v4436_v1 = vld [vmem:[%s5377_s29 + $0x1] ss:$2 sm:$0xff]  ;;  %v4439_v27 = vld [vmem:[%s5377_s29 + $0x12] ss:$2 sm:$0xff] }
  0x12   : > { %v4453_v2 = vld [vmem:[%s5377_s29 + $0x26] ss:$2 sm:$0xff]  ;;  %v293_v3 = vpack.c.bf16 %v4437_v0, %v4437_v0  ;;  %v284_v4 = vpack.c.bf16 %v4436_v1, %v4436_v1  ;;  %v4468_v6 = vld [vmem:[%s5377_s29 + $0x49] ss:$2 sm:$0xff]  ;;  %v4455_v23 = vld [vmem:[%s5377_s29 + $0x36] ss:$2 sm:$0xff]  ;;  %v311_v30 = vpack.c.bf16 %v4439_v27, %v4439_v27 }
  0x13   : > { %v434_v5 = vpack.c.bf16 %v4453_v2, %v4453_v2  ;;  %v4484_v7 = vld [vmem:[%s5377_s29 + $0x6d] ss:$2 sm:$0xff]  ;;  %v571_v9 = vpack.c.bf16 %v4468_v6, %v4468_v6  ;;  %v4485_v18 = vld [vmem:[%s5377_s29 + $0x6e] ss:$2 sm:$0xff]  ;;  %v452_v26 = vpack.c.bf16 %v4455_v23, %v4455_v23  ;;  %v4487_v38 = vld [vmem:[%s5377_s29 + $0x7e] ss:$2 sm:$0xff] }
  0x14   : > { %295 = vrot.lane.b32.xlu1 %v293_v3, %s5306_s30  ;;  %286 = vrot.lane.b32.xlu0 %v284_v4, %s5307_s8  ;;  %v690_v10 = vpack.c.bf16 %v4484_v7, %v4484_v7  ;;  %v4438_v11 = vld [vmem:[%s5377_s29 + $0x3] ss:$2 sm:$0xff]  ;;  %v698_v21 = vpack.c.bf16 %v4485_v18, %v4485_v18  ;;  %v4469_v22 = vld [vmem:[%s5377_s29 + $0x4a] ss:$2 sm:$0xff]  ;;  %v714_v41 = vpack.c.bf16 %v4487_v38, %v4487_v38 }
  0x15   : > { %v436_v8 = vrot.slane %v434_v5, 4  ;;  %v4454_v12 = vld [vmem:[%s5377_s29 + $0x27] ss:$2 sm:$0xff]  ;;  %v302_v15 = vpack.c.bf16 %v4438_v11, %v4438_v11  ;;  %v578_v25 = vpack.c.bf16 %v4469_v22, %v4469_v22  ;;  %v454_v29 = vrot.slane %v452_v26, 4  ;;  %v4456_v33 = vld [vmem:[%s5377_s29 + $0x37] ss:$2 sm:$0xff] }
  0x16   : > { %v4452_v13 = vld [vmem:[%s5377_s29 + $0x25] ss:$2 sm:$0xff]  ;;  %v692_v14 = vrot.slane %v690_v10, 4  ;;  %v443_v16 = vpack.c.bf16 %v4454_v12, %v4454_v12  ;;  %v700_v24 = vrot.slane %v698_v21, 4  ;;  %v461_v36 = vpack.c.bf16 %v4456_v33, %v4456_v33  ;;  %v4471_v42 = vld [vmem:[%s5377_s29 + $0x5a] ss:$2 sm:$0xff] }
  0x17   : > { %v425_v17 = vpack.c.bf16 %v4452_v13, %v4452_v13  ;;  %v4486_v28 = vld [vmem:[%s5377_s29 + $0x6f] ss:$2 sm:$0xff]  ;;  %v4457_v43 = vld [vmem:[%s5377_s29 + $0x38] ss:$2 sm:$0xff]  ;;  %v4467_v46 = vld [vmem:[%s5377_s29 + $0x48] ss:$2 sm:$0xff]  ;;  %v592_v49 = vpack.c.bf16 %v4471_v42, %v4471_v42 }
  0x18   : > { %437 = vrot.lane.b32.xlu1 %v436_v8, %s5306_s30  ;;  %573 = vrot.lane.b32.xlu0 %v571_v9, %s5307_s8  ;;  %v445_v19 = vrot.slane %v443_v16, 4  ;;  %v706_v31 = vpack.c.bf16 %v4486_v28, %v4486_v28  ;;  %v4470_v32 = vld [vmem:[%s5377_s29 + $0x4b] ss:$2 sm:$0xff]  ;;  %v463_v39 = vrot.slane %v461_v36, 4  ;;  %v278_v44 = vld [vmem:[%s5377_s29] ss:$2 sm:$0xff]  ;;  %v568_v47 = vpack.c.bf16 %v4467_v46, %v4467_v46 }
  0x19   : > { %v427_v20 = vrot.slane %v425_v17, 4  ;;  %v585_v35 = vpack.c.bf16 %v4470_v32, %v4470_v32  ;;  %v4440_v37 = vld [vmem:[%s5377_s29 + $0x13] ss:$2 sm:$0xff]  ;;  %v279_v45 = vpack.c.bf16 %v278_v44, %v278_v44  ;;  %v716_v48 = vrot.slane %v714_v41, 4  ;;  %v4483_v51 = vld [vmem:[%s5377_s29 + $0x6c] ss:$2 sm:$0xff] }
  0x1a   : > { %v708_v34 = vrot.slane %v706_v31, 4  ;;  %v320_v40 = vpack.c.bf16 %v4440_v37, %v4440_v37  ;;  %v470_v50 = vpack.c.bf16 %v4457_v43, %v4457_v43  ;;  %v4441_v52 = vld [vmem:[%s5377_s29 + $0x14] ss:$2 sm:$0xff]  ;;  %v4488_v53 = vld [vmem:[%s5377_s29 + $0x7f] ss:$2 sm:$0xff]  ;;  %v684_v54 = vpack.c.bf16 %v4483_v51, %v4483_v51 }
  0x1b   : > { %281 = vst.msk [vmem:[#allocation2] sm:$0xf] %vm280_vm0, %v279_v45  ;;  %569 = vst.msk [vmem:[#allocation2 + $0x8] sm:$0xf] %vm280_vm0, %v568_v47  ;;  %v4451_v55 = vld [vmem:[%s5377_s29 + $0x24] ss:$2 sm:$0xff]  ;;  %v329_v59 = vpack.c.bf16 %v4441_v52, %v4441_v52  ;;  %v722_v60 = vpack.c.bf16 %v4488_v53, %v4488_v53 }
  0x1c   : > { %693 = vrot.lane.b32.xlu1 %v692_v14, %s5307_s8  ;;  %304 = vrot.lane.b32.xlu0 %v302_v15, %s5308_s9  ;;  %v418_v56 = vpack.c.bf16 %v4451_v55, %v4451_v55  ;;  %v686_v57 = vrot.slane %v684_v54, 4  ;;  %v472_v58 = vrot.slane %v470_v50, 4  ;;  %v4472_v62 = vld [vmem:[%s5377_s29 + $0x5b] ss:$2 sm:$0xff]  ;;  %v4489_v4 = vld [vmem:[%s5377_s29 + $0x80] ss:$2 sm:$0xff] }
  0x1d   : > { %v4458_v63 = vld [vmem:[%s5377_s29 + $0x39] ss:$2 sm:$0xff]  ;;  %v724_v0 = vrot.slane %v722_v60, 4  ;;  %v599_v1 = vpack.c.bf16 %v4472_v62, %v4472_v62  ;;  %v730_v7 = vpack.c.bf16 %v4489_v4, %v4489_v4  ;;  %v4473_v8 = vld [vmem:[%s5377_s29 + $0x5c] ss:$2 sm:$0xff] }
  0x1e   : > { %v420_v61 = vrot.slane %v418_v56, 4  ;;  %688 = vst.msk [vmem:[#allocation2 + $0x8] sm:$0xf0] %vm422_vm1, %v686_v57  ;;  %v479_v2 = vpack.c.bf16 %v4458_v63, %v4458_v63  ;;  %v4442_v3 = vld [vmem:[%s5377_s29 + $0x15] ss:$2 sm:$0xff]  ;;  %v606_v12 = vpack.c.bf16 %v4473_v8, %v4473_v8 }
  0x1f   : > { %v338_v6 = vpack.c.bf16 %v4442_v3, %v4442_v3  ;;  %v4459_v9 = vld [vmem:[%s5377_s29 + $0x48] ss:$2 sm:$0xff]  ;;  %v732_v11 = vrot.slane %v730_v7, 4  ;;  %v4490_v14 = vld [vmem:[%s5377_s29 + $0x81] ss:$2 sm:$0xff] }
  0x20   : > { %446 = vrot.lane.b32.xlu1 %v445_v19, %s5308_s9  ;;  %428 = vrot.lane.b32.xlu0 %v427_v20, %s5307_s8  ;;  %423 = vst.msk [vmem:[#allocation2] sm:$0xf0] %vm422_vm1, %v420_v61  ;;  %v481_v5 = vrot.slane %v479_v2, 4  ;;  %v4443_v10 = vld [vmem:[%s5377_s29 + $0x24] ss:$2 sm:$0xff]  ;;  %v489_v13 = vpack.c.bf16 %v4459_v9, %v4459_v9  ;;  %v738_v18 = vpack.c.bf16 %v4490_v14, %v4490_v14 }
  0x21   : > { %v4474_v15 = vld [vmem:[%s5377_s29 + $0x5d] ss:$2 sm:$0xff]  ;;  %v347_v17 = vpack.c.bf16 %v4443_v10, %v4443_v10  ;;  %v4515_v20 = vld [vmem:[%s5377_s29 + $0xb4] ss:$2 sm:$0xff] }
  0x22   : > { %v491_v16 = vrot.slane %v489_v13, 4  ;;  %v4460_v19 = vld [vmem:[%s5377_s29 + $0x49] ss:$2 sm:$0xff]  ;;  %v934_v21 = vpack.c.bf16 %v4515_v20, %v4515_v20  ;;  %v613_v22 = vpack.c.bf16 %v4474_v15, %v4474_v15  ;;  %v4547_v45 = vld [vmem:[%s5377_s29 + $0xfc] ss:$2 sm:$0xff] }
  0x23   : > { %v4444_v23 = vld [vmem:[%s5377_s29 + $0x25] ss:$2 sm:$0xff]  ;;  %v499_v26 = vpack.c.bf16 %v4460_v19, %v4460_v19  ;;  %v1184_v46 = vpack.c.bf16 %v4547_v45, %v4547_v45  ;;  %v4517_v54 = vld [vmem:[%s5377_s29 + $0xb6] ss:$2 sm:$0xff] }
  0x24   : > { %701 = vrot.lane.b32.xlu1 %v700_v24, %s5306_s30  ;;  %580 = vrot.lane.b32.xlu0 %v578_v25, %s5306_s30  ;;  %v4499_v24 = vld [vmem:[%s5377_s29 + $0x90] ss:$2 sm:$0xff]  ;;  %v740_v25 = vrot.slane %v738_v18, 4  ;;  %v936_v27 = vrot.slane %v934_v21, 4  ;;  %v356_v32 = vpack.c.bf16 %v4444_v23, %v4444_v23  ;;  %v4492_v44 = vld [vmem:[%s5377_s29 + $0x91] ss:$2 sm:$0xff] }
  0x25   : > { %v818_v28 = vpack.c.bf16 %v4499_v24, %v4499_v24  ;;  %v501_v31 = vrot.slane %v499_v26, 4  ;;  %v756_v51 = vpack.c.bf16 %v4492_v44, %v4492_v44  ;;  %v1186_v52 = vrot.slane %v1184_v46, 4  ;;  %v4501_v55 = vld [vmem:[%s5377_s29 + $0x92] ss:$2 sm:$0xff]  ;;  %v4532_v60 = vld [vmem:[%s5377_s29 + $0xd9] ss:$2 sm:$0xff] }
  0x26   : > { %938 = vst.msk [vmem:[#allocation2 + $0x10] sm:$0xf0] %vm422_vm1, %v936_v27  ;;  %v828_v62 = vpack.c.bf16 %v4501_v55, %v4501_v55  ;;  %v1071_v3 = vpack.c.bf16 %v4532_v60, %v4532_v60  ;;  %v4518_v10 = vld [vmem:[%s5377_s29 + $0xb7] ss:$2 sm:$0xff]  ;;  %v4549_v15 = vld [vmem:[%s5377_s29 + $0xfe] ss:$2 sm:$0xff] }
  0x27   : > { %819 = vst.msk [vmem:[#allocation2 + $0x10] sm:$0xf] %vm280_vm0, %v818_v28  ;;  %v758_v56 = vrot.slane %v756_v51, 4  ;;  %v956_v14 = vpack.c.bf16 %v4518_v10, %v4518_v10  ;;  %v1198_v19 = vpack.c.bf16 %v4549_v15, %v4549_v15  ;;  %v4463_v20 = vld [vmem:[%s5377_s29 + $0x5a] ss:$2 sm:$0xff] }
  0x28   : > { %455 = vrot.lane.b32.xlu1 %v454_v29, %s5309_s10  ;;  %313 = vrot.lane.b32.xlu0 %v311_v30, %s5309_s10  ;;  %v4491_v29 = vld [vmem:[%s5377_s29 + $0x90] ss:$2 sm:$0xff]  ;;  %1188 = vst.msk [vmem:[#allocation2 + $0x18] sm:$0xf0] %vm422_vm1, %v1186_v52  ;;  %v529_v24 = vpack.c.bf16 %v4463_v20, %v4463_v20  ;;  %v4478_v26 = vld [vmem:[%s5377_s29 + $0x6f] ss:$2 sm:$0xff] }
  0x29   : > { %v4475_v30 = vld [vmem:[%s5377_s29 + $0x6c] ss:$2 sm:$0xff]  ;;  %v747_v33 = vpack.c.bf16 %v4491_v29, %v4491_v29  ;;  %v4504_v55 = vld [vmem:[%s5377_s29 + $0xa3] ss:$2 sm:$0xff]  ;;  %vm6564_vm1 = vcmask 585216  }
  0x2a   : > { %v621_v37 = vpack.c.bf16 %v4475_v30, %v4475_v30  ;;  %v4447_v21 = vld [vmem:[%s5377_s29 + $0x36] ss:$2 sm:$0xff]  ;;  %v531_v27 = vrot.slane %v529_v24, 4  ;;  %v4519_v30 = vld [vmem:[%s5377_s29 + $0xc6] ss:$2 sm:$0xff] }
  0x2b   : > { %v749_v36 = vrot.slane %v747_v33, 4  ;;  %v383_v28 = vpack.c.bf16 %v4447_v21, %v4447_v21  ;;  %v645_v33 = vpack.c.bf16 %v4478_v26, %v4478_v26  ;;  %v5094_v10 = vld [vmem:[%s6554_s1] sm:$0xff]   ;;  %v5096_v26 = vld [vmem:[%s6554_s1 + $0x10] sm:$0xff]  }
  0x2c   : > { %709 = vrot.lane.b32.xlu1 %v708_v34, %s5308_s9  ;;  %587 = vrot.lane.b32.xlu0 %v585_v35, %s5308_s9  ;;  %v4516_v34 = vld [vmem:[%s5377_s29 + $0xb5] ss:$2 sm:$0xff]  ;;  %v4505_v21 = vld [vmem:[%s5377_s29 + $0xa4] ss:$2 sm:$0xff] }
  0x2d   : > { %v4500_v35 = vld [vmem:[%s5377_s29 + $0x91] ss:$2 sm:$0xff]  ;;  %v940_v38 = vpack.c.bf16 %v4516_v34, %v4516_v34  ;;  %v964_v34 = vpack.c.bf16 %v4519_v30, %v4519_v30  ;;  %5044 = vmatprep.subr.bf16.mxu0 %v5094_v10 }
  0x2e   : > { %v821_v42 = vpack.c.bf16 %v4500_v35, %v4500_v35  ;;  %v4550_v35 = vld [vmem:[%s5377_s29 + $0xff] ss:$2 sm:$0xff]  ;;  %5045 = vmatpush3.bf16.msra.mxu0 %v5094_v10 }
  0x2f   : > { %v942_v41 = vrot.slane %v940_v38, 4  ;;  %v966_v38 = vrot.slane %v964_v34, 4  ;;  %v4466_v30 = vld [vmem:[%s5377_s29 + $0x5d] ss:$2 sm:$0xff] }
  0x30   : > { %464 = vrot.lane.b32.xlu1 %v463_v39, %s5310_s11  ;;  %322 = vrot.lane.b32.xlu0 %v320_v40, %s5310_s11  ;;  %v4461_v39 = vld [vmem:[%s5377_s29 + $0x4a] ss:$2 sm:$0xff] }
  0x31   : > { %v4445_v40 = vld [vmem:[%s5377_s29 + $0x26] ss:$2 sm:$0xff]  ;;  %v509_v43 = vpack.c.bf16 %v4461_v39, %v4461_v39  ;;  %v5097_v34 = vld [vmem:[%s6554_s1 + $0x18] sm:$0xff]  }
  0x32   : > { %v365_v47 = vpack.c.bf16 %v4445_v40, %v4445_v40  ;;  %v1206_v40 = vpack.c.bf16 %v4550_v35, %v4550_v35 }
  0x33   : > { %v511_v50 = vrot.slane %v509_v43, 4 }
  0x34   : > { %717 = vrot.lane.b32.xlu1 %v716_v48, %s5309_s10  ;;  %594 = vrot.lane.b32.xlu0 %v592_v49, %s5309_s10  ;;  %v4476_v48 = vld [vmem:[%s5377_s29 + $0x6d] ss:$2 sm:$0xff]  ;;  %v4531_v49 = vld [vmem:[%s5377_s29 + $0xd8] ss:$2 sm:$0xff]  ;;  %v1208_v43 = vrot.slane %v1206_v40, 4 }
  0x35   : > { %v1068_v53 = vpack.c.bf16 %v4531_v49, %v4531_v49  ;;  %v629_v57 = vpack.c.bf16 %v4476_v48, %v4476_v48  ;;  %v4479_v48 = vld [vmem:[%s5377_s29 + $0x7e] ss:$2 sm:$0xff]  ;;  %v4520_v49 = vld [vmem:[%s5377_s29 + $0xc7] ss:$2 sm:$0xff] }
  0x37   : > { %1069 = vst.msk [vmem:[#allocation2 + $0x18] sm:$0xf] %vm280_vm0, %v1068_v53  ;;  %vm495_vm0 = vcmask 589316  }
  0x38   : > { %473 = vrot.lane.b32.xlu1 %v472_v58, %s5311_s12  ;;  %331 = vrot.lane.b32.xlu0 %v329_v59, %s5311_s12  ;;  %v948_v58 = vpack.c.bf16 %v4517_v54, %v4517_v54  ;;  %v4548_v59 = vld [vmem:[%s5377_s29 + $0xfd] ss:$2 sm:$0xff] }
  0x39   : > { %v1190_v63 = vpack.c.bf16 %v4548_v59, %v4548_v59  ;;  %v972_v59 = vpack.c.bf16 %v4520_v49, %v4520_v49 }
  0x3a   : > { %v950_v61 = vrot.slane %v948_v58, 4  ;;  %v653_v58 = vpack.c.bf16 %v4479_v48, %v4479_v48 }
  0x3b   : > { %v1192_v2 = vrot.slane %v1190_v63, 4  ;;  %v4465_v63 = vld [vmem:[%s5377_s29 + $0x5c] ss:$2 sm:$0xff] }
  0x3c   : > { %725 = vrot.lane.b32.xlu1 %v724_v0, %s5310_s11  ;;  %601 = vrot.lane.b32.xlu0 %v599_v1, %s5310_s11  ;;  %v4462_v0 = vld [vmem:[%s5377_s29 + $0x4b] ss:$2 sm:$0xff] }
  0x3d   : > { %v4446_v1 = vld [vmem:[%s5377_s29 + $0x27] ss:$2 sm:$0xff]  ;;  %v519_v4 = vpack.c.bf16 %v4462_v0, %v4462_v0  ;;  %v974_v0 = vrot.slane %v972_v59, 4 }
  0x3e   : > { %v374_v8 = vpack.c.bf16 %v4446_v1, %v4446_v1  ;;  %v849_v1 = vpack.c.bf16 %v4504_v55, %v4504_v55 }
  0x3f   : > { %v521_v7 = vrot.slane %v519_v4, 4 }
  0x40   : > { %482 = vrot.lane.b32.xlu1 %v481_v5, %s5312_s13  ;;  %340 = vrot.lane.b32.xlu0 %v338_v6, %s5312_s13  ;;  %v4493_v5 = vld [vmem:[%s5377_s29 + $0x92] ss:$2 sm:$0xff] }
  0x41   : > { %v4477_v6 = vld [vmem:[%s5377_s29 + $0x6e] ss:$2 sm:$0xff]  ;;  %v765_v9 = vpack.c.bf16 %v4493_v5, %v4493_v5 }
  0x42   : > { %v637_v13 = vpack.c.bf16 %v4477_v6, %v4477_v6  ;;  %v4449_v5 = vld [vmem:[%s5377_s29 + $0x38] ss:$2 sm:$0xff]  ;;  %v4496_v6 = vld [vmem:[%s5377_s29 + $0xa3] ss:$2 sm:$0xff] }
  0x44   : > { %733 = vrot.lane.b32.xlu1 %v732_v11, %s5311_s12  ;;  %608 = vrot.lane.b32.xlu0 %v606_v12, %s5311_s12  ;;  %v4502_v11 = vld [vmem:[%s5377_s29 + $0x93] ss:$2 sm:$0xff]  ;;  %v767_v12 = vrot.slane %v765_v9, 4  ;;  %v549_v9 = vpack.c.bf16 %v4465_v63, %v4465_v63 }
  0x45   : > { %v835_v18 = vpack.c.bf16 %v4502_v11, %v4502_v11 }
  0x46   : > { %v551_v15 = vrot.slane %v549_v9, 4 }
  0x48   : > { %492 = vrot.lane.b32.xlu1 %v491_v16, %s5313_s14  ;;  %349 = vrot.lane.b32.xlu0 %v347_v17, %s5313_s14  ;;  %v4533_v16 = vld [vmem:[%s5377_s29 + $0xda] ss:$2 sm:$0xff]  ;;  %v958_v17 = vrot.slane %v956_v14, 4 }
  0x49   : > { %v1078_v23 = vpack.c.bf16 %v4533_v16, %v4533_v16  ;;  %v4521_v14 = vld [vmem:[%s5377_s29 + $0xc8] ss:$2 sm:$0xff]  ;;  %v401_v16 = vpack.c.bf16 %v4449_v5, %v4449_v5  ;;  %v4482_v5 = vld [vmem:[%s5377_s29 + $0x81] ss:$2 sm:$0xff] }
  0x4c   : > { %741 = vrot.lane.b32.xlu1 %v740_v25, %s5312_s13  ;;  %615 = vrot.lane.b32.xlu0 %v613_v22, %s5312_s13  ;;  %v1200_v22 = vrot.slane %v1198_v19, 4  ;;  %v4494_v25 = vld [vmem:[%s5377_s29 + $0x93] ss:$2 sm:$0xff] }
  0x4d   : > { %v774_v29 = vpack.c.bf16 %v4494_v25, %v4494_v25  ;;  %v980_v25 = vpack.c.bf16 %v4521_v14, %v4521_v14 }
  0x50   : > { %502 = vrot.lane.b32.xlu1 %v501_v31, %s5314_s15  ;;  %358 = vrot.lane.b32.xlu0 %v356_v32, %s5314_s15  ;;  %v4503_v31 = vld [vmem:[%s5377_s29 + $0xa2] ss:$2 sm:$0xff]  ;;  %v776_v32 = vrot.slane %v774_v29, 4  ;;  %v4536_v29 = vld [vmem:[%s5377_s29 + $0xeb] ss:$2 sm:$0xff] }
  0x51   : > { %v842_v39 = vpack.c.bf16 %v4503_v31, %v4503_v31  ;;  %v982_v31 = vrot.slane %v980_v25, 4  ;;  %v1099_v40 = vpack.c.bf16 %v4536_v29, %v4536_v29 }
  0x54   : > { %750 = vrot.lane.b32.xlu1 %v749_v36, %s5313_s14  ;;  %623 = vrot.lane.b32.xlu0 %v621_v37, %s5313_s14  ;;  %v4534_v36 = vld [vmem:[%s5377_s29 + $0xdb] ss:$2 sm:$0xff] }
  0x55   : > { %v4464_v37 = vld [vmem:[%s5377_s29 + $0x5b] ss:$2 sm:$0xff]  ;;  %v1085_v44 = vpack.c.bf16 %v4534_v36, %v4534_v36 }
  0x56   : > { %v539_v45 = vpack.c.bf16 %v4464_v37, %v4464_v37  ;;  %v4450_v37 = vld [vmem:[%s5377_s29 + $0x39] ss:$2 sm:$0xff] }
  0x57   : > { %v410_v48 = vpack.c.bf16 %v4450_v37, %v4450_v37 }
  0x58   : > { %943 = vrot.lane.b32.xlu1 %v942_v41, %s5307_s8  ;;  %823 = vrot.lane.b32.xlu0 %v821_v42, %s5307_s8  ;;  %v4448_v41 = vld [vmem:[%s5377_s29 + $0x37] ss:$2 sm:$0xff]  ;;  %v4495_v42 = vld [vmem:[%s5377_s29 + $0xa2] ss:$2 sm:$0xff] }
  0x59   : > { %v392_v51 = vpack.c.bf16 %v4448_v41, %v4448_v41  ;;  %v783_v52 = vpack.c.bf16 %v4495_v42, %v4495_v42  ;;  %v559_v41 = vpack.c.bf16 %v4466_v30, %v4466_v30  ;;  %v5098_v42 = vld [vmem:[%s6554_s1 + $0x20] sm:$0xff]  }
  0x5c   : > { %512 = vrot.lane.b32.xlu1 %v511_v50, %s5315_s16  ;;  %367 = vrot.lane.b32.xlu0 %v365_v47, %s5315_s16  ;;  %v541_v50 = vrot.slane %v539_v45, 4  ;;  %v4481_v45 = vld [vmem:[%s5377_s29 + $0x80] ss:$2 sm:$0xff] }
  0x60   : > { %759 = vrot.lane.b32.xlu1 %v758_v56, %s5314_s15  ;;  %631 = vrot.lane.b32.xlu0 %v629_v57, %s5314_s15  ;;  %v4551_v56 = vld [vmem:[%s5377_s29 + $0x10e] ss:$2 sm:$0xff]  ;;  %v785_v57 = vrot.slane %v783_v52, 4 }
  0x64   : > { %951 = vrot.lane.b32.xlu1 %v950_v61, %s5306_s30  ;;  %830 = vrot.lane.b32.xlu0 %v828_v62, %s5306_s30  ;;  %v4535_v62 = vld [vmem:[%s5377_s29 + $0xea] ss:$2 sm:$0xff] }
  0x68   : > { %1193 = vrot.lane.b32.xlu1 %v1192_v2, %s5307_s8  ;;  %1073 = vrot.lane.b32.xlu0 %v1071_v3, %s5307_s8  ;;  %v1214_v2 = vpack.c.bf16 %v4551_v56, %v4551_v56  ;;  %v669_v56 = vpack.c.bf16 %v4481_v45, %v4481_v45 }
  0x6c   : > { %522 = vrot.lane.b32.xlu1 %v521_v7, %s5316_s17  ;;  %376 = vrot.lane.b32.xlu0 %v374_v8, %s5316_s17  ;;  %v1216_v7 = vrot.slane %v1214_v2, 4  ;;  %v1092_v8 = vpack.c.bf16 %v4535_v62, %v4535_v62  ;;  %v4498_v62 = vld [vmem:[%s5377_s29 + $0xa5] ss:$2 sm:$0xff]  ;;  %v5101_v2 = vld [vmem:[%s6554_s1 + $0x38] sm:$0xff]  }
  0x6d   : > { %v810_v9 = vpack.c.bf16 %v4498_v62, %v4498_v62  ;;  %v4527_v62 = vld [vmem:[%s5377_s29 + $0xea] ss:$2 sm:$0xff] }
  0x6f   : > { %v812_v14 = vrot.slane %v810_v9, 4 }
  0x70   : > { %768 = vrot.lane.b32.xlu1 %v767_v12, %s5315_s16  ;;  %639 = vrot.lane.b32.xlu0 %v637_v13, %s5315_s16  ;;  %v4480_v13 = vld [vmem:[%s5377_s29 + $0x7f] ss:$2 sm:$0xff] }
  0x71   : > { %v661_v24 = vpack.c.bf16 %v4480_v13, %v4480_v13  ;;  %v4554_v13 = vld [vmem:[%s5377_s29 + $0x111] ss:$2 sm:$0xff] }
  0x74   : > { %959 = vrot.lane.b32.xlu1 %v958_v17, %s5308_s9  ;;  %837 = vrot.lane.b32.xlu0 %v835_v18, %s5308_s9  ;;  %v792_v17 = vpack.c.bf16 %v4496_v6, %v4496_v6  ;;  %v5095_v18 = vld [vmem:[%s6554_s1 + $0x8] sm:$0xff]   ;;  %v4523_v6 = vld [vmem:[%s5377_s29 + $0xd8] ss:$2 sm:$0xff] }
  0x75   : > { %5046 = vmatprep.subr.bf16.mxu0 %v5095_v18 }
  0x76   : > { %5047 = vmatpush3.bf16.msra.mxu0 %v5095_v18 }
  0x77   : > { %5048 = vmatprep.subr.bf16.mxu0 %v5096_v26 }
  0x78   : > { %1201 = vrot.lane.b32.xlu1 %v1200_v22, %s5306_s30  ;;  %1080 = vrot.lane.b32.xlu0 %v1078_v23, %s5306_s30  ;;  %v4552_v22 = vld [vmem:[%s5377_s29 + $0x10f] ss:$2 sm:$0xff]  ;;  %v794_v23 = vrot.slane %v792_v17, 4 }
  0x7a   : > { %5049 = vmatpush3.bf16.msra.mxu0 %v5096_v26  ;;  %v4508_v26 = vld [vmem:[%s5377_s29 + $0xb5] ss:$2 sm:$0xff] }
  0x7b   : > { %5050 = vmatprep.subr.bf16.mxu0 %v5097_v34 }
  0x7c   : > { %532 = vrot.lane.b32.xlu1 %v531_v27, %s5317_s18  ;;  %385 = vrot.lane.b32.xlu0 %v383_v28, %s5317_s18 }
  0x7e   : > { %5051 = vmatpush3.bf16.msra.mxu0 %v5097_v34  ;;  %v4525_v34 = vld [vmem:[%s5377_s29 + $0xda] ss:$2 sm:$0xff] }
  0x7f   : > { %5052 = vmatprep.subr.bf16.mxu0 %v5098_v42 }
  0x80   : > { %777 = vrot.lane.b32.xlu1 %v776_v32, %s5316_s17  ;;  %647 = vrot.lane.b32.xlu0 %v645_v33, %s5316_s17  ;;  %v856_v32 = vpack.c.bf16 %v4505_v21, %v4505_v21  ;;  %v1222_v33 = vpack.c.bf16 %v4552_v22, %v4552_v22 }
  0x82   : > { %5053 = vmatpush3.bf16.msra.mxu0 %v5098_v42 }
  0x84   : > { %967 = vrot.lane.b32.xlu1 %v966_v38, %s5309_s10  ;;  %844 = vrot.lane.b32.xlu0 %v842_v39, %s5309_s10  ;;  %v4497_v38 = vld [vmem:[%s5377_s29 + $0xa4] ss:$2 sm:$0xff]  ;;  %v1224_v39 = vrot.slane %v1222_v33, 4 }
  0x85   : > { %v801_v49 = vpack.c.bf16 %v4497_v38, %v4497_v38  ;;  %v4539_v33 = vld [vmem:[%s5377_s29 + $0xfc] ss:$2 sm:$0xff] }
  0x86   : > { %v296_v46 = vpop.permute.xlu1 %295  ;;  %v287_v47 = vpop.permute.xlu0 %286 }
  0x87   : > { %290 = vst.msk [vmem:[#allocation2] sm:$0xf] %vm289_vm2, %v287_v47  ;;  %v561_v47 = vrot.slane %v559_v41, 4  ;;  %v803_v55 = vrot.slane %v801_v49, 4  ;;  %v4556_v41 = vld [vmem:[%s5377_s29 + $0x121] ss:$2 sm:$0xff] }
  0x88   : > { %1209 = vrot.lane.b32.xlu1 %v1208_v43, %s5308_s9  ;;  %1087 = vrot.lane.b32.xlu0 %v1085_v44, %s5308_s9  ;;  %299 = vst.msk [vmem:[#allocation2] sm:$0xf] %vm298_vm3, %v296_v46  ;;  %v4522_v46 = vld [vmem:[%s5377_s29 + $0xc9] ss:$2 sm:$0xff] }
  0x8a   : > { %v438_v53 = vpop.permute.xlu1 %437  ;;  %v574_v54 = vpop.permute.xlu0 %573 }
  0x8b   : > { %576 = vst.msk [vmem:[#allocation2 + $0x8] sm:$0xf] %vm289_vm2, %v574_v54  ;;  %v4553_v54 = vld [vmem:[%s5377_s29 + $0x110] ss:$2 sm:$0xff] }
  0x8c   : > { %542 = vrot.lane.b32.xlu1 %v541_v50, %s5318_s19  ;;  %394 = vrot.lane.b32.xlu0 %v392_v51, %s5318_s19  ;;  %v5099_v50 = vld [vmem:[%s6554_s1 + $0x28] sm:$0xff]  }
  0x8d   : > { %5054 = vmatprep.subr.bf16.mxu0 %v5099_v50 }
  0x8e   : > { %v694_v60 = vpop.permute.xlu1 %693  ;;  %v305_v61 = vpop.permute.xlu0 %304  ;;  %5055 = vmatpush3.bf16.msra.mxu0 %v5099_v50 }
  0x8f   : > { %696 = vst.msk [vmem:[#allocation2 + $0x8] sm:$0xf0] %vm431_vm4, %v694_v60 }
  0x90   : > { %308 = vst.msk [vmem:[#allocation2] sm:$0xf] %vm307_vm5, %v305_v61  ;;  %786 = vrot.lane.b32.xlu1 %v785_v57, %s5317_s18  ;;  %655 = vrot.lane.b32.xlu0 %v653_v58, %s5317_s18  ;;  %v988_v57 = vpack.c.bf16 %v4522_v46, %v4522_v46  ;;  %v5100_v58 = vld [vmem:[%s6554_s1 + $0x30] sm:$0xff]  }
  0x91   : > { %v4537_v61 = vld [vmem:[%s5377_s29 + $0xec] ss:$2 sm:$0xff]  ;;  %5056 = vmatprep.subr.bf16.mxu0 %v5100_v58 }
  0x92   : > { %v447_v3 = vpop.permute.xlu1 %446  ;;  %v429_v4 = vpop.permute.xlu0 %428  ;;  %v990_v63 = vrot.slane %v988_v57, 4  ;;  %5057 = vmatpush3.bf16.msra.mxu0 %v5100_v58 }
  0x93   : > { %432 = vst.msk [vmem:[#allocation2] sm:$0xf0] %vm431_vm4, %v429_v4  ;;  %5058 = vmatprep.subr.bf16.mxu0 %v5101_v2 }
  0x94   : > { %441 = vst.msk [vmem:[#allocation2] sm:$0xf0] %vm440_vm6, %v438_v53  ;;  %975 = vrot.lane.b32.xlu1 %v974_v0, %s5310_s11  ;;  %851 = vrot.lane.b32.xlu0 %v849_v1, %s5310_s11  ;;  %v4506_v53 = vld [vmem:[%s5377_s29 + $0xa5] ss:$2 sm:$0xff]  ;;  %v1230_v1 = vpack.c.bf16 %v4553_v54, %v4553_v54 }
  0x95   : > { %450 = vst.msk [vmem:[#allocation2] sm:$0xf0] %vm449_vm7, %v447_v3  ;;  %v863_v0 = vpack.c.bf16 %v4506_v53, %v4506_v53  ;;  %v4510_v54 = vld [vmem:[%s5377_s29 + $0xb7] ss:$2 sm:$0xff] }
  0x96   : > { %v702_v11 = vpop.permute.xlu1 %701  ;;  %v581_v12 = vpop.permute.xlu0 %580  ;;  %5059 = vmatpush3.bf16.msra.mxu0 %v5101_v2 }
  0x97   : > { %704 = vst.msk [vmem:[#allocation2 + $0x8] sm:$0xf0] %vm440_vm6, %v702_v11 }
  0x98   : > { %583 = vst.msk [vmem:[#allocation2 + $0x8] sm:$0xf] %vm298_vm3, %v581_v12  ;;  %1217 = vrot.lane.b32.xlu1 %v1216_v7, %s5309_s10  ;;  %1094 = vrot.lane.b32.xlu0 %v1092_v8, %s5309_s10  ;;  %v1232_v7 = vrot.slane %v1230_v1, 4  ;;  %v1106_v8 = vpack.c.bf16 %v4537_v61, %v4537_v61  ;;  %v4507_v12 = vld [vmem:[%s5377_s29 + $0xb4] ss:$2 sm:$0xff] }
  0x99   : > { %v871_v22 = vpack.c.bf16 %v4507_v12, %v4507_v12  ;;  %v4541_v61 = vld [vmem:[%s5377_s29 + $0xfe] ss:$2 sm:$0xff]  ;;  %v4528_v12 = vld [vmem:[%s5377_s29 + $0xeb] ss:$2 sm:$0xff] }
  0x9a   : > { %v456_v19 = vpop.permute.xlu1 %455  ;;  %v314_v20 = vpop.permute.xlu0 %313 }
  0x9b   : > { %459 = vst.msk [vmem:[#allocation2] sm:$0xf0] %vm458_vm8, %v456_v19  ;;  %v4538_v19 = vld [vmem:[%s5377_s29 + $0xed] ss:$2 sm:$0xff] }
  0x9c   : > { %317 = vst.msk [vmem:[#allocation2] sm:$0xf] %vm316_vm9, %v314_v20  ;;  %552 = vrot.lane.b32.xlu1 %v551_v15, %s5319_s26  ;;  %403 = vrot.lane.b32.xlu0 %v401_v16, %s5319_s26  ;;  %v677_v15 = vpack.c.bf16 %v4482_v5, %v4482_v5  ;;  %v997_v16 = vpack.c.bf16 %v4523_v6, %v4523_v6  ;;  %v4524_v20 = vld [vmem:[%s5377_s29 + $0xd9] ss:$2 sm:$0xff] }
  0x9d   : > { %v1113_v29 = vpack.c.bf16 %v4538_v19, %v4538_v19  ;;  %v1006_v30 = vpack.c.bf16 %v4524_v20, %v4524_v20  ;;  %v4558_v5 = vld [vmem:[%s5377_s29 + $0x123] ss:$2 sm:$0xff]  ;;  %v4559_v19 = vld [vmem:[%s5377_s29 + $0x132] ss:$2 sm:$0xff] }
  0x9e   : > { %v710_v27 = vpop.permute.xlu1 %709  ;;  %v588_v28 = vpop.permute.xlu0 %587  ;;  %v999_v21 = vrot.slane %v997_v16, 4 }
  0x9f   : > { %712 = vst.msk [vmem:[#allocation2 + $0x8] sm:$0xf0] %vm449_vm7, %v710_v27  ;;  %v4555_v27 = vld [vmem:[%s5377_s29 + $0x120] ss:$2 sm:$0xff] }
  0xa0   : > { %590 = vst.msk [vmem:[#allocation2 + $0x8] sm:$0xf] %vm307_vm5, %v588_v28  ;;  %795 = vrot.lane.b32.xlu1 %v794_v23, %s5318_s19  ;;  %663 = vrot.lane.b32.xlu0 %v661_v24, %s5318_s19  ;;  %v1238_v23 = vpack.c.bf16 %v4554_v13, %v4554_v13  ;;  %v1247_v37 = vpack.c.bf16 %v4555_v27, %v4555_v27 }
  0xa1   : > { %v1283_v27 = vpack.c.bf16 %v4559_v19, %v4559_v19 }
  0xa2   : > { %v465_v35 = vpop.permute.xlu1 %464  ;;  %v323_v36 = vpop.permute.xlu0 %322  ;;  %v1240_v28 = vrot.slane %v1238_v23, 4  ;;  %v1249_v42 = vrot.slane %v1247_v37, 4 }
  0xa3   : > { %468 = vst.msk [vmem:[#allocation2] sm:$0xf0] %vm467_vm10, %v465_v35  ;;  %v1008_v35 = vrot.slane %v1006_v30, 4 }
  0xa4   : > { %326 = vst.msk [vmem:[#allocation2] sm:$0xf] %vm325_vm11, %v323_v36  ;;  %983 = vrot.lane.b32.xlu1 %v982_v31, %s5311_s12  ;;  %858 = vrot.lane.b32.xlu0 %v856_v32, %s5311_s12  ;;  %v879_v36 = vpack.c.bf16 %v4508_v26, %v4508_v26 }
  0xa6   : > { %v718_v43 = vpop.permute.xlu1 %717  ;;  %v595_v44 = vpop.permute.xlu0 %594 }
  0xa7   : > { %720 = vst.msk [vmem:[#allocation2 + $0x8] sm:$0xf0] %vm458_vm8, %v718_v43  ;;  %v1121_v43 = vpack.c.bf16 %v4539_v33, %v4539_v33 }
  0xa8   : > { %597 = vst.msk [vmem:[#allocation2 + $0x8] sm:$0xf] %vm316_vm9, %v595_v44  ;;  %1225 = vrot.lane.b32.xlu1 %v1224_v39, %s5310_s11  ;;  %1101 = vrot.lane.b32.xlu0 %v1099_v40, %s5310_s11  ;;  %s5320_s11 = smov 120   ;;  %v4509_v40 = vld [vmem:[%s5377_s29 + $0xb6] ss:$2 sm:$0xff]  ;;  %v1015_v44 = vpack.c.bf16 %v4525_v34, %v4525_v34 }
  0xa9   : > { %v887_v50 = vpack.c.bf16 %v4509_v40, %v4509_v40 }
  0xaa   : > { %v474_v51 = vpop.permute.xlu1 %473  ;;  %v332_v52 = vpop.permute.xlu0 %331  ;;  %v1017_v49 = vrot.slane %v1015_v44, 4 }
  0xab   : > { %477 = vst.msk [vmem:[#allocation2] sm:$0xf0] %vm6562_vm12, %v474_v51  ;;  %v1256_v51 = vpack.c.bf16 %v4556_v41, %v4556_v41 }
  0xac   : > { %335 = vst.msk [vmem:[#allocation2] sm:$0xf] %vm6561_vm13, %v332_v52  ;;  %562 = vrot.lane.b32.xlu1 %v561_v47, %s5320_s11  ;;  %412 = vrot.lane.b32.xlu0 %v410_v48, %s5320_s11  ;;  %v4540_v47 = vld [vmem:[%s5377_s29 + $0xfd] ss:$2 sm:$0xff] }
  0xad   : > { %v4526_v48 = vld [vmem:[%s5377_s29 + $0xdb] ss:$2 sm:$0xff]  ;;  %v1129_v57 = vpack.c.bf16 %v4540_v47, %v4540_v47 }
  0xae   : > { %v726_v59 = vpop.permute.xlu1 %725  ;;  %v602_v60 = vpop.permute.xlu0 %601  ;;  %v1024_v58 = vpack.c.bf16 %v4526_v48, %v4526_v48 }
  0xaf   : > { %728 = vst.msk [vmem:[#allocation2 + $0x8] sm:$0xf0] %vm467_vm10, %v726_v59 }
  0xb0   : > { %604 = vst.msk [vmem:[#allocation2 + $0x8] sm:$0xf] %vm325_vm11, %v602_v60  ;;  %804 = vrot.lane.b32.xlu1 %v803_v55, %s5319_s26  ;;  %671 = vrot.lane.b32.xlu0 %v669_v56, %s5319_s26  ;;  %v4557_v55 = vld [vmem:[%s5377_s29 + $0x122] ss:$2 sm:$0xff]  ;;  %v1258_v56 = vrot.slane %v1256_v51, 4 }
  0xb1   : > { %v1265_v1 = vpack.c.bf16 %v4557_v55, %v4557_v55 }
  0xb2   : > { %v483_v3 = vpop.permute.xlu1 %482  ;;  %v341_v4 = vpop.permute.xlu0 %340 }
  0xb3   : > { %486 = vst.msk [vmem:[#allocation2] sm:$0xf0] %vm485_vm14, %v483_v3  ;;  %v1267_v6 = vrot.slane %v1265_v1, 4 }
  0xb4   : > { %344 = vst.msk [vmem:[#allocation2] sm:$0xf] %vm6563_vm15, %v341_v4  ;;  %991 = vrot.lane.b32.xlu1 %v990_v63, %s5312_s13  ;;  %865 = vrot.lane.b32.xlu0 %v863_v0, %s5312_s13  ;;  %v1026_v63 = vrot.slane %v1024_v58, 4  ;;  %v895_v0 = vpack.c.bf16 %v4510_v54, %v4510_v54  ;;  %v4511_v4 = vld [vmem:[%s5377_s29 + $0xc6] ss:$2 sm:$0xff] }
  0xb6   : > { %v734_v10 = vpop.permute.xlu1 %733  ;;  %v609_v11 = vpop.permute.xlu0 %608 }
  0xb7   : > { %736 = vst.msk [vmem:[#allocation2 + $0x8] sm:$0xf0] %vm6562_vm12, %v734_v10  ;;  %vm6565_vm12 = vcmask 650816  }
  0xb8   : > { %611 = vst.msk [vmem:[#allocation2 + $0x8] sm:$0xf] %vm6561_vm13, %v609_v11  ;;  %1233 = vrot.lane.b32.xlu1 %v1232_v7, %s5311_s12  ;;  %1108 = vrot.lane.b32.xlu0 %v1106_v8, %s5311_s12  ;;  %vm6566_vm13 = vcmask 654916   ;;  %v1137_v7 = vpack.c.bf16 %v4541_v61, %v4541_v61  ;;  %v1033_v8 = vpack.c.bf16 %v4527_v62, %v4527_v62  ;;  %v4542_v11 = vld [vmem:[%s5377_s29 + $0xff] ss:$2 sm:$0xff] }
  0xba   : > { %v493_v17 = vpop.permute.xlu1 %492  ;;  %v350_v18 = vpop.permute.xlu0 %349  ;;  %v1035_v13 = vrot.slane %v1033_v8, 4 }
  0xbb   : > { %496 = vst.msk [vmem:[#allocation2] sm:$0xf0] %vm495_vm0, %v493_v17 }
  0xbc   : > { %353 = vst.msk [vmem:[#allocation2] sm:$0xf] %vm6564_vm1, %v350_v18  ;;  %813 = vrot.lane.b32.xlu1 %v812_v14, %s5320_s11  ;;  %679 = vrot.lane.b32.xlu0 %v677_v15, %s5320_s11  ;;  %v903_v14 = vpack.c.bf16 %v4511_v4, %v4511_v4  ;;  %v1274_v15 = vpack.c.bf16 %v4558_v5, %v4558_v5  ;;  %v4512_v18 = vld [vmem:[%s5377_s29 + $0xc7] ss:$2 sm:$0xff] }
  0xbd   : > { %v911_v26 = vpack.c.bf16 %v4512_v18, %v4512_v18 }
  0xbe   : > { %v742_v24 = vpop.permute.xlu1 %741  ;;  %v616_v25 = vpop.permute.xlu0 %615  ;;  %v1276_v20 = vrot.slane %v1274_v15, 4 }
  0xbf   : > { %744 = vst.msk [vmem:[#allocation2 + $0x8] sm:$0xf0] %vm485_vm14, %v742_v24 }
  0xc0   : > { %618 = vst.msk [vmem:[#allocation2 + $0x8] sm:$0xf] %vm6563_vm15, %v616_v25  ;;  %1000 = vrot.lane.b32.xlu1 %v999_v21, %s5313_s14  ;;  %873 = vrot.lane.b32.xlu0 %v871_v22, %s5313_s14  ;;  %vm515_vm15 = vcmask 720516   ;;  %v1145_v21 = vpack.c.bf16 %v4542_v11, %v4542_v11  ;;  %v1042_v22 = vpack.c.bf16 %v4528_v12, %v4528_v12 }
  0xc2   : > { %v503_v31 = vpop.permute.xlu1 %502  ;;  %v359_v32 = vpop.permute.xlu0 %358  ;;  %v1044_v25 = vrot.slane %v1042_v22, 4 }
  0xc3   : > { %506 = vst.msk [vmem:[#allocation2] sm:$0xf0] %vm6566_vm13, %v503_v31 }
  0xc4   : > { %362 = vst.msk [vmem:[#allocation2] sm:$0xf] %vm6565_vm12, %v359_v32  ;;  %1241 = vrot.lane.b32.xlu1 %v1240_v28, %s5312_s13  ;;  %1115 = vrot.lane.b32.xlu0 %v1113_v29, %s5312_s13  ;;  %v4543_v28 = vld [vmem:[%s5377_s29 + $0x10e] ss:$2 sm:$0xff]  ;;  %v1285_v32 = vrot.slane %v1283_v27, 4 }
  0xc5   : > { %v4529_v29 = vld [vmem:[%s5377_s29 + $0xec] ss:$2 sm:$0xff]  ;;  %v1153_v33 = vpack.c.bf16 %v4543_v28, %v4543_v28 }
  0xc6   : > { %v751_v38 = vpop.permute.xlu1 %750  ;;  %v624_v39 = vpop.permute.xlu0 %623  ;;  %v1051_v34 = vpack.c.bf16 %v4529_v29, %v4529_v29 }
  0xc7   : > { %753 = vst.msk [vmem:[#allocation2 + $0x8] sm:$0xf0] %vm495_vm0, %v751_v38 }
  0xc8   : > { %626 = vst.msk [vmem:[#allocation2 + $0x8] sm:$0xf] %vm6564_vm1, %v624_v39  ;;  %1009 = vrot.lane.b32.xlu1 %v1008_v35, %s5314_s15  ;;  %881 = vrot.lane.b32.xlu0 %v879_v36, %s5314_s15  ;;  %vm370_vm1 = vcmask 716416   ;;  %v4513_v35 = vld [vmem:[%s5377_s29 + $0xc8] ss:$2 sm:$0xff]  ;;  %v1053_v39 = vrot.slane %v1051_v34, 4 }
  0xc9   : > { %v4560_v36 = vld [vmem:[%s5377_s29 + $0x133] ss:$2 sm:$0xff]  ;;  %v919_v40 = vpack.c.bf16 %v4513_v35, %v4513_v35 }
  0xca   : > { %v944_v45 = vpop.permute.xlu1 %943  ;;  %v824_v46 = vpop.permute.xlu0 %823  ;;  %v1292_v41 = vpack.c.bf16 %v4560_v36, %v4560_v36 }
  0xcb   : > { %946 = vst.msk [vmem:[#allocation2 + $0x10] sm:$0xf0] %vm431_vm4, %v944_v45 }
  0xcc   : > { %826 = vst.msk [vmem:[#allocation2 + $0x10] sm:$0xf] %vm289_vm2, %v824_v46  ;;  %1250 = vrot.lane.b32.xlu1 %v1249_v42, %s5313_s14  ;;  %1123 = vrot.lane.b32.xlu0 %v1121_v43, %s5313_s14  ;;  %v4544_v42 = vld [vmem:[%s5377_s29 + $0x10f] ss:$2 sm:$0xff]  ;;  %v1294_v46 = vrot.slane %v1292_v41, 4 }
  0xcd   : > { %v4530_v43 = vld [vmem:[%s5377_s29 + $0xed] ss:$2 sm:$0xff]  ;;  %v1161_v47 = vpack.c.bf16 %v4544_v42, %v4544_v42 }
  0xce   : > { %v513_v52 = vpop.permute.xlu1 %512  ;;  %v368_v53 = vpop.permute.xlu0 %367  ;;  %v1060_v48 = vpack.c.bf16 %v4530_v43, %v4530_v43 }
  0xcf   : > { %516 = vst.msk [vmem:[#allocation2] sm:$0xf0] %vm515_vm15, %v513_v52 }
  0xd0   : > { %371 = vst.msk [vmem:[#allocation2] sm:$0xf] %vm370_vm1, %v368_v53  ;;  %1018 = vrot.lane.b32.xlu1 %v1017_v49, %s5315_s16  ;;  %889 = vrot.lane.b32.xlu0 %v887_v50, %s5315_s16  ;;  %v4514_v49 = vld [vmem:[%s5377_s29 + $0xc9] ss:$2 sm:$0xff]  ;;  %v4561_v50 = vld [vmem:[%s5377_s29 + $0x134] ss:$2 sm:$0xff] }
  0xd1   : > { %v1062_v53 = vrot.slane %v1060_v48, 4  ;;  %v927_v54 = vpack.c.bf16 %v4514_v49, %v4514_v49  ;;  %v1301_v55 = vpack.c.bf16 %v4561_v50, %v4561_v50 }
  0xd2   : > { %v760_v59 = vpop.permute.xlu1 %759  ;;  %v632_v60 = vpop.permute.xlu0 %631 }
  0xd3   : > { %762 = vst.msk [vmem:[#allocation2 + $0x8] sm:$0xf0] %vm6566_vm13, %v760_v59  ;;  %vm379_vm13 = vcmask 782016  }
  0xd4   : > { %634 = vst.msk [vmem:[#allocation2 + $0x8] sm:$0xf] %vm6565_vm12, %v632_v60  ;;  %1259 = vrot.lane.b32.xlu1 %v1258_v56, %s5314_s15  ;;  %1131 = vrot.lane.b32.xlu0 %v1129_v57, %s5314_s15  ;;  %vm525_vm12 = vcmask 786116   ;;  %v4545_v56 = vld [vmem:[%s5377_s29 + $0x110] ss:$2 sm:$0xff]  ;;  %v1303_v60 = vrot.slane %v1301_v55, 4 }
  0xd5   : > { %v4562_v57 = vld [vmem:[%s5377_s29 + $0x135] ss:$2 sm:$0xff]  ;;  %v1169_v61 = vpack.c.bf16 %v4545_v56, %v4545_v56 }
  0xd6   : > { %v952_v2 = vpop.permute.xlu1 %951  ;;  %v831_v3 = vpop.permute.xlu0 %830  ;;  %v1310_v62 = vpack.c.bf16 %v4562_v57, %v4562_v57 }
  0xd7   : > { %954 = vst.msk [vmem:[#allocation2 + $0x10] sm:$0xf0] %vm440_vm6, %v952_v2 }
  0xd8   : > { %833 = vst.msk [vmem:[#allocation2 + $0x10] sm:$0xf] %vm298_vm3, %v831_v3  ;;  %1027 = vrot.lane.b32.xlu1 %v1026_v63, %s5316_s17  ;;  %897 = vrot.lane.b32.xlu0 %v895_v0, %s5316_s17  ;;  %v4546_v63 = vld [vmem:[%s5377_s29 + $0x111] ss:$2 sm:$0xff]  ;;  %v1312_v2 = vrot.slane %v1310_v62, 4 }
  0xd9   : > { %v1177_v3 = vpack.c.bf16 %v4546_v63, %v4546_v63 }
  0xda   : > { %v1194_v9 = vpop.permute.xlu1 %1193  ;;  %v1074_v10 = vpop.permute.xlu0 %1073 }
  0xdb   : > { %1196 = vst.msk [vmem:[#allocation2 + $0x18] sm:$0xf0] %vm431_vm4, %v1194_v9  ;;  %vm6567_vm4 = vcmask 847616  }
  0xdc   : > { %1076 = vst.msk [vmem:[#allocation2 + $0x18] sm:$0xf] %vm289_vm2, %v1074_v10  ;;  %1268 = vrot.lane.b32.xlu1 %v1267_v6, %s5315_s16  ;;  %1139 = vrot.lane.b32.xlu0 %v1137_v7, %s5315_s16  ;;  %vm6568_vm2 = vcmask 851716  }
  0xde   : > { %v523_v16 = vpop.permute.xlu1 %522  ;;  %v377_v17 = vpop.permute.xlu0 %376 }
  0xdf   : > { %526 = vst.msk [vmem:[#allocation2] sm:$0xf0] %vm525_vm12, %v523_v16 }
  0xe0   : > { %380 = vst.msk [vmem:[#allocation2] sm:$0xf] %vm379_vm13, %v377_v17  ;;  %1036 = vrot.lane.b32.xlu1 %v1035_v13, %s5317_s18  ;;  %905 = vrot.lane.b32.xlu0 %v903_v14, %s5317_s18 }
  0xe2   : > { %v769_v23 = vpop.permute.xlu1 %768  ;;  %v640_v24 = vpop.permute.xlu0 %639 }
  0xe3   : > { %771 = vst.msk [vmem:[#allocation2 + $0x8] sm:$0xf0] %vm515_vm15, %v769_v23 }
  0xe4   : > { %642 = vst.msk [vmem:[#allocation2 + $0x8] sm:$0xf] %vm370_vm1, %v640_v24  ;;  %1277 = vrot.lane.b32.xlu1 %v1276_v20, %s5316_s17  ;;  %1147 = vrot.lane.b32.xlu0 %v1145_v21, %s5316_s17 }
  0xe6   : > { %v960_v30 = vpop.permute.xlu1 %959  ;;  %v838_v31 = vpop.permute.xlu0 %837 }
  0xe7   : > { %962 = vst.msk [vmem:[#allocation2 + $0x10] sm:$0xf0] %vm449_vm7, %v960_v30 }
  0xe8   : > { %840 = vst.msk [vmem:[#allocation2 + $0x10] sm:$0xf] %vm307_vm5, %v838_v31  ;;  %1045 = vrot.lane.b32.xlu1 %v1044_v25, %s5318_s19  ;;  %913 = vrot.lane.b32.xlu0 %v911_v26, %s5318_s19 }
  0xea   : > { %v1202_v37 = vpop.permute.xlu1 %1201  ;;  %v1081_v38 = vpop.permute.xlu0 %1080 }
  0xeb   : > { %1204 = vst.msk [vmem:[#allocation2 + $0x18] sm:$0xf0] %vm440_vm6, %v1202_v37  ;;  %vm397_vm6 = vcmask 913216  }
  0xec   : > { %1083 = vst.msk [vmem:[#allocation2 + $0x18] sm:$0xf] %vm298_vm3, %v1081_v38  ;;  %1286 = vrot.lane.b32.xlu1 %v1285_v32, %s5317_s18  ;;  %1155 = vrot.lane.b32.xlu0 %v1153_v33, %s5317_s18  ;;  %vm545_vm3 = vcmask 917316  }
  0xee   : > { %v533_v44 = vpop.permute.xlu1 %532  ;;  %v386_v45 = vpop.permute.xlu0 %385 }
  0xef   : > { %536 = vst.msk [vmem:[#allocation2] sm:$0xf0] %vm6568_vm2, %v533_v44 }
  0xf0   : > { %389 = vst.msk [vmem:[#allocation2] sm:$0xf] %vm6567_vm4, %v386_v45  ;;  %1054 = vrot.lane.b32.xlu1 %v1053_v39, %s5319_s26  ;;  %921 = vrot.lane.b32.xlu0 %v919_v40, %s5319_s26 }
  0xf2   : > { %v778_v51 = vpop.permute.xlu1 %777  ;;  %v648_v52 = vpop.permute.xlu0 %647 }
  0xf3   : > { %780 = vst.msk [vmem:[#allocation2 + $0x8] sm:$0xf0] %vm525_vm12, %v778_v51 }
  0xf4   : > { %650 = vst.msk [vmem:[#allocation2 + $0x8] sm:$0xf] %vm379_vm13, %v648_v52  ;;  %1295 = vrot.lane.b32.xlu1 %v1294_v46, %s5318_s19  ;;  %1163 = vrot.lane.b32.xlu0 %v1161_v47, %s5318_s19 }
  0xf6   : > { %v968_v58 = vpop.permute.xlu1 %967  ;;  %v845_v59 = vpop.permute.xlu0 %844 }
  0xf7   : > { %970 = vst.msk [vmem:[#allocation2 + $0x10] sm:$0xf0] %vm458_vm8, %v968_v58 }
  0xf8   : > { %847 = vst.msk [vmem:[#allocation2 + $0x10] sm:$0xf] %vm316_vm9, %v845_v59  ;;  %1063 = vrot.lane.b32.xlu1 %v1062_v53, %s5320_s11  ;;  %929 = vrot.lane.b32.xlu0 %v927_v54, %s5320_s11 }
  0xfa   : > { %v1210_v0 = vpop.permute.xlu1 %1209  ;;  %v1088_v1 = vpop.permute.xlu0 %1087 }
  0xfb   : > { %1212 = vst.msk [vmem:[#allocation2 + $0x18] sm:$0xf0] %vm449_vm7, %v1210_v0  ;;  %vm406_vm7 = vcmask 978816  }
  0xfc   : > { %1090 = vst.msk [vmem:[#allocation2 + $0x18] sm:$0xf] %vm307_vm5, %v1088_v1  ;;  %1304 = vrot.lane.b32.xlu1 %v1303_v60, %s5319_s26  ;;  %1171 = vrot.lane.b32.xlu0 %v1169_v61, %s5319_s26  ;;  %vm555_vm5 = vcmask 982916  }
  0xfe   : > { %v543_v4 = vpop.permute.xlu1 %542  ;;  %v395_v5 = vpop.permute.xlu0 %394 }
  0xff   : > { %546 = vst.msk [vmem:[#allocation2] sm:$0xf0] %vm545_vm3, %v543_v4  ;;  %v5321_v4 = vmov 0.0  }
 0x100   : > { %398 = vst.msk [vmem:[#allocation2] sm:$0xf] %vm397_vm6, %v395_v5  ;;  %1313 = vrot.lane.b32.xlu1 %v1312_v2, %s5320_s11  ;;  %1179 = vrot.lane.b32.xlu0 %v1177_v3, %s5320_s11  ;;  %2644 = vst [vmem:[#allocation5] sm:$0xff] %v5321_v4 }
 0x101   : > { %2645 = vst [vmem:[#allocation5 + $0x8] sm:$0xff] %v5321_v4  ;;  %2646 = vst [vmem:[#allocation5 + $0x10] sm:$0xff] %v5321_v4 }
 0x102   : > { %v787_v6 = vpop.permute.xlu1 %786  ;;  %v656_v7 = vpop.permute.xlu0 %655  ;;  %2647 = vst [vmem:[#allocation5 + $0x18] sm:$0xff] %v5321_v4  ;;  %2648 = vst [vmem:[#allocation5 + $0x20] sm:$0xf] %v5321_v4 }
 0x103   : > { %789 = vst.msk [vmem:[#allocation2 + $0x8] sm:$0xf0] %vm6568_vm2, %v787_v6  ;;  %vm6569_vm2 = vcmask 1044416  }
 0x104   : > { %658 = vst.msk [vmem:[#allocation2 + $0x8] sm:$0xf] %vm6567_vm4, %v656_v7  ;;  %vm6570_vm4 = vcmask 458116  }
 0x106   : > { %v976_v8 = vpop.permute.xlu1 %975  ;;  %v852_v9 = vpop.permute.xlu0 %851 }
 0x107   : > { %978 = vst.msk [vmem:[#allocation2 + $0x10] sm:$0xf0] %vm467_vm10, %v976_v8 }
 0x108   : > { %854 = vst.msk [vmem:[#allocation2 + $0x10] sm:$0xf] %vm325_vm11, %v852_v9 }
 0x10a   : > { %v1218_v10 = vpop.permute.xlu1 %1217  ;;  %v1095_v11 = vpop.permute.xlu0 %1094 }
 0x10b   : > { %1220 = vst.msk [vmem:[#allocation2 + $0x18] sm:$0xf0] %vm458_vm8, %v1218_v10  ;;  %vm6571_vm8 = vcmask 454016  }
 0x10c   : > { %1097 = vst.msk [vmem:[#allocation2 + $0x18] sm:$0xf] %vm316_vm9, %v1095_v11  ;;  %vm565_vm9 = vcmask 1048516  }
 0x10e   : > { %v553_v12 = vpop.permute.xlu1 %552  ;;  %v404_v13 = vpop.permute.xlu0 %403 }
 0x10f   : > { %556 = vst.msk [vmem:[#allocation2] sm:$0xf0] %vm555_vm5, %v553_v12 }
 0x110   : > { %407 = vst.msk [vmem:[#allocation2] sm:$0xf] %vm406_vm7, %v404_v13  ;;  %v5798_v13 = vld [vmem:[%s6555_s2] ss:$0 sm:$0xff] }
 0x112   : > { %v796_v14 = vpop.permute.xlu1 %795  ;;  %v664_v15 = vpop.permute.xlu0 %663 }
 0x113   : > { %798 = vst.msk [vmem:[#allocation2 + $0x8] sm:$0xf0] %vm545_vm3, %v796_v14 }
 0x114   : > { %666 = vst.msk [vmem:[#allocation2 + $0x8] sm:$0xf] %vm397_vm6, %v664_v15 }
 0x116   : > { %v984_v16 = vpop.permute.xlu1 %983  ;;  %v859_v17 = vpop.permute.xlu0 %858 }
 0x117   : > { %986 = vst.msk [vmem:[#allocation2 + $0x10] sm:$0xf0] %vm6570_vm4, %v984_v16 }
 0x118   : > { %861 = vst.msk [vmem:[#allocation2 + $0x10] sm:$0xf] %vm6571_vm8, %v859_v17 }
 0x11a   : > { %v1226_v18 = vpop.permute.xlu1 %1225  ;;  %v1102_v19 = vpop.permute.xlu0 %1101 }
 0x11b   : > { %1228 = vst.msk [vmem:[#allocation2 + $0x18] sm:$0xf0] %vm467_vm10, %v1226_v18  ;;  %vm6572_vm10 = vcmask 519616  }
 0x11c   : > { %1104 = vst.msk [vmem:[#allocation2 + $0x18] sm:$0xf] %vm325_vm11, %v1102_v19  ;;  %vm6573_vm11 = vmmov %vm6570_vm4 }
 0x11d   : > { %vm6574_vm4 = vmmov %vm6571_vm8  ;;  %vm6575_vm8 = vcmask 585216  }
 0x11e   : > { %v563_v20 = vpop.permute.xlu1 %562  ;;  %v413_v21 = vpop.permute.xlu0 %412 }
 0x11f   : > { %566 = vst.msk [vmem:[#allocation2] sm:$0xf0] %vm565_vm9, %v563_v20 }
 0x120   : > { %416 = vst.msk [vmem:[#allocation2] sm:$0xf] %vm6569_vm2, %v413_v21 }
 0x122   : > { %v805_v22 = vpop.permute.xlu1 %804  ;;  %v672_v23 = vpop.permute.xlu0 %671 }
 0x123   : > { %807 = vst.msk [vmem:[#allocation2 + $0x8] sm:$0xf0] %vm555_vm5, %v805_v22 }
 0x124   : > { %674 = vst.msk [vmem:[#allocation2 + $0x8] sm:$0xf] %vm406_vm7, %v672_v23 }
 0x126   : > { %v992_v24 = vpop.permute.xlu1 %991  ;;  %v866_v25 = vpop.permute.xlu0 %865 }
 0x127   : > { %v1317_v26 = vld [vmem:[#allocation2] sm:$0xff]  ;;  %994 = vst.msk [vmem:[#allocation2 + $0x10] sm:$0xf0] %vm485_vm14, %v992_v24 }
 0x128   : > { %868 = vst.msk [vmem:[#allocation2 + $0x10] sm:$0xf] %vm6572_vm10, %v866_v25  ;;  %5060 = vmatprep.mubr.bf16.mxu0 %v1317_v26 }
 0x12a   : > { %v1234_v27 = vpop.permute.xlu1 %1233  ;;  %v1109_v28 = vpop.permute.xlu0 %1108 }
 0x12b   : > { %1236 = vst.msk [vmem:[#allocation2 + $0x18] sm:$0xf0] %vm6573_vm11, %v1234_v27  ;;  %vm6576_vm11 = vcmask 654916  }
 0x12c   : > { %1111 = vst.msk [vmem:[#allocation2 + $0x18] sm:$0xf] %vm6574_vm4, %v1109_v28  ;;  %vm6577_vm4 = vcmask 650816  }
 0x12e   : > { %v814_v29 = vpop.permute.xlu1 %813  ;;  %v680_v30 = vpop.permute.xlu0 %679 }
 0x12f   : > { %816 = vst.msk [vmem:[#allocation2 + $0x8] sm:$0xf0] %vm565_vm9, %v814_v29 }
 0x130   : > { %682 = vst.msk [vmem:[#allocation2 + $0x8] sm:$0xf] %vm6569_vm2, %v680_v30  ;;  %vm6578_vm2 = vmmov %vm6575_vm8 }
 0x132   : > { %v1001_v31 = vpop.permute.xlu1 %1000  ;;  %v874_v32 = vpop.permute.xlu0 %873 }
 0x133   : > { %1003 = vst.msk [vmem:[#allocation2 + $0x10] sm:$0xf0] %vm495_vm0, %v1001_v31 }
 0x134   : > { %876 = vst.msk [vmem:[#allocation2 + $0x10] sm:$0xf] %vm6575_vm8, %v874_v32  ;;  %vm6580_vm8 = vmmov %vm6577_vm4 }
 0x136   : > { %v1242_v33 = vpop.permute.xlu1 %1241  ;;  %v1116_v34 = vpop.permute.xlu0 %1115 }
 0x137   : > { %v1318_v35 = vld [vmem:[#allocation2 + $0x8] sm:$0xff]  ;;  %1244 = vst.msk [vmem:[#allocation2 + $0x18] sm:$0xf0] %vm485_vm14, %v1242_v33  ;;  %vm6579_vm14 = vmmov %vm6576_vm11 }
 0x138   : > { %1118 = vst.msk [vmem:[#allocation2 + $0x18] sm:$0xf] %vm6572_vm10, %v1116_v34  ;;  %5061 = vmatmul.mubr.bf16.vlgmr.msra.gmra.mrb[0].mxu0 %v1318_v35  ;;  %vm1712_vm10 = vcmask 521220  }
 0x13a   : > { %v1010_v36 = vpop.permute.xlu1 %1009  ;;  %v882_v37 = vpop.permute.xlu0 %881 }
 0x13b   : > { %1012 = vst.msk [vmem:[#allocation2 + $0x10] sm:$0xf0] %vm6576_vm11, %v1010_v36  ;;  %vm1834_vm11 = vcmask 523270  }
 0x13c   : > { %884 = vst.msk [vmem:[#allocation2 + $0x10] sm:$0xf] %vm6577_vm4, %v882_v37  ;;  %vm1599_vm4 = vcmask 1043970  }
 0x13e   : > { %v1251_v38 = vpop.permute.xlu1 %1250  ;;  %v1124_v39 = vpop.permute.xlu0 %1123 }
 0x13f   : > { %1253 = vst.msk [vmem:[#allocation2 + $0x18] sm:$0xf0] %vm495_vm0, %v1251_v38  ;;  %vm6581_vm0 = vcmask 851716  }
 0x140   : > { %1126 = vst.msk [vmem:[#allocation2 + $0x18] sm:$0xf] %vm6578_vm2, %v1124_v39  ;;  %vm6582_vm2 = vcmask 847616   ;;  %v5102_v39 = vld [vmem:[%s6556_s3 + $0x40] sm:$0xff]  }
 0x141   : > { %4780 = vmatprep.subr.bf16.mxu1 %v5102_v39 }
 0x142   : > { %v1019_v40 = vpop.permute.xlu1 %1018  ;;  %v890_v41 = vpop.permute.xlu0 %889 }
 0x143   : > { %1021 = vst.msk [vmem:[#allocation2 + $0x10] sm:$0xf0] %vm515_vm15, %v1019_v40 }
 0x144   : > { %892 = vst.msk [vmem:[#allocation2 + $0x10] sm:$0xf] %vm370_vm1, %v890_v41  ;;  %v5103_v41 = vld [vmem:[%s6556_s3] sm:$0xff]  }
 0x145   : > { %4781 = vmatpush3.bf16.msra.mxu1 %v5103_v41 }
 0x146   : > { %v1260_v42 = vpop.permute.xlu1 %1259  ;;  %v1132_v43 = vpop.permute.xlu0 %1131 }
 0x147   : > { %1262 = vst.msk [vmem:[#allocation2 + $0x18] sm:$0xf0] %vm6579_vm14, %v1260_v42  ;;  %v5104_v42 = vld [vmem:[%s6556_s3 + $0x48] sm:$0xff]   ;;  %vm1721_vm14 = vcmask 1046020  }
 0x148   : > { %1134 = vst.msk [vmem:[#allocation2 + $0x18] sm:$0xf] %vm6580_vm8, %v1132_v43  ;;  %4782 = vmatprep.subr.bf16.mxu1 %v5104_v42  ;;  %vm1843_vm8 = vcmask 1048070  }
 0x14a   : > { %v1028_v44 = vpop.permute.xlu1 %1027  ;;  %v898_v45 = vpop.permute.xlu0 %897 }
 0x14b   : > { %1030 = vst.msk [vmem:[#allocation2 + $0x10] sm:$0xf0] %vm525_vm12, %v1028_v44 }
 0x14c   : > { %900 = vst.msk [vmem:[#allocation2 + $0x10] sm:$0xf] %vm379_vm13, %v898_v45 }
 0x14e   : > { %v1269_v46 = vpop.permute.xlu1 %1268  ;;  %v1140_v47 = vpop.permute.xlu0 %1139 }
 0x14f   : > { %1271 = vst.msk [vmem:[#allocation2 + $0x18] sm:$0xf0] %vm515_vm15, %v1269_v46  ;;  %vm6583_vm15 = vmmov %vm6581_vm0  ;;  %v5106_v46 = vld [vmem:[%s6556_s3 + $0xc0] sm:$0xff]  }
 0x150   : > { %1142 = vst.msk [vmem:[#allocation2 + $0x18] sm:$0xf] %vm370_vm1, %v1140_v47  ;;  %vm6584_vm1 = vmmov %vm6582_vm2  ;;  %4802 = vmatprep.subr.bf16.mxu0 %v5106_v46 }
 0x152   : > { %v1037_v48 = vpop.permute.xlu1 %1036  ;;  %v906_v49 = vpop.permute.xlu0 %905 }
 0x153   : > { %1039 = vst.msk [vmem:[#allocation2 + $0x10] sm:$0xf0] %vm6581_vm0, %v1037_v48  ;;  %v5105_v48 = vld [vmem:[%s6556_s3 + $0x8] sm:$0xff]  }
 0x154   : > { %908 = vst.msk [vmem:[#allocation2 + $0x10] sm:$0xf] %vm6582_vm2, %v906_v49  ;;  %4783 = vmatpush3.bf16.msra.mxu1 %v5105_v48  ;;  %v5117_v48 = vld [vmem:[%s6556_s3 + $0x20] sm:$0xff]  }
 0x156   : > { %v1278_v50 = vpop.permute.xlu1 %1277  ;;  %v1148_v51 = vpop.permute.xlu0 %1147 }
 0x157   : > { %1280 = vst.msk [vmem:[#allocation2 + $0x18] sm:$0xf0] %vm525_vm12, %v1278_v50  ;;  %vm6585_vm12 = vcmask 1044416  }
 0x158   : > { %1150 = vst.msk [vmem:[#allocation2 + $0x18] sm:$0xf] %vm379_vm13, %v1148_v51  ;;  %vm6586_vm13 = vmmov %vm6585_vm12  ;;  %v5107_v51 = vld [vmem:[%s6556_s3 + $0x80] sm:$0xff]  }
 0x159   : > { %4803 = vmatpush3.bf16.msra.mxu0 %v5107_v51  ;;  %v5119_v51 = vld [vmem:[%s6556_s3 + $0x98] sm:$0xff]  }
 0x15a   : > { %v1046_v52 = vpop.permute.xlu1 %1045  ;;  %v914_v53 = vpop.permute.xlu0 %913 }
 0x15b   : > { %1048 = vst.msk [vmem:[#allocation2 + $0x10] sm:$0xf0] %vm545_vm3, %v1046_v52  ;;  %v5108_v52 = vld [vmem:[%s6556_s3 + $0x50] sm:$0xff]  }
 0x15c   : > { %916 = vst.msk [vmem:[#allocation2 + $0x10] sm:$0xf] %vm397_vm6, %v914_v53  ;;  %4784 = vmatprep.subr.bf16.mxu1 %v5108_v52  ;;  %v5120_v52 = vld [vmem:[%s6556_s3 + $0x68] sm:$0xff]  }
 0x15e   : > { %v1287_v54 = vpop.permute.xlu1 %1286  ;;  %v1156_v55 = vpop.permute.xlu0 %1155 }
 0x15f   : > { %1289 = vst.msk [vmem:[#allocation2 + $0x18] sm:$0xf0] %vm6583_vm15, %v1287_v54 }
 0x160   : > { %1158 = vst.msk [vmem:[#allocation2 + $0x18] sm:$0xf] %vm6584_vm1, %v1156_v55 }
 0x162   : > { %v1055_v56 = vpop.permute.xlu1 %1054  ;;  %v922_v57 = vpop.permute.xlu0 %921 }
 0x163   : > { %1057 = vst.msk [vmem:[#allocation2 + $0x10] sm:$0xf0] %vm555_vm5, %v1055_v56 }
 0x164   : > { %924 = vst.msk [vmem:[#allocation2 + $0x10] sm:$0xf] %vm406_vm7, %v922_v57 }
 0x166   : > { %v1296_v58 = vpop.permute.xlu1 %1295  ;;  %v1164_v59 = vpop.permute.xlu0 %1163 }
 0x167   : > { %1298 = vst.msk [vmem:[#allocation2 + $0x18] sm:$0xf0] %vm545_vm3, %v1296_v58  ;;  %vm1465_vm3 = vcmask 523264  }
 0x168   : > { %1166 = vst.msk [vmem:[#allocation2 + $0x18] sm:$0xf] %vm397_vm6, %v1164_v59  ;;  %vm1478_vm6 = vcmask 519168  }
 0x169   : > { %1469 = vst.msk [vmem:[#allocation3 + $0x18] sm:$0xff] %vm1465_vm3, %v5321_v4  ;;  %1470 = vst.msk [vmem:[#allocation3 + $0x20] sm:$0xff] %vm1465_vm3, %v5321_v4 }
 0x16a   : > { %v1064_v60 = vpop.permute.xlu1 %1063  ;;  %v930_v61 = vpop.permute.xlu0 %929  ;;  %1466 = vst.msk [vmem:[#allocation3] sm:$0xff] %vm1465_vm3, %v5321_v4  ;;  %1467 = vst.msk [vmem:[#allocation3 + $0x8] sm:$0xff] %vm1465_vm3, %v5321_v4 }
 0x16b   : > { %1066 = vst.msk [vmem:[#allocation2 + $0x10] sm:$0xf0] %vm565_vm9, %v1064_v60 }
 0x16c   : > { %932 = vst.msk [vmem:[#allocation2 + $0x10] sm:$0xf] %vm6585_vm12, %v930_v61 }
 0x16d   : > { %1468 = vst.msk [vmem:[#allocation3 + $0x10] sm:$0xff] %vm1465_vm3, %v5321_v4  ;;  %1471 = vst.msk [vmem:[#allocation3 + $0x28] sm:$0xff] %vm1465_vm3, %v5321_v4 }
 0x16e   : > { %v1305_v62 = vpop.permute.xlu1 %1304  ;;  %v1172_v63 = vpop.permute.xlu0 %1171  ;;  %1472 = vst.msk [vmem:[#allocation3 + $0x30] sm:$0xff] %vm1465_vm3, %v5321_v4  ;;  %1473 = vst.msk [vmem:[#allocation3 + $0x38] sm:$0xff] %vm1465_vm3, %v5321_v4 }
 0x16f   : > { %1307 = vst.msk [vmem:[#allocation2 + $0x18] sm:$0xf0] %vm555_vm5, %v1305_v62  ;;  %vm1490_vm5 = vcmask 517120   ;;  %v5109_v62 = vld [vmem:[%s6556_s3 + $0x10] sm:$0xff]  }
 0x170   : > { %1174 = vst.msk [vmem:[#allocation2 + $0x18] sm:$0xf] %vm406_vm7, %v1172_v63  ;;  %vm1499_vm7 = vcmask 1041920   ;;  %v5110_v63 = vld [vmem:[%s6556_s3 + $0xc8] sm:$0xff]   ;;  %4785 = vmatpush3.bf16.msra.mxu1 %v5109_v62 }
 0x171   : > { %1474 = vst.msk [vmem:[#allocation3 + $0x40] sm:$0xff] %vm1465_vm3, %v5321_v4  ;;  %1475 = vst.msk [vmem:[#allocation3 + $0x48] sm:$0xff] %vm1465_vm3, %v5321_v4  ;;  %v1506_v5 = vld [vmem:[#allocation3 + $0x3] ss:$2 sm:$0xf]  ;;  %4804 = vmatprep.subr.bf16.mxu0 %v5110_v63 }
 0x172   : > { %v1314_v0 = vpop.permute.xlu1 %1313  ;;  %v1180_v1 = vpop.permute.xlu0 %1179  ;;  %1476 = vst.msk [vmem:[#allocation3 + $0x50] sm:$0xff] %vm1465_vm3, %v5321_v4  ;;  %1477 = vst.msk [vmem:[#allocation3 + $0x58] sm:$0xff] %vm1465_vm3, %v5321_v4  ;;  %v1507_v6 = vpack.c.bf16 %v1506_v5, %v1506_v5  ;;  %v1493_v7 = vld [vmem:[#allocation3 + $0x1] ss:$2 sm:$0xf] }
 0x173   : > { %v1319_v2 = vld [vmem:[#allocation2 + $0x10] sm:$0xff]  ;;  %1316 = vst.msk [vmem:[#allocation2 + $0x18] sm:$0xf0] %vm565_vm9, %v1314_v0  ;;  %v1494_v8 = vpack.c.bf16 %v1493_v7, %v1493_v7  ;;  %v1502_v9 = vld [vmem:[#allocation3 + $0x2] ss:$2 sm:$0xf] }
 0x174   : > { %1182 = vst.msk [vmem:[#allocation2 + $0x18] sm:$0xf] %vm6586_vm13, %v1180_v1  ;;  %5064 = vmatprep.mubr.bf16.mxu0 %v1319_v2  ;;  %1509 = vrot.lane.b32.xlu0 %v1507_v6, %s5313_s14  ;;  %v1503_v10 = vpack.c.bf16 %v1502_v9, %v1502_v9  ;;  %v1488_v12 = vld [vmem:[#allocation3] ss:$2 sm:$0xf]  ;;  %vm1590_vm9 = vcmask 519170  }
 0x175   : > { %1479 = vst.msk [vmem:[#allocation3 + $0x60] sm:$0xf] %vm1478_vm6, %v5321_v4  ;;  %v1489_v14 = vpack.c.bf16 %v1488_v12, %v1488_v12  ;;  %v5111_v7 = vld [vmem:[%s6556_s3 + $0x88] sm:$0xff]  }
 0x176   : > { %1504 = vst.msk [vmem:[#allocation4 + $0x8] sm:$0x3] %vm1490_vm5, %v1503_v10  ;;  %4805 = vmatpush3.bf16.msra.mxu0 %v5111_v7 }
 0x177   : > { %1491 = vst.msk [vmem:[#allocation4] sm:$0x3] %vm1490_vm5, %v1489_v14  ;;  %v5114_v14 = vld [vmem:[%s6556_s3 + $0xd0] sm:$0xff]  }
 0x178   : > { %1496 = vrot.lane.b32.xlu0 %v1494_v8, %s5313_s14  ;;  %v5112_v8 = vld [vmem:[%s6556_s3 + $0x58] sm:$0xff]   ;;  %4806 = vmatprep.subr.bf16.mxu0 %v5114_v14 }
 0x179   : > { %4786 = vmatprep.subr.bf16.mxu1 %v5112_v8  ;;  %v5128_v8 = vld [vmem:[%s6556_s3 + $0x78] sm:$0xff]  }
 0x17b   : > { %v1320_v3 = vld [vmem:[#allocation2 + $0x18] sm:$0xff] }
 0x17c   : > { %5065 = vmatmul.mubr.bf16.gmra.mrb[4].mxu0 %v1320_v3 }
 0x1e6   : > { %v1510_v11 = vpop.permute.xlu0 %1509 }
 0x1e7   : > { %1512 = vst.msk [vmem:[#allocation4 + $0x8] sm:$0x3] %vm1499_vm7, %v1510_v11 }
 0x1ea   : > { %v1497_v16 = vpop.permute.xlu0 %1496 }
 0x1eb   : > { %1500 = vst.msk [vmem:[#allocation4] sm:$0x3] %vm1499_vm7, %v1497_v16 }
 0x20b   : > { %v5062_v15 = vpop.f32.mrb[0].mxu0 }
 0x20c   : > { %v1435_v17 = vadd.f32 %v5062_v15, %v5798_v13  ;;  %v1426_v18 = vpop.f32.mrb[1].mxu0 }
 0x20d   : > { %v1427_v19 = vadd.f32 %v5798_v13, %v1426_v18  ;;  %v5063_v20 = vpop.f32.mrb[2].mxu0 }
 0x20e   : > { %v1459_v21 = vmax.f32 %v1435_v17, 0.0  ;;  %v1438_v22 = vadd.f32 %v5063_v20, %v5798_v13  ;;  %v1429_v23 = vpop.f32.mrb[3].mxu0 }
 0x20f   : > { %v1457_v24 = vmax.f32 %v1427_v19, 0.0  ;;  %v1430_v25 = vadd.f32 %v5798_v13, %v1429_v23  ;;  %v5115_v19 = vld [vmem:[%s6556_s3 + $0x90] sm:$0xff]  }
 0x210   : > { %1482 = vst.msk [vmem:[#allocation3 + $0x1f] sm:$0xff] %vm1465_vm3, %v1459_v21  ;;  %v1460_v26 = vmax.f32 %v1438_v22, 0.0  ;;  %v5113_v21 = vld [vmem:[%s6556_s3 + $0x18] sm:$0xff]   ;;  %4807 = vmatpush3.bf16.msra.mxu0 %v5115_v19 }
 0x211   : > { %1480 = vst.msk [vmem:[#allocation3 + $0xb] sm:$0xff] %vm1465_vm3, %v1457_v24  ;;  %v1458_v27 = vmax.f32 %v1430_v25, 0.0  ;;  %v5116_v24 = vld [vmem:[%s6556_s3 + $0x60] sm:$0xff]   ;;  %4787 = vmatpush3.bf16.msra.mxu1 %v5113_v21 }
 0x212   : > { %1483 = vst.msk [vmem:[#allocation3 + $0x29] sm:$0xff] %vm1465_vm3, %v1460_v26  ;;  %4788 = vmatprep.subr.bf16.mxu1 %v5116_v24 }
 0x213   : > { %1481 = vst.msk [vmem:[#allocation3 + $0x15] sm:$0xff] %vm1465_vm3, %v1458_v27 }
 0x215   : > { %4789 = vmatpush3.bf16.msra.mxu1 %v5117_v48 }
 0x216   : > { %4790 = vmatprep.subr.bf16.mxu1 %v5120_v52 }
 0x217   : > { %v1635_v28 = vld [vmem:[#allocation3 + $0x21] ss:$2 sm:$0xf]  ;;  %v1629_v55 = vld [vmem:[#allocation3 + $0x20] ss:$2 sm:$0xf] }
 0x218   : > { %v1621_v29 = vld [vmem:[#allocation3 + $0x1f] ss:$2 sm:$0xf]  ;;  %v1530_v30 = vld [vmem:[#allocation3 + $0xd] ss:$2 sm:$0xf]  ;;  %v1636_v31 = vpack.c.bf16 %v1635_v28, %v1635_v28  ;;  %v1630_v59 = vpack.c.bf16 %v1629_v55, %v1629_v55 }
 0x219   : > { %v1531_v32 = vpack.c.bf16 %v1530_v30, %v1530_v30  ;;  %v1729_v33 = vld [vmem:[#allocation3 + $0x2b] ss:$2 sm:$0xf]  ;;  %v1622_v36 = vpack.c.bf16 %v1621_v29, %v1621_v29  ;;  %v1526_v50 = vld [vmem:[#allocation3 + $0xc] ss:$2 sm:$0xf] }
 0x21a   : > { %v1638_v34 = vrot.slane %v1636_v31, 6  ;;  %v1518_v35 = vld [vmem:[#allocation3 + $0xb] ss:$2 sm:$0xf]  ;;  %v1730_v38 = vpack.c.bf16 %v1729_v33, %v1729_v33  ;;  %v1527_v54 = vpack.c.bf16 %v1526_v50, %v1526_v50  ;;  %v1632_v3 = vrot.slane %v1630_v59, 6  ;;  %v5123_v55 = vld [vmem:[%s6556_s3 + $0xa0] sm:$0xff]  }
 0x21b   : > { %1533 = vrot.lane.b32.xlu0 %v1531_v32, %s5313_s14  ;;  %v1607_v37 = vld [vmem:[#allocation3 + $0x17] ss:$2 sm:$0xf]  ;;  %v1519_v40 = vpack.c.bf16 %v1518_v35, %v1518_v35  ;;  %v1624_v43 = vrot.slane %v1622_v36, 6 }
 0x21c   : > { %1639 = vrot.lane.b32.xlu1 %v1638_v34, %s5313_s14  ;;  %v1608_v44 = vpack.c.bf16 %v1607_v37, %v1607_v37  ;;  %v1714_v45 = vld [vmem:[#allocation3 + $0x29] ss:$2 sm:$0xf]  ;;  %v1592_v47 = vld [vmem:[#allocation3 + $0x15] ss:$2 sm:$0xf] }
 0x21d   : > { %v1732_v49 = vrot.slane %v1730_v38, 4  ;;  %v1715_v53 = vpack.c.bf16 %v1714_v45, %v1714_v45  ;;  %v1514_v56 = vld [vmem:[#allocation3 + $0xa] ss:$2 sm:$0xf]  ;;  %v1593_v58 = vpack.c.bf16 %v1592_v47, %v1592_v47  ;;  %1528 = vst.msk [vmem:[#allocation4 + $0x18] sm:$0x3] %vm1490_vm5, %v1527_v54 }
 0x21e   : > { %v1610_v57 = vrot.slane %v1608_v44, 6  ;;  %v1515_v60 = vpack.c.bf16 %v1514_v56, %v1514_v56  ;;  %v1615_v61 = vld [vmem:[#allocation3 + $0x1e] ss:$2 sm:$0xf]  ;;  %1634 = vst.msk [vmem:[#allocation4 + $0x18] sm:$0xc] %vm1590_vm9, %v1632_v3 }
 0x21f   : > { %1521 = vrot.lane.b32.xlu0 %v1519_v40, %s5313_s14  ;;  %v1616_v0 = vpack.c.bf16 %v1615_v61, %v1615_v61  ;;  %v1723_v1 = vld [vmem:[#allocation3 + $0x2a] ss:$2 sm:$0xf]  ;;  %v1601_v2 = vld [vmem:[#allocation3 + $0x16] ss:$2 sm:$0xf] }
 0x220   : > { %1625 = vrot.lane.b32.xlu1 %v1624_v43, %s5313_s14  ;;  %1516 = vst.msk [vmem:[#allocation4 + $0x10] sm:$0x3] %vm1490_vm5, %v1515_v60  ;;  %v1724_v4 = vpack.c.bf16 %v1723_v1, %v1723_v1  ;;  %v1602_v5 = vpack.c.bf16 %v1601_v2, %v1601_v2  ;;  %v1707_v6 = vld [vmem:[#allocation3 + $0x28] ss:$2 sm:$0xf]  ;;  %v1717_v9 = vrot.slane %v1715_v53, 4 }
 0x221   : > { %v1618_v10 = vrot.slane %v1616_v0, 6  ;;  %v1708_v11 = vpack.c.bf16 %v1707_v6, %v1707_v6  ;;  %v1585_v12 = vld [vmem:[#allocation3 + $0x14] ss:$2 sm:$0xf]  ;;  %v1595_v15 = vrot.slane %v1593_v58, 6  ;;  %v5121_v53 = vld [vmem:[%s6556_s3 + $0x28] sm:$0xff]  }
 0x222   : > { %v1726_v16 = vrot.slane %v1724_v4, 4  ;;  %v1604_v17 = vrot.slane %v1602_v5, 6  ;;  %v1586_v18 = vpack.c.bf16 %v1585_v12, %v1585_v12  ;;  %v1550_v22 = vld [vmem:[#allocation3 + $0x16] ss:$2 sm:$0xf]  ;;  %v5122_v54 = vld [vmem:[%s6556_s3 + $0xe0] sm:$0xff]   ;;  %4791 = vmatpush3.bf16.msra.mxu1 %v5121_v53 }
 0x223   : > { %1733 = vrot.lane.b32.xlu0 %v1732_v49, %s5313_s14  ;;  %1620 = vst.msk [vmem:[#allocation4 + $0x10] sm:$0xc] %vm1590_vm9, %v1618_v10  ;;  %v1710_v20 = vrot.slane %v1708_v11, 4  ;;  %v1551_v25 = vpack.c.bf16 %v1550_v22, %v1550_v22  ;;  %v1538_v26 = vld [vmem:[#allocation3 + $0x14] ss:$2 sm:$0xf] }
 0x224   : > { %1611 = vrot.lane.b32.xlu1 %v1610_v57, %s5313_s14  ;;  %1728 = vst.msk [vmem:[#allocation4 + $0x8] sm:$0x30] %vm1712_vm10, %v1726_v16  ;;  %v1588_v23 = vrot.slane %v1586_v18, 6  ;;  %v1539_v27 = vpack.c.bf16 %v1538_v26, %v1538_v26  ;;  %v1660_v28 = vld [vmem:[#allocation3 + $0x2a] ss:$2 sm:$0xf] }
 0x225   : > { %1606 = vst.msk [vmem:[#allocation4 + $0x8] sm:$0xc] %vm1590_vm9, %v1604_v17  ;;  %v1574_v29 = vld [vmem:[#allocation3 + $0x20] ss:$2 sm:$0xf]  ;;  %v1661_v30 = vpack.c.bf16 %v1660_v28, %v1660_v28  ;;  %v5118_v49 = vld [vmem:[%s6556_s3 + $0xd8] sm:$0xff]  }
 0x226   : > { %1713 = vst.msk [vmem:[#allocation4] sm:$0x30] %vm1712_vm10, %v1710_v20  ;;  %v1575_v31 = vpack.c.bf16 %v1574_v29, %v1574_v29  ;;  %v1644_v32 = vld [vmem:[#allocation3 + $0x28] ss:$2 sm:$0xf]  ;;  %4808 = vmatprep.subr.bf16.mxu0 %v5118_v49  ;;  %v5124_v56 = vld [vmem:[%s6556_s3 + $0x70] sm:$0xff]  }
 0x227   : > { %1718 = vrot.lane.b32.xlu0 %v1717_v9, %s5313_s14  ;;  %1591 = vst.msk [vmem:[#allocation4] sm:$0xc] %vm1590_vm9, %v1588_v23  ;;  %v1562_v33 = vld [vmem:[#allocation3 + $0x1e] ss:$2 sm:$0xf]  ;;  %v1645_v34 = vpack.c.bf16 %v1644_v32, %v1644_v32  ;;  %v1663_v36 = vrot.slane %v1661_v30, 6  ;;  %4809 = vmatpush3.bf16.msra.mxu0 %v5119_v51 }
 0x228   : > { %1596 = vrot.lane.b32.xlu1 %v1595_v15, %s5313_s14  ;;  %1552 = vst.msk [vmem:[#allocation4 + $0x28] sm:$0x3] %vm1490_vm5, %v1551_v25  ;;  %1540 = vst.msk [vmem:[#allocation4 + $0x20] sm:$0x3] %vm1490_vm5, %v1539_v27  ;;  %v1563_v35 = vpack.c.bf16 %v1562_v33, %v1562_v33  ;;  %4810 = vmatprep.subr.bf16.mxu0 %v5122_v54  ;;  %v5125_v0 = vld [vmem:[%s6556_s3 + $0x30] sm:$0xff]   ;;  %v5126_v5 = vld [vmem:[%s6556_s3 + $0xe8] sm:$0xff]  }
 0x229   : > { %1576 = vst.msk [vmem:[#allocation4 + $0x38] sm:$0x3] %vm1490_vm5, %v1575_v31  ;;  %v1647_v37 = vrot.slane %v1645_v34, 6  ;;  %4792 = vmatprep.subr.bf16.mxu1 %v5124_v56  ;;  %v5127_v6 = vld [vmem:[%s6556_s3 + $0xa8] sm:$0xff]   ;;  %v5129_v9 = vld [vmem:[%s6556_s3 + $0x38] sm:$0xff]   ;;  %v5130_v11 = vld [vmem:[%s6556_s3 + $0xf0] sm:$0xff]  }
 0x22a   : > { %1564 = vst.msk [vmem:[#allocation4 + $0x30] sm:$0x3] %vm1490_vm5, %v1563_v35  ;;  %4793 = vmatpush3.bf16.msra.mxu1 %v5125_v0  ;;  %v5131_v12 = vld [vmem:[%s6556_s3 + $0xb0] sm:$0xff]   ;;  %v5132_v16 = vld [vmem:[%s6556_s3 + $0x140] sm:$0xff]   ;;  %v5133_v17 = vld [vmem:[%s6556_s3 + $0xf8] sm:$0xff]  }
 0x22b   : > { %1665 = vst.msk [vmem:[#allocation4 + $0x28] sm:$0xc] %vm1590_vm9, %v1663_v36  ;;  %1649 = vst.msk [vmem:[#allocation4 + $0x20] sm:$0xc] %vm1590_vm9, %v1647_v37  ;;  %4811 = vmatpush3.bf16.msra.mxu0 %v5123_v55  ;;  %4794 = vmatprep.subr.bf16.mxu1 %v5128_v8  ;;  %v5135_v23 = vld [vmem:[%s6556_s3 + $0xb8] sm:$0xff]   ;;  %v5138_v30 = vld [vmem:[%s6556_s3 + $0x1c0] sm:$0xff]  }
 0x22c   : > { %4812 = vmatprep.subr.bf16.mxu0 %v5126_v5  ;;  %v1554_v18 = vld [vmem:[#allocation3 + $0x17] ss:$2 sm:$0xf]  ;;  %v1667_v25 = vld [vmem:[#allocation3 + $0x2b] ss:$2 sm:$0xf] }
 0x22d   : > { %v1542_v21 = vld [vmem:[#allocation3 + $0x15] ss:$2 sm:$0xf]  ;;  %v1555_v24 = vpack.c.bf16 %v1554_v18, %v1554_v18  ;;  %v1668_v36 = vpack.c.bf16 %v1667_v25, %v1667_v25  ;;  %v1578_v37 = vld [vmem:[#allocation3 + $0x21] ss:$2 sm:$0xf] }
 0x22e   : > { %4795 = vmatpush3.bf16.msra.mxu1 %v5129_v9  ;;  %v1651_v49 = vld [vmem:[#allocation3 + $0x29] ss:$2 sm:$0xf]  ;;  %v1936_v18 = vld [vmem:[#allocation3 + $0x5c] ss:$2 sm:$0xf] }
 0x22f   : > { %4813 = vmatpush3.bf16.msra.mxu0 %v5127_v6  ;;  %4824 = vmatprep.subr.bf16.mxu1 %v5132_v16  ;;  %v1652_v6 = vpack.c.bf16 %v1651_v49, %v1651_v49 }
 0x230   : > { %4814 = vmatprep.subr.bf16.mxu0 %v5130_v11 }
 0x233   : > { %4815 = vmatpush3.bf16.msra.mxu0 %v5131_v12 }
 0x234   : > { %4816 = vmatprep.subr.bf16.mxu0 %v5133_v17 }
 0x237   : > { %4817 = vmatpush3.bf16.msra.mxu0 %v5135_v23 }
 0x238   : > { %4846 = vmatprep.subr.bf16.mxu0 %v5138_v30  ;;  %v1943_v30 = vld [vmem:[#allocation3 + $0x5d] ss:$2 sm:$0xf] }
 0x24f   : > { %v5066_v38 = vpop.f32.mrb[4].mxu0 }
 0x250   : > { %v1451_v39 = vadd.f32 %v5066_v38, %v5798_v13  ;;  %v1442_v40 = vpop.f32.mrb[5].mxu0 }
 0x251   : > { %v1443_v41 = vadd.f32 %v5798_v13, %v1442_v40  ;;  %v5067_v42 = vpop.f32.mrb[6].mxu0 }
 0x252   : > { %v1463_v43 = vmax.f32 %v1451_v39, 0.0  ;;  %v1454_v44 = vadd.f32 %v5067_v42, %v5798_v13  ;;  %v1445_v45 = vpop.f32.mrb[7].mxu0  ;;  %v1543_v42 = vpack.c.bf16 %v1542_v21, %v1542_v21 }
 0x253   : > { %v1461_v46 = vmax.f32 %v1443_v41, 0.0  ;;  %v1446_v47 = vadd.f32 %v5798_v13, %v1445_v45 }
 0x254   : > { %1486 = vst.msk [vmem:[#allocation3 + $0x47] sm:$0xff] %vm1465_vm3, %v1463_v43  ;;  %v1464_v50 = vmax.f32 %v1454_v44, 0.0 }
 0x255   : > { %1484 = vst.msk [vmem:[#allocation3 + $0x33] sm:$0xff] %vm1465_vm3, %v1461_v46  ;;  %v1462_v13 = vmax.f32 %v1446_v47, 0.0 }
 0x256   : > { %1487 = vst.msk [vmem:[#allocation3 + $0x51] sm:$0xff] %vm1465_vm3, %v1464_v50 }
 0x257   : > { %1485 = vst.msk [vmem:[#allocation3 + $0x3d] sm:$0xff] %vm1465_vm3, %v1462_v13  ;;  %v1670_v13 = vrot.slane %v1668_v36, 6 }
 0x25b   : > { %v1879_v57 = vld [vmem:[#allocation3 + $0x49] ss:$2 sm:$0xf]  ;;  %v1873_v22 = vld [vmem:[#allocation3 + $0x48] ss:$2 sm:$0xf] }
 0x25c   : > { %v1880_v58 = vpack.c.bf16 %v1879_v57, %v1879_v57  ;;  %v1757_v59 = vld [vmem:[#allocation3 + $0x35] ss:$2 sm:$0xf]  ;;  %v1865_v15 = vld [vmem:[#allocation3 + $0x47] ss:$2 sm:$0xf]  ;;  %v1874_v26 = vpack.c.bf16 %v1873_v22, %v1873_v22  ;;  %v1579_v57 = vpack.c.bf16 %v1578_v37, %v1578_v37 }
 0x25d   : > { %v1743_v60 = vld [vmem:[#allocation3 + $0x33] ss:$2 sm:$0xf]  ;;  %v1758_v61 = vpack.c.bf16 %v1757_v59, %v1757_v59  ;;  %v1866_v20 = vpack.c.bf16 %v1865_v15, %v1865_v15  ;;  %v1751_v27 = vld [vmem:[#allocation3 + $0x34] ss:$2 sm:$0xf] }
 0x25e   : > { %v1882_v62 = vrot.slane %v1880_v58, 2  ;;  %v1851_v63 = vld [vmem:[#allocation3 + $0x3f] ss:$2 sm:$0xf]  ;;  %v1744_v3 = vpack.c.bf16 %v1743_v60, %v1743_v60  ;;  %v1752_v28 = vpack.c.bf16 %v1751_v27, %v1751_v27  ;;  %v1876_v32 = vrot.slane %v1874_v26, 2 }
 0x25f   : > { %v1760_v1 = vrot.slane %v1758_v61, 4  ;;  %v1852_v2 = vpack.c.bf16 %v1851_v63, %v1851_v63  ;;  %v1836_v4 = vld [vmem:[#allocation3 + $0x3d] ss:$2 sm:$0xf]  ;;  %v1868_v35 = vrot.slane %v1866_v20, 2  ;;  %v1937_v20 = vpack.c.bf16 %v1936_v18, %v1936_v18  ;;  %v5143_v18 = vld [vmem:[%s6556_s3 + $0x188] sm:$0xff]  }
 0x260   : > { %1883 = vrot.lane.b32.xlu1 %v1882_v62, %s5313_s14  ;;  %v1837_v10 = vpack.c.bf16 %v1836_v4, %v1836_v4  ;;  %v1746_v14 = vrot.slane %v1744_v3, 4  ;;  %v1845_v29 = vld [vmem:[#allocation3 + $0x3e] ss:$2 sm:$0xf]  ;;  %v1754_v39 = vrot.slane %v1752_v28, 4  ;;  %v1654_v22 = vrot.slane %v1652_v6, 6 }
 0x261   : > { %1761 = vrot.lane.b32.xlu0 %v1760_v1, %s5313_s14  ;;  %v1854_v7 = vrot.slane %v1852_v2, 2  ;;  %v1911_v31 = vld [vmem:[#allocation3 + $0x53] ss:$2 sm:$0xf]  ;;  %v1846_v33 = vpack.c.bf16 %v1845_v29, %v1845_v29  ;;  %1878 = vst.msk [vmem:[#allocation4 + $0x18] sm:$0xc0] %vm1834_vm11, %v1876_v32 }
 0x262   : > { %v1839_v19 = vrot.slane %v1837_v10, 2  ;;  %v1737_v34 = vld [vmem:[#allocation3 + $0x32] ss:$2 sm:$0xf]  ;;  %1756 = vst.msk [vmem:[#allocation4 + $0x18] sm:$0x30] %vm1712_vm10, %v1754_v39  ;;  %v1912_v53 = vpack.c.bf16 %v1911_v31, %v1911_v31 }
 0x263   : > { %v1821_v38 = vld [vmem:[#allocation3 + $0x49] ss:$2 sm:$0xf]  ;;  %v1738_v40 = vpack.c.bf16 %v1737_v34, %v1737_v34  ;;  %v1829_v41 = vld [vmem:[#allocation3 + $0x3c] ss:$2 sm:$0xf] }
 0x264   : > { %1855 = vrot.lane.b32.xlu1 %v1854_v7, %s5313_s14  ;;  %v1848_v43 = vrot.slane %v1846_v33, 2  ;;  %v1830_v44 = vpack.c.bf16 %v1829_v41, %v1829_v41  ;;  %v1859_v45 = vld [vmem:[#allocation3 + $0x46] ss:$2 sm:$0xf]  ;;  %v1822_v58 = vpack.c.bf16 %v1821_v38, %v1821_v38  ;;  %v1914_v5 = vrot.slane %v1912_v53, 2 }
 0x265   : > { %1747 = vrot.lane.b32.xlu0 %v1746_v14, %s5313_s14  ;;  %v1740_v46 = vrot.slane %v1738_v40, 4  ;;  %v1860_v47 = vpack.c.bf16 %v1859_v45, %v1859_v45  ;;  %v1904_v48 = vld [vmem:[#allocation3 + $0x52] ss:$2 sm:$0xf]  ;;  %v1939_v28 = vrot.slane %v1937_v20, 2 }
 0x266   : > { %1850 = vst.msk [vmem:[#allocation4 + $0x8] sm:$0xc0] %vm1834_vm11, %v1848_v43  ;;  %v1832_v50 = vrot.slane %v1830_v44, 2  ;;  %v1905_v51 = vpack.c.bf16 %v1904_v48, %v1904_v48  ;;  %v1814_v52 = vld [vmem:[#allocation3 + $0x48] ss:$2 sm:$0xf] }
 0x267   : > { %1742 = vst.msk [vmem:[#allocation4 + $0x10] sm:$0x30] %vm1712_vm10, %v1740_v46  ;;  %v1862_v54 = vrot.slane %v1860_v47, 2  ;;  %v1815_v55 = vpack.c.bf16 %v1814_v52, %v1814_v52  ;;  %v1888_v56 = vld [vmem:[#allocation3 + $0x50] ss:$2 sm:$0xf] }
 0x268   : > { %1840 = vrot.lane.b32.xlu1 %v1839_v19, %s5313_s14  ;;  %1835 = vst.msk [vmem:[#allocation4] sm:$0xc0] %vm1834_vm11, %v1832_v50  ;;  %v1907_v59 = vrot.slane %v1905_v51, 2  ;;  %v1889_v60 = vpack.c.bf16 %v1888_v56, %v1888_v56  ;;  %v1782_v61 = vld [vmem:[#allocation3 + $0x3e] ss:$2 sm:$0xf] }
 0x269   : > { %1557 = vrot.lane.b32.xlu0 %v1555_v24, %s5313_s14  ;;  %1864 = vst.msk [vmem:[#allocation4 + $0x10] sm:$0xc0] %vm1834_vm11, %v1862_v54  ;;  %v1817_v62 = vrot.slane %v1815_v55, 4  ;;  %v1783_v63 = vpack.c.bf16 %v1782_v61, %v1782_v61  ;;  %v1692_v0 = vld [vmem:[#allocation3 + $0x34] ss:$2 sm:$0xf] }
 0x26a   : > { %v1895_v1 = vld [vmem:[#allocation3 + $0x51] ss:$2 sm:$0xf]  ;;  %1909 = vst.msk [vmem:[#allocation4 + $0x28] sm:$0xc0] %vm1834_vm11, %v1907_v59  ;;  %v1891_v2 = vrot.slane %v1889_v60, 2  ;;  %v1693_v3 = vpack.c.bf16 %v1692_v0, %v1692_v0 }
 0x26b   : > { %v1766_v4 = vld [vmem:[#allocation3 + $0x3c] ss:$2 sm:$0xf]  ;;  %v1566_v7 = vld [vmem:[#allocation3 + $0x1f] ss:$2 sm:$0xf]  ;;  %v1896_v23 = vpack.c.bf16 %v1895_v1, %v1895_v1 }
 0x26c   : > { %1869 = vrot.lane.b32.xlu1 %v1868_v35, %s5313_s14  ;;  %v1789_v8 = vld [vmem:[#allocation3 + $0x3f] ss:$2 sm:$0xf]  ;;  %1819 = vst.msk [vmem:[#allocation4 + $0x38] sm:$0x30] %vm1712_vm10, %v1817_v62  ;;  %v1785_v9 = vrot.slane %v1783_v63, 4  ;;  %v1767_v10 = vpack.c.bf16 %v1766_v4, %v1766_v4  ;;  %v1567_v25 = vpack.c.bf16 %v1566_v7, %v1566_v7  ;;  %v1944_v35 = vpack.c.bf16 %v1943_v30, %v1943_v30 }
 0x26d   : > { %1545 = vrot.lane.b32.xlu0 %v1543_v42, %s5313_s14  ;;  %v1798_v11 = vld [vmem:[#allocation3 + $0x46] ss:$2 sm:$0xf]  ;;  %v1824_v12 = vrot.slane %v1822_v58, 4  ;;  %1893 = vst.msk [vmem:[#allocation4 + $0x20] sm:$0xc0] %vm1834_vm11, %v1891_v2  ;;  %v1790_v26 = vpack.c.bf16 %v1789_v8, %v1789_v8 }
 0x26e   : > { %v1695_v14 = vrot.slane %v1693_v3, 6  ;;  %v1799_v15 = vpack.c.bf16 %v1798_v11, %v1798_v11  ;;  %v1676_v16 = vld [vmem:[#allocation3 + $0x32] ss:$2 sm:$0xf]  ;;  %1787 = vst.msk [vmem:[#allocation4 + $0x28] sm:$0x30] %vm1712_vm10, %v1785_v9 }
 0x26f   : > { %v1769_v17 = vrot.slane %v1767_v10, 4  ;;  %v1677_v19 = vpack.c.bf16 %v1676_v16, %v1676_v16  ;;  %v1699_v27 = vld [vmem:[#allocation3 + $0x35] ss:$2 sm:$0xf]  ;;  %1941 = vst.msk [vmem:[#allocation4 + $0x38] sm:$0xc0] %vm1834_vm11, %v1939_v28 }
 0x270   : > { %1671 = vrot.lane.b32.xlu1 %v1670_v13, %s5313_s14  ;;  %1697 = vst.msk [vmem:[#allocation4 + $0x38] sm:$0xc] %vm1590_vm9, %v1695_v14  ;;  %v1801_v21 = vrot.slane %v1799_v15, 4  ;;  %v1773_v29 = vld [vmem:[#allocation3 + $0x3d] ss:$2 sm:$0xf]  ;;  %v1700_v32 = vpack.c.bf16 %v1699_v27, %v1699_v27 }
 0x271   : > { %1581 = vrot.lane.b32.xlu0 %v1579_v57, %s5313_s14  ;;  %1771 = vst.msk [vmem:[#allocation4 + $0x20] sm:$0x30] %vm1712_vm10, %v1769_v17  ;;  %v1679_v24 = vrot.slane %v1677_v19, 6  ;;  %v1898_v31 = vrot.slane %v1896_v23, 2  ;;  %v1792_v33 = vrot.slane %v1790_v26, 4  ;;  %v1774_v34 = vpack.c.bf16 %v1773_v29, %v1773_v29  ;;  %v5134_v4 = vld [vmem:[%s6556_s3 + $0x100] sm:$0xff]  }
 0x272   : > { %1803 = vst.msk [vmem:[#allocation4 + $0x30] sm:$0x30] %vm1712_vm10, %v1801_v21  ;;  %v1805_v36 = vld [vmem:[#allocation3 + $0x47] ss:$2 sm:$0xf]  ;;  %v1702_v38 = vrot.slane %v1700_v32, 6 }
 0x273   : > { %1681 = vst.msk [vmem:[#allocation4 + $0x30] sm:$0xc] %vm1590_vm9, %v1679_v24  ;;  %v1920_v37 = vld [vmem:[#allocation3 + $0x5a] ss:$2 sm:$0xf]  ;;  %v1776_v40 = vrot.slane %v1774_v34, 4  ;;  %v1806_v41 = vpack.c.bf16 %v1805_v36, %v1805_v36 }
 0x274   : > { %1915 = vrot.lane.b32.xlu1 %v1914_v5, %s5313_s14  ;;  %v1921_v39 = vpack.c.bf16 %v1920_v37, %v1920_v37  ;;  %v1683_v42 = vld [vmem:[#allocation3 + $0x33] ss:$2 sm:$0xf]  ;;  %v1946_v43 = vrot.slane %v1944_v35, 2  ;;  %v5136_v5 = vld [vmem:[%s6556_s3 + $0x148] sm:$0xff]   ;;  %v5139_v10 = vld [vmem:[%s6556_s3 + $0x180] sm:$0xff]  }
 0x275   : > { %1825 = vrot.lane.b32.xlu0 %v1824_v12, %s5313_s14  ;;  %v1927_v45 = vld [vmem:[#allocation3 + $0x5b] ss:$2 sm:$0xf]  ;;  %v1684_v46 = vpack.c.bf16 %v1683_v42, %v1683_v42  ;;  %v1808_v47 = vrot.slane %v1806_v41, 4  ;;  %v5137_v9 = vld [vmem:[%s6556_s3 + $0x108] sm:$0xff]   ;;  %v5140_v11 = vld [vmem:[%s6556_s3 + $0x150] sm:$0xff]  }
 0x276   : > { %v1923_v44 = vrot.slane %v1921_v39, 2  ;;  %v1928_v48 = vpack.c.bf16 %v1927_v45, %v1927_v45  ;;  %v5142_v12 = vld [vmem:[%s6556_s3 + $0x1c8] sm:$0xff]   ;;  %v5141_v17 = vld [vmem:[%s6556_s3 + $0x110] sm:$0xff]   ;;  %v5144_v19 = vld [vmem:[%s6556_s3 + $0x158] sm:$0xff]  }
 0x277   : > { %v1686_v49 = vrot.slane %v1684_v46, 6  ;;  %v5146_v20 = vld [vmem:[%s6556_s3 + $0x1d0] sm:$0xff]   ;;  %v5145_v23 = vld [vmem:[%s6556_s3 + $0x118] sm:$0xff]   ;;  %v5149_v29 = vld [vmem:[%s6556_s3 + $0x120] sm:$0xff]  }
 0x278   : > { %1655 = vrot.lane.b32.xlu1 %v1654_v22, %s5313_s14  ;;  %1925 = vst.msk [vmem:[#allocation4 + $0x30] sm:$0xc0] %vm1834_vm11, %v1923_v44  ;;  %v1930_v50 = vrot.slane %v1928_v48, 2  ;;  %v5147_v24 = vld [vmem:[%s6556_s3 + $0x190] sm:$0xff]   ;;  %v5150_v26 = vld [vmem:[%s6556_s3 + $0x1d8] sm:$0xff]   ;;  %v5154_v32 = vld [vmem:[%s6556_s3 + $0x1e0] sm:$0xff]  }
 0x279   : > { %1569 = vrot.lane.b32.xlu0 %v1567_v25, %s5313_s14  ;;  %v5148_v25 = vld [vmem:[%s6556_s3 + $0x160] sm:$0xff]   ;;  %v5151_v30 = vld [vmem:[%s6556_s3 + $0x198] sm:$0xff]   ;;  %v5153_v35 = vld [vmem:[%s6556_s3 + $0x128] sm:$0xff]  }
 0x27a   : > { %v5155_v36 = vld [vmem:[%s6556_s3 + $0x1a0] sm:$0xff]   ;;  %v5156_v37 = vld [vmem:[%s6556_s3 + $0x170] sm:$0xff]   ;;  %v5158_v39 = vld [vmem:[%s6556_s3 + $0x1e8] sm:$0xff]  }
 0x27b   : > { %v5157_v42 = vld [vmem:[%s6556_s3 + $0x130] sm:$0xff]   ;;  %v5160_v44 = vld [vmem:[%s6556_s3 + $0x178] sm:$0xff]  }
 0x27c   : > { %1899 = vrot.lane.b32.xlu1 %v1898_v31, %s5313_s14  ;;  %v5152_v31 = vld [vmem:[%s6556_s3 + $0x168] sm:$0xff]   ;;  %v5162_v46 = vld [vmem:[%s6556_s3 + $0x1f0] sm:$0xff]  }
 0x27d   : > { %1793 = vrot.lane.b32.xlu0 %v1792_v33, %s5313_s14  ;;  %v5163_v48 = vld [vmem:[%s6556_s3 + $0x1b0] sm:$0xff]  }
 0x280   : > { %1703 = vrot.lane.b32.xlu1 %v1702_v38, %s5313_s14 }
 0x281   : > { %1777 = vrot.lane.b32.xlu0 %v1776_v40, %s5313_s14 }
 0x284   : > { %1947 = vrot.lane.b32.xlu1 %v1946_v43, %s5313_s14  ;;  %v5159_v43 = vld [vmem:[%s6556_s3 + $0x1a8] sm:$0xff]  }
 0x285   : > { %1809 = vrot.lane.b32.xlu0 %v1808_v47, %s5313_s14  ;;  %v5161_v47 = vld [vmem:[%s6556_s3 + $0x138] sm:$0xff]  }
 0x288   : > { %1687 = vrot.lane.b32.xlu1 %v1686_v49, %s5313_s14 }
 0x28c   : > { %1931 = vrot.lane.b32.xlu1 %v1930_v50, %s5313_s14 }
 0x28d   : > { %v1534_v51 = vpop.permute.xlu0 %1533 }
 0x28e   : > { %1536 = vst.msk [vmem:[#allocation4 + $0x18] sm:$0x3] %vm1499_vm7, %v1534_v51  ;;  %v1640_v52 = vpop.permute.xlu1 %1639  ;;  %v5164_v51 = vld [vmem:[%s6556_s3 + $0x1f8] sm:$0xff]  }
 0x28f   : > { %1642 = vst.msk [vmem:[#allocation4 + $0x18] sm:$0xc] %vm1599_vm4, %v1640_v52  ;;  %v5165_v52 = vld [vmem:[%s6556_s3 + $0x1b8] sm:$0xff]  }
 0x291   : > { %v1522_v13 = vpop.permute.xlu0 %1521 }
 0x292   : > { %1524 = vst.msk [vmem:[#allocation4 + $0x10] sm:$0x3] %vm1499_vm7, %v1522_v13  ;;  %v1626_v53 = vpop.permute.xlu1 %1625 }
 0x293   : > { %1628 = vst.msk [vmem:[#allocation4 + $0x10] sm:$0xc] %vm1599_vm4, %v1626_v53 }
 0x295   : > { %v1734_v54 = vpop.permute.xlu0 %1733 }
 0x296   : > { %1736 = vst.msk [vmem:[#allocation4 + $0x8] sm:$0x30] %vm1721_vm14, %v1734_v54  ;;  %v1612_v55 = vpop.permute.xlu1 %1611  ;;  %v5166_v54 = vld [vmem:[%s6558_s5 + $0x40] sm:$0xff]  }
 0x297   : > { %1614 = vst.msk [vmem:[#allocation4 + $0x8] sm:$0xc] %vm1599_vm4, %v1612_v55  ;;  %v5167_v55 = vld [vmem:[%s6558_s5] sm:$0xff]  }
 0x299   : > { %v1719_v56 = vpop.permute.xlu0 %1718 }
 0x29a   : > { %1722 = vst.msk [vmem:[#allocation4] sm:$0x30] %vm1721_vm14, %v1719_v56  ;;  %v1597_v57 = vpop.permute.xlu1 %1596  ;;  %v5168_v56 = vld [vmem:[%s6558_s5 + $0xc0] sm:$0xff]  }
 0x29b   : > { %1600 = vst.msk [vmem:[#allocation4] sm:$0xc] %vm1599_vm4, %v1597_v57  ;;  %v5169_v57 = vld [vmem:[%s6558_s5 + $0x80] sm:$0xff]  }
 0x2d2   : > { %v1884_v58 = vpop.permute.xlu1 %1883 }
 0x2d3   : > { %1886 = vst.msk [vmem:[#allocation4 + $0x18] sm:$0xc0] %vm1843_vm8, %v1884_v58  ;;  %v1762_v59 = vpop.permute.xlu0 %1761  ;;  %v5170_v58 = vld [vmem:[%s6558_s5 + $0x48] sm:$0xff]  }
 0x2d4   : > { %1764 = vst.msk [vmem:[#allocation4 + $0x18] sm:$0x30] %vm1721_vm14, %v1762_v59  ;;  %v5171_v59 = vld [vmem:[%s6558_s5 + $0x8] sm:$0xff]  }
 0x2d6   : > { %v1856_v60 = vpop.permute.xlu1 %1855 }
 0x2d7   : > { %1858 = vst.msk [vmem:[#allocation4 + $0x8] sm:$0xc0] %vm1843_vm8, %v1856_v60  ;;  %v1748_v61 = vpop.permute.xlu0 %1747  ;;  %v5172_v60 = vld [vmem:[%s6558_s5 + $0xc8] sm:$0xff]  }
 0x2d8   : > { %1750 = vst.msk [vmem:[#allocation4 + $0x10] sm:$0x30] %vm1721_vm14, %v1748_v61  ;;  %v5173_v61 = vld [vmem:[%s6558_s5 + $0x88] sm:$0xff]  }
 0x2da   : > { %v1841_v62 = vpop.permute.xlu1 %1840 }
 0x2db   : > { %1844 = vst.msk [vmem:[#allocation4] sm:$0xc0] %vm1843_vm8, %v1841_v62  ;;  %v1558_v63 = vpop.permute.xlu0 %1557  ;;  %v1954_v0 = vld [vmem:[#allocation4 + $0x18] sm:$0xff]  ;;  %v5174_v62 = vld [vmem:[%s6558_s5 + $0x50] sm:$0xff]  }
 0x2dc   : > { %1560 = vst.msk [vmem:[#allocation4 + $0x28] sm:$0x3] %vm1499_vm7, %v1558_v63  ;;  %2551 = vmatprep.mubr.bf16.mxu0 %v1954_v0  ;;  %v5175_v63 = vld [vmem:[%s6558_s5 + $0x10] sm:$0xff]   ;;  %v5322_v0 = vmov 1983009808  }
 0x2de   : > { %v1870_v1 = vpop.permute.xlu1 %1869  ;;  %v1952_v2 = vld [vmem:[#allocation4 + $0x8] sm:$0xff] }
 0x2df   : > { %1872 = vst.msk [vmem:[#allocation4 + $0x10] sm:$0xc0] %vm1843_vm8, %v1870_v1  ;;  %2510 = vmatprep.mubr.bf16.mxu1 %v1952_v2  ;;  %v1546_v3 = vpop.permute.xlu0 %1545  ;;  %v2720_v1 = vunpack.c.l.s4 %v5322_v0  ;;  %v2722_v2 = vlaneseq }
 0x2e0   : > { %1548 = vst.msk [vmem:[#allocation4 + $0x20] sm:$0x3] %vm1499_vm7, %v1546_v3  ;;  %v5176_v3 = vld [vmem:[%s6558_s5 + $0xd0] sm:$0xff]  }
 0x2e2   : > { %v1672_v6 = vpop.permute.xlu1 %1671  ;;  %v1951_v7 = vld [vmem:[#allocation4] sm:$0xff] }
 0x2e3   : > { %1674 = vst.msk [vmem:[#allocation4 + $0x28] sm:$0xc] %vm1599_vm4, %v1672_v6  ;;  %2511 = vmatmul.mubr.bf16.vlgmr.msra.gmra.mrb[0].mxu1 %v1951_v7  ;;  %v1582_v8 = vpop.permute.xlu0 %1581  ;;  %v5180_v6 = vld [vmem:[%s6558_s5 + $0xd8] sm:$0xff]  }
 0x2e4   : > { %4825 = vmatpush3.bf16.msra.mxu1 %v5134_v4  ;;  %1584 = vst.msk [vmem:[#allocation4 + $0x38] sm:$0x3] %vm1499_vm7, %v1582_v8  ;;  %v5178_v4 = vld [vmem:[%s6558_s5 + $0x58] sm:$0xff]   ;;  %v2721_v8 = vunpack.c.0.s8 %v2720_v1 }
 0x2e5   : > { %4826 = vmatprep.subr.bf16.mxu1 %v5136_v5  ;;  %v5177_v5 = vld [vmem:[%s6558_s5 + $0x90] sm:$0xff]   ;;  %v5179_v7 = vld [vmem:[%s6558_s5 + $0x18] sm:$0xff]  }
 0x2e6   : > { %v1916_v14 = vpop.permute.xlu1 %1915  ;;  %v1953_v15 = vld [vmem:[#allocation4 + $0x10] sm:$0xff] }
 0x2e7   : > { %1918 = vst.msk [vmem:[#allocation4 + $0x28] sm:$0xc0] %vm1843_vm8, %v1916_v14  ;;  %v1826_v16 = vpop.permute.xlu0 %1825  ;;  %2552 = vmatmul.mubr.bf16.vlgmr.msra.gmra.mrb[8].mxu0 %v1953_v15  ;;  %v5184_v14 = vld [vmem:[%s6558_s5 + $0xe0] sm:$0xff]  }
 0x2e8   : > { %4827 = vmatpush3.bf16.msra.mxu1 %v5137_v9  ;;  %1828 = vst.msk [vmem:[#allocation4 + $0x38] sm:$0x30] %vm1721_vm14, %v1826_v16  ;;  %4847 = vmatpush3.bf16.msra.mxu0 %v5139_v10  ;;  %v2723_v9 = vshrl.u32 %v2722_v2, 7  ;;  %v5182_v10 = vld [vmem:[%s6558_s5 + $0x60] sm:$0xff]   ;;  %v5186_v16 = vld [vmem:[%s6558_s5 + $0x68] sm:$0xff]  }
 0x2e9   : > { %4828 = vmatprep.subr.bf16.mxu1 %v5140_v11  ;;  %4848 = vmatprep.subr.bf16.mxu0 %v5142_v12  ;;  %v5181_v11 = vld [vmem:[%s6558_s5 + $0x98] sm:$0xff]   ;;  %v5183_v12 = vld [vmem:[%s6558_s5 + $0x20] sm:$0xff]  }
 0x2ea   : > { %v1656_v21 = vpop.permute.xlu1 %1655  ;;  %v5185_v15 = vld [vmem:[%s6558_s5 + $0xa0] sm:$0xff]  }
 0x2eb   : > { %1658 = vst.msk [vmem:[#allocation4 + $0x20] sm:$0xc] %vm1599_vm4, %v1656_v21  ;;  %v1570_v22 = vpop.permute.xlu0 %1569  ;;  %v2657_v21 = vld [vmem:[#allocation5 + $0x1] ss:$2 sm:$0x3] }
 0x2ec   : > { %4829 = vmatpush3.bf16.msra.mxu1 %v5141_v17  ;;  %1572 = vst.msk [vmem:[#allocation4 + $0x30] sm:$0x3] %vm1499_vm7, %v1570_v22  ;;  %4849 = vmatpush3.bf16.msra.mxu0 %v5143_v18  ;;  %v2653_v17 = vld [vmem:[#allocation5] ss:$2 sm:$0x3]  ;;  %v6163_v18 = vsub.s32 %v2721_v8, %v2723_v9 }
 0x2ed   : > { %4830 = vmatprep.subr.bf16.mxu1 %v5144_v19  ;;  %4850 = vmatprep.subr.bf16.mxu0 %v5146_v20  ;;  %v5188_v19 = vld [vmem:[%s6558_s5 + $0xe8] sm:$0xff]   ;;  %v2654_v20 = vpack.c.bf16 %v2653_v17, %v2653_v17 }
 0x2ee   : > { %v1900_v27 = vpop.permute.xlu1 %1899  ;;  %v2661_v22 = vld [vmem:[#allocation5 + $0x2] ss:$2 sm:$0x3] }
 0x2ef   : > { %1902 = vst.msk [vmem:[#allocation4 + $0x20] sm:$0xc0] %vm1843_vm8, %v1900_v27  ;;  %v1794_v28 = vpop.permute.xlu0 %1793  ;;  %2655 = vst [vmem:[#allocation6] sm:$0x1] %v2654_v20 }
 0x2f0   : > { %4831 = vmatpush3.bf16.msra.mxu1 %v5145_v23  ;;  %1796 = vst.msk [vmem:[#allocation4 + $0x28] sm:$0x30] %vm1721_vm14, %v1794_v28  ;;  %4851 = vmatpush3.bf16.msra.mxu0 %v5147_v24  ;;  %v2658_v23 = vpack.c.bf16 %v2657_v21, %v2657_v21  ;;  %v2662_v24 = vpack.c.bf16 %v2661_v22, %v2661_v22 }
 0x2f1   : > { %4832 = vmatprep.subr.bf16.mxu1 %v5148_v25  ;;  %4852 = vmatprep.subr.bf16.mxu0 %v5150_v26  ;;  %v2665_v25 = vld [vmem:[#allocation5 + $0x3] ss:$2 sm:$0x3]  ;;  %v2877_v26 = vld [vmem:[#allocation5 + $0x1e] ss:$2 sm:$0x3] }
 0x2f2   : > { %v1704_v33 = vpop.permute.xlu1 %1703  ;;  %v2666_v27 = vpack.c.bf16 %v2665_v25, %v2665_v25  ;;  %v2878_v28 = vpack.c.bf16 %v2877_v26, %v2877_v26  ;;  %2659 = vst [vmem:[#allocation6 + $0x2] sm:$0x1] %v2658_v23  ;;  %2663 = vst [vmem:[#allocation6 + $0x4] sm:$0x1] %v2662_v24 }
 0x2f3   : > { %1706 = vst.msk [vmem:[#allocation4 + $0x38] sm:$0xc] %vm1599_vm4, %v1704_v33  ;;  %v1778_v34 = vpop.permute.xlu0 %1777 }
 0x2f4   : > { %4833 = vmatpush3.bf16.msra.mxu1 %v5149_v29  ;;  %1780 = vst.msk [vmem:[#allocation4 + $0x20] sm:$0x30] %vm1721_vm14, %v1778_v34  ;;  %4853 = vmatpush3.bf16.msra.mxu0 %v5151_v30  ;;  %v2891_v29 = vld [vmem:[#allocation5 + $0x1f] ss:$2 sm:$0x3] }
 0x2f5   : > { %4834 = vmatprep.subr.bf16.mxu1 %v5152_v31  ;;  %4854 = vmatprep.subr.bf16.mxu0 %v5154_v32  ;;  %v2905_v30 = vld [vmem:[#allocation5 + $0x20] ss:$2 sm:$0x3]  ;;  %v2892_v32 = vpack.c.bf16 %v2891_v29, %v2891_v29  ;;  %v2919_v34 = vld [vmem:[#allocation5 + $0x21] ss:$2 sm:$0x3] }
 0x2f6   : > { %v1948_v38 = vpop.permute.xlu1 %1947  ;;  %v5187_v31 = vld [vmem:[%s6558_s5 + $0x28] sm:$0xff]   ;;  %v2906_v33 = vpack.c.bf16 %v2905_v30, %v2905_v30  ;;  %2667 = vst [vmem:[#allocation6 + $0x6] sm:$0x1] %v2666_v27 }
 0x2f7   : > { %1950 = vst.msk [vmem:[#allocation4 + $0x38] sm:$0xc0] %vm1843_vm8, %v1948_v38  ;;  %v1810_v40 = vpop.permute.xlu0 %1809  ;;  %v1956_v41 = vld [vmem:[#allocation4 + $0x28] sm:$0xff]  ;;  %v5189_v38 = vld [vmem:[%s6558_s5 + $0xa8] sm:$0xff]  }
 0x2f8   : > { %4835 = vmatpush3.bf16.msra.mxu1 %v5153_v35  ;;  %1812 = vst.msk [vmem:[#allocation4 + $0x30] sm:$0x30] %vm1721_vm14, %v1810_v40  ;;  %2592 = vmatprep.mubr.bf16.mxu1 %v1956_v41  ;;  %v5190_v35 = vld [vmem:[%s6558_s5 + $0x70] sm:$0xff]   ;;  %v2914_v40 = vrot.slane %v2906_v33, %v6163_v18 }
 0x2f9   : > { %4855 = vmatpush3.bf16.msra.mxu0 %v5155_v36  ;;  %4836 = vmatprep.subr.bf16.mxu1 %v5156_v37  ;;  %v2886_v36 = vrot.slane %v2878_v28, %v6163_v18  ;;  %v2920_v37 = vpack.c.bf16 %v2919_v34, %v2919_v34  ;;  %v5192_v41 = vld [vmem:[%s6558_s5 + $0xf0] sm:$0xff]  }
 0x2fa   : > { %v1688_v45 = vpop.permute.xlu1 %1687  ;;  %4856 = vmatprep.subr.bf16.mxu0 %v5158_v39  ;;  %v2900_v39 = vrot.slane %v2892_v32, %v6163_v18 }
 0x2fb   : > { %1690 = vst.msk [vmem:[#allocation4 + $0x30] sm:$0xc] %vm1599_vm4, %v1688_v45  ;;  %v1955_v13 = vld [vmem:[#allocation4 + $0x20] sm:$0xff] }
 0x2fc   : > { %4837 = vmatpush3.bf16.msra.mxu1 %v5157_v42  ;;  %v2887_v42 = vrot.slane %v2886_v36, 7  ;;  %v2901_v45 = vrot.slane %v2900_v39, 7 }
 0x2fd   : > { %4857 = vmatpush3.bf16.msra.mxu0 %v5159_v43  ;;  %4838 = vmatprep.subr.bf16.mxu1 %v5160_v44  ;;  %v2928_v43 = vrot.slane %v2920_v37, %v6163_v18  ;;  %v5191_v44 = vld [vmem:[%s6558_s5 + $0x30] sm:$0xff]  }
 0x2fe   : > { %v1932_v49 = vpop.permute.xlu1 %1931  ;;  %4858 = vmatprep.subr.bf16.mxu0 %v5162_v46  ;;  %v1958_v50 = vld [vmem:[#allocation4 + $0x38] sm:$0xff]  ;;  %v2915_v46 = vrot.slane %v2914_v40, 7  ;;  %2889 = vst [vmem:[#allocation6 + $0x18] sm:$0x2] %v2887_v42  ;;  %2903 = vst [vmem:[#allocation6 + $0x1a] sm:$0x2] %v2901_v45 }
 0x2ff   : > { %1934 = vst.msk [vmem:[#allocation4 + $0x30] sm:$0xc0] %vm1843_vm8, %v1932_v49  ;;  %2633 = vmatprep.mubr.bf16.mxu0 %v1958_v50  ;;  %v5193_v49 = vld [vmem:[%s6558_s5 + $0xb0] sm:$0xff]   ;;  %v5196_v50 = vld [vmem:[%s6558_s5 + $0xf8] sm:$0xff]  }
 0x300   : > { %4839 = vmatpush3.bf16.msra.mxu1 %v5161_v47  ;;  %v5194_v47 = vld [vmem:[%s6558_s5 + $0x78] sm:$0xff]   ;;  %2917 = vst [vmem:[#allocation6 + $0x1c] sm:$0x2] %v2915_v46 }
 0x301   : > { %4859 = vmatpush3.bf16.msra.mxu0 %v5163_v48  ;;  %4868 = vmatprep.subr.bf16.mxu1 %v5166_v54  ;;  %v2929_v48 = vrot.slane %v2928_v43, 7 }
 0x302   : > { %4860 = vmatprep.subr.bf16.mxu0 %v5164_v51  ;;  %v5195_v51 = vld [vmem:[%s6558_s5 + $0x38] sm:$0xff]  }
 0x303   : > { %2593 = vmatmul.mubr.bf16.vlgmr.msra.gmra.mrb[4].mxu1 %v1955_v13  ;;  %2931 = vst [vmem:[#allocation6 + $0x1e] sm:$0x2] %v2929_v48  ;;  %v5197_v13 = vld [vmem:[%s6558_s5 + $0xb8] sm:$0xff]  }
 0x304   : > { %4869 = vmatpush3.bf16.msra.mxu1 %v5167_v55 }
 0x305   : > { %4861 = vmatpush3.bf16.msra.mxu0 %v5165_v52  ;;  %4870 = vmatprep.subr.bf16.mxu1 %v5170_v58  ;;  %v5198_v52 = vld [vmem:[%s6558_s5 + $0x140] sm:$0xff]  }
 0x306   : > { %v1957_v53 = vld [vmem:[#allocation4 + $0x30] sm:$0xff]  ;;  %4890 = vmatprep.subr.bf16.mxu0 %v5168_v56  ;;  %v4572_v58 = vld [vmem:[%s6557_s4] ss:$0 sm:$0xff] }
 0x308   : > { %2634 = vmatmul.mubr.bf16.vlgmr.msra.gmra.mrb[12].mxu0 %v1957_v53  ;;  %4871 = vmatpush3.bf16.msra.mxu1 %v5171_v59  ;;  %v5201_v53 = vld [vmem:[%s6558_s5 + $0x1c0] sm:$0xff]  }
 0x309   : > { %4891 = vmatpush3.bf16.msra.mxu0 %v5169_v57  ;;  %4872 = vmatprep.subr.bf16.mxu1 %v5174_v62 }
 0x30a   : > { %4892 = vmatprep.subr.bf16.mxu0 %v5172_v60 }
 0x30c   : > { %4873 = vmatpush3.bf16.msra.mxu1 %v5175_v63 }
 0x30d   : > { %4893 = vmatpush3.bf16.msra.mxu0 %v5173_v61  ;;  %4874 = vmatprep.subr.bf16.mxu1 %v5178_v4 }
 0x30e   : > { %4894 = vmatprep.subr.bf16.mxu0 %v5176_v3 }
 0x310   : > { %4875 = vmatpush3.bf16.msra.mxu1 %v5179_v7 }
 0x311   : > { %4895 = vmatpush3.bf16.msra.mxu0 %v5177_v5  ;;  %4876 = vmatprep.subr.bf16.mxu1 %v5182_v10 }
 0x312   : > { %4896 = vmatprep.subr.bf16.mxu0 %v5180_v6 }
 0x314   : > { %4877 = vmatpush3.bf16.msra.mxu1 %v5183_v12 }
 0x315   : > { %4897 = vmatpush3.bf16.msra.mxu0 %v5181_v11  ;;  %4878 = vmatprep.subr.bf16.mxu1 %v5186_v16 }
 0x316   : > { %4898 = vmatprep.subr.bf16.mxu0 %v5184_v14 }
 0x318   : > { %4879 = vmatpush3.bf16.msra.mxu1 %v5187_v31 }
 0x319   : > { %4899 = vmatpush3.bf16.msra.mxu0 %v5185_v15  ;;  %4880 = vmatprep.subr.bf16.mxu1 %v5190_v35 }
 0x31a   : > { %4900 = vmatprep.subr.bf16.mxu0 %v5188_v19 }
 0x31c   : > { %4881 = vmatpush3.bf16.msra.mxu1 %v5191_v44 }
 0x31d   : > { %4901 = vmatpush3.bf16.msra.mxu0 %v5189_v38  ;;  %4882 = vmatprep.subr.bf16.mxu1 %v5194_v47 }
 0x31e   : > { %4902 = vmatprep.subr.bf16.mxu0 %v5192_v41 }
 0x320   : > { %4883 = vmatpush3.bf16.msra.mxu1 %v5195_v51 }
 0x321   : > { %4903 = vmatpush3.bf16.msra.mxu0 %v5193_v49  ;;  %4912 = vmatprep.subr.bf16.mxu1 %v5198_v52 }
 0x322   : > { %4904 = vmatprep.subr.bf16.mxu0 %v5196_v50 }
 0x325   : > { %4905 = vmatpush3.bf16.msra.mxu0 %v5197_v13 }
 0x326   : > { %4934 = vmatprep.subr.bf16.mxu0 %v5201_v53 }
 0x3b6   : > { %v4796_v54 = vpop.f32.mrb[0].mxu1 }
 0x3b7   : > { %v4797_v55 = vpop.f32.mrb[1].mxu1 }
 0x3b8   : > { %v4798_v56 = vadd.f32 %v4797_v55, %v4796_v54  ;;  %v4799_v57 = vpop.f32.mrb[2].mxu1 }
 0x3b9   : > { %v4800_v59 = vpop.f32.mrb[3].mxu1 }
 0x3ba   : > { %v4801_v60 = vadd.f32 %v4800_v59, %v4799_v57  ;;  %v4818_v61 = vpop.f32.mrb[8].mxu0  ;;  %v2513_v63 = vadd.f32 %v4798_v56, %v4572_v58 }
 0x3bb   : > { %v4819_v62 = vpop.f32.mrb[9].mxu0 }
 0x3bc   : > { %v4820_v0 = vadd.f32 %v4819_v62, %v4818_v61  ;;  %v4821_v1 = vpop.f32.mrb[10].mxu0  ;;  %v2516_v3 = vadd.f32 %v4801_v60, %v4572_v58 }
 0x3bd   : > { %v4822_v2 = vpop.f32.mrb[11].mxu0 }
 0x3be   : > { %v2554_v4 = vadd.f32 %v4820_v0, %v2513_v63  ;;  %v4823_v5 = vadd.f32 %v4822_v2, %v4821_v1 }
 0x3c0   : > { %v2557_v6 = vadd.f32 %v4823_v5, %v2516_v3 }
 0x3d6   : > { %v4840_v7 = vpop.f32.mrb[4].mxu1 }
 0x3d7   : > { %v4841_v8 = vpop.f32.mrb[5].mxu1 }
 0x3d8   : > { %v4842_v9 = vadd.f32 %v4841_v8, %v4840_v7  ;;  %v4843_v10 = vpop.f32.mrb[6].mxu1 }
 0x3d9   : > { %v4844_v11 = vpop.f32.mrb[7].mxu1 }
 0x3da   : > { %v2595_v12 = vadd.f32 %v4842_v9, %v2554_v4  ;;  %v4845_v14 = vadd.f32 %v4844_v11, %v4843_v10 }
 0x3db   : > { %v4862_v15 = vpop.f32.mrb[12].mxu0 }
 0x3dc   : > { %v2598_v16 = vadd.f32 %v4845_v14, %v2557_v6  ;;  %v4863_v17 = vpop.f32.mrb[13].mxu0 }
 0x3dd   : > { %v4864_v19 = vadd.f32 %v4863_v17, %v4862_v15  ;;  %v4865_v20 = vpop.f32.mrb[14].mxu0 }
 0x3de   : > { %v4866_v21 = vpop.f32.mrb[15].mxu0 }
 0x3df   : > { %v2636_v22 = vadd.f32 %v4864_v19, %v2595_v12  ;;  %v4867_v23 = vadd.f32 %v4866_v21, %v4865_v20 }
 0x3e1   : > { %v2642_v24 = vmax.f32 %v2636_v22, 0.0  ;;  %v2639_v25 = vadd.f32 %v4867_v23, %v2598_v16 }
 0x3e3   : > { %2649 = vst [vmem:[#allocation5 + $0x7] ss:$6 sps:$4 sm:$0xff] %v2642_v24   ;;  %v2643_v26 = vmax.f32 %v2639_v25, 0.0 }
 0x3e5   : > { %2651 = vst [vmem:[#allocation5 + $0x13] ss:$6 sps:$4 sm:$0xff] %v2643_v26  }
 0x3ea   : > { %v2669_v27 = vld [vmem:[#allocation5 + $0x6] ss:$2 sm:$0x3]  ;;  %v2673_v28 = vld [vmem:[#allocation5 + $0x7] ss:$2 sm:$0x3] }
 0x3eb   : > { %v2677_v29 = vld [vmem:[#allocation5 + $0x8] ss:$2 sm:$0x3]  ;;  %v2681_v30 = vld [vmem:[#allocation5 + $0x9] ss:$2 sm:$0x3]  ;;  %v2670_v31 = vpack.c.bf16 %v2669_v27, %v2669_v27  ;;  %v2674_v32 = vpack.c.bf16 %v2673_v28, %v2673_v28 }
 0x3ec   : > { %v2685_v33 = vld [vmem:[#allocation5 + $0xc] ss:$2 sm:$0x3]  ;;  %v2689_v34 = vld [vmem:[#allocation5 + $0xd] ss:$2 sm:$0x3]  ;;  %v2678_v35 = vpack.c.bf16 %v2677_v29, %v2677_v29  ;;  %v2682_v36 = vpack.c.bf16 %v2681_v30, %v2681_v30 }
 0x3ed   : > { %v2693_v37 = vld [vmem:[#allocation5 + $0xe] ss:$2 sm:$0x3]  ;;  %v2697_v38 = vld [vmem:[#allocation5 + $0xf] ss:$2 sm:$0x3]  ;;  %v2686_v39 = vpack.c.bf16 %v2685_v33, %v2685_v33  ;;  %v2690_v40 = vpack.c.bf16 %v2689_v34, %v2689_v34 }
 0x3ee   : > { %2671 = vst [vmem:[#allocation6 + $0x8] sm:$0x1] %v2670_v31  ;;  %2675 = vst [vmem:[#allocation6 + $0xa] sm:$0x1] %v2674_v32  ;;  %v2694_v43 = vpack.c.bf16 %v2693_v37, %v2693_v37  ;;  %v2698_v44 = vpack.c.bf16 %v2697_v38, %v2697_v38 }
 0x3ef   : > { %v2716_v41 = vld [vmem:[#allocation5 + $0xc] ss:$2 sm:$0x3]  ;;  %v2729_v42 = vld [vmem:[#allocation5 + $0xd] ss:$2 sm:$0x3] }
 0x3f0   : > { %2679 = vst [vmem:[#allocation6 + $0xc] sm:$0x1] %v2678_v35  ;;  %2683 = vst [vmem:[#allocation6 + $0xe] sm:$0x1] %v2682_v36  ;;  %v2717_v45 = vpack.c.bf16 %v2716_v41, %v2716_v41  ;;  %v2730_v46 = vpack.c.bf16 %v2729_v42, %v2729_v42 }
 0x3f1   : > { %v2742_v47 = vld [vmem:[#allocation5 + $0xe] ss:$2 sm:$0x3]  ;;  %v2755_v48 = vld [vmem:[#allocation5 + $0xf] ss:$2 sm:$0x3] }
 0x3f2   : > { %2687 = vst [vmem:[#allocation6 + $0x10] sm:$0x1] %v2686_v39  ;;  %2691 = vst [vmem:[#allocation6 + $0x12] sm:$0x1] %v2690_v40  ;;  %v2743_v49 = vpack.c.bf16 %v2742_v47, %v2742_v47  ;;  %v2756_v50 = vpack.c.bf16 %v2755_v48, %v2755_v48  ;;  %v2725_v0 = vrot.slane %v2717_v45, %v6163_v18  ;;  %v5202_v48 = vld [vmem:[%s6558_s5 + $0x180] sm:$0xff]  }
 0x3f3   : > { %v2701_v51 = vld [vmem:[#allocation5 + $0x12] ss:$2 sm:$0x3]  ;;  %v2705_v52 = vld [vmem:[#allocation5 + $0x13] ss:$2 sm:$0x3]  ;;  %v2738_v1 = vrot.slane %v2730_v46, %v6163_v18 }
 0x3f4   : > { %2695 = vst [vmem:[#allocation6 + $0x14] sm:$0x1] %v2694_v43  ;;  %2699 = vst [vmem:[#allocation6 + $0x16] sm:$0x1] %v2698_v44  ;;  %v2702_v13 = vpack.c.bf16 %v2701_v51, %v2701_v51  ;;  %v2706_v53 = vpack.c.bf16 %v2705_v52, %v2705_v52  ;;  %v2751_v6 = vrot.slane %v2743_v49, %v6163_v18  ;;  %v2726_v22 = vrot.slane %v2725_v0, 7  ;;  %v5199_v43 = vld [vmem:[%s6558_s5 + $0x100] sm:$0xff]  }
 0x3f5   : > { %v2709_v54 = vld [vmem:[#allocation5 + $0x14] ss:$2 sm:$0x3]  ;;  %v2713_v55 = vld [vmem:[#allocation5 + $0x15] ss:$2 sm:$0x3]  ;;  %v2764_v7 = vrot.slane %v2756_v50, %v6163_v18 }
 0x3f6   : > { %v2710_v56 = vpack.c.bf16 %v2709_v54, %v2709_v54  ;;  %v2714_v57 = vpack.c.bf16 %v2713_v55, %v2713_v55  ;;  %v2768_v58 = vld [vmem:[#allocation5 + $0x12] ss:$2 sm:$0x3]  ;;  %v2781_v59 = vld [vmem:[#allocation5 + $0x13] ss:$2 sm:$0x3] }
 0x3f7   : > { %2703 = vst [vmem:[#allocation6 + $0x18] sm:$0x1] %v2702_v13  ;;  %2707 = vst [vmem:[#allocation6 + $0x1a] sm:$0x1] %v2706_v53  ;;  %v2769_v60 = vpack.c.bf16 %v2768_v58, %v2768_v58  ;;  %v2782_v61 = vpack.c.bf16 %v2781_v59, %v2781_v59  ;;  %v2739_v23 = vrot.slane %v2738_v1, 7  ;;  %v2752_v26 = vrot.slane %v2751_v6, 7 }
 0x3f8   : > { %v2794_v62 = vld [vmem:[#allocation5 + $0x14] ss:$2 sm:$0x3]  ;;  %v2807_v63 = vld [vmem:[#allocation5 + $0x15] ss:$2 sm:$0x3] }
 0x3f9   : > { %2711 = vst [vmem:[#allocation6 + $0x1c] sm:$0x1] %v2710_v56  ;;  %2715 = vst [vmem:[#allocation6 + $0x1e] sm:$0x1] %v2714_v57  ;;  %v2795_v2 = vpack.c.bf16 %v2794_v62, %v2794_v62  ;;  %v2808_v3 = vpack.c.bf16 %v2807_v63, %v2807_v63  ;;  %v2777_v8 = vrot.slane %v2769_v60, %v6163_v18  ;;  %v2765_v27 = vrot.slane %v2764_v7, 7  ;;  %v5203_v49 = vld [vmem:[%s6558_s5 + $0x148] sm:$0xff]  }
 0x3fa   : > { %v2821_v4 = vld [vmem:[#allocation5 + $0x18] ss:$2 sm:$0x3]  ;;  %v2835_v5 = vld [vmem:[#allocation5 + $0x19] ss:$2 sm:$0x3]  ;;  %v2790_v9 = vrot.slane %v2782_v61, %v6163_v18 }
 0x3fb   : > { %v2822_v10 = vpack.c.bf16 %v2821_v4, %v2821_v4  ;;  %v2836_v11 = vpack.c.bf16 %v2835_v5, %v2835_v5  ;;  %v2849_v12 = vld [vmem:[#allocation5 + $0x1a] ss:$2 sm:$0x3]  ;;  %v2863_v14 = vld [vmem:[#allocation5 + $0x1b] ss:$2 sm:$0x3]  ;;  %v2803_v15 = vrot.slane %v2795_v2, %v6163_v18  ;;  %v2816_v16 = vrot.slane %v2808_v3, %v6163_v18 }
 0x3fc   : > { %v2850_v17 = vpack.c.bf16 %v2849_v12, %v2849_v12  ;;  %v2864_v19 = vpack.c.bf16 %v2863_v14, %v2863_v14  ;;  %2728 = vst [vmem:[#allocation6] sm:$0x2] %v2726_v22  ;;  %2741 = vst [vmem:[#allocation6 + $0x2] sm:$0x2] %v2739_v23  ;;  %v2778_v28 = vrot.slane %v2777_v8, 7  ;;  %v2791_v29 = vrot.slane %v2790_v9, 7 }
 0x3fd   : > { %v2830_v20 = vrot.slane %v2822_v10, %v6163_v18  ;;  %v2844_v21 = vrot.slane %v2836_v11, %v6163_v18  ;;  %v2804_v30 = vrot.slane %v2803_v15, 7  ;;  %v2817_v31 = vrot.slane %v2816_v16, 7  ;;  %2754 = vst [vmem:[#allocation6 + $0x4] sm:$0x2] %v2752_v26  ;;  %2767 = vst [vmem:[#allocation6 + $0x6] sm:$0x2] %v2765_v27 }
 0x3fe   : > { %v2858_v24 = vrot.slane %v2850_v17, %v6163_v18  ;;  %v2872_v25 = vrot.slane %v2864_v19, %v6163_v18  ;;  %2780 = vst [vmem:[#allocation6 + $0x8] sm:$0x2] %v2778_v28  ;;  %2793 = vst [vmem:[#allocation6 + $0xa] sm:$0x2] %v2791_v29  ;;  %v5206_v51 = vld [vmem:[%s6558_s5 + $0x1c8] sm:$0xff]   ;;  %v5208_v13 = vld [vmem:[%s6558_s5 + $0x150] sm:$0xff]  }
 0x3ff   : > { %v2831_v32 = vrot.slane %v2830_v20, 7  ;;  %v2845_v33 = vrot.slane %v2844_v21, 7  ;;  %2806 = vst [vmem:[#allocation6 + $0xc] sm:$0x2] %v2804_v30  ;;  %2819 = vst [vmem:[#allocation6 + $0xe] sm:$0x2] %v2817_v31 }
 0x400   : > { %v2859_v34 = vrot.slane %v2858_v24, 7  ;;  %v2873_v35 = vrot.slane %v2872_v25, 7  ;;  %v5205_v52 = vld [vmem:[%s6558_s5 + $0x108] sm:$0xff]   ;;  %v5210_v54 = vld [vmem:[%s6558_s5 + $0x1d0] sm:$0xff]   ;;  %v5212_v56 = vld [vmem:[%s6558_s5 + $0x158] sm:$0xff]  }
 0x401   : > { %2833 = vst [vmem:[#allocation6 + $0x10] sm:$0x2] %v2831_v32  ;;  %2847 = vst [vmem:[#allocation6 + $0x12] sm:$0x2] %v2845_v33  ;;  %v5207_v53 = vld [vmem:[%s6558_s5 + $0x188] sm:$0xff]   ;;  %v5209_v55 = vld [vmem:[%s6558_s5 + $0x110] sm:$0xff]  }
 0x402   : > { %2861 = vst [vmem:[#allocation6 + $0x14] sm:$0x2] %v2859_v34  ;;  %2875 = vst [vmem:[#allocation6 + $0x16] sm:$0x2] %v2873_v35  ;;  %v5211_v57 = vld [vmem:[%s6558_s5 + $0x190] sm:$0xff]   ;;  %v5214_v58 = vld [vmem:[%s6558_s5 + $0x1d8] sm:$0xff]  }
 0x403   : > { %v5213_v59 = vld [vmem:[%s6558_s5 + $0x118] sm:$0xff]   ;;  %v5216_v60 = vld [vmem:[%s6558_s5 + $0x160] sm:$0xff]   ;;  %v5220_v0 = vld [vmem:[%s6558_s5 + $0x168] sm:$0xff]  }
 0x404   : > { %v2932_v36 = vld [vmem:[#allocation6] sm:$0xff]  ;;  %v5215_v61 = vld [vmem:[%s6558_s5 + $0x198] sm:$0xff]   ;;  %v5218_v62 = vld [vmem:[%s6558_s5 + $0x1e0] sm:$0xff]  }
 0x405   : > { %v3210_v37 = vrot.slane %v2932_v36, %v6163_v18  ;;  %v3203_v38 = vcombine.high %v2932_v36, %v2932_v36  ;;  %v5217_v63 = vld [vmem:[%s6558_s5 + $0x120] sm:$0xff]   ;;  %v5222_v2 = vld [vmem:[%s6558_s5 + $0x1e8] sm:$0xff]   ;;  %v5224_v4 = vld [vmem:[%s6558_s5 + $0x170] sm:$0xff]  }
 0x406   : > { %v2933_v39 = vld [vmem:[#allocation6 + $0x8] sm:$0xff]  ;;  %v5219_v1 = vld [vmem:[%s6558_s5 + $0x1a0] sm:$0xff]   ;;  %v5221_v3 = vld [vmem:[%s6558_s5 + $0x128] sm:$0xff]  }
 0x407   : > { %v6225_v40 = vrot.slane %v2933_v39, %v6163_v18  ;;  %v3220_v41 = vcombine.high %v2933_v39, %v2933_v39  ;;  %v3218_v42 = vcombine.high %v3210_v37, %v3210_v37  ;;  %v3217_v44 = vrot.slane %v3203_v38, %v6163_v18  ;;  %v5223_v5 = vld [vmem:[%s6558_s5 + $0x1a8] sm:$0xff]   ;;  %v5226_v6 = vld [vmem:[%s6558_s5 + $0x1f0] sm:$0xff]   ;;  %v5228_v8 = vld [vmem:[%s6558_s5 + $0x178] sm:$0xff]  }
 0x408   : > { %v5225_v7 = vld [vmem:[%s6558_s5 + $0x130] sm:$0xff]   ;;  %v5230_v11 = vld [vmem:[%s6558_s5 + $0x1f8] sm:$0xff]   ;;  %v5232_v15 = vld [vmem:[%s6558_s5 + $0x240] sm:$0xff]  }
 0x409   : > { %v3235_v45 = vcombine.high %v6225_v40, %v6225_v40  ;;  %v6234_v46 = vrot.slane %v3220_v41, %v6163_v18  ;;  %4087 = vmatprep.mubr.bf16.mxu1 %v3218_v42  ;;  %v3219_v47 = vcombine.high %v3217_v44, %v3217_v44  ;;  %v2934_v9 = vld [vmem:[#allocation6 + $0x10] sm:$0xff]  ;;  %v5227_v10 = vld [vmem:[%s6558_s5 + $0x1b0] sm:$0xff]   ;;  %v5229_v12 = vld [vmem:[%s6558_s5 + $0x138] sm:$0xff]  }
 0x40a   : > { %4088 = vmatmul.mubr.bf16.vlgmr.msra.gmra.mrb[8].mxu1 %v3210_v37  ;;  %v3237_v14 = vcombine.high %v2934_v9, %v2934_v9  ;;  %v5231_v16 = vld [vmem:[%s6558_s5 + $0x1b8] sm:$0xff]   ;;  %v6329_v17 = vrot.slane %v2934_v9, %v6163_v18  ;;  %v5234_v19 = vld [vmem:[%s6558_s5 + $0x2c0] sm:$0xff]   ;;  %v5237_v22 = vld [vmem:[%s6558_s5 + $0x248] sm:$0xff]  }
 0x40b   : > { %v3236_v50 = vcombine.high %v6234_v46, %v6234_v46  ;;  %4913 = vmatpush3.bf16.msra.mxu1 %v5199_v43  ;;  %4127 = vmatprep.mubr.bf16.mxu0 %v3219_v47  ;;  %v5233_v20 = vld [vmem:[%s6558_s5 + $0x200] sm:$0xff]   ;;  %v5239_v25 = vld [vmem:[%s6558_s5 + $0x2c8] sm:$0xff]   ;;  %v5241_v28 = vld [vmem:[%s6558_s5 + $0x250] sm:$0xff]  }
 0x40c   : > { %4167 = vmatprep.mubr.bf16.mxu1 %v3235_v45  ;;  %4128 = vmatmul.mubr.bf16.vlgmr.msra.gmra.mrb[16].mxu0 %v3217_v44  ;;  %v6338_v21 = vrot.slane %v3237_v14, %v6163_v18  ;;  %v3252_v23 = vcombine.high %v6329_v17, %v6329_v17  ;;  %v5235_v24 = vld [vmem:[%s6558_s5 + $0x280] sm:$0xff]   ;;  %v5238_v27 = vld [vmem:[%s6558_s5 + $0x208] sm:$0xff]   ;;  %v5243_v30 = vld [vmem:[%s6558_s5 + $0x2d0] sm:$0xff]  }
 0x40d   : > { %4935 = vmatpush3.bf16.msra.mxu0 %v5202_v48  ;;  %4914 = vmatprep.subr.bf16.mxu1 %v5203_v49  ;;  %v5240_v29 = vld [vmem:[%s6558_s5 + $0x288] sm:$0xff]   ;;  %v5242_v31 = vld [vmem:[%s6558_s5 + $0x210] sm:$0xff]   ;;  %v5245_v32 = vld [vmem:[%s6558_s5 + $0x258] sm:$0xff]  }
 0x40e   : > { %4207 = vmatprep.mubr.bf16.mxu0 %v3236_v50  ;;  %4936 = vmatprep.subr.bf16.mxu0 %v5206_v51  ;;  %v3253_v26 = vcombine.high %v6338_v21, %v6338_v21  ;;  %v5244_v33 = vld [vmem:[%s6558_s5 + $0x290] sm:$0xff]   ;;  %v5247_v34 = vld [vmem:[%s6558_s5 + $0x2d8] sm:$0xff]   ;;  %v5249_v36 = vld [vmem:[%s6558_s5 + $0x260] sm:$0xff]  }
 0x40f   : > { %4915 = vmatpush3.bf16.msra.mxu1 %v5205_v52  ;;  %v5246_v35 = vld [vmem:[%s6558_s5 + $0x218] sm:$0xff]   ;;  %v5251_v38 = vld [vmem:[%s6558_s5 + $0x2e0] sm:$0xff]   ;;  %v5255_v42 = vld [vmem:[%s6558_s5 + $0x2e8] sm:$0xff]  }
 0x410   : > { %4916 = vmatprep.subr.bf16.mxu1 %v5208_v13  ;;  %v5248_v37 = vld [vmem:[%s6558_s5 + $0x298] sm:$0xff]   ;;  %v5250_v39 = vld [vmem:[%s6558_s5 + $0x220] sm:$0xff]   ;;  %v5254_v43 = vld [vmem:[%s6558_s5 + $0x228] sm:$0xff]  }
 0x411   : > { %4937 = vmatpush3.bf16.msra.mxu0 %v5207_v53  ;;  %v5252_v41 = vld [vmem:[%s6558_s5 + $0x2a0] sm:$0xff]   ;;  %v5257_v44 = vld [vmem:[%s6558_s5 + $0x270] sm:$0xff]   ;;  %v5256_v45 = vld [vmem:[%s6558_s5 + $0x2a8] sm:$0xff]  }
 0x412   : > { %4938 = vmatprep.subr.bf16.mxu0 %v5210_v54  ;;  %v5258_v47 = vld [vmem:[%s6558_s5 + $0x230] sm:$0xff]   ;;  %v5261_v48 = vld [vmem:[%s6558_s5 + $0x278] sm:$0xff]   ;;  %v2935_v49 = vld [vmem:[#allocation6 + $0x18] sm:$0xff] }
 0x413   : > { %4917 = vmatpush3.bf16.msra.mxu1 %v5209_v55  ;;  %v5260_v50 = vld [vmem:[%s6558_s5 + $0x2b0] sm:$0xff]   ;;  %v5263_v51 = vld [vmem:[%s6558_s5 + $0x2f8] sm:$0xff]   ;;  %v3254_v13 = vcombine.high %v2935_v49, %v2935_v49  ;;  %v5265_v53 = vld [vmem:[%s6558_s5 + $0x340] sm:$0xff]   ;;  %v6437_v55 = vrot.slane %v2935_v49, %v6163_v18 }
 0x414   : > { %4918 = vmatprep.subr.bf16.mxu1 %v5212_v56  ;;  %v5262_v52 = vld [vmem:[%s6558_s5 + $0x238] sm:$0xff]   ;;  %v5267_v56 = vld [vmem:[%s6558_s5 + $0x3c0] sm:$0xff]  }
 0x415   : > { %4939 = vmatpush3.bf16.msra.mxu0 %v5211_v57  ;;  %v5264_v54 = vld [vmem:[%s6558_s5 + $0x2b8] sm:$0xff]   ;;  %v5266_v57 = vld [vmem:[%s6558_s5 + $0x300] sm:$0xff]  }
 0x416   : > { %4940 = vmatprep.subr.bf16.mxu0 %v5214_v58  ;;  %v6446_v58 = vrot.slane %v3254_v13, %v6163_v18  ;;  %v5272_v18 = vld [vmem:[%s6558_s5 + $0x3c8] sm:$0xff]   ;;  %v5281_v9 = vld [vmem:[%s6558_s5 + $0x398] sm:$0xff]   ;;  %v5285_v14 = vld [vmem:[%s6558_s5 + $0x3a0] sm:$0xff]  }
 0x417   : > { %4919 = vmatpush3.bf16.msra.mxu1 %v5213_v59  ;;  %v5270_v59 = vld [vmem:[%s6558_s5 + $0x348] sm:$0xff]  }
 0x418   : > { %4920 = vmatprep.subr.bf16.mxu1 %v5216_v60  ;;  %v3269_v60 = vcombine.high %v6437_v55, %v6437_v55 }
 0x419   : > { %4941 = vmatpush3.bf16.msra.mxu0 %v5215_v61  ;;  %v5268_v61 = vld [vmem:[%s6558_s5 + $0x380] sm:$0xff]  }
 0x41a   : > { %4942 = vmatprep.subr.bf16.mxu0 %v5218_v62  ;;  %v3270_v62 = vcombine.high %v6446_v58, %v6446_v58 }
 0x41b   : > { %4921 = vmatpush3.bf16.msra.mxu1 %v5217_v63  ;;  %v5271_v63 = vld [vmem:[%s6558_s5 + $0x308] sm:$0xff]  }
 0x41c   : > { %4922 = vmatprep.subr.bf16.mxu1 %v5220_v0  ;;  %v5274_v0 = vld [vmem:[%s6558_s5 + $0x350] sm:$0xff]  }
 0x41d   : > { %4943 = vmatpush3.bf16.msra.mxu0 %v5219_v1  ;;  %v5273_v1 = vld [vmem:[%s6558_s5 + $0x388] sm:$0xff]  }
 0x41e   : > { %4944 = vmatprep.subr.bf16.mxu0 %v5222_v2  ;;  %v5276_v2 = vld [vmem:[%s6558_s5 + $0x3d0] sm:$0xff]  }
 0x41f   : > { %4923 = vmatpush3.bf16.msra.mxu1 %v5221_v3  ;;  %v5275_v3 = vld [vmem:[%s6558_s5 + $0x310] sm:$0xff]  }
 0x420   : > { %4924 = vmatprep.subr.bf16.mxu1 %v5224_v4  ;;  %v5278_v4 = vld [vmem:[%s6558_s5 + $0x358] sm:$0xff]  }
 0x421   : > { %4945 = vmatpush3.bf16.msra.mxu0 %v5223_v5  ;;  %v5277_v5 = vld [vmem:[%s6558_s5 + $0x390] sm:$0xff]  }
 0x422   : > { %4946 = vmatprep.subr.bf16.mxu0 %v5226_v6  ;;  %v5280_v6 = vld [vmem:[%s6558_s5 + $0x3d8] sm:$0xff]  }
 0x423   : > { %4925 = vmatpush3.bf16.msra.mxu1 %v5225_v7  ;;  %v5279_v7 = vld [vmem:[%s6558_s5 + $0x318] sm:$0xff]  }
 0x424   : > { %4926 = vmatprep.subr.bf16.mxu1 %v5228_v8  ;;  %v5282_v8 = vld [vmem:[%s6558_s5 + $0x360] sm:$0xff]  }
 0x425   : > { %4947 = vmatpush3.bf16.msra.mxu0 %v5227_v10  ;;  %v5284_v10 = vld [vmem:[%s6558_s5 + $0x3e0] sm:$0xff]  }
 0x426   : > { %4948 = vmatprep.subr.bf16.mxu0 %v5230_v11  ;;  %v5283_v11 = vld [vmem:[%s6558_s5 + $0x320] sm:$0xff]  }
 0x427   : > { %4927 = vmatpush3.bf16.msra.mxu1 %v5229_v12  ;;  %v5286_v12 = vld [vmem:[%s6558_s5 + $0x368] sm:$0xff]  }
 0x428   : > { %4956 = vmatprep.subr.bf16.mxu1 %v5232_v15  ;;  %v5288_v15 = vld [vmem:[%s6558_s5 + $0x3e8] sm:$0xff]  }
 0x429   : > { %4949 = vmatpush3.bf16.msra.mxu0 %v5231_v16  ;;  %v5287_v16 = vld [vmem:[%s6558_s5 + $0x328] sm:$0xff]  }
 0x42a   : > { %4168 = vmatmul.mubr.bf16.vlgmr.msra.gmra.mrb[12].mxu1 %v6225_v40  ;;  %4978 = vmatprep.subr.bf16.mxu0 %v5234_v19  ;;  %v5253_v40 = vld [vmem:[%s6558_s5 + $0x268] sm:$0xff]  }
 0x42b   : > { %4957 = vmatpush3.bf16.msra.mxu1 %v5233_v20  ;;  %4247 = vmatprep.mubr.bf16.mxu1 %v3252_v23  ;;  %v5289_v19 = vld [vmem:[%s6558_s5 + $0x3a8] sm:$0xff]   ;;  %v5292_v20 = vld [vmem:[%s6558_s5 + $0x3f0] sm:$0xff]  }
 0x42c   : > { %4208 = vmatmul.mubr.bf16.vlgmr.msra.gmra.mrb[20].mxu0 %v6234_v46  ;;  %4958 = vmatprep.subr.bf16.mxu1 %v5237_v22  ;;  %v5259_v46 = vld [vmem:[%s6558_s5 + $0x2f0] sm:$0xff]   ;;  %v5294_v22 = vld [vmem:[%s6558_s5 + $0x378] sm:$0xff]  }
 0x42d   : > { %4979 = vmatpush3.bf16.msra.mxu0 %v5235_v24  ;;  %4287 = vmatprep.mubr.bf16.mxu0 %v3253_v26  ;;  %v5293_v23 = vld [vmem:[%s6558_s5 + $0x3b0] sm:$0xff]   ;;  %v5296_v24 = vld [vmem:[%s6558_s5 + $0x3f8] sm:$0xff]  }
 0x42e   : > { %4980 = vmatprep.subr.bf16.mxu0 %v5239_v25  ;;  %v5295_v25 = vld [vmem:[%s6558_s5 + $0x338] sm:$0xff]  }
 0x42f   : > { %4959 = vmatpush3.bf16.msra.mxu1 %v5238_v27  ;;  %v5297_v26 = vld [vmem:[%s6558_s5 + $0x3b8] sm:$0xff]  }
 0x430   : > { %4960 = vmatprep.subr.bf16.mxu1 %v5241_v28  ;;  %v4637_v28 = vld [vmem:[%s6559_s6] ss:$0 sm:$0xff] }
 0x431   : > { %4981 = vmatpush3.bf16.msra.mxu0 %v5240_v29 }
 0x432   : > { %4982 = vmatprep.subr.bf16.mxu0 %v5243_v30 }
 0x433   : > { %4961 = vmatpush3.bf16.msra.mxu1 %v5242_v31 }
 0x434   : > { %4962 = vmatprep.subr.bf16.mxu1 %v5245_v32 }
 0x435   : > { %4983 = vmatpush3.bf16.msra.mxu0 %v5244_v33 }
 0x436   : > { %4984 = vmatprep.subr.bf16.mxu0 %v5247_v34 }
 0x437   : > { %4963 = vmatpush3.bf16.msra.mxu1 %v5246_v35 }
 0x438   : > { %4964 = vmatprep.subr.bf16.mxu1 %v5249_v36 }
 0x439   : > { %4985 = vmatpush3.bf16.msra.mxu0 %v5248_v37 }
 0x43a   : > { %4986 = vmatprep.subr.bf16.mxu0 %v5251_v38 }
 0x43b   : > { %4965 = vmatpush3.bf16.msra.mxu1 %v5250_v39 }
 0x43c   : > { %4966 = vmatprep.subr.bf16.mxu1 %v5253_v40 }
 0x43d   : > { %4987 = vmatpush3.bf16.msra.mxu0 %v5252_v41 }
 0x43e   : > { %4988 = vmatprep.subr.bf16.mxu0 %v5255_v42 }
 0x43f   : > { %4967 = vmatpush3.bf16.msra.mxu1 %v5254_v43 }
 0x440   : > { %4968 = vmatprep.subr.bf16.mxu1 %v5257_v44 }
 0x441   : > { %4989 = vmatpush3.bf16.msra.mxu0 %v5256_v45 }
 0x442   : > { %4990 = vmatprep.subr.bf16.mxu0 %v5259_v46 }
 0x443   : > { %4969 = vmatpush3.bf16.msra.mxu1 %v5258_v47 }
 0x444   : > { %4970 = vmatprep.subr.bf16.mxu1 %v5261_v48 }
 0x445   : > { %4991 = vmatpush3.bf16.msra.mxu0 %v5260_v50 }
 0x446   : > { %4992 = vmatprep.subr.bf16.mxu0 %v5263_v51 }
 0x447   : > { %4971 = vmatpush3.bf16.msra.mxu1 %v5262_v52 }
 0x448   : > { %5000 = vmatprep.subr.bf16.mxu1 %v5265_v53 }
 0x449   : > { %4993 = vmatpush3.bf16.msra.mxu0 %v5264_v54 }
 0x44a   : > { %4248 = vmatmul.mubr.bf16.vlgmr.msra.gmra.mrb[16].mxu1 %v6329_v17  ;;  %5022 = vmatprep.subr.bf16.mxu0 %v5267_v56  ;;  %v5290_v17 = vld [vmem:[%s6558_s5 + $0x370] sm:$0xff]  }
 0x44b   : > { %5001 = vmatpush3.bf16.msra.mxu1 %v5266_v57  ;;  %4327 = vmatprep.mubr.bf16.mxu1 %v3269_v60 }
 0x44c   : > { %4288 = vmatmul.mubr.bf16.vlgmr.msra.gmra.mrb[24].mxu0 %v6338_v21  ;;  %5002 = vmatprep.subr.bf16.mxu1 %v5270_v59  ;;  %v5291_v21 = vld [vmem:[%s6558_s5 + $0x330] sm:$0xff]  }
 0x44d   : > { %5023 = vmatpush3.bf16.msra.mxu0 %v5268_v61  ;;  %4367 = vmatprep.mubr.bf16.mxu0 %v3270_v62 }
 0x44e   : > { %5024 = vmatprep.subr.bf16.mxu0 %v5272_v18 }
 0x44f   : > { %5003 = vmatpush3.bf16.msra.mxu1 %v5271_v63 }
 0x450   : > { %5004 = vmatprep.subr.bf16.mxu1 %v5274_v0 }
 0x451   : > { %5025 = vmatpush3.bf16.msra.mxu0 %v5273_v1 }
 0x452   : > { %5026 = vmatprep.subr.bf16.mxu0 %v5276_v2 }
 0x453   : > { %5005 = vmatpush3.bf16.msra.mxu1 %v5275_v3 }
 0x454   : > { %5006 = vmatprep.subr.bf16.mxu1 %v5278_v4 }
 0x455   : > { %5027 = vmatpush3.bf16.msra.mxu0 %v5277_v5 }
 0x456   : > { %5028 = vmatprep.subr.bf16.mxu0 %v5280_v6 }
 0x457   : > { %5007 = vmatpush3.bf16.msra.mxu1 %v5279_v7 }
 0x458   : > { %5008 = vmatprep.subr.bf16.mxu1 %v5282_v8 }
 0x459   : > { %5029 = vmatpush3.bf16.msra.mxu0 %v5281_v9 }
 0x45a   : > { %5030 = vmatprep.subr.bf16.mxu0 %v5284_v10 }
 0x45b   : > { %5009 = vmatpush3.bf16.msra.mxu1 %v5283_v11 }
 0x45c   : > { %5010 = vmatprep.subr.bf16.mxu1 %v5286_v12 }
 0x45d   : > { %5031 = vmatpush3.bf16.msra.mxu0 %v5285_v14 }
 0x45e   : > { %5032 = vmatprep.subr.bf16.mxu0 %v5288_v15 }
 0x45f   : > { %5011 = vmatpush3.bf16.msra.mxu1 %v5287_v16 }
 0x460   : > { %5012 = vmatprep.subr.bf16.mxu1 %v5290_v17 }
 0x461   : > { %5033 = vmatpush3.bf16.msra.mxu0 %v5289_v19 }
 0x462   : > { %5034 = vmatprep.subr.bf16.mxu0 %v5292_v20 }
 0x463   : > { %5013 = vmatpush3.bf16.msra.mxu1 %v5291_v21 }
 0x464   : > { %5014 = vmatprep.subr.bf16.mxu1 %v5294_v22 }
 0x465   : > { %5035 = vmatpush3.bf16.msra.mxu0 %v5293_v23 }
 0x466   : > { %5036 = vmatprep.subr.bf16.mxu0 %v5296_v24 }
 0x467   : > { %5015 = vmatpush3.bf16.msra.mxu1 %v5295_v25 }
 0x469   : > { %5037 = vmatpush3.bf16.msra.mxu0 %v5297_v26 }
 0x46a   : > { %4328 = vmatmul.mubr.bf16.vlgmr.msra.gmra.mrb[20].mxu1 %v6437_v55 }
 0x46c   : > { %4368 = vmatmul.mubr.bf16.vlgmr.msra.gmra.mrb[28].mxu0 %v6446_v58 }
 0x4dd   : > { %v4884_v27 = vpop.f32.mrb[8].mxu1 }
 0x4de   : > { %v4885_v29 = vpop.f32.mrb[9].mxu1 }
 0x4df   : > { %v4886_v30 = vadd.f32 %v4885_v29, %v4884_v27  ;;  %v4887_v31 = vpop.f32.mrb[10].mxu1  ;;  %v4906_v32 = vpop.f32.mrb[16].mxu0 }
 0x4e0   : > { %v4888_v33 = vpop.f32.mrb[11].mxu1  ;;  %v4907_v34 = vpop.f32.mrb[17].mxu0 }
 0x4e1   : > { %v4090_v35 = vadd.f32 %v4886_v30, %v4637_v28  ;;  %v4908_v36 = vadd.f32 %v4907_v34, %v4906_v32  ;;  %v4909_v37 = vpop.f32.mrb[18].mxu0 }
 0x4e2   : > { %v4910_v38 = vpop.f32.mrb[19].mxu0 }
 0x4e3   : > { %v4130_v39 = vadd.f32 %v4908_v36, %v4090_v35 }
 0x4fd   : > { %v4928_v40 = vpop.f32.mrb[12].mxu1 }
 0x4fe   : > { %v4929_v41 = vpop.f32.mrb[13].mxu1 }
 0x4ff   : > { %v4930_v42 = vadd.f32 %v4929_v41, %v4928_v40  ;;  %v4931_v43 = vpop.f32.mrb[14].mxu1  ;;  %v4950_v44 = vpop.f32.mrb[20].mxu0 }
 0x500   : > { %v4932_v45 = vpop.f32.mrb[15].mxu1  ;;  %v4951_v46 = vpop.f32.mrb[21].mxu0 }
 0x501   : > { %v4170_v47 = vadd.f32 %v4930_v42, %v4130_v39  ;;  %v4952_v48 = vadd.f32 %v4951_v46, %v4950_v44  ;;  %v4953_v49 = vpop.f32.mrb[22].mxu0 }
 0x502   : > { %v4954_v50 = vpop.f32.mrb[23].mxu0 }
 0x503   : > { %v4210_v51 = vadd.f32 %v4952_v48, %v4170_v47 }
 0x51d   : > { %v4972_v52 = vpop.f32.mrb[16].mxu1 }
 0x51e   : > { %v4973_v13 = vpop.f32.mrb[17].mxu1 }
 0x51f   : > { %v4974_v53 = vadd.f32 %v4973_v13, %v4972_v52  ;;  %v4975_v54 = vpop.f32.mrb[18].mxu1  ;;  %v4994_v55 = vpop.f32.mrb[24].mxu0 }
 0x520   : > { %v4976_v56 = vpop.f32.mrb[19].mxu1  ;;  %v4995_v57 = vpop.f32.mrb[25].mxu0 }
 0x521   : > { %v4250_v58 = vadd.f32 %v4974_v53, %v4210_v51  ;;  %v4996_v59 = vadd.f32 %v4995_v57, %v4994_v55  ;;  %v4997_v60 = vpop.f32.mrb[26].mxu0 }
 0x522   : > { %v4998_v61 = vpop.f32.mrb[27].mxu0 }
 0x523   : > { %v4290_v18 = vadd.f32 %v4996_v59, %v4250_v58 }
 0x53d   : > { %v5016_v62 = vpop.f32.mrb[20].mxu1 }
 0x53e   : > { %v5017_v63 = vpop.f32.mrb[21].mxu1 }
 0x53f   : > { %v5018_v0 = vadd.f32 %v5017_v63, %v5016_v62  ;;  %v5019_v1 = vpop.f32.mrb[22].mxu1  ;;  %v5038_v2 = vpop.f32.mrb[28].mxu0 }
 0x540   : > { %v5020_v3 = vpop.f32.mrb[23].mxu1  ;;  %v5039_v4 = vpop.f32.mrb[29].mxu0 }
 0x541   : > { %v4330_v5 = vadd.f32 %v5018_v0, %v4290_v18  ;;  %v5040_v6 = vadd.f32 %v5039_v4, %v5038_v2  ;;  %v5041_v7 = vpop.f32.mrb[30].mxu0 }
 0x542   : > { %v5042_v8 = vpop.f32.mrb[31].mxu0 }
 0x543   : > { %v4370_v9 = vadd.f32 %v5040_v6, %v4330_v5 }
 0x545   : > { %4375 = vst [vmem:[%s276_s23] sm:$0xf] %v4370_v9 }
 0x546 PF: > { %s17_s24 = sadd.s32 1, %s5304_s24  }
 0x547   : > { %p14_p4 = scmp.ge.s32.totalorder %s17_s24, 4  }
 0x549   :  { %16 = sbr.rel (!%p14_p4) target bundleno = 1 (0x1), region = 211 }

</bundles_post_ra>
